<compile_context>
chip_gen: v6e
topology: v6e:2x2x1
jax: 0.10.0
libtpu: 0.0.40
codegen_flags: <defaults>
</compile_context>

<pallas_src>
import functools

import jax
import jax.numpy as jnp
from jax import lax
from jax.experimental import pallas as pl
from jax.experimental.pallas import tpu as pltpu

EPS = 1e-5


def _round_up(x, m):
    return ((x + m - 1) // m) * m


# --------------------------- Pallas kernel bodies ---------------------------

def _conv_stats_kernel(x_ref, w_ref, o_ref, sum_ref, ssq_ref, *,
                       tap_off, n_rows_out, wp, out_w):
    """Folded-im2col conv for one image block + fused BN-stat partials.

    x_ref   : (n_rows_in, Cin)   bf16  padded image, rows flattened as y*Wp + x
    w_ref   : (T, Cin, Cout)     bf16  one (Cin, Cout) matrix per kernel tap
    o_ref   : (n_rows_out, Cout) f32   conv output on the padded-width grid
    sum_ref : (1, Cout)          f32   per-block partial sum   (BN statistics)
    ssq_ref : (1, Cout)          f32   per-block partial sum of squares
    """
    cout = w_ref.shape[2]
    acc = jnp.zeros((n_rows_out, cout), jnp.float32)
    # Static tap loop: T shifted-window MXU matmuls, f32 accumulation.
    for t in range(len(tap_off)):
        lhs = x_ref[pl.ds(tap_off[t], n_rows_out), :]
        acc = acc + jnp.dot(lhs, w_ref[t], preferred_element_type=jnp.float32)
    o_ref[...] = acc
    # Columns x >= out_w are wrap-around garbage (cropped later in JAX);
    # mask them out of the batch-norm statistics.
    col = lax.broadcasted_iota(jnp.int32, (n_rows_out, cout), 0) % wp
    am = jnp.where(col < out_w, acc, 0.0)
    sum_ref[...] = jnp.sum(am, axis=0, keepdims=True)
    ssq_ref[...] = jnp.sum(am * am, axis=0, keepdims=True)


def _bn_relu_kernel(y_ref, ss_ref, o_ref):
    # Fused normalize+affine (pre-folded into scale/shift) + ReLU.
    scale = ss_ref[0:1, :]
    shift = ss_ref[1:2, :]
    o_ref[...] = jnp.maximum(y_ref[...] * scale + shift, 0.0).astype(o_ref.dtype)


# ------------------------------ Pallas wrappers ------------------------------

def conv_with_stats(x_nhwc, w_taps, taps, pad):
    """y[n, y, x, :] = sum_t x_pad[n, y+dy_t, x+dx_t, :] @ w_taps[t].

    Returns the (uncropped, padded-width) conv output plus per-image partial
    BN statistics.  Grid is one image per step ("parallel" -> megacore).
    """
    N, H, W, Cin = x_nhwc.shape
    T, _, Cout = w_taps.shape
    (pt, pb), (pleft, pright) = pad
    max_dy = max(t[0] for t in taps)
    max_dx = max(t[1] for t in taps)
    Hp, Wp = H + pt + pb, W + pleft + pright
    out_h, out_w = Hp - max_dy, Wp - max_dx
    n_rows_out = out_h * Wp
    n_rows_in = Hp * Wp + max_dx
    tap_off = tuple(dy * Wp + dx for dy, dx in taps)

    xp = jnp.pad(x_nhwc, ((0, 0), (pt, pb), (pleft, pright), (0, 0)))
    xflat = xp.reshape(N, Hp * Wp, Cin)
    if max_dx:
        xflat = jnp.pad(xflat, ((0, 0), (0, max_dx), (0, 0)))
    xflat = xflat.astype(jnp.bfloat16)          # bf16 MXU inputs, f32 accumulate
    wb = w_taps.astype(jnp.bfloat16)

    kernel = functools.partial(_conv_stats_kernel, tap_off=tap_off,
                               n_rows_out=n_rows_out, wp=Wp, out_w=out_w)
    y, ps, pq = pl.pallas_call(
        kernel,
        out_shape=(jax.ShapeDtypeStruct((N, n_rows_out, Cout), jnp.float32),
                   jax.ShapeDtypeStruct((N, 1, Cout), jnp.float32),
                   jax.ShapeDtypeStruct((N, 1, Cout), jnp.float32)),
        grid=(N,),
        in_specs=[pl.BlockSpec((None, n_rows_in, Cin), lambda n: (n, 0, 0)),
                  pl.BlockSpec((T, Cin, Cout), lambda n: (0, 0, 0))],
        out_specs=(pl.BlockSpec((None, n_rows_out, Cout), lambda n: (n, 0, 0)),
                   pl.BlockSpec((None, 1, Cout), lambda n: (n, 0, 0)),
                   pl.BlockSpec((None, 1, Cout), lambda n: (n, 0, 0))),
        compiler_params=pltpu.CompilerParams(
            dimension_semantics=("parallel",)),
    )(xflat, wb)
    return y, ps, pq, (out_h, out_w, Wp)


def _bn_scale_shift(psums, pssqs, count, gamma, beta):
    """Fold training-mode BN (biased variance) into per-channel scale/shift."""
    c = gamma.shape[0]
    tot = sum(p.sum(axis=0) for p in psums)          # (1, C)
    tot2 = sum(q.sum(axis=0) for q in pssqs)         # (1, C)
    mean = tot / count
    var = jnp.maximum(tot2 / count - mean * mean, 0.0)
    scale = gamma.reshape(1, c) / jnp.sqrt(var + EPS)
    shift = beta.reshape(1, c) - mean * scale
    return scale, shift


def pallas_bn_relu(y, scale, shift, out_dtype):
    """Fused normalize + affine + ReLU over (M, C) rows, large tiles."""
    M, C = y.shape
    tm = min(1024, _round_up(M, 8))      # big tiles amortize per-grid-step cost
    Mp = _round_up(M, tm)
    if Mp != M:
        y = jnp.pad(y, ((0, Mp - M), (0, 0)))
    ss = jnp.concatenate([scale, shift], axis=0)     # (2, C) resident block
    out = pl.pallas_call(
        _bn_relu_kernel,
        out_shape=jax.ShapeDtypeStruct((Mp, C), out_dtype),
        grid=(Mp // tm,),
        in_specs=[pl.BlockSpec((tm, C), lambda i: (i, 0)),
                  pl.BlockSpec((2, C), lambda i: (0, 0))],
        out_specs=pl.BlockSpec((tm, C), lambda i: (i, 0)),
        compiler_params=pltpu.CompilerParams(
            dimension_semantics=("parallel",)),
    )(y, ss)
    return out[:M] if Mp != M else out


def conv_bn_relu_stage(x_nhwc, w_taps, taps, pad, gamma, beta, out_dtype):
    """One conv + training-mode BN + ReLU stage."""
    n = x_nhwc.shape[0]
    cout = w_taps.shape[-1]
    y, ps, pq, (oh, ow, wp) = conv_with_stats(x_nhwc, w_taps, taps, pad)
    scale, shift = _bn_scale_shift([ps], [pq], n * oh * ow, gamma, beta)
    y = pallas_bn_relu(y.reshape(n * oh * wp, cout), scale, shift, out_dtype)
    return y.reshape(n, oh, wp, cout)[:, :, :ow, :]


# ------------------------------- forward pass -------------------------------

_TAPS3x3 = tuple((ky, kx) for ky in range(3) for kx in range(3))

# ConvTranspose2d(k=3, s=2, p=1, output_padding=1) as four output-phase convs
# on the *undilated* input (sub-pixel decomposition): phase (dy, dx) produces
# out[2y+dy, 2x+dx].  Wf is the flipped / in<->out transposed kernel.
_DECONV_PHASES = (
    # (taps,                          ((pad_h), (pad_w)),  Wf tap indices)
    (((0, 0),),                        ((0, 0), (0, 0)), ((1, 1),)),
    (((0, 0), (0, 1)),                 ((0, 0), (0, 1)), ((1, 0), (1, 2))),
    (((0, 0), (1, 0)),                 ((0, 1), (0, 0)), ((0, 1), (2, 1))),
    (((0, 0), (0, 1), (1, 0), (1, 1)), ((0, 1), (0, 1)), ((0, 0), (0, 2), (2, 0), (2, 2))),
)


@jax.jit
def decoder_block_forward(x_nchw, params):
    x = jnp.transpose(x_nchw, (0, 2, 3, 1))                  # NCHW -> NHWC

    # ---- stage 1: Conv2d(k=3, pad=1, bias=False) + BN + ReLU ---------------
    w1 = params["w1"]                                        # (C4, Cin, 3, 3)
    c4 = w1.shape[0]
    w1_t = jnp.transpose(w1, (2, 3, 1, 0))                   # (3, 3, Cin, C4)
    w1_taps = jnp.stack([w1_t[ky, kx] for ky, kx in _TAPS3x3], axis=0)
    x = conv_bn_relu_stage(x, w1_taps, _TAPS3x3, ((1, 1), (1, 1)),
                           params["g1"], params["b1"], jnp.bfloat16)

    # ---- stage 2: ConvTranspose2d(k=3, s=2, p=1, op=1) + BN + ReLU ---------
    n, h, w, _ = x.shape
    wf = jnp.transpose(params["wt2"][:, :, ::-1, ::-1], (2, 3, 0, 1))  # (3,3,Ci,Co)
    ys, psums, pssqs = [], [], []
    for taps, pad, widx in _DECONV_PHASES:
        w_taps = jnp.stack([wf[a, b] for a, b in widx], axis=0)
        y, ps, pq, (oh, ow, wp) = conv_with_stats(x, w_taps, taps, pad)
        ys.append(y.reshape(n, oh, wp, c4)[:, :, :ow, :])    # (n, h, w, c4)
        psums.append(ps)
        pssqs.append(pq)
    # Joint BN statistics over the four phases == BN over the (2h, 2w) output.
    scale, shift = _bn_scale_shift(psums, pssqs, 4 * n * h * w,
                                   params["g2"], params["b2"])
    cat = jnp.stack(ys, axis=0).reshape(4 * n * h * w, c4)
    cat = pallas_bn_relu(cat, scale, shift, jnp.bfloat16).reshape(4, n, h, w, c4)
    up = jnp.zeros((n, 2 * h, 2 * w, c4), cat.dtype)
    up = up.at[:, 0::2, 0::2, :].set(cat[0])
    up = up.at[:, 0::2, 1::2, :].set(cat[1])
    up = up.at[:, 1::2, 0::2, :].set(cat[2])
    up = up.at[:, 1::2, 1::2, :].set(cat[3])

    # ---- stage 3: Conv2d(k=3, pad=1, bias=False) + BN + ReLU ---------------
    w3 = params["w3"]                                        # (Nf, C4, 3, 3)
    w3_t = jnp.transpose(w3, (2, 3, 1, 0))
    w3_taps = jnp.stack([w3_t[ky, kx] for ky, kx in _TAPS3x3], axis=0)
    y = conv_bn_relu_stage(up, w3_taps, _TAPS3x3, ((1, 1), (1, 1)),
                           params["g3"], params["b3"], jnp.float32)

    return jnp.transpose(y, (0, 3, 1, 2))                    # NHWC -> NCHW


# ---------------------------- pure-JAX references ----------------------------

def _ref_bn_relu(y, gamma, beta):
    mean = y.mean(axis=(0, 2, 3), keepdims=True)
    var = ((y - mean) ** 2).mean(axis=(0, 2, 3), keepdims=True)
    yn = (y - mean) / jnp.sqrt(var + EPS)
    return jnp.maximum(yn * gamma.reshape(1, -1, 1, 1)
                       + beta.reshape(1, -1, 1, 1), 0.0)


def ref_forward(x, params, conv_dtype=None):
    dn = ("NCHW", "OIHW", "NCHW")

    def conv(lhs, wgt, padding, lhs_dilation=(1, 1)):
        if conv_dtype is not None:
            lhs = lhs.astype(conv_dtype)
            wgt = wgt.astype(conv_dtype)
        return lax.conv_general_dilated(
            lhs, wgt, (1, 1), padding, lhs_dilation=lhs_dilation,
            dimension_numbers=dn, preferred_element_type=jnp.float32)

    y = conv(x, params["w1"], ((1, 1), (1, 1)))
    y = _ref_bn_relu(y, params["g1"], params["b1"])
    w2 = jnp.transpose(params["wt2"][:, :, ::-1, ::-1], (1, 0, 2, 3))
    y = conv(y, w2, ((1, 2), (1, 2)), lhs_dilation=(2, 2))
    y = _ref_bn_relu(y, params["g2"], params["b2"])
    y = conv(y, params["w3"], ((1, 1), (1, 1)))
    y = _ref_bn_relu(y, params["g3"], params["b3"])
    return y


# ----------------------------------- main ------------------------------------

if __name__ == "__main__":
    key = jax.random.PRNGKey(0)
    ks = jax.random.split(key, 9)

    in_channels, n_filters = 16, 8          # small stand-ins for 512 / 256
    c4 = in_channels // 4
    N, H, W = 2, 8, 8

    params = dict(
        w1=0.1 * jax.random.normal(ks[0], (c4, in_channels, 3, 3), jnp.float32),
        g1=1.0 + 0.1 * jax.random.normal(ks[1], (c4,), jnp.float32),
        b1=0.1 * jax.random.normal(ks[2], (c4,), jnp.float32),
        wt2=0.1 * jax.random.normal(ks[3], (c4, c4, 3, 3), jnp.float32),
        g2=1.0 + 0.1 * jax.random.normal(ks[4], (c4,), jnp.float32),
        b2=0.1 * jax.random.normal(ks[5], (c4,), jnp.float32),
        w3=0.1 * jax.random.normal(ks[6], (n_filters, c4, 3, 3), jnp.float32),
        g3=1.0 + 0.1 * jax.random.normal(ks[7], (n_filters,), jnp.float32),
        b3=jnp.zeros((n_filters,), jnp.float32),
    )
    x = jax.random.normal(ks[8], (N, in_channels, H, W), jnp.float32)

    out = jax.block_until_ready(decoder_block_forward(x, params))
    assert out.shape == (N, n_filters, 2 * H, 2 * W), out.shape

    # Tight check vs. a precision-matched reference (bf16 conv inputs, f32
    # accumulation -- the same arithmetic the kernels use).
    ref16 = ref_forward(x, params, conv_dtype=jnp.bfloat16)
    err16 = float(jnp.max(jnp.abs(out - ref16)))
    assert err16 < 2e-2, f"max abs err vs bf16-matched ref: {err16}"

    # Loose sanity check vs. the full-f32 reference (bounds bf16 cast error).
    ref32 = ref_forward(x, params, conv_dtype=None)
    err32 = float(jnp.max(jnp.abs(out - ref32)))
    assert err32 < 1e-1, f"max abs err vs f32 ref: {err32}"

    print("KERNEL_OK")
</pallas_src>

<mosaic_0001>
module attributes {stable_mosaic.version = 11 : i64} {
  func.func @_conv_stats_kernel(%arg0: i32, %arg1: memref<1x102x16xbf16, #tpu.memory_space<vmem>>, %arg2: memref<9x16x4xbf16, #tpu.memory_space<vmem>>, %arg3: memref<1x80x4xf32, #tpu.memory_space<vmem>>, %arg4: memref<1x1x4xf32, #tpu.memory_space<vmem>>, %arg5: memref<1x1x4xf32, #tpu.memory_space<vmem>>) attributes {dimension_semantics = [#tpu.dimension_semantics<parallel>], iteration_bounds = array<i64: 2>, scalar_prefetch = 0 : i64, scratch_operands = 0 : i64, tpu.core_type = #tpu.core_type<tc>, window_params = [{transform_indices = @transform_0, window_bounds = array<i64: 1, 102, 16>}, {pipeline_mode = #tpu.pipeline_mode<synchronous>, transform_indices = @transform_1, window_bounds = array<i64: 9, 16, 4>}, {transform_indices = @transform_2, window_bounds = array<i64: 1, 80, 4>}, {transform_indices = @transform_3, window_bounds = array<i64: 1, 1, 4>}, {transform_indices = @transform_4, window_bounds = array<i64: 1, 1, 4>}]} {
    %cst = arith.constant 0.000000e+00 : f32
    %0 = vector.broadcast %cst : f32 to vector<80x4xf32>
    %c0 = arith.constant 0 : index
    %c0_0 = arith.constant 0 : index
    %c0_1 = arith.constant 0 : index
    %1 = vector.load %arg1[%c0, %c0_0, %c0_1] : memref<1x102x16xbf16, #tpu.memory_space<vmem>>, vector<1x80x16xbf16>
    %2 = vector.shape_cast %1 : vector<1x80x16xbf16> to vector<80x16xbf16>
    %c0_2 = arith.constant 0 : index
    %c0_3 = arith.constant 0 : index
    %c0_4 = arith.constant 0 : index
    %3 = vector.load %arg2[%c0_2, %c0_3, %c0_4] : memref<9x16x4xbf16, #tpu.memory_space<vmem>>, vector<1x16x4xbf16>
    %4 = vector.shape_cast %3 : vector<1x16x4xbf16> to vector<16x4xbf16>
    %cst_5 = arith.constant dense<0.000000e+00> : vector<80x4xf32>
    %5 = tpu.matmul %2, %4, %cst_5 {dimension_numbers = #tpu.dot_dimension_numbers<[1], [0], [0], [1], [0, 0, 1, 1], [], []>} : vector<80x16xbf16>, vector<16x4xbf16>, vector<80x4xf32> -> vector<80x4xf32>
    %6 = arith.addf %0, %5 : vector<80x4xf32>
    %c0_6 = arith.constant 0 : index
    %c1 = arith.constant 1 : index
    %c0_7 = arith.constant 0 : index
    %7 = vector.load %arg1[%c0_6, %c1, %c0_7] : memref<1x102x16xbf16, #tpu.memory_space<vmem>>, vector<1x80x16xbf16>
    %8 = vector.shape_cast %7 : vector<1x80x16xbf16> to vector<80x16xbf16>
    %c1_8 = arith.constant 1 : index
    %c0_9 = arith.constant 0 : index
    %c0_10 = arith.constant 0 : index
    %9 = vector.load %arg2[%c1_8, %c0_9, %c0_10] : memref<9x16x4xbf16, #tpu.memory_space<vmem>>, vector<1x16x4xbf16>
    %10 = vector.shape_cast %9 : vector<1x16x4xbf16> to vector<16x4xbf16>
    %cst_11 = arith.constant dense<0.000000e+00> : vector<80x4xf32>
    %11 = tpu.matmul %8, %10, %cst_11 {dimension_numbers = #tpu.dot_dimension_numbers<[1], [0], [0], [1], [0, 0, 1, 1], [], []>} : vector<80x16xbf16>, vector<16x4xbf16>, vector<80x4xf32> -> vector<80x4xf32>
    %12 = arith.addf %6, %11 : vector<80x4xf32>
    %c0_12 = arith.constant 0 : index
    %c2 = arith.constant 2 : index
    %c0_13 = arith.constant 0 : index
    %13 = vector.load %arg1[%c0_12, %c2, %c0_13] : memref<1x102x16xbf16, #tpu.memory_space<vmem>>, vector<1x80x16xbf16>
    %14 = vector.shape_cast %13 : vector<1x80x16xbf16> to vector<80x16xbf16>
    %c2_14 = arith.constant 2 : index
    %c0_15 = arith.constant 0 : index
    %c0_16 = arith.constant 0 : index
    %15 = vector.load %arg2[%c2_14, %c0_15, %c0_16] : memref<9x16x4xbf16, #tpu.memory_space<vmem>>, vector<1x16x4xbf16>
    %16 = vector.shape_cast %15 : vector<1x16x4xbf16> to vector<16x4xbf16>
    %cst_17 = arith.constant dense<0.000000e+00> : vector<80x4xf32>
    %17 = tpu.matmul %14, %16, %cst_17 {dimension_numbers = #tpu.dot_dimension_numbers<[1], [0], [0], [1], [0, 0, 1, 1], [], []>} : vector<80x16xbf16>, vector<16x4xbf16>, vector<80x4xf32> -> vector<80x4xf32>
    %18 = arith.addf %12, %17 : vector<80x4xf32>
    %c0_18 = arith.constant 0 : index
    %c10 = arith.constant 10 : index
    %c0_19 = arith.constant 0 : index
    %19 = vector.load %arg1[%c0_18, %c10, %c0_19] : memref<1x102x16xbf16, #tpu.memory_space<vmem>>, vector<1x80x16xbf16>
    %20 = vector.shape_cast %19 : vector<1x80x16xbf16> to vector<80x16xbf16>
    %c3 = arith.constant 3 : index
    %c0_20 = arith.constant 0 : index
    %c0_21 = arith.constant 0 : index
    %21 = vector.load %arg2[%c3, %c0_20, %c0_21] : memref<9x16x4xbf16, #tpu.memory_space<vmem>>, vector<1x16x4xbf16>
    %22 = vector.shape_cast %21 : vector<1x16x4xbf16> to vector<16x4xbf16>
    %cst_22 = arith.constant dense<0.000000e+00> : vector<80x4xf32>
    %23 = tpu.matmul %20, %22, %cst_22 {dimension_numbers = #tpu.dot_dimension_numbers<[1], [0], [0], [1], [0, 0, 1, 1], [], []>} : vector<80x16xbf16>, vector<16x4xbf16>, vector<80x4xf32> -> vector<80x4xf32>
    %24 = arith.addf %18, %23 : vector<80x4xf32>
    %c0_23 = arith.constant 0 : index
    %c11 = arith.constant 11 : index
    %c0_24 = arith.constant 0 : index
    %25 = vector.load %arg1[%c0_23, %c11, %c0_24] : memref<1x102x16xbf16, #tpu.memory_space<vmem>>, vector<1x80x16xbf16>
    %26 = vector.shape_cast %25 : vector<1x80x16xbf16> to vector<80x16xbf16>
    %c4 = arith.constant 4 : index
    %c0_25 = arith.constant 0 : index
    %c0_26 = arith.constant 0 : index
    %27 = vector.load %arg2[%c4, %c0_25, %c0_26] : memref<9x16x4xbf16, #tpu.memory_space<vmem>>, vector<1x16x4xbf16>
    %28 = vector.shape_cast %27 : vector<1x16x4xbf16> to vector<16x4xbf16>
    %cst_27 = arith.constant dense<0.000000e+00> : vector<80x4xf32>
    %29 = tpu.matmul %26, %28, %cst_27 {dimension_numbers = #tpu.dot_dimension_numbers<[1], [0], [0], [1], [0, 0, 1, 1], [], []>} : vector<80x16xbf16>, vector<16x4xbf16>, vector<80x4xf32> -> vector<80x4xf32>
    %30 = arith.addf %24, %29 : vector<80x4xf32>
    %c0_28 = arith.constant 0 : index
    %c12 = arith.constant 12 : index
    %c0_29 = arith.constant 0 : index
    %31 = vector.load %arg1[%c0_28, %c12, %c0_29] : memref<1x102x16xbf16, #tpu.memory_space<vmem>>, vector<1x80x16xbf16>
    %32 = vector.shape_cast %31 : vector<1x80x16xbf16> to vector<80x16xbf16>
    %c5 = arith.constant 5 : index
    %c0_30 = arith.constant 0 : index
    %c0_31 = arith.constant 0 : index
    %33 = vector.load %arg2[%c5, %c0_30, %c0_31] : memref<9x16x4xbf16, #tpu.memory_space<vmem>>, vector<1x16x4xbf16>
    %34 = vector.shape_cast %33 : vector<1x16x4xbf16> to vector<16x4xbf16>
    %cst_32 = arith.constant dense<0.000000e+00> : vector<80x4xf32>
    %35 = tpu.matmul %32, %34, %cst_32 {dimension_numbers = #tpu.dot_dimension_numbers<[1], [0], [0], [1], [0, 0, 1, 1], [], []>} : vector<80x16xbf16>, vector<16x4xbf16>, vector<80x4xf32> -> vector<80x4xf32>
    %36 = arith.addf %30, %35 : vector<80x4xf32>
    %c0_33 = arith.constant 0 : index
    %c20 = arith.constant 20 : index
    %c0_34 = arith.constant 0 : index
    %37 = vector.load %arg1[%c0_33, %c20, %c0_34] : memref<1x102x16xbf16, #tpu.memory_space<vmem>>, vector<1x80x16xbf16>
    %38 = vector.shape_cast %37 : vector<1x80x16xbf16> to vector<80x16xbf16>
    %c6 = arith.constant 6 : index
    %c0_35 = arith.constant 0 : index
    %c0_36 = arith.constant 0 : index
    %39 = vector.load %arg2[%c6, %c0_35, %c0_36] : memref<9x16x4xbf16, #tpu.memory_space<vmem>>, vector<1x16x4xbf16>
    %40 = vector.shape_cast %39 : vector<1x16x4xbf16> to vector<16x4xbf16>
    %cst_37 = arith.constant dense<0.000000e+00> : vector<80x4xf32>
    %41 = tpu.matmul %38, %40, %cst_37 {dimension_numbers = #tpu.dot_dimension_numbers<[1], [0], [0], [1], [0, 0, 1, 1], [], []>} : vector<80x16xbf16>, vector<16x4xbf16>, vector<80x4xf32> -> vector<80x4xf32>
    %42 = arith.addf %36, %41 : vector<80x4xf32>
    %c0_38 = arith.constant 0 : index
    %c21 = arith.constant 21 : index
    %c0_39 = arith.constant 0 : index
    %43 = vector.load %arg1[%c0_38, %c21, %c0_39] : memref<1x102x16xbf16, #tpu.memory_space<vmem>>, vector<1x80x16xbf16>
    %44 = vector.shape_cast %43 : vector<1x80x16xbf16> to vector<80x16xbf16>
    %c7 = arith.constant 7 : index
    %c0_40 = arith.constant 0 : index
    %c0_41 = arith.constant 0 : index
    %45 = vector.load %arg2[%c7, %c0_40, %c0_41] : memref<9x16x4xbf16, #tpu.memory_space<vmem>>, vector<1x16x4xbf16>
    %46 = vector.shape_cast %45 : vector<1x16x4xbf16> to vector<16x4xbf16>
    %cst_42 = arith.constant dense<0.000000e+00> : vector<80x4xf32>
    %47 = tpu.matmul %44, %46, %cst_42 {dimension_numbers = #tpu.dot_dimension_numbers<[1], [0], [0], [1], [0, 0, 1, 1], [], []>} : vector<80x16xbf16>, vector<16x4xbf16>, vector<80x4xf32> -> vector<80x4xf32>
    %48 = arith.addf %42, %47 : vector<80x4xf32>
    %c0_43 = arith.constant 0 : index
    %c22 = arith.constant 22 : index
    %c0_44 = arith.constant 0 : index
    %49 = vector.load %arg1[%c0_43, %c22, %c0_44] : memref<1x102x16xbf16, #tpu.memory_space<vmem>>, vector<1x80x16xbf16>
    %50 = vector.shape_cast %49 : vector<1x80x16xbf16> to vector<80x16xbf16>
    %c8 = arith.constant 8 : index
    %c0_45 = arith.constant 0 : index
    %c0_46 = arith.constant 0 : index
    %51 = vector.load %arg2[%c8, %c0_45, %c0_46] : memref<9x16x4xbf16, #tpu.memory_space<vmem>>, vector<1x16x4xbf16>
    %52 = vector.shape_cast %51 : vector<1x16x4xbf16> to vector<16x4xbf16>
    %cst_47 = arith.constant dense<0.000000e+00> : vector<80x4xf32>
    %53 = tpu.matmul %50, %52, %cst_47 {dimension_numbers = #tpu.dot_dimension_numbers<[1], [0], [0], [1], [0, 0, 1, 1], [], []>} : vector<80x16xbf16>, vector<16x4xbf16>, vector<80x4xf32> -> vector<80x4xf32>
    %54 = arith.addf %48, %53 : vector<80x4xf32>
    %c0_48 = arith.constant 0 : index
    %c0_49 = arith.constant 0 : index
    %c0_50 = arith.constant 0 : index
    %55 = vector.load %arg3[%c0_48, %c0_49, %c0_50] : memref<1x80x4xf32, #tpu.memory_space<vmem>>, vector<1x80x4xf32>
    %56 = vector.shape_cast %55 : vector<1x80x4xf32> to vector<80x4xf32>
    %57 = vector.shape_cast %54 : vector<80x4xf32> to vector<1x80x4xf32>
    tpu.vector_store %arg3[%c0_48, %c0_49, %c0_50], %57 {strides = array<i32>} : memref<1x80x4xf32, #tpu.memory_space<vmem>>, vector<1x80x4xf32>,
    %58 = tpu.iota {dimensions = array<i32: 0>} : vector<80x4xi32>
    %c10_i32 = arith.constant 10 : i32
    %c0_i32 = arith.constant 0 : i32
    %59 = arith.cmpi eq, %c10_i32, %c0_i32 : i32
    %c1_i32 = arith.constant 1 : i32
    %60 = arith.select %59, %c1_i32, %c10_i32 : i32
    %61 = vector.broadcast %60 : i32 to vector<80x4xi32>
    %62 = arith.remsi %58, %61 : vector<80x4xi32>
    %c0_i32_51 = arith.constant 0 : i32
    %63 = vector.broadcast %c0_i32_51 : i32 to vector<80x4xi32>
    %64 = arith.cmpi ne, %62, %63 : vector<80x4xi32>
    %c0_i32_52 = arith.constant 0 : i32
    %65 = vector.broadcast %c0_i32_52 : i32 to vector<80x4xi32>
    %66 = arith.cmpi slt, %62, %65 : vector<80x4xi32>
    %c0_i32_53 = arith.constant 0 : i32
    %67 = arith.cmpi slt, %60, %c0_i32_53 : i32
    %68 = vector.broadcast %67 : i1 to vector<80x4xi1>
    %69 = vector.broadcast %68 : vector<80x4xi1> to vector<80x4xi1>
    %70 = arith.xori %66, %69 : vector<80x4xi1>
    %71 = arith.andi %70, %64 : vector<80x4xi1>
    %72 = vector.broadcast %60 : i32 to vector<80x4xi32>
    %73 = arith.addi %62, %72 : vector<80x4xi32>
    %74 = arith.select %71, %73, %62 : vector<80x4xi1>, vector<80x4xi32>
    %c8_i32 = arith.constant 8 : i32
    %75 = vector.broadcast %c8_i32 : i32 to vector<80x4xi32>
    %76 = arith.cmpi slt, %74, %75 : vector<80x4xi32>
    %cst_54 = arith.constant 0.000000e+00 : f32
    %77 = vector.broadcast %cst_54 : f32 to vector<80x4xf32>
    %78 = arith.select %76, %54, %77 : vector<80x4xi1>, vector<80x4xf32>
    %cst_55 = arith.constant dense<0.000000e+00> : vector<4xf32>
    %79 = vector.multi_reduction <add>, %78, %cst_55 [0] : vector<80x4xf32> to vector<4xf32>
    %80 = vector.shape_cast %79 : vector<4xf32> to vector<1x4xf32>
    %c0_56 = arith.constant 0 : index
    %c0_57 = arith.constant 0 : index
    %c0_58 = arith.constant 0 : index
    %81 = vector.load %arg4[%c0_56, %c0_57, %c0_58] : memref<1x1x4xf32, #tpu.memory_space<vmem>>, vector<1x1x4xf32>
    %82 = vector.shape_cast %81 : vector<1x1x4xf32> to vector<1x4xf32>
    %83 = vector.shape_cast %80 : vector<1x4xf32> to vector<1x1x4xf32>
    tpu.vector_store %arg4[%c0_56, %c0_57, %c0_58], %83 {strides = array<i32>} : memref<1x1x4xf32, #tpu.memory_space<vmem>>, vector<1x1x4xf32>,
    %84 = arith.mulf %78, %78 : vector<80x4xf32>
    %cst_59 = arith.constant dense<0.000000e+00> : vector<4xf32>
    %85 = vector.multi_reduction <add>, %84, %cst_59 [0] : vector<80x4xf32> to vector<4xf32>
    %86 = vector.shape_cast %85 : vector<4xf32> to vector<1x4xf32>
    %c0_60 = arith.constant 0 : index
    %c0_61 = arith.constant 0 : index
    %c0_62 = arith.constant 0 : index
    %87 = vector.load %arg5[%c0_60, %c0_61, %c0_62] : memref<1x1x4xf32, #tpu.memory_space<vmem>>, vector<1x1x4xf32>
    %88 = vector.shape_cast %87 : vector<1x1x4xf32> to vector<1x4xf32>
    %89 = vector.shape_cast %86 : vector<1x4xf32> to vector<1x1x4xf32>
    tpu.vector_store %arg5[%c0_60, %c0_61, %c0_62], %89 {strides = array<i32>} : memref<1x1x4xf32, #tpu.memory_space<vmem>>, vector<1x1x4xf32>,
    return
  }
  func.func @transform_0(%arg0: i32) -> (i32, i32, i32) {
    %c0_i32 = arith.constant 0 : i32
    %c0_i32_0 = arith.constant 0 : i32
    %c0_i32_1 = arith.constant 0 : i32
    return %arg0, %c0_i32, %c0_i32_0 : i32, i32, i32
  }
  func.func @transform_1(%arg0: i32) -> (i32, i32, i32) {
    %c0_i32 = arith.constant 0 : i32
    %c0_i32_0 = arith.constant 0 : i32
    %c0_i32_1 = arith.constant 0 : i32
    %c0_i32_2 = arith.constant 0 : i32
    return %c0_i32, %c0_i32_0, %c0_i32_1 : i32, i32, i32
  }
  func.func @transform_2(%arg0: i32) -> (i32, i32, i32) {
    %c0_i32 = arith.constant 0 : i32
    %c0_i32_0 = arith.constant 0 : i32
    %c0_i32_1 = arith.constant 0 : i32
    return %arg0, %c0_i32, %c0_i32_0 : i32, i32, i32
  }
  func.func @transform_3(%arg0: i32) -> (i32, i32, i32) {
    %c0_i32 = arith.constant 0 : i32
    %c0_i32_0 = arith.constant 0 : i32
    %c0_i32_1 = arith.constant 0 : i32
    return %arg0, %c0_i32, %c0_i32_0 : i32, i32, i32
  }
  func.func @transform_4(%arg0: i32) -> (i32, i32, i32) {
    %c0_i32 = arith.constant 0 : i32
    %c0_i32_0 = arith.constant 0 : i32
    %c0_i32_1 = arith.constant 0 : i32
    return %arg0, %c0_i32, %c0_i32_0 : i32, i32, i32
  }
}

module attributes {stable_mosaic.version = 11 : i64} {
  func.func @_bn_relu_kernel(%arg0: i32, %arg1: memref<160x4xf32, #tpu.memory_space<vmem>>, %arg2: memref<2x4xf32, #tpu.memory_space<vmem>>, %arg3: memref<160x4xbf16, #tpu.memory_space<vmem>>) attributes {dimension_semantics = [#tpu.dimension_semantics<parallel>], iteration_bounds = array<i64: 1>, scalar_prefetch = 0 : i64, scratch_operands = 0 : i64, tpu.core_type = #tpu.core_type<tc>, window_params = [{transform_indices = @transform_0, window_bounds = array<i64: 160, 4>}, {pipeline_mode = #tpu.pipeline_mode<synchronous>, transform_indices = @transform_1, window_bounds = array<i64: 2, 4>}, {transform_indices = @transform_2, window_bounds = array<i64: 160, 4>}]} {
    %c0 = arith.constant 0 : index
    %c0_0 = arith.constant 0 : index
    %0 = vector.load %arg2[%c0, %c0_0] : memref<2x4xf32, #tpu.memory_space<vmem>>, vector<1x4xf32>
    %c1 = arith.constant 1 : index
    %c0_1 = arith.constant 0 : index
    %1 = vector.load %arg2[%c1, %c0_1] : memref<2x4xf32, #tpu.memory_space<vmem>>, vector<1x4xf32>
    %c0_2 = arith.constant 0 : index
    %c0_3 = arith.constant 0 : index
    %2 = vector.load %arg1[%c0_2, %c0_3] : memref<160x4xf32, #tpu.memory_space<vmem>>, vector<160x4xf32>
    %3 = vector.broadcast %0 : vector<1x4xf32> to vector<160x4xf32>
    %4 = arith.mulf %2, %3 : vector<160x4xf32>
    %5 = vector.broadcast %1 : vector<1x4xf32> to vector<160x4xf32>
    %6 = arith.addf %4, %5 : vector<160x4xf32>
    %cst = arith.constant 0.000000e+00 : f32
    %7 = vector.broadcast %cst : f32 to vector<160x4xf32>
    %8 = arith.maximumf %6, %7 : vector<160x4xf32>
    %9 = arith.truncf %8 : vector<160x4xf32> to vector<160x4xbf16>
    %c0_4 = arith.constant 0 : index
    %c0_5 = arith.constant 0 : index
    %10 = vector.load %arg3[%c0_4, %c0_5] : memref<160x4xbf16, #tpu.memory_space<vmem>>, vector<160x4xbf16>
    tpu.vector_store %arg3[%c0_4, %c0_5], %9 {strides = array<i32>} : memref<160x4xbf16, #tpu.memory_space<vmem>>, vector<160x4xbf16>,
    return
  }
  func.func @transform_0(%arg0: i32) -> (i32, i32) {
    %c0_i32 = arith.constant 0 : i32
    %c0_i32_0 = arith.constant 0 : i32
    return %arg0, %c0_i32 : i32, i32
  }
  func.func @transform_1(%arg0: i32) -> (i32, i32) {
    %c0_i32 = arith.constant 0 : i32
    %c0_i32_0 = arith.constant 0 : i32
    %c0_i32_1 = arith.constant 0 : i32
    return %c0_i32, %c0_i32_0 : i32, i32
  }
  func.func @transform_2(%arg0: i32) -> (i32, i32) {
    %c0_i32 = arith.constant 0 : i32
    %c0_i32_0 = arith.constant 0 : i32
    return %arg0, %c0_i32 : i32, i32
  }
}

module attributes {stable_mosaic.version = 11 : i64} {
  func.func @_conv_stats_kernel(%arg0: i32, %arg1: memref<1x73x4xbf16, #tpu.memory_space<vmem>>, %arg2: memref<2x4x4xbf16, #tpu.memory_space<vmem>>, %arg3: memref<1x72x4xf32, #tpu.memory_space<vmem>>, %arg4: memref<1x1x4xf32, #tpu.memory_space<vmem>>, %arg5: memref<1x1x4xf32, #tpu.memory_space<vmem>>) attributes {dimension_semantics = [#tpu.dimension_semantics<parallel>], iteration_bounds = array<i64: 2>, scalar_prefetch = 0 : i64, scratch_operands = 0 : i64, tpu.core_type = #tpu.core_type<tc>, window_params = [{transform_indices = @transform_0, window_bounds = array<i64: 1, 73, 4>}, {pipeline_mode = #tpu.pipeline_mode<synchronous>, transform_indices = @transform_1, window_bounds = array<i64: 2, 4, 4>}, {transform_indices = @transform_2, window_bounds = array<i64: 1, 72, 4>}, {transform_indices = @transform_3, window_bounds = array<i64: 1, 1, 4>}, {transform_indices = @transform_4, window_bounds = array<i64: 1, 1, 4>}]} {
    %cst = arith.constant 0.000000e+00 : f32
    %0 = vector.broadcast %cst : f32 to vector<72x4xf32>
    %c0 = arith.constant 0 : index
    %c0_0 = arith.constant 0 : index
    %c0_1 = arith.constant 0 : index
    %1 = vector.load %arg1[%c0, %c0_0, %c0_1] : memref<1x73x4xbf16, #tpu.memory_space<vmem>>, vector<1x72x4xbf16>
    %2 = vector.shape_cast %1 : vector<1x72x4xbf16> to vector<72x4xbf16>
    %c0_2 = arith.constant 0 : index
    %c0_3 = arith.constant 0 : index
    %c0_4 = arith.constant 0 : index
    %3 = vector.load %arg2[%c0_2, %c0_3, %c0_4] : memref<2x4x4xbf16, #tpu.memory_space<vmem>>, vector<1x4x4xbf16>
    %4 = vector.shape_cast %3 : vector<1x4x4xbf16> to vector<4x4xbf16>
    %cst_5 = arith.constant dense<0.000000e+00> : vector<72x4xf32>
    %5 = tpu.matmul %2, %4, %cst_5 {dimension_numbers = #tpu.dot_dimension_numbers<[1], [0], [0], [1], [0, 0, 1, 1], [], []>} : vector<72x4xbf16>, vector<4x4xbf16>, vector<72x4xf32> -> vector<72x4xf32>
    %6 = arith.addf %0, %5 : vector<72x4xf32>
    %c0_6 = arith.constant 0 : index
    %c1 = arith.constant 1 : index
    %c0_7 = arith.constant 0 : index
    %7 = vector.load %arg1[%c0_6, %c1, %c0_7] : memref<1x73x4xbf16, #tpu.memory_space<vmem>>, vector<1x72x4xbf16>
    %8 = vector.shape_cast %7 : vector<1x72x4xbf16> to vector<72x4xbf16>
    %c1_8 = arith.constant 1 : index
    %c0_9 = arith.constant 0 : index
    %c0_10 = arith.constant 0 : index
    %9 = vector.load %arg2[%c1_8, %c0_9, %c0_10] : memref<2x4x4xbf16, #tpu.memory_space<vmem>>, vector<1x4x4xbf16>
    %10 = vector.shape_cast %9 : vector<1x4x4xbf16> to vector<4x4xbf16>
    %cst_11 = arith.constant dense<0.000000e+00> : vector<72x4xf32>
    %11 = tpu.matmul %8, %10, %cst_11 {dimension_numbers = #tpu.dot_dimension_numbers<[1], [0], [0], [1], [0, 0, 1, 1], [], []>} : vector<72x4xbf16>, vector<4x4xbf16>, vector<72x4xf32> -> vector<72x4xf32>
    %12 = arith.addf %6, %11 : vector<72x4xf32>
    %c0_12 = arith.constant 0 : index
    %c0_13 = arith.constant 0 : index
    %c0_14 = arith.constant 0 : index
    %13 = vector.load %arg3[%c0_12, %c0_13, %c0_14] : memref<1x72x4xf32, #tpu.memory_space<vmem>>, vector<1x72x4xf32>
    %14 = vector.shape_cast %13 : vector<1x72x4xf32> to vector<72x4xf32>
    %15 = vector.shape_cast %12 : vector<72x4xf32> to vector<1x72x4xf32>
    tpu.vector_store %arg3[%c0_12, %c0_13, %c0_14], %15 {strides = array<i32>} : memref<1x72x4xf32, #tpu.memory_space<vmem>>, vector<1x72x4xf32>,
    %16 = tpu.iota {dimensions = array<i32: 0>} : vector<72x4xi32>
    %c9_i32 = arith.constant 9 : i32
    %c0_i32 = arith.constant 0 : i32
    %17 = arith.cmpi eq, %c9_i32, %c0_i32 : i32
    %c1_i32 = arith.constant 1 : i32
    %18 = arith.select %17, %c1_i32, %c9_i32 : i32
    %19 = vector.broadcast %18 : i32 to vector<72x4xi32>
    %20 = arith.remsi %16, %19 : vector<72x4xi32>
    %c0_i32_15 = arith.constant 0 : i32
    %21 = vector.broadcast %c0_i32_15 : i32 to vector<72x4xi32>
    %22 = arith.cmpi ne, %20, %21 : vector<72x4xi32>
    %c0_i32_16 = arith.constant 0 : i32
    %23 = vector.broadcast %c0_i32_16 : i32 to vector<72x4xi32>
    %24 = arith.cmpi slt, %20, %23 : vector<72x4xi32>
    %c0_i32_17 = arith.constant 0 : i32
    %25 = arith.cmpi slt, %18, %c0_i32_17 : i32
    %26 = vector.broadcast %25 : i1 to vector<72x4xi1>
    %27 = vector.broadcast %26 : vector<72x4xi1> to vector<72x4xi1>
    %28 = arith.xori %24, %27 : vector<72x4xi1>
    %29 = arith.andi %28, %22 : vector<72x4xi1>
    %30 = vector.broadcast %18 : i32 to vector<72x4xi32>
    %31 = arith.addi %20, %30 : vector<72x4xi32>
    %32 = arith.select %29, %31, %20 : vector<72x4xi1>, vector<72x4xi32>
    %c8_i32 = arith.constant 8 : i32
    %33 = vector.broadcast %c8_i32 : i32 to vector<72x4xi32>
    %34 = arith.cmpi slt, %32, %33 : vector<72x4xi32>
    %cst_18 = arith.constant 0.000000e+00 : f32
    %35 = vector.broadcast %cst_18 : f32 to vector<72x4xf32>
    %36 = arith.select %34, %12, %35 : vector<72x4xi1>, vector<72x4xf32>
    %cst_19 = arith.constant dense<0.000000e+00> : vector<4xf32>
    %37 = vector.multi_reduction <add>, %36, %cst_19 [0] : vector<72x4xf32> to vector<4xf32>
    %38 = vector.shape_cast %37 : vector<4xf32> to vector<1x4xf32>
    %c0_20 = arith.constant 0 : index
    %c0_21 = arith.constant 0 : index
    %c0_22 = arith.constant 0 : index
    %39 = vector.load %arg4[%c0_20, %c0_21, %c0_22] : memref<1x1x4xf32, #tpu.memory_space<vmem>>, vector<1x1x4xf32>
    %40 = vector.shape_cast %39 : vector<1x1x4xf32> to vector<1x4xf32>
    %41 = vector.shape_cast %38 : vector<1x4xf32> to vector<1x1x4xf32>
    tpu.vector_store %arg4[%c0_20, %c0_21, %c0_22], %41 {strides = array<i32>} : memref<1x1x4xf32, #tpu.memory_space<vmem>>, vector<1x1x4xf32>,
    %42 = arith.mulf %36, %36 : vector<72x4xf32>
    %cst_23 = arith.constant dense<0.000000e+00> : vector<4xf32>
    %43 = vector.multi_reduction <add>, %42, %cst_23 [0] : vector<72x4xf32> to vector<4xf32>
    %44 = vector.shape_cast %43 : vector<4xf32> to vector<1x4xf32>
    %c0_24 = arith.constant 0 : index
    %c0_25 = arith.constant 0 : index
    %c0_26 = arith.constant 0 : index
    %45 = vector.load %arg5[%c0_24, %c0_25, %c0_26] : memref<1x1x4xf32, #tpu.memory_space<vmem>>, vector<1x1x4xf32>
    %46 = vector.shape_cast %45 : vector<1x1x4xf32> to vector<1x4xf32>
    %47 = vector.shape_cast %44 : vector<1x4xf32> to vector<1x1x4xf32>
    tpu.vector_store %arg5[%c0_24, %c0_25, %c0_26], %47 {strides = array<i32>} : memref<1x1x4xf32, #tpu.memory_space<vmem>>, vector<1x1x4xf32>,
    return
  }
  func.func @transform_0(%arg0: i32) -> (i32, i32, i32) {
    %c0_i32 = arith.constant 0 : i32
    %c0_i32_0 = arith.constant 0 : i32
    %c0_i32_1 = arith.constant 0 : i32
    return %arg0, %c0_i32, %c0_i32_0 : i32, i32, i32
  }
  func.func @transform_1(%arg0: i32) -> (i32, i32, i32) {
    %c0_i32 = arith.constant 0 : i32
    %c0_i32_0 = arith.constant 0 : i32
    %c0_i32_1 = arith.constant 0 : i32
    %c0_i32_2 = arith.constant 0 : i32
    return %c0_i32, %c0_i32_0, %c0_i32_1 : i32, i32, i32
  }
  func.func @transform_2(%arg0: i32) -> (i32, i32, i32) {
    %c0_i32 = arith.constant 0 : i32
    %c0_i32_0 = arith.constant 0 : i32
    %c0_i32_1 = arith.constant 0 : i32
    return %arg0, %c0_i32, %c0_i32_0 : i32, i32, i32
  }
  func.func @transform_3(%arg0: i32) -> (i32, i32, i32) {
    %c0_i32 = arith.constant 0 : i32
    %c0_i32_0 = arith.constant 0 : i32
    %c0_i32_1 = arith.constant 0 : i32
    return %arg0, %c0_i32, %c0_i32_0 : i32, i32, i32
  }
  func.func @transform_4(%arg0: i32) -> (i32, i32, i32) {
    %c0_i32 = arith.constant 0 : i32
    %c0_i32_0 = arith.constant 0 : i32
    %c0_i32_1 = arith.constant 0 : i32
    return %arg0, %c0_i32, %c0_i32_0 : i32, i32, i32
  }
}

module attributes {stable_mosaic.version = 11 : i64} {
  func.func @_conv_stats_kernel(%arg0: i32, %arg1: memref<1x72x4xbf16, #tpu.memory_space<vmem>>, %arg2: memref<2x4x4xbf16, #tpu.memory_space<vmem>>, %arg3: memref<1x64x4xf32, #tpu.memory_space<vmem>>, %arg4: memref<1x1x4xf32, #tpu.memory_space<vmem>>, %arg5: memref<1x1x4xf32, #tpu.memory_space<vmem>>) attributes {dimension_semantics = [#tpu.dimension_semantics<parallel>], iteration_bounds = array<i64: 2>, scalar_prefetch = 0 : i64, scratch_operands = 0 : i64, tpu.core_type = #tpu.core_type<tc>, window_params = [{transform_indices = @transform_0, window_bounds = array<i64: 1, 72, 4>}, {pipeline_mode = #tpu.pipeline_mode<synchronous>, transform_indices = @transform_1, window_bounds = array<i64: 2, 4, 4>}, {transform_indices = @transform_2, window_bounds = array<i64: 1, 64, 4>}, {transform_indices = @transform_3, window_bounds = array<i64: 1, 1, 4>}, {transform_indices = @transform_4, window_bounds = array<i64: 1, 1, 4>}]} {
    %cst = arith.constant 0.000000e+00 : f32
    %0 = vector.broadcast %cst : f32 to vector<64x4xf32>
    %c0 = arith.constant 0 : index
    %c0_0 = arith.constant 0 : index
    %c0_1 = arith.constant 0 : index
    %1 = vector.load %arg1[%c0, %c0_0, %c0_1] : memref<1x72x4xbf16, #tpu.memory_space<vmem>>, vector<1x64x4xbf16>
    %2 = vector.shape_cast %1 : vector<1x64x4xbf16> to vector<64x4xbf16>
    %c0_2 = arith.constant 0 : index
    %c0_3 = arith.constant 0 : index
    %c0_4 = arith.constant 0 : index
    %3 = vector.load %arg2[%c0_2, %c0_3, %c0_4] : memref<2x4x4xbf16, #tpu.memory_space<vmem>>, vector<1x4x4xbf16>
    %4 = vector.shape_cast %3 : vector<1x4x4xbf16> to vector<4x4xbf16>
    %cst_5 = arith.constant dense<0.000000e+00> : vector<64x4xf32>
    %5 = tpu.matmul %2, %4, %cst_5 {dimension_numbers = #tpu.dot_dimension_numbers<[1], [0], [0], [1], [0, 0, 1, 1], [], []>} : vector<64x4xbf16>, vector<4x4xbf16>, vector<64x4xf32> -> vector<64x4xf32>
    %6 = arith.addf %0, %5 : vector<64x4xf32>
    %c0_6 = arith.constant 0 : index
    %c8 = arith.constant 8 : index
    %c0_7 = arith.constant 0 : index
    %7 = vector.load %arg1[%c0_6, %c8, %c0_7] : memref<1x72x4xbf16, #tpu.memory_space<vmem>>, vector<1x64x4xbf16>
    %8 = vector.shape_cast %7 : vector<1x64x4xbf16> to vector<64x4xbf16>
    %c1 = arith.constant 1 : index
    %c0_8 = arith.constant 0 : index
    %c0_9 = arith.constant 0 : index
    %9 = vector.load %arg2[%c1, %c0_8, %c0_9] : memref<2x4x4xbf16, #tpu.memory_space<vmem>>, vector<1x4x4xbf16>
    %10 = vector.shape_cast %9 : vector<1x4x4xbf16> to vector<4x4xbf16>
    %cst_10 = arith.constant dense<0.000000e+00> : vector<64x4xf32>
    %11 = tpu.matmul %8, %10, %cst_10 {dimension_numbers = #tpu.dot_dimension_numbers<[1], [0], [0], [1], [0, 0, 1, 1], [], []>} : vector<64x4xbf16>, vector<4x4xbf16>, vector<64x4xf32> -> vector<64x4xf32>
    %12 = arith.addf %6, %11 : vector<64x4xf32>
    %c0_11 = arith.constant 0 : index
    %c0_12 = arith.constant 0 : index
    %c0_13 = arith.constant 0 : index
    %13 = vector.load %arg3[%c0_11, %c0_12, %c0_13] : memref<1x64x4xf32, #tpu.memory_space<vmem>>, vector<1x64x4xf32>
    %14 = vector.shape_cast %13 : vector<1x64x4xf32> to vector<64x4xf32>
    %15 = vector.shape_cast %12 : vector<64x4xf32> to vector<1x64x4xf32>
    tpu.vector_store %arg3[%c0_11, %c0_12, %c0_13], %15 {strides = array<i32>} : memref<1x64x4xf32, #tpu.memory_space<vmem>>, vector<1x64x4xf32>,
    %16 = tpu.iota {dimensions = array<i32: 0>} : vector<64x4xi32>
    %c8_i32 = arith.constant 8 : i32
    %c0_i32 = arith.constant 0 : i32
    %17 = arith.cmpi eq, %c8_i32, %c0_i32 : i32
    %c1_i32 = arith.constant 1 : i32
    %18 = arith.select %17, %c1_i32, %c8_i32 : i32
    %19 = vector.broadcast %18 : i32 to vector<64x4xi32>
    %20 = arith.remsi %16, %19 : vector<64x4xi32>
    %c0_i32_14 = arith.constant 0 : i32
    %21 = vector.broadcast %c0_i32_14 : i32 to vector<64x4xi32>
    %22 = arith.cmpi ne, %20, %21 : vector<64x4xi32>
    %c0_i32_15 = arith.constant 0 : i32
    %23 = vector.broadcast %c0_i32_15 : i32 to vector<64x4xi32>
    %24 = arith.cmpi slt, %20, %23 : vector<64x4xi32>
    %c0_i32_16 = arith.constant 0 : i32
    %25 = arith.cmpi slt, %18, %c0_i32_16 : i32
    %26 = vector.broadcast %25 : i1 to vector<64x4xi1>
    %27 = vector.broadcast %26 : vector<64x4xi1> to vector<64x4xi1>
    %28 = arith.xori %24, %27 : vector<64x4xi1>
    %29 = arith.andi %28, %22 : vector<64x4xi1>
    %30 = vector.broadcast %18 : i32 to vector<64x4xi32>
    %31 = arith.addi %20, %30 : vector<64x4xi32>
    %32 = arith.select %29, %31, %20 : vector<64x4xi1>, vector<64x4xi32>
    %c8_i32_17 = arith.constant 8 : i32
    %33 = vector.broadcast %c8_i32_17 : i32 to vector<64x4xi32>
    %34 = arith.cmpi slt, %32, %33 : vector<64x4xi32>
    %cst_18 = arith.constant 0.000000e+00 : f32
    %35 = vector.broadcast %cst_18 : f32 to vector<64x4xf32>
    %36 = arith.select %34, %12, %35 : vector<64x4xi1>, vector<64x4xf32>
    %cst_19 = arith.constant dense<0.000000e+00> : vector<4xf32>
    %37 = vector.multi_reduction <add>, %36, %cst_19 [0] : vector<64x4xf32> to vector<4xf32>
    %38 = vector.shape_cast %37 : vector<4xf32> to vector<1x4xf32>
    %c0_20 = arith.constant 0 : index
    %c0_21 = arith.constant 0 : index
    %c0_22 = arith.constant 0 : index
    %39 = vector.load %arg4[%c0_20, %c0_21, %c0_22] : memref<1x1x4xf32, #tpu.memory_space<vmem>>, vector<1x1x4xf32>
    %40 = vector.shape_cast %39 : vector<1x1x4xf32> to vector<1x4xf32>
    %41 = vector.shape_cast %38 : vector<1x4xf32> to vector<1x1x4xf32>
    tpu.vector_store %arg4[%c0_20, %c0_21, %c0_22], %41 {strides = array<i32>} : memref<1x1x4xf32, #tpu.memory_space<vmem>>, vector<1x1x4xf32>,
    %42 = arith.mulf %36, %36 : vector<64x4xf32>
    %cst_23 = arith.constant dense<0.000000e+00> : vector<4xf32>
    %43 = vector.multi_reduction <add>, %42, %cst_23 [0] : vector<64x4xf32> to vector<4xf32>
    %44 = vector.shape_cast %43 : vector<4xf32> to vector<1x4xf32>
    %c0_24 = arith.constant 0 : index
    %c0_25 = arith.constant 0 : index
    %c0_26 = arith.constant 0 : index
    %45 = vector.load %arg5[%c0_24, %c0_25, %c0_26] : memref<1x1x4xf32, #tpu.memory_space<vmem>>, vector<1x1x4xf32>
    %46 = vector.shape_cast %45 : vector<1x1x4xf32> to vector<1x4xf32>
    %47 = vector.shape_cast %44 : vector<1x4xf32> to vector<1x1x4xf32>
    tpu.vector_store %arg5[%c0_24, %c0_25, %c0_26], %47 {strides = array<i32>} : memref<1x1x4xf32, #tpu.memory_space<vmem>>, vector<1x1x4xf32>,
    return
  }
  func.func @transform_0(%arg0: i32) -> (i32, i32, i32) {
    %c0_i32 = arith.constant 0 : i32
    %c0_i32_0 = arith.constant 0 : i32
    %c0_i32_1 = arith.constant 0 : i32
    return %arg0, %c0_i32, %c0_i32_0 : i32, i32, i32
  }
  func.func @transform_1(%arg0: i32) -> (i32, i32, i32) {
    %c0_i32 = arith.constant 0 : i32
    %c0_i32_0 = arith.constant 0 : i32
    %c0_i32_1 = arith.constant 0 : i32
    %c0_i32_2 = arith.constant 0 : i32
    return %c0_i32, %c0_i32_0, %c0_i32_1 : i32, i32, i32
  }
  func.func @transform_2(%arg0: i32) -> (i32, i32, i32) {
    %c0_i32 = arith.constant 0 : i32
    %c0_i32_0 = arith.constant 0 : i32
    %c0_i32_1 = arith.constant 0 : i32
    return %arg0, %c0_i32, %c0_i32_0 : i32, i32, i32
  }
  func.func @transform_3(%arg0: i32) -> (i32, i32, i32) {
    %c0_i32 = arith.constant 0 : i32
    %c0_i32_0 = arith.constant 0 : i32
    %c0_i32_1 = arith.constant 0 : i32
    return %arg0, %c0_i32, %c0_i32_0 : i32, i32, i32
  }
  func.func @transform_4(%arg0: i32) -> (i32, i32, i32) {
    %c0_i32 = arith.constant 0 : i32
    %c0_i32_0 = arith.constant 0 : i32
    %c0_i32_1 = arith.constant 0 : i32
    return %arg0, %c0_i32, %c0_i32_0 : i32, i32, i32
  }
}

module attributes {stable_mosaic.version = 11 : i64} {
  func.func @_conv_stats_kernel(%arg0: i32, %arg1: memref<1x82x4xbf16, #tpu.memory_space<vmem>>, %arg2: memref<4x4x4xbf16, #tpu.memory_space<vmem>>, %arg3: memref<1x72x4xf32, #tpu.memory_space<vmem>>, %arg4: memref<1x1x4xf32, #tpu.memory_space<vmem>>, %arg5: memref<1x1x4xf32, #tpu.memory_space<vmem>>) attributes {dimension_semantics = [#tpu.dimension_semantics<parallel>], iteration_bounds = array<i64: 2>, scalar_prefetch = 0 : i64, scratch_operands = 0 : i64, tpu.core_type = #tpu.core_type<tc>, window_params = [{transform_indices = @transform_0, window_bounds = array<i64: 1, 82, 4>}, {pipeline_mode = #tpu.pipeline_mode<synchronous>, transform_indices = @transform_1, window_bounds = array<i64: 4, 4, 4>}, {transform_indices = @transform_2, window_bounds = array<i64: 1, 72, 4>}, {transform_indices = @transform_3, window_bounds = array<i64: 1, 1, 4>}, {transform_indices = @transform_4, window_bounds = array<i64: 1, 1, 4>}]} {
    %cst = arith.constant 0.000000e+00 : f32
    %0 = vector.broadcast %cst : f32 to vector<72x4xf32>
    %c0 = arith.constant 0 : index
    %c0_0 = arith.constant 0 : index
    %c0_1 = arith.constant 0 : index
    %1 = vector.load %arg1[%c0, %c0_0, %c0_1] : memref<1x82x4xbf16, #tpu.memory_space<vmem>>, vector<1x72x4xbf16>
    %2 = vector.shape_cast %1 : vector<1x72x4xbf16> to vector<72x4xbf16>
    %c0_2 = arith.constant 0 : index
    %c0_3 = arith.constant 0 : index
    %c0_4 = arith.constant 0 : index
    %3 = vector.load %arg2[%c0_2, %c0_3, %c0_4] : memref<4x4x4xbf16, #tpu.memory_space<vmem>>, vector<1x4x4xbf16>
    %4 = vector.shape_cast %3 : vector<1x4x4xbf16> to vector<4x4xbf16>
    %cst_5 = arith.constant dense<0.000000e+00> : vector<72x4xf32>
    %5 = tpu.matmul %2, %4, %cst_5 {dimension_numbers = #tpu.dot_dimension_numbers<[1], [0], [0], [1], [0, 0, 1, 1], [], []>} : vector<72x4xbf16>, vector<4x4xbf16>, vector<72x4xf32> -> vector<72x4xf32>
    %6 = arith.addf %0, %5 : vector<72x4xf32>
    %c0_6 = arith.constant 0 : index
    %c1 = arith.constant 1 : index
    %c0_7 = arith.constant 0 : index
    %7 = vector.load %arg1[%c0_6, %c1, %c0_7] : memref<1x82x4xbf16, #tpu.memory_space<vmem>>, vector<1x72x4xbf16>
    %8 = vector.shape_cast %7 : vector<1x72x4xbf16> to vector<72x4xbf16>
    %c1_8 = arith.constant 1 : index
    %c0_9 = arith.constant 0 : index
    %c0_10 = arith.constant 0 : index
    %9 = vector.load %arg2[%c1_8, %c0_9, %c0_10] : memref<4x4x4xbf16, #tpu.memory_space<vmem>>, vector<1x4x4xbf16>
    %10 = vector.shape_cast %9 : vector<1x4x4xbf16> to vector<4x4xbf16>
    %cst_11 = arith.constant dense<0.000000e+00> : vector<72x4xf32>
    %11 = tpu.matmul %8, %10, %cst_11 {dimension_numbers = #tpu.dot_dimension_numbers<[1], [0], [0], [1], [0, 0, 1, 1], [], []>} : vector<72x4xbf16>, vector<4x4xbf16>, vector<72x4xf32> -> vector<72x4xf32>
    %12 = arith.addf %6, %11 : vector<72x4xf32>
    %c0_12 = arith.constant 0 : index
    %c9 = arith.constant 9 : index
    %c0_13 = arith.constant 0 : index
    %13 = vector.load %arg1[%c0_12, %c9, %c0_13] : memref<1x82x4xbf16, #tpu.memory_space<vmem>>, vector<1x72x4xbf16>
    %14 = vector.shape_cast %13 : vector<1x72x4xbf16> to vector<72x4xbf16>
    %c2 = arith.constant 2 : index
    %c0_14 = arith.constant 0 : index
    %c0_15 = arith.constant 0 : index
    %15 = vector.load %arg2[%c2, %c0_14, %c0_15] : memref<4x4x4xbf16, #tpu.memory_space<vmem>>, vector<1x4x4xbf16>
    %16 = vector.shape_cast %15 : vector<1x4x4xbf16> to vector<4x4xbf16>
    %cst_16 = arith.constant dense<0.000000e+00> : vector<72x4xf32>
    %17 = tpu.matmul %14, %16, %cst_16 {dimension_numbers = #tpu.dot_dimension_numbers<[1], [0], [0], [1], [0, 0, 1, 1], [], []>} : vector<72x4xbf16>, vector<4x4xbf16>, vector<72x4xf32> -> vector<72x4xf32>
    %18 = arith.addf %12, %17 : vector<72x4xf32>
    %c0_17 = arith.constant 0 : index
    %c10 = arith.constant 10 : index
    %c0_18 = arith.constant 0 : index
    %19 = vector.load %arg1[%c0_17, %c10, %c0_18] : memref<1x82x4xbf16, #tpu.memory_space<vmem>>, vector<1x72x4xbf16>
    %20 = vector.shape_cast %19 : vector<1x72x4xbf16> to vector<72x4xbf16>
    %c3 = arith.constant 3 : index
    %c0_19 = arith.constant 0 : index
    %c0_20 = arith.constant 0 : index
    %21 = vector.load %arg2[%c3, %c0_19, %c0_20] : memref<4x4x4xbf16, #tpu.memory_space<vmem>>, vector<1x4x4xbf16>
    %22 = vector.shape_cast %21 : vector<1x4x4xbf16> to vector<4x4xbf16>
    %cst_21 = arith.constant dense<0.000000e+00> : vector<72x4xf32>
    %23 = tpu.matmul %20, %22, %cst_21 {dimension_numbers = #tpu.dot_dimension_numbers<[1], [0], [0], [1], [0, 0, 1, 1], [], []>} : vector<72x4xbf16>, vector<4x4xbf16>, vector<72x4xf32> -> vector<72x4xf32>
    %24 = arith.addf %18, %23 : vector<72x4xf32>
    %c0_22 = arith.constant 0 : index
    %c0_23 = arith.constant 0 : index
    %c0_24 = arith.constant 0 : index
    %25 = vector.load %arg3[%c0_22, %c0_23, %c0_24] : memref<1x72x4xf32, #tpu.memory_space<vmem>>, vector<1x72x4xf32>
    %26 = vector.shape_cast %25 : vector<1x72x4xf32> to vector<72x4xf32>
    %27 = vector.shape_cast %24 : vector<72x4xf32> to vector<1x72x4xf32>
    tpu.vector_store %arg3[%c0_22, %c0_23, %c0_24], %27 {strides = array<i32>} : memref<1x72x4xf32, #tpu.memory_space<vmem>>, vector<1x72x4xf32>,
    %28 = tpu.iota {dimensions = array<i32: 0>} : vector<72x4xi32>
    %c9_i32 = arith.constant 9 : i32
    %c0_i32 = arith.constant 0 : i32
    %29 = arith.cmpi eq, %c9_i32, %c0_i32 : i32
    %c1_i32 = arith.constant 1 : i32
    %30 = arith.select %29, %c1_i32, %c9_i32 : i32
    %31 = vector.broadcast %30 : i32 to vector<72x4xi32>
    %32 = arith.remsi %28, %31 : vector<72x4xi32>
    %c0_i32_25 = arith.constant 0 : i32
    %33 = vector.broadcast %c0_i32_25 : i32 to vector<72x4xi32>
    %34 = arith.cmpi ne, %32, %33 : vector<72x4xi32>
    %c0_i32_26 = arith.constant 0 : i32
    %35 = vector.broadcast %c0_i32_26 : i32 to vector<72x4xi32>
    %36 = arith.cmpi slt, %32, %35 : vector<72x4xi32>
    %c0_i32_27 = arith.constant 0 : i32
    %37 = arith.cmpi slt, %30, %c0_i32_27 : i32
    %38 = vector.broadcast %37 : i1 to vector<72x4xi1>
    %39 = vector.broadcast %38 : vector<72x4xi1> to vector<72x4xi1>
    %40 = arith.xori %36, %39 : vector<72x4xi1>
    %41 = arith.andi %40, %34 : vector<72x4xi1>
    %42 = vector.broadcast %30 : i32 to vector<72x4xi32>
    %43 = arith.addi %32, %42 : vector<72x4xi32>
    %44 = arith.select %41, %43, %32 : vector<72x4xi1>, vector<72x4xi32>
    %c8_i32 = arith.constant 8 : i32
    %45 = vector.broadcast %c8_i32 : i32 to vector<72x4xi32>
    %46 = arith.cmpi slt, %44, %45 : vector<72x4xi32>
    %cst_28 = arith.constant 0.000000e+00 : f32
    %47 = vector.broadcast %cst_28 : f32 to vector<72x4xf32>
    %48 = arith.select %46, %24, %47 : vector<72x4xi1>, vector<72x4xf32>
    %cst_29 = arith.constant dense<0.000000e+00> : vector<4xf32>
    %49 = vector.multi_reduction <add>, %48, %cst_29 [0] : vector<72x4xf32> to vector<4xf32>
    %50 = vector.shape_cast %49 : vector<4xf32> to vector<1x4xf32>
    %c0_30 = arith.constant 0 : index
    %c0_31 = arith.constant 0 : index
    %c0_32 = arith.constant 0 : index
    %51 = vector.load %arg4[%c0_30, %c0_31, %c0_32] : memref<1x1x4xf32, #tpu.memory_space<vmem>>, vector<1x1x4xf32>
    %52 = vector.shape_cast %51 : vector<1x1x4xf32> to vector<1x4xf32>
    %53 = vector.shape_cast %50 : vector<1x4xf32> to vector<1x1x4xf32>
    tpu.vector_store %arg4[%c0_30, %c0_31, %c0_32], %53 {strides = array<i32>} : memref<1x1x4xf32, #tpu.memory_space<vmem>>, vector<1x1x4xf32>,
    %54 = arith.mulf %48, %48 : vector<72x4xf32>
    %cst_33 = arith.constant dense<0.000000e+00> : vector<4xf32>
    %55 = vector.multi_reduction <add>, %54, %cst_33 [0] : vector<72x4xf32> to vector<4xf32>
    %56 = vector.shape_cast %55 : vector<4xf32> to vector<1x4xf32>
    %c0_34 = arith.constant 0 : index
    %c0_35 = arith.constant 0 : index
    %c0_36 = arith.constant 0 : index
    %57 = vector.load %arg5[%c0_34, %c0_35, %c0_36] : memref<1x1x4xf32, #tpu.memory_space<vmem>>, vector<1x1x4xf32>
    %58 = vector.shape_cast %57 : vector<1x1x4xf32> to vector<1x4xf32>
    %59 = vector.shape_cast %56 : vector<1x4xf32> to vector<1x1x4xf32>
    tpu.vector_store %arg5[%c0_34, %c0_35, %c0_36], %59 {strides = array<i32>} : memref<1x1x4xf32, #tpu.memory_space<vmem>>, vector<1x1x4xf32>,
    return
  }
  func.func @transform_0(%arg0: i32) -> (i32, i32, i32) {
    %c0_i32 = arith.constant 0 : i32
    %c0_i32_0 = arith.constant 0 : i32
    %c0_i32_1 = arith.constant 0 : i32
    return %arg0, %c0_i32, %c0_i32_0 : i32, i32, i32
  }
  func.func @transform_1(%arg0: i32) -> (i32, i32, i32) {
    %c0_i32 = arith.constant 0 : i32
    %c0_i32_0 = arith.constant 0 : i32
    %c0_i32_1 = arith.constant 0 : i32
    %c0_i32_2 = arith.constant 0 : i32
    return %c0_i32, %c0_i32_0, %c0_i32_1 : i32, i32, i32
  }
  func.func @transform_2(%arg0: i32) -> (i32, i32, i32) {
    %c0_i32 = arith.constant 0 : i32
    %c0_i32_0 = arith.constant 0 : i32
    %c0_i32_1 = arith.constant 0 : i32
    return %arg0, %c0_i32, %c0_i32_0 : i32, i32, i32
  }
  func.func @transform_3(%arg0: i32) -> (i32, i32, i32) {
    %c0_i32 = arith.constant 0 : i32
    %c0_i32_0 = arith.constant 0 : i32
    %c0_i32_1 = arith.constant 0 : i32
    return %arg0, %c0_i32, %c0_i32_0 : i32, i32, i32
  }
  func.func @transform_4(%arg0: i32) -> (i32, i32, i32) {
    %c0_i32 = arith.constant 0 : i32
    %c0_i32_0 = arith.constant 0 : i32
    %c0_i32_1 = arith.constant 0 : i32
    return %arg0, %c0_i32, %c0_i32_0 : i32, i32, i32
  }
}

module attributes {stable_mosaic.version = 11 : i64} {
  func.func @_conv_stats_kernel(%arg0: i32, %arg1: memref<1x64x4xbf16, #tpu.memory_space<vmem>>, %arg2: memref<1x4x4xbf16, #tpu.memory_space<vmem>>, %arg3: memref<1x64x4xf32, #tpu.memory_space<vmem>>, %arg4: memref<1x1x4xf32, #tpu.memory_space<vmem>>, %arg5: memref<1x1x4xf32, #tpu.memory_space<vmem>>) attributes {dimension_semantics = [#tpu.dimension_semantics<parallel>], iteration_bounds = array<i64: 2>, scalar_prefetch = 0 : i64, scratch_operands = 0 : i64, tpu.core_type = #tpu.core_type<tc>, window_params = [{transform_indices = @transform_0, window_bounds = array<i64: 1, 64, 4>}, {pipeline_mode = #tpu.pipeline_mode<synchronous>, transform_indices = @transform_1, window_bounds = array<i64: 1, 4, 4>}, {transform_indices = @transform_2, window_bounds = array<i64: 1, 64, 4>}, {transform_indices = @transform_3, window_bounds = array<i64: 1, 1, 4>}, {transform_indices = @transform_4, window_bounds = array<i64: 1, 1, 4>}]} {
    %cst = arith.constant 0.000000e+00 : f32
    %0 = vector.broadcast %cst : f32 to vector<64x4xf32>
    %c0 = arith.constant 0 : index
    %c0_0 = arith.constant 0 : index
    %c0_1 = arith.constant 0 : index
    %1 = vector.load %arg1[%c0, %c0_0, %c0_1] : memref<1x64x4xbf16, #tpu.memory_space<vmem>>, vector<1x64x4xbf16>
    %2 = vector.shape_cast %1 : vector<1x64x4xbf16> to vector<64x4xbf16>
    %c0_2 = arith.constant 0 : index
    %c0_3 = arith.constant 0 : index
    %c0_4 = arith.constant 0 : index
    %3 = vector.load %arg2[%c0_2, %c0_3, %c0_4] : memref<1x4x4xbf16, #tpu.memory_space<vmem>>, vector<1x4x4xbf16>
    %4 = vector.shape_cast %3 : vector<1x4x4xbf16> to vector<4x4xbf16>
    %cst_5 = arith.constant dense<0.000000e+00> : vector<64x4xf32>
    %5 = tpu.matmul %2, %4, %cst_5 {dimension_numbers = #tpu.dot_dimension_numbers<[1], [0], [0], [1], [0, 0, 1, 1], [], []>} : vector<64x4xbf16>, vector<4x4xbf16>, vector<64x4xf32> -> vector<64x4xf32>
    %6 = arith.addf %0, %5 : vector<64x4xf32>
    %c0_6 = arith.constant 0 : index
    %c0_7 = arith.constant 0 : index
    %c0_8 = arith.constant 0 : index
    %7 = vector.load %arg3[%c0_6, %c0_7, %c0_8] : memref<1x64x4xf32, #tpu.memory_space<vmem>>, vector<1x64x4xf32>
    %8 = vector.shape_cast %7 : vector<1x64x4xf32> to vector<64x4xf32>
    %9 = vector.shape_cast %6 : vector<64x4xf32> to vector<1x64x4xf32>
    tpu.vector_store %arg3[%c0_6, %c0_7, %c0_8], %9 {strides = array<i32>} : memref<1x64x4xf32, #tpu.memory_space<vmem>>, vector<1x64x4xf32>,
    %10 = tpu.iota {dimensions = array<i32: 0>} : vector<64x4xi32>
    %c8_i32 = arith.constant 8 : i32
    %c0_i32 = arith.constant 0 : i32
    %11 = arith.cmpi eq, %c8_i32, %c0_i32 : i32
    %c1_i32 = arith.constant 1 : i32
    %12 = arith.select %11, %c1_i32, %c8_i32 : i32
    %13 = vector.broadcast %12 : i32 to vector<64x4xi32>
    %14 = arith.remsi %10, %13 : vector<64x4xi32>
    %c0_i32_9 = arith.constant 0 : i32
    %15 = vector.broadcast %c0_i32_9 : i32 to vector<64x4xi32>
    %16 = arith.cmpi ne, %14, %15 : vector<64x4xi32>
    %c0_i32_10 = arith.constant 0 : i32
    %17 = vector.broadcast %c0_i32_10 : i32 to vector<64x4xi32>
    %18 = arith.cmpi slt, %14, %17 : vector<64x4xi32>
    %c0_i32_11 = arith.constant 0 : i32
    %19 = arith.cmpi slt, %12, %c0_i32_11 : i32
    %20 = vector.broadcast %19 : i1 to vector<64x4xi1>
    %21 = vector.broadcast %20 : vector<64x4xi1> to vector<64x4xi1>
    %22 = arith.xori %18, %21 : vector<64x4xi1>
    %23 = arith.andi %22, %16 : vector<64x4xi1>
    %24 = vector.broadcast %12 : i32 to vector<64x4xi32>
    %25 = arith.addi %14, %24 : vector<64x4xi32>
    %26 = arith.select %23, %25, %14 : vector<64x4xi1>, vector<64x4xi32>
    %c8_i32_12 = arith.constant 8 : i32
    %27 = vector.broadcast %c8_i32_12 : i32 to vector<64x4xi32>
    %28 = arith.cmpi slt, %26, %27 : vector<64x4xi32>
    %cst_13 = arith.constant 0.000000e+00 : f32
    %29 = vector.broadcast %cst_13 : f32 to vector<64x4xf32>
    %30 = arith.select %28, %6, %29 : vector<64x4xi1>, vector<64x4xf32>
    %cst_14 = arith.constant dense<0.000000e+00> : vector<4xf32>
    %31 = vector.multi_reduction <add>, %30, %cst_14 [0] : vector<64x4xf32> to vector<4xf32>
    %32 = vector.shape_cast %31 : vector<4xf32> to vector<1x4xf32>
    %c0_15 = arith.constant 0 : index
    %c0_16 = arith.constant 0 : index
    %c0_17 = arith.constant 0 : index
    %33 = vector.load %arg4[%c0_15, %c0_16, %c0_17] : memref<1x1x4xf32, #tpu.memory_space<vmem>>, vector<1x1x4xf32>
    %34 = vector.shape_cast %33 : vector<1x1x4xf32> to vector<1x4xf32>
    %35 = vector.shape_cast %32 : vector<1x4xf32> to vector<1x1x4xf32>
    tpu.vector_store %arg4[%c0_15, %c0_16, %c0_17], %35 {strides = array<i32>} : memref<1x1x4xf32, #tpu.memory_space<vmem>>, vector<1x1x4xf32>,
    %36 = arith.mulf %30, %30 : vector<64x4xf32>
    %cst_18 = arith.constant dense<0.000000e+00> : vector<4xf32>
    %37 = vector.multi_reduction <add>, %36, %cst_18 [0] : vector<64x4xf32> to vector<4xf32>
    %38 = vector.shape_cast %37 : vector<4xf32> to vector<1x4xf32>
    %c0_19 = arith.constant 0 : index
    %c0_20 = arith.constant 0 : index
    %c0_21 = arith.constant 0 : index
    %39 = vector.load %arg5[%c0_19, %c0_20, %c0_21] : memref<1x1x4xf32, #tpu.memory_space<vmem>>, vector<1x1x4xf32>
    %40 = vector.shape_cast %39 : vector<1x1x4xf32> to vector<1x4xf32>
    %41 = vector.shape_cast %38 : vector<1x4xf32> to vector<1x1x4xf32>
    tpu.vector_store %arg5[%c0_19, %c0_20, %c0_21], %41 {strides = array<i32>} : memref<1x1x4xf32, #tpu.memory_space<vmem>>, vector<1x1x4xf32>,
    return
  }
  func.func @transform_0(%arg0: i32) -> (i32, i32, i32) {
    %c0_i32 = arith.constant 0 : i32
    %c0_i32_0 = arith.constant 0 : i32
    %c0_i32_1 = arith.constant 0 : i32
    return %arg0, %c0_i32, %c0_i32_0 : i32, i32, i32
  }
  func.func @transform_1(%arg0: i32) -> (i32, i32, i32) {
    %c0_i32 = arith.constant 0 : i32
    %c0_i32_0 = arith.constant 0 : i32
    %c0_i32_1 = arith.constant 0 : i32
    %c0_i32_2 = arith.constant 0 : i32
    return %c0_i32, %c0_i32_0, %c0_i32_1 : i32, i32, i32
  }
  func.func @transform_2(%arg0: i32) -> (i32, i32, i32) {
    %c0_i32 = arith.constant 0 : i32
    %c0_i32_0 = arith.constant 0 : i32
    %c0_i32_1 = arith.constant 0 : i32
    return %arg0, %c0_i32, %c0_i32_0 : i32, i32, i32
  }
  func.func @transform_3(%arg0: i32) -> (i32, i32, i32) {
    %c0_i32 = arith.constant 0 : i32
    %c0_i32_0 = arith.constant 0 : i32
    %c0_i32_1 = arith.constant 0 : i32
    return %arg0, %c0_i32, %c0_i32_0 : i32, i32, i32
  }
  func.func @transform_4(%arg0: i32) -> (i32, i32, i32) {
    %c0_i32 = arith.constant 0 : i32
    %c0_i32_0 = arith.constant 0 : i32
    %c0_i32_1 = arith.constant 0 : i32
    return %arg0, %c0_i32, %c0_i32_0 : i32, i32, i32
  }
}

module attributes {stable_mosaic.version = 11 : i64} {
  func.func @_bn_relu_kernel(%arg0: i32, %arg1: memref<512x4xf32, #tpu.memory_space<vmem>>, %arg2: memref<2x4xf32, #tpu.memory_space<vmem>>, %arg3: memref<512x4xbf16, #tpu.memory_space<vmem>>) attributes {dimension_semantics = [#tpu.dimension_semantics<parallel>], iteration_bounds = array<i64: 1>, scalar_prefetch = 0 : i64, scratch_operands = 0 : i64, tpu.core_type = #tpu.core_type<tc>, window_params = [{transform_indices = @transform_0, window_bounds = array<i64: 512, 4>}, {pipeline_mode = #tpu.pipeline_mode<synchronous>, transform_indices = @transform_1, window_bounds = array<i64: 2, 4>}, {transform_indices = @transform_2, window_bounds = array<i64: 512, 4>}]} {
    %c0 = arith.constant 0 : index
    %c0_0 = arith.constant 0 : index
    %0 = vector.load %arg2[%c0, %c0_0] : memref<2x4xf32, #tpu.memory_space<vmem>>, vector<1x4xf32>
    %c1 = arith.constant 1 : index
    %c0_1 = arith.constant 0 : index
    %1 = vector.load %arg2[%c1, %c0_1] : memref<2x4xf32, #tpu.memory_space<vmem>>, vector<1x4xf32>
    %c0_2 = arith.constant 0 : index
    %c0_3 = arith.constant 0 : index
    %2 = vector.load %arg1[%c0_2, %c0_3] : memref<512x4xf32, #tpu.memory_space<vmem>>, vector<512x4xf32>
    %3 = vector.broadcast %0 : vector<1x4xf32> to vector<512x4xf32>
    %4 = arith.mulf %2, %3 : vector<512x4xf32>
    %5 = vector.broadcast %1 : vector<1x4xf32> to vector<512x4xf32>
    %6 = arith.addf %4, %5 : vector<512x4xf32>
    %cst = arith.constant 0.000000e+00 : f32
    %7 = vector.broadcast %cst : f32 to vector<512x4xf32>
    %8 = arith.maximumf %6, %7 : vector<512x4xf32>
    %9 = arith.truncf %8 : vector<512x4xf32> to vector<512x4xbf16>
    %c0_4 = arith.constant 0 : index
    %c0_5 = arith.constant 0 : index
    %10 = vector.load %arg3[%c0_4, %c0_5] : memref<512x4xbf16, #tpu.memory_space<vmem>>, vector<512x4xbf16>
    tpu.vector_store %arg3[%c0_4, %c0_5], %9 {strides = array<i32>} : memref<512x4xbf16, #tpu.memory_space<vmem>>, vector<512x4xbf16>,
    return
  }
  func.func @transform_0(%arg0: i32) -> (i32, i32) {
    %c0_i32 = arith.constant 0 : i32
    %c0_i32_0 = arith.constant 0 : i32
    return %arg0, %c0_i32 : i32, i32
  }
  func.func @transform_1(%arg0: i32) -> (i32, i32) {
    %c0_i32 = arith.constant 0 : i32
    %c0_i32_0 = arith.constant 0 : i32
    %c0_i32_1 = arith.constant 0 : i32
    return %c0_i32, %c0_i32_0 : i32, i32
  }
  func.func @transform_2(%arg0: i32) -> (i32, i32) {
    %c0_i32 = arith.constant 0 : i32
    %c0_i32_0 = arith.constant 0 : i32
    return %arg0, %c0_i32 : i32, i32
  }
}

module attributes {stable_mosaic.version = 11 : i64} {
  func.func @_conv_stats_kernel(%arg0: i32, %arg1: memref<1x326x4xbf16, #tpu.memory_space<vmem>>, %arg2: memref<9x4x8xbf16, #tpu.memory_space<vmem>>, %arg3: memref<1x288x8xf32, #tpu.memory_space<vmem>>, %arg4: memref<1x1x8xf32, #tpu.memory_space<vmem>>, %arg5: memref<1x1x8xf32, #tpu.memory_space<vmem>>) attributes {dimension_semantics = [#tpu.dimension_semantics<parallel>], iteration_bounds = array<i64: 2>, scalar_prefetch = 0 : i64, scratch_operands = 0 : i64, tpu.core_type = #tpu.core_type<tc>, window_params = [{transform_indices = @transform_0, window_bounds = array<i64: 1, 326, 4>}, {pipeline_mode = #tpu.pipeline_mode<synchronous>, transform_indices = @transform_1, window_bounds = array<i64: 9, 4, 8>}, {transform_indices = @transform_2, window_bounds = array<i64: 1, 288, 8>}, {transform_indices = @transform_3, window_bounds = array<i64: 1, 1, 8>}, {transform_indices = @transform_4, window_bounds = array<i64: 1, 1, 8>}]} {
    %cst = arith.constant 0.000000e+00 : f32
    %0 = vector.broadcast %cst : f32 to vector<288x8xf32>
    %c0 = arith.constant 0 : index
    %c0_0 = arith.constant 0 : index
    %c0_1 = arith.constant 0 : index
    %1 = vector.load %arg1[%c0, %c0_0, %c0_1] : memref<1x326x4xbf16, #tpu.memory_space<vmem>>, vector<1x288x4xbf16>
    %2 = vector.shape_cast %1 : vector<1x288x4xbf16> to vector<288x4xbf16>
    %c0_2 = arith.constant 0 : index
    %c0_3 = arith.constant 0 : index
    %c0_4 = arith.constant 0 : index
    %3 = vector.load %arg2[%c0_2, %c0_3, %c0_4] : memref<9x4x8xbf16, #tpu.memory_space<vmem>>, vector<1x4x8xbf16>
    %4 = vector.shape_cast %3 : vector<1x4x8xbf16> to vector<4x8xbf16>
    %cst_5 = arith.constant dense<0.000000e+00> : vector<288x8xf32>
    %5 = tpu.matmul %2, %4, %cst_5 {dimension_numbers = #tpu.dot_dimension_numbers<[1], [0], [0], [1], [0, 0, 1, 1], [], []>} : vector<288x4xbf16>, vector<4x8xbf16>, vector<288x8xf32> -> vector<288x8xf32>
    %6 = arith.addf %0, %5 : vector<288x8xf32>
    %c0_6 = arith.constant 0 : index
    %c1 = arith.constant 1 : index
    %c0_7 = arith.constant 0 : index
    %7 = vector.load %arg1[%c0_6, %c1, %c0_7] : memref<1x326x4xbf16, #tpu.memory_space<vmem>>, vector<1x288x4xbf16>
    %8 = vector.shape_cast %7 : vector<1x288x4xbf16> to vector<288x4xbf16>
    %c1_8 = arith.constant 1 : index
    %c0_9 = arith.constant 0 : index
    %c0_10 = arith.constant 0 : index
    %9 = vector.load %arg2[%c1_8, %c0_9, %c0_10] : memref<9x4x8xbf16, #tpu.memory_space<vmem>>, vector<1x4x8xbf16>
    %10 = vector.shape_cast %9 : vector<1x4x8xbf16> to vector<4x8xbf16>
    %cst_11 = arith.constant dense<0.000000e+00> : vector<288x8xf32>
    %11 = tpu.matmul %8, %10, %cst_11 {dimension_numbers = #tpu.dot_dimension_numbers<[1], [0], [0], [1], [0, 0, 1, 1], [], []>} : vector<288x4xbf16>, vector<4x8xbf16>, vector<288x8xf32> -> vector<288x8xf32>
    %12 = arith.addf %6, %11 : vector<288x8xf32>
    %c0_12 = arith.constant 0 : index
    %c2 = arith.constant 2 : index
    %c0_13 = arith.constant 0 : index
    %13 = vector.load %arg1[%c0_12, %c2, %c0_13] : memref<1x326x4xbf16, #tpu.memory_space<vmem>>, vector<1x288x4xbf16>
    %14 = vector.shape_cast %13 : vector<1x288x4xbf16> to vector<288x4xbf16>
    %c2_14 = arith.constant 2 : index
    %c0_15 = arith.constant 0 : index
    %c0_16 = arith.constant 0 : index
    %15 = vector.load %arg2[%c2_14, %c0_15, %c0_16] : memref<9x4x8xbf16, #tpu.memory_space<vmem>>, vector<1x4x8xbf16>
    %16 = vector.shape_cast %15 : vector<1x4x8xbf16> to vector<4x8xbf16>
    %cst_17 = arith.constant dense<0.000000e+00> : vector<288x8xf32>
    %17 = tpu.matmul %14, %16, %cst_17 {dimension_numbers = #tpu.dot_dimension_numbers<[1], [0], [0], [1], [0, 0, 1, 1], [], []>} : vector<288x4xbf16>, vector<4x8xbf16>, vector<288x8xf32> -> vector<288x8xf32>
    %18 = arith.addf %12, %17 : vector<288x8xf32>
    %c0_18 = arith.constant 0 : index
    %c18 = arith.constant 18 : index
    %c0_19 = arith.constant 0 : index
    %19 = vector.load %arg1[%c0_18, %c18, %c0_19] : memref<1x326x4xbf16, #tpu.memory_space<vmem>>, vector<1x288x4xbf16>
    %20 = vector.shape_cast %19 : vector<1x288x4xbf16> to vector<288x4xbf16>
    %c3 = arith.constant 3 : index
    %c0_20 = arith.constant 0 : index
    %c0_21 = arith.constant 0 : index
    %21 = vector.load %arg2[%c3, %c0_20, %c0_21] : memref<9x4x8xbf16, #tpu.memory_space<vmem>>, vector<1x4x8xbf16>
    %22 = vector.shape_cast %21 : vector<1x4x8xbf16> to vector<4x8xbf16>
    %cst_22 = arith.constant dense<0.000000e+00> : vector<288x8xf32>
    %23 = tpu.matmul %20, %22, %cst_22 {dimension_numbers = #tpu.dot_dimension_numbers<[1], [0], [0], [1], [0, 0, 1, 1], [], []>} : vector<288x4xbf16>, vector<4x8xbf16>, vector<288x8xf32> -> vector<288x8xf32>
    %24 = arith.addf %18, %23 : vector<288x8xf32>
    %c0_23 = arith.constant 0 : index
    %c19 = arith.constant 19 : index
    %c0_24 = arith.constant 0 : index
    %25 = vector.load %arg1[%c0_23, %c19, %c0_24] : memref<1x326x4xbf16, #tpu.memory_space<vmem>>, vector<1x288x4xbf16>
    %26 = vector.shape_cast %25 : vector<1x288x4xbf16> to vector<288x4xbf16>
    %c4 = arith.constant 4 : index
    %c0_25 = arith.constant 0 : index
    %c0_26 = arith.constant 0 : index
    %27 = vector.load %arg2[%c4, %c0_25, %c0_26] : memref<9x4x8xbf16, #tpu.memory_space<vmem>>, vector<1x4x8xbf16>
    %28 = vector.shape_cast %27 : vector<1x4x8xbf16> to vector<4x8xbf16>
    %cst_27 = arith.constant dense<0.000000e+00> : vector<288x8xf32>
    %29 = tpu.matmul %26, %28, %cst_27 {dimension_numbers = #tpu.dot_dimension_numbers<[1], [0], [0], [1], [0, 0, 1, 1], [], []>} : vector<288x4xbf16>, vector<4x8xbf16>, vector<288x8xf32> -> vector<288x8xf32>
    %30 = arith.addf %24, %29 : vector<288x8xf32>
    %c0_28 = arith.constant 0 : index
    %c20 = arith.constant 20 : index
    %c0_29 = arith.constant 0 : index
    %31 = vector.load %arg1[%c0_28, %c20, %c0_29] : memref<1x326x4xbf16, #tpu.memory_space<vmem>>, vector<1x288x4xbf16>
    %32 = vector.shape_cast %31 : vector<1x288x4xbf16> to vector<288x4xbf16>
    %c5 = arith.constant 5 : index
    %c0_30 = arith.constant 0 : index
    %c0_31 = arith.constant 0 : index
    %33 = vector.load %arg2[%c5, %c0_30, %c0_31] : memref<9x4x8xbf16, #tpu.memory_space<vmem>>, vector<1x4x8xbf16>
    %34 = vector.shape_cast %33 : vector<1x4x8xbf16> to vector<4x8xbf16>
    %cst_32 = arith.constant dense<0.000000e+00> : vector<288x8xf32>
    %35 = tpu.matmul %32, %34, %cst_32 {dimension_numbers = #tpu.dot_dimension_numbers<[1], [0], [0], [1], [0, 0, 1, 1], [], []>} : vector<288x4xbf16>, vector<4x8xbf16>, vector<288x8xf32> -> vector<288x8xf32>
    %36 = arith.addf %30, %35 : vector<288x8xf32>
    %c0_33 = arith.constant 0 : index
    %c36 = arith.constant 36 : index
    %c0_34 = arith.constant 0 : index
    %37 = vector.load %arg1[%c0_33, %c36, %c0_34] : memref<1x326x4xbf16, #tpu.memory_space<vmem>>, vector<1x288x4xbf16>
    %38 = vector.shape_cast %37 : vector<1x288x4xbf16> to vector<288x4xbf16>
    %c6 = arith.constant 6 : index
    %c0_35 = arith.constant 0 : index
    %c0_36 = arith.constant 0 : index
    %39 = vector.load %arg2[%c6, %c0_35, %c0_36] : memref<9x4x8xbf16, #tpu.memory_space<vmem>>, vector<1x4x8xbf16>
    %40 = vector.shape_cast %39 : vector<1x4x8xbf16> to vector<4x8xbf16>
    %cst_37 = arith.constant dense<0.000000e+00> : vector<288x8xf32>
    %41 = tpu.matmul %38, %40, %cst_37 {dimension_numbers = #tpu.dot_dimension_numbers<[1], [0], [0], [1], [0, 0, 1, 1], [], []>} : vector<288x4xbf16>, vector<4x8xbf16>, vector<288x8xf32> -> vector<288x8xf32>
    %42 = arith.addf %36, %41 : vector<288x8xf32>
    %c0_38 = arith.constant 0 : index
    %c37 = arith.constant 37 : index
    %c0_39 = arith.constant 0 : index
    %43 = vector.load %arg1[%c0_38, %c37, %c0_39] : memref<1x326x4xbf16, #tpu.memory_space<vmem>>, vector<1x288x4xbf16>
    %44 = vector.shape_cast %43 : vector<1x288x4xbf16> to vector<288x4xbf16>
    %c7 = arith.constant 7 : index
    %c0_40 = arith.constant 0 : index
    %c0_41 = arith.constant 0 : index
    %45 = vector.load %arg2[%c7, %c0_40, %c0_41] : memref<9x4x8xbf16, #tpu.memory_space<vmem>>, vector<1x4x8xbf16>
    %46 = vector.shape_cast %45 : vector<1x4x8xbf16> to vector<4x8xbf16>
    %cst_42 = arith.constant dense<0.000000e+00> : vector<288x8xf32>
    %47 = tpu.matmul %44, %46, %cst_42 {dimension_numbers = #tpu.dot_dimension_numbers<[1], [0], [0], [1], [0, 0, 1, 1], [], []>} : vector<288x4xbf16>, vector<4x8xbf16>, vector<288x8xf32> -> vector<288x8xf32>
    %48 = arith.addf %42, %47 : vector<288x8xf32>
    %c0_43 = arith.constant 0 : index
    %c38 = arith.constant 38 : index
    %c0_44 = arith.constant 0 : index
    %49 = vector.load %arg1[%c0_43, %c38, %c0_44] : memref<1x326x4xbf16, #tpu.memory_space<vmem>>, vector<1x288x4xbf16>
    %50 = vector.shape_cast %49 : vector<1x288x4xbf16> to vector<288x4xbf16>
    %c8 = arith.constant 8 : index
    %c0_45 = arith.constant 0 : index
    %c0_46 = arith.constant 0 : index
    %51 = vector.load %arg2[%c8, %c0_45, %c0_46] : memref<9x4x8xbf16, #tpu.memory_space<vmem>>, vector<1x4x8xbf16>
    %52 = vector.shape_cast %51 : vector<1x4x8xbf16> to vector<4x8xbf16>
    %cst_47 = arith.constant dense<0.000000e+00> : vector<288x8xf32>
    %53 = tpu.matmul %50, %52, %cst_47 {dimension_numbers = #tpu.dot_dimension_numbers<[1], [0], [0], [1], [0, 0, 1, 1], [], []>} : vector<288x4xbf16>, vector<4x8xbf16>, vector<288x8xf32> -> vector<288x8xf32>
    %54 = arith.addf %48, %53 : vector<288x8xf32>
    %c0_48 = arith.constant 0 : index
    %c0_49 = arith.constant 0 : index
    %c0_50 = arith.constant 0 : index
    %55 = vector.load %arg3[%c0_48, %c0_49, %c0_50] : memref<1x288x8xf32, #tpu.memory_space<vmem>>, vector<1x288x8xf32>
    %56 = vector.shape_cast %55 : vector<1x288x8xf32> to vector<288x8xf32>
    %57 = vector.shape_cast %54 : vector<288x8xf32> to vector<1x288x8xf32>
    tpu.vector_store %arg3[%c0_48, %c0_49, %c0_50], %57 {strides = array<i32>} : memref<1x288x8xf32, #tpu.memory_space<vmem>>, vector<1x288x8xf32>,
    %58 = tpu.iota {dimensions = array<i32: 0>} : vector<288x8xi32>
    %c18_i32 = arith.constant 18 : i32
    %c0_i32 = arith.constant 0 : i32
    %59 = arith.cmpi eq, %c18_i32, %c0_i32 : i32
    %c1_i32 = arith.constant 1 : i32
    %60 = arith.select %59, %c1_i32, %c18_i32 : i32
    %61 = vector.broadcast %60 : i32 to vector<288x8xi32>
    %62 = arith.remsi %58, %61 : vector<288x8xi32>
    %c0_i32_51 = arith.constant 0 : i32
    %63 = vector.broadcast %c0_i32_51 : i32 to vector<288x8xi32>
    %64 = arith.cmpi ne, %62, %63 : vector<288x8xi32>
    %c0_i32_52 = arith.constant 0 : i32
    %65 = vector.broadcast %c0_i32_52 : i32 to vector<288x8xi32>
    %66 = arith.cmpi slt, %62, %65 : vector<288x8xi32>
    %c0_i32_53 = arith.constant 0 : i32
    %67 = arith.cmpi slt, %60, %c0_i32_53 : i32
    %68 = vector.broadcast %67 : i1 to vector<288x8xi1>
    %69 = vector.broadcast %68 : vector<288x8xi1> to vector<288x8xi1>
    %70 = arith.xori %66, %69 : vector<288x8xi1>
    %71 = arith.andi %70, %64 : vector<288x8xi1>
    %72 = vector.broadcast %60 : i32 to vector<288x8xi32>
    %73 = arith.addi %62, %72 : vector<288x8xi32>
    %74 = arith.select %71, %73, %62 : vector<288x8xi1>, vector<288x8xi32>
    %c16_i32 = arith.constant 16 : i32
    %75 = vector.broadcast %c16_i32 : i32 to vector<288x8xi32>
    %76 = arith.cmpi slt, %74, %75 : vector<288x8xi32>
    %cst_54 = arith.constant 0.000000e+00 : f32
    %77 = vector.broadcast %cst_54 : f32 to vector<288x8xf32>
    %78 = arith.select %76, %54, %77 : vector<288x8xi1>, vector<288x8xf32>
    %cst_55 = arith.constant dense<0.000000e+00> : vector<8xf32>
    %79 = vector.multi_reduction <add>, %78, %cst_55 [0] : vector<288x8xf32> to vector<8xf32>
    %80 = vector.shape_cast %79 : vector<8xf32> to vector<1x8xf32>
    %c0_56 = arith.constant 0 : index
    %c0_57 = arith.constant 0 : index
    %c0_58 = arith.constant 0 : index
    %81 = vector.load %arg4[%c0_56, %c0_57, %c0_58] : memref<1x1x8xf32, #tpu.memory_space<vmem>>, vector<1x1x8xf32>
    %82 = vector.shape_cast %81 : vector<1x1x8xf32> to vector<1x8xf32>
    %83 = vector.shape_cast %80 : vector<1x8xf32> to vector<1x1x8xf32>
    tpu.vector_store %arg4[%c0_56, %c0_57, %c0_58], %83 {strides = array<i32>} : memref<1x1x8xf32, #tpu.memory_space<vmem>>, vector<1x1x8xf32>,
    %84 = arith.mulf %78, %78 : vector<288x8xf32>
    %cst_59 = arith.constant dense<0.000000e+00> : vector<8xf32>
    %85 = vector.multi_reduction <add>, %84, %cst_59 [0] : vector<288x8xf32> to vector<8xf32>
    %86 = vector.shape_cast %85 : vector<8xf32> to vector<1x8xf32>
    %c0_60 = arith.constant 0 : index
    %c0_61 = arith.constant 0 : index
    %c0_62 = arith.constant 0 : index
    %87 = vector.load %arg5[%c0_60, %c0_61, %c0_62] : memref<1x1x8xf32, #tpu.memory_space<vmem>>, vector<1x1x8xf32>
    %88 = vector.shape_cast %87 : vector<1x1x8xf32> to vector<1x8xf32>
    %89 = vector.shape_cast %86 : vector<1x8xf32> to vector<1x1x8xf32>
    tpu.vector_store %arg5[%c0_60, %c0_61, %c0_62], %89 {strides = array<i32>} : memref<1x1x8xf32, #tpu.memory_space<vmem>>, vector<1x1x8xf32>,
    return
  }
  func.func @transform_0(%arg0: i32) -> (i32, i32, i32) {
    %c0_i32 = arith.constant 0 : i32
    %c0_i32_0 = arith.constant 0 : i32
    %c0_i32_1 = arith.constant 0 : i32
    return %arg0, %c0_i32, %c0_i32_0 : i32, i32, i32
  }
  func.func @transform_1(%arg0: i32) -> (i32, i32, i32) {
    %c0_i32 = arith.constant 0 : i32
    %c0_i32_0 = arith.constant 0 : i32
    %c0_i32_1 = arith.constant 0 : i32
    %c0_i32_2 = arith.constant 0 : i32
    return %c0_i32, %c0_i32_0, %c0_i32_1 : i32, i32, i32
  }
  func.func @transform_2(%arg0: i32) -> (i32, i32, i32) {
    %c0_i32 = arith.constant 0 : i32
    %c0_i32_0 = arith.constant 0 : i32
    %c0_i32_1 = arith.constant 0 : i32
    return %arg0, %c0_i32, %c0_i32_0 : i32, i32, i32
  }
  func.func @transform_3(%arg0: i32) -> (i32, i32, i32) {
    %c0_i32 = arith.constant 0 : i32
    %c0_i32_0 = arith.constant 0 : i32
    %c0_i32_1 = arith.constant 0 : i32
    return %arg0, %c0_i32, %c0_i32_0 : i32, i32, i32
  }
  func.func @transform_4(%arg0: i32) -> (i32, i32, i32) {
    %c0_i32 = arith.constant 0 : i32
    %c0_i32_0 = arith.constant 0 : i32
    %c0_i32_1 = arith.constant 0 : i32
    return %arg0, %c0_i32, %c0_i32_0 : i32, i32, i32
  }
}

module attributes {stable_mosaic.version = 11 : i64} {
  func.func @_bn_relu_kernel(%arg0: i32, %arg1: memref<576x8xf32, #tpu.memory_space<vmem>>, %arg2: memref<2x8xf32, #tpu.memory_space<vmem>>, %arg3: memref<576x8xf32, #tpu.memory_space<vmem>>) attributes {dimension_semantics = [#tpu.dimension_semantics<parallel>], iteration_bounds = array<i64: 1>, scalar_prefetch = 0 : i64, scratch_operands = 0 : i64, tpu.core_type = #tpu.core_type<tc>, window_params = [{transform_indices = @transform_0, window_bounds = array<i64: 576, 8>}, {pipeline_mode = #tpu.pipeline_mode<synchronous>, transform_indices = @transform_1, window_bounds = array<i64: 2, 8>}, {transform_indices = @transform_2, window_bounds = array<i64: 576, 8>}]} {
    %c0 = arith.constant 0 : index
    %c0_0 = arith.constant 0 : index
    %0 = vector.load %arg2[%c0, %c0_0] : memref<2x8xf32, #tpu.memory_space<vmem>>, vector<1x8xf32>
    %c1 = arith.constant 1 : index
    %c0_1 = arith.constant 0 : index
    %1 = vector.load %arg2[%c1, %c0_1] : memref<2x8xf32, #tpu.memory_space<vmem>>, vector<1x8xf32>
    %c0_2 = arith.constant 0 : index
    %c0_3 = arith.constant 0 : index
    %2 = vector.load %arg1[%c0_2, %c0_3] : memref<576x8xf32, #tpu.memory_space<vmem>>, vector<576x8xf32>
    %3 = vector.broadcast %0 : vector<1x8xf32> to vector<576x8xf32>
    %4 = arith.mulf %2, %3 : vector<576x8xf32>
    %5 = vector.broadcast %1 : vector<1x8xf32> to vector<576x8xf32>
    %6 = arith.addf %4, %5 : vector<576x8xf32>
    %cst = arith.constant 0.000000e+00 : f32
    %7 = vector.broadcast %cst : f32 to vector<576x8xf32>
    %8 = arith.maximumf %6, %7 : vector<576x8xf32>
    %c0_4 = arith.constant 0 : index
    %c0_5 = arith.constant 0 : index
    %9 = vector.load %arg3[%c0_4, %c0_5] : memref<576x8xf32, #tpu.memory_space<vmem>>, vector<576x8xf32>
    tpu.vector_store %arg3[%c0_4, %c0_5], %8 {strides = array<i32>} : memref<576x8xf32, #tpu.memory_space<vmem>>, vector<576x8xf32>,
    return
  }
  func.func @transform_0(%arg0: i32) -> (i32, i32) {
    %c0_i32 = arith.constant 0 : i32
    %c0_i32_0 = arith.constant 0 : i32
    return %arg0, %c0_i32 : i32, i32
  }
  func.func @transform_1(%arg0: i32) -> (i32, i32) {
    %c0_i32 = arith.constant 0 : i32
    %c0_i32_0 = arith.constant 0 : i32
    %c0_i32_1 = arith.constant 0 : i32
    return %c0_i32, %c0_i32_0 : i32, i32
  }
  func.func @transform_2(%arg0: i32) -> (i32, i32) {
    %c0_i32 = arith.constant 0 : i32
    %c0_i32_0 = arith.constant 0 : i32
    return %arg0, %c0_i32 : i32, i32
  }
}

</mosaic_0001>

<bundles_post_ra>
// kernel: decoder_block_forward.10
= control target key start
LH: loop header
LB: loop body
LE: loop exit
PB: predicated region body
PF: predicated region fallthrough
CT: control target
= control target key end

     0   :  { %vm181_vm0 = vcmask 27648   ;;  %s453_s0 = inlined_call_operand.vmem [shape: f32[160,4], index: 0, kind: input, shape index: {}]   ;;  %s454_s1 = inlined_call_operand.vmem [shape: f32[2,4], index: 1, kind: input, shape index: {}]   ;;  %s455_s2 = inlined_call_operand.vmem [shape: bf16[160,4], index: 2, kind: output, shape index: {}]  }
   0x1   :  { %v266_v0 = vld [vmem:[%s454_s1] ss:$0 sm:$0xff]  ;;  %v271_v1 = vld [vmem:[%s454_s1 + $0x1] ss:$0 sm:$0xff]  ;;  %v14_v4 = vld [vmem:[%s453_s0 + $0x8] sm:$0xff] }
   0x2   :  { %v13_v2 = vld [vmem:[%s453_s0] sm:$0xff]  ;;  %v15_v5 = vld [vmem:[%s453_s0 + $0x10] sm:$0xff]  ;;  %v16_v6 = vld [vmem:[%s453_s0 + $0x18] sm:$0xff]  ;;  %v38_v7 = vmul.f32 %v266_v0, %v14_v4 }
   0x3   :  { %v37_v3 = vmul.f32 %v266_v0, %v13_v2  ;;  %v39_v8 = vmul.f32 %v266_v0, %v15_v5  ;;  %v40_v9 = vmul.f32 %v266_v0, %v16_v6  ;;  %v17_v10 = vld [vmem:[%s453_s0 + $0x20] sm:$0xff]  ;;  %v18_v11 = vld [vmem:[%s453_s0 + $0x28] sm:$0xff]  ;;  %v19_v12 = vld [vmem:[%s453_s0 + $0x30] sm:$0xff] }
   0x4   :  { %v41_v14 = vmul.f32 %v266_v0, %v17_v10  ;;  %v42_v15 = vmul.f32 %v266_v0, %v18_v11  ;;  %v43_v16 = vmul.f32 %v266_v0, %v19_v12  ;;  %v20_v17 = vld [vmem:[%s453_s0 + $0x38] sm:$0xff]  ;;  %v62_v18 = vadd.f32 %v271_v1, %v38_v7  ;;  %v21_v30 = vld [vmem:[%s453_s0 + $0x40] sm:$0xff]  ;;  %v22_v35 = vld [vmem:[%s453_s0 + $0x48] sm:$0xff] }
   0x5   :  { %v61_v13 = vadd.f32 %v271_v1, %v37_v3  ;;  %v63_v19 = vadd.f32 %v271_v1, %v39_v8  ;;  %v64_v20 = vadd.f32 %v271_v1, %v40_v9  ;;  %v44_v21 = vmul.f32 %v266_v0, %v20_v17  ;;  %v23_v36 = vld [vmem:[%s453_s0 + $0x50] sm:$0xff]  ;;  %v24_v37 = vld [vmem:[%s453_s0 + $0x58] sm:$0xff]  ;;  %v25_v42 = vld [vmem:[%s453_s0 + $0x60] sm:$0xff] }
   0x6   :  { %v65_v23 = vadd.f32 %v271_v1, %v41_v14  ;;  %v66_v24 = vadd.f32 %v271_v1, %v42_v15  ;;  %v67_v25 = vadd.f32 %v271_v1, %v43_v16  ;;  %v82_v26 = vmax.f32 %v62_v18, 0.0  ;;  %v26_v43 = vld [vmem:[%s453_s0 + $0x68] sm:$0xff]  ;;  %v27_v44 = vld [vmem:[%s453_s0 + $0x70] sm:$0xff]  ;;  %v28_v49 = vld [vmem:[%s453_s0 + $0x78] sm:$0xff] }
   0x7   :  { %v81_v22 = vmax.f32 %v61_v13, 0.0  ;;  %v83_v27 = vmax.f32 %v63_v19, 0.0  ;;  %v84_v28 = vmax.f32 %v64_v20, 0.0  ;;  %v68_v29 = vadd.f32 %v271_v1, %v44_v21  ;;  %v29_v8 = vld [vmem:[%s453_s0 + $0x80] sm:$0xff]  ;;  %v30_v13 = vld [vmem:[%s453_s0 + $0x88] sm:$0xff]  ;;  %v31_v14 = vld [vmem:[%s453_s0 + $0x90] sm:$0xff] }
   0x8   :  { %v85_v32 = vmax.f32 %v65_v23, 0.0  ;;  %v86_v33 = vmax.f32 %v66_v24, 0.0  ;;  %v87_v34 = vmax.f32 %v67_v25, 0.0  ;;  %v229_v38 = vpack.c.bf16 %v82_v26, %v82_v26  ;;  %v32_v15 = vld [vmem:[%s453_s0 + $0x98] sm:$0xff] }
   0x9   :  { %v228_v31 = vpack.c.bf16 %v81_v22, %v81_v22  ;;  %v230_v39 = vpack.c.bf16 %v83_v27, %v83_v27  ;;  %v231_v40 = vpack.c.bf16 %v84_v28, %v84_v28  ;;  %v88_v41 = vmax.f32 %v68_v29, 0.0 }
   0xa   :  { %v232_v45 = vpack.c.bf16 %v85_v32, %v85_v32  ;;  %v233_v46 = vpack.c.bf16 %v86_v33, %v86_v33  ;;  %v234_v47 = vpack.c.bf16 %v87_v34, %v87_v34  ;;  %v45_v48 = vmul.f32 %v266_v0, %v21_v30  ;;  %183 = vst.msk [vmem:[%s455_s2 + $0x4] sm:$0xf] %vm181_vm0, %v229_v38 }
   0xb   :  { %182 = vst.msk [vmem:[%s455_s2] sm:$0xf] %vm181_vm0, %v228_v31  ;;  %184 = vst.msk [vmem:[%s455_s2 + $0x8] sm:$0xf] %vm181_vm0, %v230_v39  ;;  %v235_v50 = vpack.c.bf16 %v88_v41, %v88_v41  ;;  %v46_v51 = vmul.f32 %v266_v0, %v22_v35  ;;  %v47_v52 = vmul.f32 %v266_v0, %v23_v36 }
   0xc   :  { %185 = vst.msk [vmem:[%s455_s2 + $0xc] sm:$0xf] %vm181_vm0, %v231_v40  ;;  %v48_v53 = vmul.f32 %v266_v0, %v24_v37  ;;  %186 = vst.msk [vmem:[%s455_s2 + $0x10] sm:$0xf] %vm181_vm0, %v232_v45  ;;  %v69_v54 = vadd.f32 %v271_v1, %v45_v48  ;;  %v49_v55 = vmul.f32 %v266_v0, %v25_v42 }
   0xd   :  { %187 = vst.msk [vmem:[%s455_s2 + $0x14] sm:$0xf] %vm181_vm0, %v233_v46  ;;  %188 = vst.msk [vmem:[%s455_s2 + $0x18] sm:$0xf] %vm181_vm0, %v234_v47  ;;  %v50_v56 = vmul.f32 %v266_v0, %v26_v43  ;;  %v51_v57 = vmul.f32 %v266_v0, %v27_v44  ;;  %v70_v58 = vadd.f32 %v271_v1, %v46_v51 }
   0xe   :  { %189 = vst.msk [vmem:[%s455_s2 + $0x1c] sm:$0xf] %vm181_vm0, %v235_v50  ;;  %v71_v59 = vadd.f32 %v271_v1, %v47_v52  ;;  %v72_v60 = vadd.f32 %v271_v1, %v48_v53  ;;  %v52_v61 = vmul.f32 %v266_v0, %v28_v49  ;;  %v89_v62 = vmax.f32 %v69_v54, 0.0 }
   0xf   :  { %v73_v63 = vadd.f32 %v271_v1, %v49_v55  ;;  %v74_v2 = vadd.f32 %v271_v1, %v50_v56  ;;  %v75_v3 = vadd.f32 %v271_v1, %v51_v57  ;;  %v90_v4 = vmax.f32 %v70_v58, 0.0 }
  0x10   :  { %v91_v5 = vmax.f32 %v71_v59, 0.0  ;;  %v92_v6 = vmax.f32 %v72_v60, 0.0  ;;  %v76_v7 = vadd.f32 %v271_v1, %v52_v61  ;;  %v236_v9 = vpack.c.bf16 %v89_v62, %v89_v62 }
  0x11   :  { %v93_v10 = vmax.f32 %v73_v63, 0.0  ;;  %v94_v11 = vmax.f32 %v74_v2, 0.0  ;;  %v95_v12 = vmax.f32 %v75_v3, 0.0  ;;  %v237_v16 = vpack.c.bf16 %v90_v4, %v90_v4 }
  0x12   :  { %v238_v17 = vpack.c.bf16 %v91_v5, %v91_v5  ;;  %v239_v18 = vpack.c.bf16 %v92_v6, %v92_v6  ;;  %v96_v19 = vmax.f32 %v76_v7, 0.0  ;;  %190 = vst.msk [vmem:[%s455_s2 + $0x20] sm:$0xf] %vm181_vm0, %v236_v9  ;;  %v53_v23 = vmul.f32 %v266_v0, %v29_v8 }
  0x13   :  { %v240_v20 = vpack.c.bf16 %v93_v10, %v93_v10  ;;  %v241_v21 = vpack.c.bf16 %v94_v11, %v94_v11  ;;  %v242_v22 = vpack.c.bf16 %v95_v12, %v95_v12  ;;  %191 = vst.msk [vmem:[%s455_s2 + $0x24] sm:$0xf] %vm181_vm0, %v237_v16  ;;  %v54_v25 = vmul.f32 %v266_v0, %v30_v13 }
  0x14   :  { %192 = vst.msk [vmem:[%s455_s2 + $0x28] sm:$0xf] %vm181_vm0, %v238_v17  ;;  %193 = vst.msk [vmem:[%s455_s2 + $0x2c] sm:$0xf] %vm181_vm0, %v239_v18  ;;  %v243_v24 = vpack.c.bf16 %v96_v19, %v96_v19  ;;  %v55_v26 = vmul.f32 %v266_v0, %v31_v14  ;;  %v56_v27 = vmul.f32 %v266_v0, %v32_v15 }
  0x15   :  { %194 = vst.msk [vmem:[%s455_s2 + $0x30] sm:$0xf] %vm181_vm0, %v240_v20  ;;  %195 = vst.msk [vmem:[%s455_s2 + $0x34] sm:$0xf] %vm181_vm0, %v241_v21  ;;  %v77_v28 = vadd.f32 %v271_v1, %v53_v23  ;;  %v78_v0 = vadd.f32 %v271_v1, %v54_v25 }
  0x16   :  { %196 = vst.msk [vmem:[%s455_s2 + $0x38] sm:$0xf] %vm181_vm0, %v242_v22  ;;  %197 = vst.msk [vmem:[%s455_s2 + $0x3c] sm:$0xf] %vm181_vm0, %v243_v24  ;;  %v79_v29 = vadd.f32 %v271_v1, %v55_v26  ;;  %v80_v30 = vadd.f32 %v271_v1, %v56_v27 }
  0x17   :  { %v97_v31 = vmax.f32 %v77_v28, 0.0  ;;  %v98_v32 = vmax.f32 %v78_v0, 0.0 }
  0x18   :  { %v99_v33 = vmax.f32 %v79_v29, 0.0  ;;  %v100_v34 = vmax.f32 %v80_v30, 0.0 }
  0x19   :  { %v244_v35 = vpack.c.bf16 %v97_v31, %v97_v31  ;;  %v245_v36 = vpack.c.bf16 %v98_v32, %v98_v32 }
  0x1a   :  { %v246_v37 = vpack.c.bf16 %v99_v33, %v99_v33  ;;  %v247_v38 = vpack.c.bf16 %v100_v34, %v100_v34 }
  0x1b   :  { %198 = vst.msk [vmem:[%s455_s2 + $0x40] sm:$0xf] %vm181_vm0, %v244_v35  ;;  %199 = vst.msk [vmem:[%s455_s2 + $0x44] sm:$0xf] %vm181_vm0, %v245_v36 }
  0x1c   :  { %200 = vst.msk [vmem:[%s455_s2 + $0x48] sm:$0xf] %vm181_vm0, %v246_v37  ;;  %201 = vst.msk [vmem:[%s455_s2 + $0x4c] sm:$0xf] %vm181_vm0, %v247_v38 }

// kernel: decoder_block_forward.12
= control target key start
LH: loop header
LB: loop body
LE: loop exit
PB: predicated region body
PF: predicated region fallthrough
CT: control target
= control target key end

     0   :  { %s970_s15 = smov 0   ;;  %s1265_s0 = inlined_call_operand.vmem [shape: bf16[2,73,4], index: 0, kind: input, shape index: {}]   ;;  %s1266_s1 = inlined_call_operand.vmem [shape: bf16[2,4,4], index: 1, kind: input, shape index: {}]   ;;  %s1267_s2 = inlined_call_operand.vmem [shape: f32[2,72,4], index: 2, kind: output, shape index: {0}]   ;;  %s1268_s3 = inlined_call_operand.vmem [shape: f32[2,1,4], index: 3, kind: output, shape index: {1}]   ;;  %s1269_s4 = inlined_call_operand.vmem [shape: f32[2,1,4], index: 4, kind: output, shape index: {2}]  }
   0x1 LB: > { %s817_s16 = sadd.s32 4294967295, %s941_s15   ;;  %p821_p0 = scmp.ge.s32.totalorder %s941_s15, 1  ;;  %s941_s15 = sphi %s970_s15, %s15_s15  }
   0x2   : > { %p167_p1 = scmp.lt.s32.totalorder %s941_s15, 3 }
   0x4   : > { %p168_p2 = pnand %p821_p0, %p167_p1 }
   0x5   : > { %p199_p3 = scmp.lt.s32.totalorder (!%p168_p2), %s817_s16, 1 }
   0x6   : > { %171 = sbr.rel (%p168_p2) target bundleno = 269 (0x10d), region = 28 }
   0xb   : > { %v225_v0 = vld [vmem:[%s1266_s1] sm:$0x3]  ;;  %vm310_vm0 = vcmask 1041408   ;;  %v943_v1 = vmov 0.0   ;;  %vm944_vm1 = vmmov 0   ;;  %s1291_s16 = smov (!%p199_p3, %s817_s16), 1  ;;  %v482_v37 = vlaneseq }
   0xc   : > { %877 = vmatprep.subr.bf16.mxu1 %v943_v1  ;;  %v399_v2 = vsel %vm310_vm0, %v225_v0, 0  ;;  %879 = vmatprep.mubr.msk.bf16.mxu1 %vm944_vm1, %v943_v1  ;;  %v824_v3 = vld [vmem:[%s1266_s1 + $0x2] sm:$0x3]  ;;  %s899_s21 = smul.u32 40, %s1291_s16  ;;  %vm294_vm2 = vcmask 31744   ;;  %s211_s5 = scalar_lea.vmem %s1268_s3, %s1291_s16 }
   0xd   : > { %878 = vmatpush3.bf16.msra.mxu1 %v399_v2  ;;  %855 = vmatprep.subr.bf16.mxu0 %v943_v1  ;;  %v312_v4 = vsel %vm310_vm0, %v824_v3, 0  ;;  %vm254_vm3 = vsmask.f32 7424  ;;  %v483_v38 = vshrl.u32 %v482_v37, 7  ;;  %s900_s25 = smul.u32 72, %s1291_s16  ;;  %s214_s8 = scalar_lea.vmem %s1269_s4, %s1291_s16 }
   0xe   : > { %856 = vmatpush3.bf16.msra.mxu0 %v312_v4  ;;  %857 = vmatprep.mubr.msk.bf16.mxu0 %vm944_vm1, %v943_v1  ;;  %s203_s24 = scalar_lea.vmem %s1265_s0, %s899_s21 }
   0xf   : > { %v929_v5 = vld [vmem:[%s203_s24] sm:$0xff]   ;;  %v930_v6 = vld [vmem:[%s203_s24 + $0x8] sm:$0xff]   ;;  %v931_v10 = vld [vmem:[%s203_s24 + $0x10] sm:$0xff]   ;;  %v484_v39 = vadd.s32 8, %v483_v38  ;;  %v485_v40 = vadd.s32 16, %v483_v38  ;;  %v486_v43 = vadd.s32 24, %v483_v38  ;;  %s1070_s28 = scalar_lea.vmem %s1267_s2, %s900_s25 }
  0x10   : > { %880 = vmatmul.mubr.msk.bf16.vlgmr.msra.gmra.mxu1 %vm294_vm2, %v929_v5  ;;  %v256_v7 = vshrl.u32 %v929_v5, 16  ;;  %v258_v8 = vshll.u32 %v929_v5, 16  ;;  %v263_v9 = vshll.u32 %v930_v6, 16  ;;  %v267_v14 = vshrl.u32 %v930_v6, 16  ;;  %v932_v19 = vld [vmem:[%s203_s24 + $0x18] sm:$0xff]  }
  0x11   : > { %883 = vmatprep.mubr.msk.bf16.mxu1 %vm944_vm1, %v943_v1  ;;  %v271_v15 = vshll.u32 %v931_v10, 16  ;;  %v275_v21 = vshrl.u32 %v931_v10, 16  ;;  %v279_v22 = vshll.u32 %v932_v19, 16  ;;  %v224_v23 = vld [vmem:[%s203_s24 + $0x20] sm:$0xf]  ;;  %v283_v29 = vshrl.u32 %v932_v19, 16 }
  0x12   : > { %v260_v11 = vrot.slane %v258_v8, 1  ;;  %v265_v12 = vrot.slane %v263_v9, 1  ;;  %v226_v24 = vld [vmem:[%s203_s24 + $0x24] sm:$0x1]  ;;  %v835_v34 = vcombine.low %v224_v23, %v224_v23  ;;  %v487_v46 = vadd.s32 32, %v483_v38 }
  0x13   : > { %v273_v18 = vrot.slane %v271_v15, 1  ;;  %v281_v26 = vrot.slane %v279_v22, 1  ;;  %v829_v27 = vcombine.low %v224_v23, %v226_v24  ;;  %v488_v49 = vadd.s32 40, %v483_v38 }
  0x14   : > { %v261_v13 = vor.u32 %v260_v11, %v256_v7  ;;  %v269_v17 = vor.u32 %v267_v14, %v265_v12  ;;  %v1026_v41 = vmul.u32.u64.low 3817748708, %v484_v39  ;;  %v1027_v42 = vmul.u32.u64.high 3817748708, %v484_v39, %v1026_v41 }
  0x15   : > { %v277_v25 = vor.u32 %v275_v21, %v273_v18  ;;  %v287_v30 = vshll.u32 %v829_v27, 16  ;;  %v285_v31 = vor.u32 %v283_v29, %v281_v26  ;;  %v291_v35 = vshrl.u32 %v829_v27, 16 }
  0x16   : > { %v266_v16 = vsel %vm254_vm3, %v261_v13, %v265_v12  ;;  %v274_v20 = vsel %vm254_vm3, %v269_v17, %v273_v18  ;;  %v1029_v44 = vmul.u32.u64.low 3817748708, %v483_v38  ;;  %v1030_v45 = vmul.u32.u64.high 3817748708, %v483_v38, %v1029_v44 }
  0x17   : > { %858 = vmatmul.mubr.msk.bf16.vlgmr.msra.gmra.mxu0 %vm294_vm2, %v266_v16  ;;  %v282_v28 = vsel %vm254_vm3, %v277_v25, %v281_v26  ;;  %v289_v32 = vrot.slane %v287_v30, 1  ;;  %v1032_v47 = vmul.u32.u64.low 3817748708, %v485_v40  ;;  %v1033_v48 = vmul.u32.u64.high 3817748708, %v485_v40, %v1032_v47 }
  0x18   : > { %884 = vmatmul.mubr.msk.bf16.gmra.mxu1 %vm294_vm2, %v930_v6  ;;  %861 = vmatprep.mubr.msk.bf16.mxu0 %vm944_vm1, %v943_v1  ;;  %v1035_v50 = vmul.u32.u64.low 3817748708, %v486_v43  ;;  %v1036_v51 = vmul.u32.u64.high 3817748708, %v486_v43, %v1035_v50  ;;  %v1038_v52 = vmul.u32.u64.low 3817748708, %v487_v46  ;;  %v1039_v53 = vmul.u32.u64.high 3817748708, %v487_v46, %v1038_v52 }
  0x19   : > { %887 = vmatprep.mubr.msk.bf16.mxu1 %vm944_vm1, %v943_v1  ;;  %v290_v33 = vsel %vm254_vm3, %v285_v31, %v289_v32  ;;  %v293_v36 = vor.u32 %v291_v35, %v289_v32  ;;  %v1041_v54 = vadd.s32 48, %v483_v38  ;;  %v509_v55 = vshrl.u32 %v1027_v42, 3 }
  0x1a   : > { %v1044_v56 = vmul.u32.u64.low 3817748708, %v488_v49  ;;  %v1045_v57 = vmul.u32.u64.high 3817748708, %v488_v49, %v1044_v56  ;;  %v1047_v58 = vadd.s32 56, %v483_v38  ;;  %v498_v59 = vshrl.u32 %v1030_v45, 3 }
  0x1b   : > { %v1051_v60 = vmul.u32.u64.low 3817748708, %v1041_v54  ;;  %v1052_v61 = vmul.u32.u64.high 3817748708, %v1041_v54, %v1051_v60  ;;  %v520_v63 = vshrl.u32 %v1033_v48, 3  ;;  %v510_v0 = vmul.u32 9, %v509_v55 }
  0x1c   : > { %v531_v2 = vshrl.u32 %v1036_v51, 3  ;;  %v1057_v3 = vmul.u32.u64.low 3817748708, %v1047_v58  ;;  %v1058_v4 = vmul.u32.u64.high 3817748708, %v1047_v58, %v1057_v3  ;;  %v499_v5 = vmul.u32 9, %v498_v59 }
  0x1d   : > { %v542_v6 = vshrl.u32 %v1039_v53, 3  ;;  %v521_v8 = vmul.u32 9, %v520_v63  ;;  %v1062_v9 = vsub.s32 %v484_v39, %v510_v0  ;;  %v1065_v13 = vadd.s32 64, %v483_v38 }
  0x1e   : > { %v532_v12 = vmul.u32 9, %v531_v2  ;;  %v1072_v15 = vsub.s32 %v483_v38, %v499_v5  ;;  %v564_v17 = vshrl.u32 %v1052_v61, 3  ;;  %v575_v25 = vshrl.u32 %v1058_v4, 3 }
  0x1f   : > { %862 = vmatmul.mubr.msk.bf16.gmra.mxu0 %vm294_vm2, %v274_v20  ;;  %v543_v16 = vmul.u32 9, %v542_v6  ;;  %v1077_v20 = vsub.s32 %v485_v40, %v521_v8  ;;  %vm592_vm4 = vcmp.ne.s32.totalorder %v1062_v9, 0  ;;  %vm601_vm5 = vcmp.lt.s32.totalorder %v1062_v9, 0 }
  0x20   : > { %888 = vmatmul.mubr.msk.bf16.gmra.mxu1 %vm294_vm2, %v931_v10  ;;  %865 = vmatprep.mubr.msk.bf16.mxu0 %vm944_vm1, %v943_v1  ;;  %v553_v10 = vshrl.u32 %v1045_v57, 3  ;;  %v1084_v24 = vsub.s32 %v486_v43, %v532_v12  ;;  %v1088_v26 = vmul.u32.u64.low 3817748708, %v1065_v13  ;;  %v1089_v27 = vmul.u32.u64.high 3817748708, %v1065_v13, %v1088_v26  ;;  %vm1103_vm10 = vmand %vm601_vm5, %vm592_vm4 }
  0x21   : > { %891 = vmatprep.mubr.msk.bf16.mxu1 %vm944_vm1, %v943_v1  ;;  %vm591_vm6 = vcmp.ne.s32.totalorder %v1072_v15, 0  ;;  %vm600_vm7 = vcmp.lt.s32.totalorder %v1072_v15, 0  ;;  %v1093_v29 = vsub.s32 %v487_v46, %v543_v16  ;;  %v565_v30 = vmul.u32 9, %v564_v17 }
  0x22   : > { %v554_v22 = vmul.u32 9, %v553_v10  ;;  %v619_v32 = vadd.s32 9, %v1062_v9  ;;  %vm593_vm8 = vcmp.ne.s32.totalorder %v1077_v20, 0  ;;  %vm602_vm9 = vcmp.lt.s32.totalorder %v1077_v20, 0  ;;  %vm1109_vm11 = vmand %vm600_vm7, %vm591_vm6 }
  0x23   : > { %v620_v39 = vadd.s32 9, %v1077_v20  ;;  %vm594_vm12 = vcmp.ne.s32.totalorder %v1084_v24, 0  ;;  %vm603_vm13 = vcmp.lt.s32.totalorder %v1084_v24, 0  ;;  %v576_v41 = vmul.u32 9, %v575_v25  ;;  %vm1120_vm14 = vmand %vm602_vm9, %vm593_vm8 }
  0x24   : > { %v1107_v37 = vsub.s32 %v488_v49, %v554_v22  ;;  %vm595_vm15 = vcmp.ne.s32.totalorder %v1093_v29, 0  ;;  %vm604_vm0 = vcmp.lt.s32.totalorder %v1093_v29, 0  ;;  %v1127_v44 = vsub.s32 %v1041_v54, %v565_v30 }
  0x25   : > { %v628_v45 = vsel %vm1103_vm10, %v619_v32, %v1062_v9  ;;  %v621_v48 = vadd.s32 9, %v1084_v24  ;;  %v622_v51 = vadd.s32 9, %v1093_v29  ;;  %v629_v53 = vsel %vm1120_vm14, %v620_v39, %v1077_v20  ;;  %vm1152_vm5 = vmand %vm604_vm0, %vm595_vm15 }
  0x26   : > { %vm596_vm3 = vcmp.ne.s32.totalorder %v1107_v37, 0  ;;  %vm605_vm4 = vcmp.lt.s32.totalorder %v1107_v37, 0  ;;  %v1157_v56 = vsub.s32 %v1047_v58, %v576_v41  ;;  %v586_v57 = vshrl.u32 %v1089_v27, 3 }
  0x27   : > { %866 = vmatmul.mubr.msk.bf16.gmra.mxu0 %vm294_vm2, %v282_v28  ;;  %vm637_vm6 = vcmp.lt.s32.totalorder %v628_v45, 8  ;;  %v623_v60 = vadd.s32 9, %v1107_v37  ;;  %vm597_vm7 = vcmp.ne.s32.totalorder %v1127_v44, 0  ;;  %vm606_vm8 = vcmp.lt.s32.totalorder %v1127_v44, 0  ;;  %vm1170_vm9 = vmand %vm605_vm4, %vm596_vm3 }
  0x28   : > { %892 = vmatmul.mubr.msk.bf16.gmra.mxu1 %vm294_vm2, %v932_v19  ;;  %869 = vmatprep.mubr.msk.bf16.mxu0 %vm944_vm1, %v943_v1  ;;  %v624_v2 = vadd.s32 9, %v1127_v44  ;;  %vm607_vm14 = vcmp.lt.s32.totalorder %v1157_v56, 0  ;;  %v587_v6 = vmul.u32 9, %v586_v57 }
  0x29   : > { %895 = vmatprep.mubr.msk.bf16.mxu1 %vm944_vm1, %v943_v1  ;;  %v632_v8 = vsel %vm1170_vm9, %v623_v60, %v1107_v37 }
  0x2a   : > { %vm641_vm3 = vcmp.lt.s32.totalorder %v632_v8, 8 }
  0x2f   : > { %870 = vmatmul.mubr.msk.bf16.gmra.mxu0 %vm294_vm2, %v290_v33 }
  0x30   : > { %896 = vmatmul.mubr.msk.bf16.gmra.mxu1 %vm294_vm2, %v835_v34  ;;  %873 = vmatprep.mubr.msk.bf16.mxu0 %vm944_vm1, %v943_v1  ;;  %v618_v34 = vadd.s32 9, %v1072_v15  ;;  %vm1133_vm1 = vmand %vm603_vm13, %vm594_vm12  ;;  %vm598_vm13 = vcmp.ne.s32.totalorder %v1157_v56, 0 }
  0x31   : > { %vm1180_vm12 = vmand %vm606_vm8, %vm597_vm7 }
  0x32   : > { %v627_v52 = vsel %vm1109_vm11, %v618_v34, %v1072_v15  ;;  %vm638_vm11 = vcmp.lt.s32.totalorder %v629_v53, 8  ;;  %v633_v17 = vsel %vm1180_vm12, %v624_v2, %v1127_v44 }
  0x33   : > { %vm636_vm10 = vcmp.lt.s32.totalorder %v627_v52, 8  ;;  %vm1206_vm4 = vcmp.lt.s32.totalorder %v633_v17, 8 }
  0x37   : > { %874 = vmatmul.mubr.msk.bf16.gmra.mxu0 %vm294_vm2, %v293_v36 }
  0xd0   : > { %v435_v62 = vpop.f32.mrf.mxu1 }
  0xd2   : > { %v881_v1 = vpop.f32.mrf.mxu1 }
  0xd3   : > { %v631_v1 = vsel %vm1152_vm5, %v622_v51, %v1093_v29 }
  0xd4   : > { %v438_v7 = vpop.f32.mrf.mxu1  ;;  %vm640_vm0 = vcmp.lt.s32.totalorder %v631_v1, 8 }
  0xd6   : > { %v882_v11 = vpop.f32.mrf.mxu1 }
  0xd7   : > { %v348_v14 = vpop.f32.mrf.mxu0 }
  0xd8   : > { %v1075_v18 = vadd.f32 %v435_v62, %v348_v14  ;;  %v443_v19 = vpop.f32.mrf.mxu1  ;;  %v630_v62 = vsel %vm1133_vm1, %v621_v48, %v1084_v24  ;;  %v625_v14 = vadd.s32 9, %v1157_v56  ;;  %vm1196_vm1 = vmand %vm607_vm14, %vm598_vm13 }
  0xd9   : > { %v859_v21 = vpop.f32.mrf.mxu0  ;;  %vm639_vm15 = vcmp.lt.s32.totalorder %v630_v62, 8 }
  0xda   : > { %473 = vst.msk [vmem:[%s1070_s28] sm:$0xff] %vm294_vm2, %v1075_v18  ;;  %v885_v23 = vpop.f32.mrf.mxu1  ;;  %v645_v9 = vsel %vm636_vm10, %v1075_v18, 0.0  ;;  %v1203_v21 = vsub.s32 %v1065_v13, %v587_v6  ;;  %v634_v30 = vsel %vm1196_vm1, %v625_v14, %v1157_v56  ;;  %vm677_vm10 = vcmask 24576  }
  0xdb   : > { %v351_v28 = vpop.f32.mrf.mxu0  ;;  %v679_v22 = vmul.f32 %v645_v9, %v645_v9  ;;  %v654_v13 = vsel %vm294_vm2, %v645_v9, 0.0  ;;  %vm643_vm8 = vcmp.lt.s32.totalorder %v634_v30, 8 }
  0xdc   : > { %v439_v31 = vadd.f32 %v438_v7, %v351_v28  ;;  %v446_v33 = vpop.f32.mrf.mxu1  ;;  %vm599_vm5 = vcmp.ne.s32.totalorder %v1203_v21, 0 }
  0xdd   : > { %v860_v36 = vpop.f32.mrf.mxu0  ;;  %v688_v38 = vsel %vm294_vm2, %v679_v22, 0.0 }
  0xde   : > { %474 = vst.msk [vmem:[%s1070_s28 + $0x8] sm:$0xff] %vm294_vm2, %v439_v31  ;;  %v886_v40 = vpop.f32.mrf.mxu1  ;;  %v646_v3 = vsel %vm637_vm6, %v439_v31, 0.0  ;;  %vm608_vm6 = vcmp.lt.s32.totalorder %v1203_v21, 0 }
  0xdf   : > { %v356_v42 = vpop.f32.mrf.mxu0  ;;  %v680_v15 = vmul.f32 %v646_v3, %v646_v3  ;;  %v655_v23 = vsel %vm294_vm2, %v646_v3, 0.0  ;;  %vm1230_vm7 = vmand %vm608_vm6, %vm599_vm5 }
  0xe0   : > { %v444_v46 = vadd.f32 %v443_v19, %v356_v42  ;;  %v451_v47 = vpop.f32.mrf.mxu1  ;;  %v656_v35 = vadd.f32 %v655_v23, %v654_v13 }
  0xe1   : > { %v863_v49 = vpop.f32.mrf.mxu0  ;;  %v689_v31 = vsel %vm294_vm2, %v680_v15, 0.0 }
  0xe2   : > { %475 = vst.msk [vmem:[%s1070_s28 + $0x10] sm:$0xff] %vm294_vm2, %v444_v46  ;;  %v889_v54 = vpop.f32.mrf.mxu1  ;;  %v647_v10 = vsel %vm638_vm11, %v444_v46, 0.0  ;;  %v690_v43 = vadd.f32 %v689_v31, %v688_v38 }
  0xe3   : > { %v359_v59 = vpop.f32.mrf.mxu0  ;;  %v681_v24 = vmul.f32 %v647_v10, %v647_v10  ;;  %v657_v32 = vsel %vm294_vm2, %v647_v10, 0.0 }
  0xe4   : > { %v447_v61 = vadd.f32 %v446_v33, %v359_v59  ;;  %v454_v63 = vpop.f32.mrf.mxu1  ;;  %v658_v44 = vadd.f32 %v657_v32, %v656_v35 }
  0xe5   : > { %v864_v0 = vpop.f32.mrf.mxu0  ;;  %v691_v39 = vsel %vm294_vm2, %v681_v24, 0.0 }
  0xe6   : > { %476 = vst.msk [vmem:[%s1070_s28 + $0x18] sm:$0xff] %vm294_vm2, %v447_v61  ;;  %v890_v4 = vpop.f32.mrf.mxu1  ;;  %v648_v20 = vsel %vm639_vm15, %v447_v61, 0.0  ;;  %v692_v53 = vadd.f32 %v691_v39, %v690_v43 }
  0xe7   : > { %v364_v7 = vpop.f32.mrf.mxu0  ;;  %v682_v33 = vmul.f32 %v648_v20, %v648_v20  ;;  %v659_v40 = vsel %vm294_vm2, %v648_v20, 0.0 }
  0xe8   : > { %v452_v11 = vadd.f32 %v451_v47, %v364_v7  ;;  %v459_v12 = vpop.f32.mrf.mxu1  ;;  %v626_v47 = vadd.s32 9, %v1203_v21  ;;  %v660_v54 = vadd.f32 %v659_v40, %v658_v44 }
  0xe9   : > { %v867_v16 = vpop.f32.mrf.mxu0  ;;  %v693_v48 = vsel %vm294_vm2, %v682_v33, 0.0 }
  0xea   : > { %477 = vst.msk [vmem:[%s1070_s28 + $0x20] sm:$0xff] %vm294_vm2, %v452_v11  ;;  %v893_v18 = vpop.f32.mrf.mxu1  ;;  %v649_v26 = vsel %vm640_vm0, %v452_v11, 0.0  ;;  %v694_v62 = vadd.f32 %v693_v48, %v692_v53  ;;  %v635_v1 = vsel %vm1230_vm7, %v626_v47, %v1203_v21 }
  0xeb   : > { %v367_v25 = vpop.f32.mrf.mxu0  ;;  %v683_v41 = vmul.f32 %v649_v26, %v649_v26  ;;  %v661_v49 = vsel %vm294_vm2, %v649_v26, 0.0  ;;  %vm644_vm9 = vcmp.lt.s32.totalorder %v635_v1, 8 }
  0xec   : > { %v455_v27 = vadd.f32 %v454_v63, %v367_v25  ;;  %v462_v28 = vpop.f32.mrf.mxu1  ;;  %v662_v63 = vadd.f32 %v661_v49, %v660_v54 }
  0xed   : > { %v868_v34 = vpop.f32.mrf.mxu0  ;;  %v695_v57 = vsel %vm294_vm2, %v683_v41, 0.0 }
  0xee   : > { %478 = vst.msk [vmem:[%s1070_s28 + $0x28] sm:$0xff] %vm294_vm2, %v455_v27  ;;  %v650_v36 = vsel %vm641_vm3, %v455_v27, 0.0  ;;  %v894_v37 = vpop.f32.mrf.mxu1  ;;  %v696_v5 = vadd.f32 %v695_v57, %v694_v62 }
  0xef   : > { %v372_v42 = vpop.f32.mrf.mxu0  ;;  %v684_v50 = vmul.f32 %v650_v36, %v650_v36  ;;  %v663_v59 = vsel %vm294_vm2, %v650_v36, 0.0 }
  0xf0   : > { %v460_v45 = vadd.f32 %v459_v12, %v372_v42  ;;  %v467_v46 = vpop.f32.mrf.mxu1  ;;  %v664_v6 = vadd.f32 %v663_v59, %v662_v63 }
  0xf1   : > { %v871_v51 = vpop.f32.mrf.mxu0  ;;  %v697_v2 = vsel %vm294_vm2, %v684_v50, 0.0 }
  0xf2   : > { %479 = vst.msk [vmem:[%s1070_s28 + $0x30] sm:$0xff] %vm294_vm2, %v460_v45  ;;  %v651_v55 = vsel %vm1206_vm4, %v460_v45, 0.0  ;;  %v897_v56 = vpop.f32.mrf.mxu1  ;;  %v698_v14 = vadd.f32 %v697_v2, %v696_v5 }
  0xf3   : > { %v685_v60 = vmul.f32 %v651_v55, %v651_v55  ;;  %v375_v61 = vpop.f32.mrf.mxu0  ;;  %v665_v3 = vsel %vm294_vm2, %v651_v55, 0.0 }
  0xf4   : > { %v463_v58 = vadd.f32 %v462_v28, %v375_v61  ;;  %v470_v0 = vpop.f32.mrf.mxu1  ;;  %v666_v15 = vadd.f32 %v665_v3, %v664_v6 }
  0xf5   : > { %v872_v4 = vpop.f32.mrf.mxu0  ;;  %v699_v9 = vsel %vm294_vm2, %v685_v60, 0.0 }
  0xf6   : > { %480 = vst.msk [vmem:[%s1070_s28 + $0x38] sm:$0xff] %vm294_vm2, %v463_v58  ;;  %v652_v7 = vsel %vm643_vm8, %v463_v58, 0.0  ;;  %v898_v8 = vpop.f32.mrf.mxu1  ;;  %v700_v20 = vadd.f32 %v699_v9, %v698_v14 }
  0xf7   : > { %v667_v10 = vsel %vm294_vm2, %v652_v7, 0.0  ;;  %v686_v11 = vmul.f32 %v652_v7, %v652_v7  ;;  %v380_v12 = vpop.f32.mrf.mxu0 }
  0xf8   : > { %v468_v16 = vadd.f32 %v467_v46, %v380_v12  ;;  %v668_v18 = vadd.f32 %v667_v10, %v666_v15 }
  0xf9   : > { %v701_v17 = vsel %vm294_vm2, %v686_v11, 0.0  ;;  %v875_v19 = vpop.f32.mrf.mxu0 }
  0xfa   : > { %481 = vst.msk [vmem:[%s1070_s28 + $0x40] sm:$0xff] %vm294_vm2, %v468_v16  ;;  %v653_v21 = vsel %vm644_vm9, %v468_v16, 0.0  ;;  %v702_v25 = vadd.f32 %v701_v17, %v700_v20 }
  0xfb   : > { %v669_v22 = vsel %vm294_vm2, %v653_v21, 0.0  ;;  %v687_v23 = vmul.f32 %v653_v21, %v653_v21  ;;  %v383_v24 = vpop.f32.mrf.mxu0 }
  0xfc   : > { %v670_v26 = vadd.f32 %v669_v22, %v668_v18 }
  0xfd   : > { %v703_v27 = vsel %vm294_vm2, %v687_v23, 0.0  ;;  %v876_v28 = vpop.f32.mrf.mxu0 }
  0xfe   : > { %v671_v29 = vrot.slane %v670_v26, 4  ;;  %v704_v30 = vadd.f32 %v703_v27, %v702_v25 }
 0x100   : > { %v672_v13 = vadd.f32 %v671_v29, %v670_v26  ;;  %v705_v31 = vrot.slane %v704_v30, 4 }
 0x102   : > { %v673_v32 = vrot.slane %v672_v13, 2  ;;  %v706_v33 = vadd.f32 %v705_v31, %v704_v30 }
 0x104   : > { %v674_v34 = vadd.f32 %v673_v32, %v672_v13  ;;  %v707_v35 = vrot.slane %v706_v33, 2 }
 0x106   : > { %v675_v36 = vrot.slane %v674_v34, 1  ;;  %v708_v37 = vadd.f32 %v707_v35, %v706_v33 }
 0x108   : > { %v676_v38 = vadd.f32 %v675_v36, %v674_v34  ;;  %v709_v39 = vrot.slane %v708_v37, 1 }
 0x10a   : > { %678 = vst.msk [vmem:[%s211_s5] sm:$0x1] %vm677_vm10, %v676_v38  ;;  %v710_v40 = vadd.f32 %v709_v39, %v708_v37 }
 0x10c   : > { %711 = vst.msk [vmem:[%s214_s8] sm:$0x1] %vm677_vm10, %v710_v40 }
 0x10d PF: > { %s15_s15 = sadd.s32 1, %s941_s15  }
 0x10e   : > { %p12_p4 = scmp.ge.s32.totalorder %s15_s15, 4  }
 0x110   :  { %14 = sbr.rel (!%p12_p4) target bundleno = 1 (0x1), region = 83 }

// kernel: decoder_block_forward.9
= control target key start
LH: loop header
LB: loop body
LE: loop exit
PB: predicated region body
PF: predicated region fallthrough
CT: control target
= control target key end

     0   :  { %s2327_s15 = smov 0   ;;  %s3087_s0 = inlined_call_operand.vmem [shape: bf16[2,102,16], index: 0, kind: input, shape index: {}]   ;;  %s3088_s1 = inlined_call_operand.vmem [shape: bf16[9,16,4], index: 1, kind: input, shape index: {}]   ;;  %s3089_s2 = inlined_call_operand.vmem [shape: f32[2,80,4], index: 2, kind: output, shape index: {0}]   ;;  %s3090_s3 = inlined_call_operand.vmem [shape: f32[2,1,4], index: 3, kind: output, shape index: {1}]   ;;  %s3091_s4 = inlined_call_operand.vmem [shape: f32[2,1,4], index: 4, kind: output, shape index: {2}]  }
   0x1 LB: > { %s1872_s16 = sadd.s32 4294967295, %s2298_s15   ;;  %p1876_p0 = scmp.ge.s32.totalorder %s2298_s15, 1  ;;  %s2298_s15 = sphi %s2327_s15, %s15_s15  }
   0x2   : > { %p167_p1 = scmp.lt.s32.totalorder %s2298_s15, 3 }
   0x4   : > { %p168_p2 = pnand %p1876_p0, %p167_p1 }
   0x5   : > { %p199_p3 = scmp.lt.s32.totalorder (!%p168_p2), %s1872_s16, 1 }
   0x6   : > { %171 = sbr.rel (%p168_p2) target bundleno = 419 (0x1a3), region = 28 }
   0xb   : > { %v2260_v0 = vld [vmem:[%s3088_s1 + $0x8] sm:$0xff]   ;;  %v2300_v1 = vmov 0.0   ;;  %vm2301_vm0 = vmmov 0   ;;  %s3127_s16 = smov (!%p199_p3, %s1872_s16), 1  ;;  %vm260_vm1 = vsmask.f32 7424 }
   0xc   : > { %2028 = vmatprep.subr.bf16.mxu0 %v2300_v1  ;;  %2226 = vmatprep.subr.bf16.mxu1 %v2300_v1  ;;  %s2228_s19 = smul.u32 52, %s3127_s16  ;;  %vm311_vm2 = vcmask 130048   ;;  %v2265_v20 = vld [vmem:[%s3088_s1 + $0x10] sm:$0xff]   ;;  %v2266_v24 = vld [vmem:[%s3088_s1] sm:$0xff]   ;;  %vm496_vm3 = vcmask 1046528   ;;  %v2269_v46 = vld [vmem:[%s3088_s1 + $0x18] sm:$0xff]   ;;  %s211_s21 = scalar_lea.vmem %s3090_s3, %s3127_s16 }
   0xd   : > { %2029 = vmatpush3.bf16.msra.mxu0 %v2260_v0  ;;  %2227 = vmatpush3.bf16.msra.mxu1 %v2260_v0  ;;  %v2271_v50 = vld [vmem:[%s3088_s1 + $0x20] sm:$0xff]   ;;  %vm776_vm4 = vsmask.f32 6400  ;;  %vm941_vm5 = vcmask 1045504   ;;  %vm1221_vm6 = vsmask.f32 5376  ;;  %s214_s24 = scalar_lea.vmem %s3091_s4, %s3127_s16 }
   0xe   : > { %2030 = vmatprep.mubr.msk.bf16.mxu0 %vm2301_vm0, %v2300_v1  ;;  %2042 = vmatprep.mubr.msk.bf16.mxu1 %vm2301_vm0, %v2300_v1  ;;  %s2352_s22 = scalar_lea.vmem %s3087_s0, %s2228_s19  ;;  %vm1386_vm7 = vcmask 1044480   ;;  %s2229_s13 = smul.u32 80, %s3127_s16 }
   0xf   : > { %2072 = vmatprep.subr.bf16.mxu0 %v2300_v1  ;;  %2050 = vmatprep.subr.bf16.mxu1 %v2300_v1  ;;  %v216_v2 = vld [vmem:[%s2352_s22] sm:$0xf]  ;;  %v217_v3 = vld [vmem:[%s2352_s22 + $0x4] sm:$0xf]  ;;  %v2357_v5 = vld [vmem:[%s2352_s22 + $0x8] sm:$0xff]  }
  0x10   : > { %v1881_v4 = vcombine.low %v216_v2, %v217_v3  ;;  %v269_v8 = vshll.u32 %v2357_v5, 16  ;;  %v2361_v9 = vld [vmem:[%s2352_s22 + $0x18] sm:$0xff]   ;;  %v2364_v10 = vld [vmem:[%s2352_s22 + $0x20] sm:$0xff]   ;;  %v2367_v11 = vld [vmem:[%s2352_s22 + $0x10] sm:$0xff]   ;;  %v273_v21 = vshrl.u32 %v2357_v5, 16  ;;  %v498_v48 = vrot.slane %v2357_v5, 1  ;;  %s2851_s18 = scalar_lea.vmem %s3089_s2, %s2229_s13 }
  0x11   : > { %v285_v14 = vshll.u32 %v2361_v9, 16  ;;  %v289_v15 = vshrl.u32 %v2361_v9, 16  ;;  %v293_v16 = vshll.u32 %v2364_v10, 16  ;;  %v2373_v17 = vld [vmem:[%s2352_s22 + $0x28] ss:$0 sps:$4 sm:$0x11]  }
  0x12   : > { %v262_v6 = vshrl.u32 %v1881_v4, 16  ;;  %v264_v7 = vshll.u32 %v1881_v4, 16  ;;  %v271_v13 = vrot.slane %v269_v8, 1  ;;  %v277_v22 = vshll.u32 %v2367_v11, 16  ;;  %v2398_v36 = vld [vmem:[%s2352_s22 + $0x24] sm:$0xff]   ;;  %v2465_v60 = vld [vmem:[%s2352_s22 + $0xc] sm:$0xff]  }
  0x13   : > { %v287_v19 = vrot.slane %v285_v14, 1  ;;  %v295_v23 = vrot.slane %v293_v16, 1  ;;  %v297_v27 = vshrl.u32 %v2364_v10, 16  ;;  %v301_v28 = vshll.u32 %v2373_v17, 16  ;;  %v489_v40 = vld [vmem:[%s2352_s22] sm:$0xe] }
  0x14   : > { %v266_v12 = vrot.slane %v264_v7, 1  ;;  %v275_v30 = vor.u32 %v273_v21, %v271_v13  ;;  %v279_v31 = vrot.slane %v277_v22, 1  ;;  %v281_v35 = vshrl.u32 %v2367_v11, 16  ;;  %v2279_v37 = vld [vmem:[%s2352_s22 + $0x2c] ss:$0 sps:$4 sm:$0x11]  }
  0x15   : > { %v291_v26 = vor.u32 %v289_v15, %v287_v19  ;;  %v299_v32 = vor.u32 %v297_v27, %v295_v23  ;;  %v303_v33 = vrot.slane %v301_v28, 1  ;;  %v661_v41 = vrot.slane %v2398_v36, 1  ;;  %v612_v56 = vld [vmem:[%s2352_s22 + $0x4] sm:$0xe]  ;;  %v2460_v57 = vld [vmem:[%s2352_s22 + $0x8] sm:$0xf] }
  0x16   : > { %v267_v18 = vor.u32 %v266_v12, %v262_v6  ;;  %v280_v34 = vsel %vm260_vm1, %v275_v30, %v279_v31  ;;  %v283_v39 = vor.u32 %v281_v35, %v279_v31  ;;  %v663_v42 = vrot.slane %v2279_v37, 1  ;;  %v2274_v12 = vld [vmem:[%s3088_s1 + $0x28] sm:$0xff]  }
  0x17   : > { %v296_v29 = vsel %vm260_vm1, %v291_v26, %v295_v23  ;;  %v304_v38 = vsel %vm260_vm1, %v299_v32, %v303_v33  ;;  %v1901_v45 = vcombine.low %v489_v40, %v217_v3  ;;  %v500_v51 = vrot.slane %v2367_v11, 1  ;;  %v2502_v23 = vld [vmem:[%s2352_s22 + $0x1c] sm:$0xff]  }
  0x18   : > { %v272_v25 = vsel %vm260_vm1, %v267_v18, %v271_v13  ;;  %2043 = vmatmul.mubr.msk.bf16.vlgmr.msra.gmra.mxu1 %vm311_vm2, %v296_v29  ;;  %v2413_v43 = vsel %vm496_vm3, %v661_v41, %v663_v42  ;;  %v288_v44 = vsel %vm260_vm1, %v283_v39, %v287_v19  ;;  %v502_v53 = vrot.slane %v2361_v9, 1  ;;  %v2484_v13 = vld [vmem:[%s2352_s22 + $0x14] sm:$0xff]   ;;  %v2526_v39 = vld [vmem:[%s2352_s22 + $0x2c] ss:$0 sps:$4 sm:$0x33]  }
  0x19   : > { %2031 = vmatmul.mubr.msk.bf16.vlgmr.msra.gmra.mxu0 %vm311_vm2, %v272_v25  ;;  %2051 = vmatpush3.bf16.msra.mxu1 %v2266_v24  ;;  %v497_v47 = vrot.slane %v1901_v45, 1  ;;  %v501_v52 = vsel %vm496_vm3, %v498_v48, %v500_v51  ;;  %v504_v55 = vrot.slane %v2364_v10, 1  ;;  %v1910_v59 = vcombine.low %v612_v56, %v2460_v57  ;;  %v2276_v19 = vld [vmem:[%s3088_s1 + $0x30] sm:$0xff]  }
  0x1a   : > { %2073 = vmatpush3.bf16.msra.mxu0 %v2265_v20  ;;  %2034 = vmatprep.mubr.msk.bf16.mxu0 %vm2301_vm0, %v2300_v1  ;;  %v503_v54 = vsel %vm496_vm3, %v500_v51, %v502_v53  ;;  %v506_v61 = vrot.slane %v2373_v17, 1  ;;  %v786_v0 = vshrl.u32 %v2465_v60, 16  ;;  %v789_v2 = vshll.u32 %v2465_v60, 16  ;;  %v1057_v51 = vld [vmem:[%s2352_s22 + $0x8] sm:$0xc] }
  0x1b   : > { %2116 = vmatprep.subr.bf16.mxu0 %v2300_v1  ;;  %2046 = vmatprep.mubr.msk.bf16.mxu1 %vm2301_vm0, %v2300_v1  ;;  %v499_v49 = vsel %vm496_vm3, %v497_v47, %v498_v48  ;;  %v505_v58 = vsel %vm496_vm3, %v502_v53, %v504_v55  ;;  %v778_v62 = vshrl.u32 %v1910_v59, 16  ;;  %v781_v63 = vshll.u32 %v1910_v59, 16 }
  0x1c   : > { %2094 = vmatprep.subr.bf16.mxu1 %v2300_v1  ;;  %v654_v3 = vrot.slane %v1910_v59, 1  ;;  %v788_v8 = vrot.slane %v786_v0, 1  ;;  %v795_v15 = vshrl.u32 %v2484_v13, 16  ;;  %v798_v16 = vshll.u32 %v2484_v13, 16  ;;  %v2576_v0 = vld [vmem:[%s2352_s22 + $0x18] sm:$0xff]  }
  0x1d   : > { %v780_v6 = vrot.slane %v778_v62, 1  ;;  %v783_v7 = vrot.slane %v781_v63, 2  ;;  %v657_v17 = vrot.slane %v2484_v13, 1  ;;  %v804_v25 = vshrl.u32 %v2502_v23, 16  ;;  %v2285_v63 = vld [vmem:[%s3088_s1 + $0x40] sm:$0xff]  }
  0x1e   : > { %v797_v20 = vrot.slane %v795_v15, 1  ;;  %v800_v21 = vrot.slane %v798_v16, 2  ;;  %v807_v26 = vshll.u32 %v2502_v23, 16  ;;  %v659_v27 = vrot.slane %v2502_v23, 1 }
  0x1f   : > { %v806_v29 = vrot.slane %v804_v25, 1  ;;  %v813_v33 = vshrl.u32 %v2398_v36, 16  ;;  %v825_v45 = vshll.u32 %v2526_v39, 16 }
  0x20   : > { %2047 = vmatmul.mubr.msk.bf16.gmra.mxu1 %vm311_vm2, %v304_v38  ;;  %v801_v24 = vor.u32 %v800_v21, %v797_v20  ;;  %v809_v30 = vrot.slane %v807_v26, 2  ;;  %v660_v31 = vsel %vm496_vm3, %v657_v17, %v659_v27  ;;  %v662_v40 = vsel %vm496_vm3, %v659_v27, %v661_v41  ;;  %v1379_v26 = vld [vmem:[%s2352_s22 + $0x8] sm:$0x8] }
  0x21   : > { %2035 = vmatmul.mubr.msk.bf16.gmra.mxu0 %vm311_vm2, %v280_v34  ;;  %2052 = vmatprep.mubr.msk.bf16.mxu1 %vm2301_vm0, %v2300_v1  ;;  %v816_v34 = vshll.u32 %v2398_v36, 16  ;;  %v815_v37 = vrot.slane %v813_v33, 1  ;;  %v827_v48 = vrot.slane %v825_v45, 2 }
  0x22   : > { %2038 = vmatprep.mubr.msk.bf16.mxu0 %vm2301_vm0, %v2300_v1  ;;  %v810_v32 = vor.u32 %v809_v30, %v806_v29  ;;  %v1240_v29 = vshrl.u32 %v2576_v0, 16  ;;  %v1243_v30 = vshll.u32 %v2576_v0, 16 }
  0x23   : > { %v818_v38 = vrot.slane %v816_v34, 2 }
  0x24   : > { %v811_v35 = vsel %vm776_vm4, %v801_v24, %v810_v32  ;;  %v1242_v34 = vrot.slane %v1240_v29, 2 }
  0x25   : > { %v819_v42 = vor.u32 %v818_v38, %v815_v37 }
  0x27   : > { %v820_v41 = vsel %vm776_vm4, %v810_v32, %v819_v42 }
  0x28   : > { %2053 = vmatmul.mubr.msk.bf16.vlgmr.msra.gmra.mxu1 %vm311_vm2, %v1881_v4  ;;  %v655_v4 = vrot.slane %v2465_v60, 1 }
  0x29   : > { %2039 = vmatmul.mubr.msk.bf16.gmra.mxu0 %vm311_vm2, %v288_v44  ;;  %2095 = vmatpush3.bf16.msra.mxu1 %v2269_v46  ;;  %v822_v44 = vshrl.u32 %v2526_v39, 16  ;;  %v934_v46 = vld [vmem:[%s2352_s22 + $0x4] sm:$0xc] }
  0x2a   : > { %2074 = vmatprep.mubr.msk.bf16.mxu0 %vm2301_vm0, %v2300_v1  ;;  %2056 = vmatprep.mubr.msk.bf16.mxu1 %vm2301_vm0, %v2300_v1  ;;  %v658_v22 = vsel %vm496_vm3, %v655_v4, %v657_v17 }
  0x2b   : > { %2138 = vmatprep.subr.bf16.mxu1 %v2300_v1  ;;  %v824_v47 = vrot.slane %v822_v44, 1 }
  0x30   : > { %2057 = vmatmul.mubr.msk.bf16.gmra.mxu1 %vm311_vm2, %v2357_v5  ;;  %v507_v5 = vsel %vm496_vm3, %v504_v55, %v506_v61  ;;  %v945_v61 = vrot.slane %v2484_v13, 2 }
  0x31   : > { %2075 = vmatmul.mubr.msk.bf16.vlgmr.msra.gmra.mxu0 %vm311_vm2, %v499_v49  ;;  %2060 = vmatprep.mubr.msk.bf16.mxu1 %vm2301_vm0, %v2300_v1  ;;  %v1933_v49 = vcombine.low %v934_v46, %v2460_v57  ;;  %v2557_v57 = vld [vmem:[%s2352_s22 + $0x10] sm:$0xff]  }
  0x32   : > { %2117 = vmatpush3.bf16.msra.mxu0 %v2271_v50  ;;  %2078 = vmatprep.mubr.msk.bf16.mxu0 %vm2301_vm0, %v2300_v1  ;;  %v828_v50 = vor.u32 %v827_v48, %v824_v47  ;;  %v1231_v16 = vshrl.u32 %v2557_v57, 16  ;;  %v1234_v17 = vshll.u32 %v2557_v57, 16  ;;  %v1388_v38 = vrot.slane %v2557_v57, 3 }
  0x33   : > { %2160 = vmatprep.subr.bf16.mxu0 %v2300_v1  ;;  %v942_v53 = vrot.slane %v1933_v49, 2  ;;  %v1390_v47 = vrot.slane %v2576_v0, 3 }
  0x34   : > { %v829_v55 = vsel %vm776_vm4, %v819_v42, %v828_v50 }
  0x38   : > { %2061 = vmatmul.mubr.msk.bf16.gmra.mxu1 %vm311_vm2, %v2367_v11  ;;  %v656_v11 = vsel %vm496_vm3, %v654_v3, %v655_v4  ;;  %v1102_v3 = vrot.slane %v2576_v0, 2  ;;  %v947_v4 = vrot.slane %v2502_v23, 2  ;;  %v1233_v23 = vrot.slane %v1231_v16, 2 }
  0x39   : > { %2079 = vmatmul.mubr.msk.bf16.gmra.mxu0 %vm311_vm2, %v501_v52  ;;  %2064 = vmatprep.mubr.msk.bf16.mxu1 %vm2301_vm0, %v2300_v1  ;;  %v2549_v52 = vld [vmem:[%s2352_s22 + $0xc] sm:$0xf] }
  0x3a   : > { %2082 = vmatprep.mubr.msk.bf16.mxu0 %vm2301_vm0, %v2300_v1  ;;  %v1942_v56 = vcombine.low %v1057_v51, %v2549_v52  ;;  %v1965_v32 = vcombine.low %v1379_v26, %v2549_v52  ;;  %v1391_v51 = vsel %vm1386_vm7, %v1388_v38, %v1390_v47 }
  0x3c   : > { %v1099_v59 = vrot.slane %v1942_v56, 2  ;;  %v1226_v15 = vshll.u32 %v1942_v56, 16  ;;  %v1387_v37 = vrot.slane %v1965_v32, 3 }
  0x3e   : > { %v1389_v44 = vsel %vm1386_vm7, %v1387_v37, %v1388_v38 }
  0x40   : > { %2065 = vmatmul.mubr.msk.bf16.gmra.mxu1 %vm311_vm2, %v2361_v9  ;;  %v791_v9 = vrot.slane %v789_v2, 2 }
  0x41   : > { %2083 = vmatmul.mubr.msk.bf16.gmra.mxu0 %vm311_vm2, %v503_v54  ;;  %2068 = vmatprep.mubr.msk.bf16.mxu1 %vm2301_vm0, %v2300_v1  ;;  %v943_v54 = vrot.slane %v2465_v60, 2  ;;  %v1100_v60 = vrot.slane %v2557_v57, 2 }
  0x42   : > { %2086 = vmatprep.mubr.msk.bf16.mxu0 %vm2301_vm0, %v2300_v1  ;;  %v792_v14 = vor.u32 %v791_v9, %v788_v8  ;;  %v949_v9 = vrot.slane %v2398_v36, 2  ;;  %v1223_v36 = vshrl.u32 %v1942_v56, 16 }
  0x43   : > { %v1101_v62 = vsel %vm941_vm5, %v1099_v59, %v1100_v60  ;;  %v946_v2 = vsel %vm941_vm5, %v943_v54, %v945_v61 }
  0x44   : > { %v802_v28 = vsel %vm776_vm4, %v792_v14, %v801_v24  ;;  %v950_v13 = vsel %vm941_vm5, %v947_v4, %v949_v9  ;;  %v1225_v21 = vrot.slane %v1223_v36, 2  ;;  %v1236_v24 = vrot.slane %v1234_v17, 3 }
  0x48   : > { %2069 = vmatmul.mubr.msk.bf16.gmra.mxu1 %vm311_vm2, %v2364_v10  ;;  %v784_v10 = vor.u32 %v783_v7, %v780_v6  ;;  %v2589_v6 = vld [vmem:[%s2352_s22 + $0x20] sm:$0xff]   ;;  %v948_v7 = vsel %vm941_vm5, %v945_v61, %v947_v4 }
  0x49   : > { %2087 = vmatmul.mubr.msk.bf16.gmra.mxu0 %vm311_vm2, %v505_v58  ;;  %2096 = vmatprep.mubr.msk.bf16.mxu1 %vm2301_vm0, %v2300_v1  ;;  %v944_v58 = vsel %vm941_vm5, %v942_v53, %v943_v54  ;;  %v1104_v8 = vrot.slane %v2589_v6, 2  ;;  %v1252_v42 = vshll.u32 %v2589_v6, 16  ;;  %v1392_v56 = vrot.slane %v2589_v6, 3 }
  0x4a   : > { %2090 = vmatprep.mubr.msk.bf16.mxu0 %vm2301_vm0, %v2300_v1  ;;  %v793_v18 = vsel %vm776_vm4, %v784_v10, %v792_v14  ;;  %v951_v14 = vrot.slane %v2526_v39, 2  ;;  %vm1502_vm4 = vcmask 31744  }
  0x4b   : > { %v1393_v59 = vsel %vm1386_vm7, %v1390_v47, %v1392_v56 }
  0x4c   : > { %v952_v20 = vsel %vm941_vm5, %v949_v9, %v951_v14 }
  0x50   : > { %2097 = vmatmul.mubr.msk.bf16.vlgmr.msra.gmra.mxu1 %vm311_vm2, %v656_v11  ;;  %v1105_v11 = vsel %vm941_vm5, %v1102_v3, %v1104_v8 }
  0x51   : > { %2091 = vmatmul.mubr.msk.bf16.gmra.mxu0 %vm311_vm2, %v507_v5  ;;  %2139 = vmatpush3.bf16.msra.mxu1 %v2274_v12  ;;  %v1103_v5 = vsel %vm941_vm5, %v1100_v60, %v1102_v3  ;;  %v2602_v12 = vld [vmem:[%s2352_s22 + $0x28] sm:$0xff]  }
  0x52   : > { %2118 = vmatprep.mubr.msk.bf16.mxu0 %vm2301_vm0, %v2300_v1  ;;  %2100 = vmatprep.mubr.msk.bf16.mxu1 %vm2301_vm0, %v2300_v1  ;;  %v1106_v10 = vrot.slane %v2602_v12, 2  ;;  %v1258_v49 = vshrl.u32 %v2602_v12, 16  ;;  %v1261_v50 = vshll.u32 %v2602_v12, 16 }
  0x53   : > { %2182 = vmatprep.subr.bf16.mxu1 %v2300_v1 }
  0x54   : > { %v1260_v53 = vrot.slane %v1258_v49, 2  ;;  %v1263_v54 = vrot.slane %v1261_v50, 3 }
  0x56   : > { %v1264_v57 = vor.u32 %v1263_v54, %v1260_v53 }
  0x58   : > { %2101 = vmatmul.mubr.msk.bf16.gmra.mxu1 %vm311_vm2, %v658_v22  ;;  %v1228_v22 = vrot.slane %v1226_v15, 3 }
  0x59   : > { %2119 = vmatmul.mubr.msk.bf16.vlgmr.msra.gmra.mxu0 %vm311_vm2, %v793_v18  ;;  %2104 = vmatprep.mubr.msk.bf16.mxu1 %vm2301_vm0, %v2300_v1  ;;  %v1107_v18 = vsel %vm941_vm5, %v1104_v8, %v1106_v10 }
  0x5a   : > { %2161 = vmatpush3.bf16.msra.mxu0 %v2276_v19  ;;  %2122 = vmatprep.mubr.msk.bf16.mxu0 %vm2301_vm0, %v2300_v1  ;;  %v2289_v19 = vld [vmem:[%s2352_s22 + $0x30] ss:$0 sps:$4 sm:$0x33]   ;;  %v1229_v27 = vor.u32 %v1228_v22, %v1225_v21 }
  0x5b   : > { %2204 = vmatprep.subr.bf16.mxu0 %v2300_v1  ;;  %v1108_v25 = vrot.slane %v2289_v19, 2 }
  0x60   : > { %2105 = vmatmul.mubr.msk.bf16.gmra.mxu1 %vm311_vm2, %v660_v31  ;;  %v1109_v31 = vsel %vm941_vm5, %v1106_v10, %v1108_v25 }
  0x61   : > { %2123 = vmatmul.mubr.msk.bf16.gmra.mxu0 %vm311_vm2, %v802_v28  ;;  %2108 = vmatprep.mubr.msk.bf16.mxu1 %vm2301_vm0, %v2300_v1  ;;  %v1237_v28 = vor.u32 %v1236_v24, %v1233_v23 }
  0x62   : > { %2126 = vmatprep.mubr.msk.bf16.mxu0 %vm2301_vm0, %v2300_v1 }
  0x63   : > { %v1238_v33 = vsel %vm1221_vm6, %v1229_v27, %v1237_v28 }
  0x68   : > { %2109 = vmatmul.mubr.msk.bf16.gmra.mxu1 %vm311_vm2, %v662_v40  ;;  %v1249_v40 = vshrl.u32 %v2589_v6, 16 }
  0x69   : > { %2127 = vmatmul.mubr.msk.bf16.gmra.mxu0 %vm311_vm2, %v811_v35  ;;  %2112 = vmatprep.mubr.msk.bf16.mxu1 %vm2301_vm0, %v2300_v1  ;;  %v1245_v35 = vrot.slane %v1243_v30, 3 }
  0x6a   : > { %2130 = vmatprep.mubr.msk.bf16.mxu0 %vm2301_vm0, %v2300_v1  ;;  %v1251_v46 = vrot.slane %v1249_v40, 2 }
  0x6b   : > { %v1246_v39 = vor.u32 %v1245_v35, %v1242_v34 }
  0x6d   : > { %v1247_v45 = vsel %vm1221_vm6, %v1237_v28, %v1246_v39 }
  0x70   : > { %2113 = vmatmul.mubr.msk.bf16.gmra.mxu1 %vm311_vm2, %v2413_v43  ;;  %v2282_v43 = vld [vmem:[%s3088_s1 + $0x38] sm:$0xff]  }
  0x71   : > { %2131 = vmatmul.mubr.msk.bf16.gmra.mxu0 %vm311_vm2, %v820_v41  ;;  %2140 = vmatprep.mubr.msk.bf16.mxu1 %vm2301_vm0, %v2300_v1  ;;  %v1254_v41 = vrot.slane %v1252_v42, 3 }
  0x72   : > { %2134 = vmatprep.mubr.msk.bf16.mxu0 %vm2301_vm0, %v2300_v1 }
  0x73   : > { %v1255_v48 = vor.u32 %v1254_v41, %v1251_v46 }
  0x75   : > { %v1256_v52 = vsel %vm1221_vm6, %v1246_v39, %v1255_v48  ;;  %v1265_v60 = vsel %vm1221_vm6, %v1255_v48, %v1264_v57 }
  0x78   : > { %2141 = vmatmul.mubr.msk.bf16.vlgmr.msra.gmra.mxu1 %vm311_vm2, %v944_v58 }
  0x79   : > { %2135 = vmatmul.mubr.msk.bf16.gmra.mxu0 %vm311_vm2, %v829_v55  ;;  %2183 = vmatpush3.bf16.msra.mxu1 %v2282_v43  ;;  %v2291_v55 = vld [vmem:[%s2352_s22 + $0x30] ss:$0 sps:$4 sm:$0x77]  }
  0x7a   : > { %2162 = vmatprep.mubr.msk.bf16.mxu0 %vm2301_vm0, %v2300_v1  ;;  %2144 = vmatprep.mubr.msk.bf16.mxu1 %vm2301_vm0, %v2300_v1  ;;  %v1267_v58 = vshrl.u32 %v2291_v55, 16  ;;  %v1270_v43 = vshll.u32 %v2291_v55, 16  ;;  %v1396_v4 = vrot.slane %v2291_v55, 3 }
  0x7c   : > { %v1269_v61 = vrot.slane %v1267_v58, 2 }
  0x80   : > { %2145 = vmatmul.mubr.msk.bf16.gmra.mxu1 %vm311_vm2, %v946_v2 }
  0x81   : > { %2163 = vmatmul.mubr.msk.bf16.vlgmr.msra.gmra.mxu0 %vm311_vm2, %v1101_v62  ;;  %2148 = vmatprep.mubr.msk.bf16.mxu1 %vm2301_vm0, %v2300_v1  ;;  %v1272_v62 = vrot.slane %v1270_v43, 3 }
  0x82   : > { %2205 = vmatpush3.bf16.msra.mxu0 %v2285_v63  ;;  %2166 = vmatprep.mubr.msk.bf16.mxu0 %vm2301_vm0, %v2300_v1  ;;  %v1394_v63 = vrot.slane %v2602_v12, 3 }
  0x83   : > { %v1273_v0 = vor.u32 %v1272_v62, %v1269_v61 }
  0x84   : > { %v1395_v2 = vsel %vm1386_vm7, %v1392_v56, %v1394_v63 }
  0x85   : > { %v1274_v3 = vsel %vm1221_vm6, %v1264_v57, %v1273_v0 }
  0x88   : > { %2149 = vmatmul.mubr.msk.bf16.gmra.mxu1 %vm311_vm2, %v948_v7 }
  0x89   : > { %2167 = vmatmul.mubr.msk.bf16.gmra.mxu0 %vm311_vm2, %v1103_v5  ;;  %2152 = vmatprep.mubr.msk.bf16.mxu1 %vm2301_vm0, %v2300_v1  ;;  %v1397_v5 = vsel %vm1386_vm7, %v1394_v63, %v1396_v4 }
  0x8a   : > { %2170 = vmatprep.mubr.msk.bf16.mxu0 %vm2301_vm0, %v2300_v1 }
  0x90   : > { %2153 = vmatmul.mubr.msk.bf16.gmra.mxu1 %vm311_vm2, %v950_v13 }
  0x91   : > { %2171 = vmatmul.mubr.msk.bf16.gmra.mxu0 %vm311_vm2, %v1105_v11  ;;  %2156 = vmatprep.mubr.msk.bf16.mxu1 %vm2301_vm0, %v2300_v1 }
  0x92   : > { %2174 = vmatprep.mubr.msk.bf16.mxu0 %vm2301_vm0, %v2300_v1 }
  0x98   : > { %2157 = vmatmul.mubr.msk.bf16.gmra.mxu1 %vm311_vm2, %v952_v20 }
  0x99   : > { %2175 = vmatmul.mubr.msk.bf16.gmra.mxu0 %vm311_vm2, %v1107_v18  ;;  %2184 = vmatprep.mubr.msk.bf16.mxu1 %vm2301_vm0, %v2300_v1 }
  0x9a   : > { %2178 = vmatprep.mubr.msk.bf16.mxu0 %vm2301_vm0, %v2300_v1 }
  0xa0   : > { %2185 = vmatmul.mubr.msk.bf16.vlgmr.msra.gmra.mxu1 %vm311_vm2, %v1238_v33 }
  0xa1   : > { %2179 = vmatmul.mubr.msk.bf16.gmra.mxu0 %vm311_vm2, %v1109_v31  ;;  %2188 = vmatprep.mubr.msk.bf16.mxu1 %vm2301_vm0, %v2300_v1 }
  0xa2   : > { %2206 = vmatprep.mubr.msk.bf16.mxu0 %vm2301_vm0, %v2300_v1 }
  0xa8   : > { %2189 = vmatmul.mubr.msk.bf16.gmra.mxu1 %vm311_vm2, %v1247_v45 }
  0xa9   : > { %2207 = vmatmul.mubr.msk.bf16.vlgmr.msra.gmra.mxu0 %vm311_vm2, %v1389_v44  ;;  %2192 = vmatprep.mubr.msk.bf16.mxu1 %vm2301_vm0, %v2300_v1 }
  0xaa   : > { %2210 = vmatprep.mubr.msk.bf16.mxu0 %vm2301_vm0, %v2300_v1 }
  0xb0   : > { %2193 = vmatmul.mubr.msk.bf16.gmra.mxu1 %vm311_vm2, %v1256_v52 }
  0xb1   : > { %2211 = vmatmul.mubr.msk.bf16.gmra.mxu0 %vm311_vm2, %v1391_v51  ;;  %2196 = vmatprep.mubr.msk.bf16.mxu1 %vm2301_vm0, %v2300_v1 }
  0xb2   : > { %2214 = vmatprep.mubr.msk.bf16.mxu0 %vm2301_vm0, %v2300_v1 }
  0xb8   : > { %2197 = vmatmul.mubr.msk.bf16.gmra.mxu1 %vm311_vm2, %v1265_v60 }
  0xb9   : > { %2215 = vmatmul.mubr.msk.bf16.gmra.mxu0 %vm311_vm2, %v1393_v59  ;;  %2200 = vmatprep.mubr.msk.bf16.mxu1 %vm2301_vm0, %v2300_v1 }
  0xba   : > { %2218 = vmatprep.mubr.msk.bf16.mxu0 %vm2301_vm0, %v2300_v1 }
  0xc0   : > { %2201 = vmatmul.mubr.msk.bf16.gmra.mxu1 %vm311_vm2, %v1274_v3 }
  0xc1   : > { %2219 = vmatmul.mubr.msk.bf16.gmra.mxu0 %vm311_vm2, %v1395_v2 }
  0xc2   : > { %2222 = vmatprep.mubr.msk.bf16.mxu0 %vm2301_vm0, %v2300_v1 }
  0xc9   : > { %2223 = vmatmul.mubr.msk.bf16.gmra.mxu0 %vm311_vm2, %v1397_v5 }
  0xd8   : > { %v385_v7 = vpop.f32.mrf.mxu1 }
  0xd9   : > { %v361_v6 = vpop.f32.mrf.mxu0 }
  0xda   : > { %v2044_v9 = vpop.f32.mrf.mxu1 }
  0xdb   : > { %v2032_v8 = vpop.f32.mrf.mxu0 }
  0xdc   : > { %v388_v12 = vpop.f32.mrf.mxu1 }
  0xdd   : > { %v364_v11 = vpop.f32.mrf.mxu0 }
  0xde   : > { %v2045_v10 = vpop.f32.mrf.mxu1 }
  0xdf   : > { %v2033_v13 = vpop.f32.mrf.mxu0 }
  0xe0   : > { %v393_v36 = vpop.f32.mrf.mxu1 }
  0xe1   : > { %v369_v14 = vpop.f32.mrf.mxu0 }
  0xe2   : > { %v2048_v16 = vpop.f32.mrf.mxu1 }
  0xe3   : > { %v2036_v15 = vpop.f32.mrf.mxu0 }
  0xe4   : > { %v396_v17 = vpop.f32.mrf.mxu1 }
  0xe5   : > { %v372_v1 = vpop.f32.mrf.mxu0 }
  0xe6   : > { %v2049_v19 = vpop.f32.mrf.mxu1 }
  0xe7   : > { %v2037_v18 = vpop.f32.mrf.mxu0 }
  0xe8   : > { %v450_v21 = vpop.f32.mrf.mxu1 }
  0xe9   : > { %v377_v20 = vpop.f32.mrf.mxu0  ;;  %v451_v23 = vadd.f32 %v450_v21, %v361_v6 }
  0xea   : > { %v2054_v24 = vpop.f32.mrf.mxu1 }
  0xeb   : > { %v2040_v22 = vpop.f32.mrf.mxu0 }
  0xec   : > { %v453_v26 = vpop.f32.mrf.mxu1 }
  0xed   : > { %v380_v25 = vpop.f32.mrf.mxu0  ;;  %v454_v28 = vadd.f32 %v453_v26, %v364_v11 }
  0xee   : > { %v2055_v29 = vpop.f32.mrf.mxu1 }
  0xef   : > { %v2041_v27 = vpop.f32.mrf.mxu0 }
  0xf0   : > { %v458_v32 = vpop.f32.mrf.mxu1 }
  0xf1   : > { %v563_v30 = vpop.f32.mrf.mxu0  ;;  %v459_v34 = vadd.f32 %v458_v32, %v369_v14 }
  0xf2   : > { %v602_v31 = vadd.f32 %v563_v30, %v451_v23  ;;  %v2058_v35 = vpop.f32.mrf.mxu1 }
  0xf3   : > { %v2076_v33 = vpop.f32.mrf.mxu0 }
  0xf4   : > { %v461_v39 = vpop.f32.mrf.mxu1 }
  0xf5   : > { %v566_v37 = vpop.f32.mrf.mxu0  ;;  %v462_v42 = vadd.f32 %v461_v39, %v372_v1 }
  0xf6   : > { %v603_v38 = vadd.f32 %v566_v37, %v454_v28  ;;  %v2059_v44 = vpop.f32.mrf.mxu1 }
  0xf7   : > { %v2077_v40 = vpop.f32.mrf.mxu0 }
  0xf8   : > { %v466_v41 = vpop.f32.mrf.mxu1 }
  0xf9   : > { %v571_v45 = vpop.f32.mrf.mxu0  ;;  %v467_v48 = vadd.f32 %v466_v41, %v377_v20 }
  0xfa   : > { %v604_v46 = vadd.f32 %v571_v45, %v459_v34  ;;  %v2062_v49 = vpop.f32.mrf.mxu1 }
  0xfb   : > { %v2080_v47 = vpop.f32.mrf.mxu0 }
  0xfc   : > { %v469_v52 = vpop.f32.mrf.mxu1 }
  0xfd   : > { %v574_v50 = vpop.f32.mrf.mxu0  ;;  %v470_v54 = vadd.f32 %v469_v52, %v380_v25 }
  0xfe   : > { %v605_v51 = vadd.f32 %v574_v50, %v462_v42  ;;  %v2063_v55 = vpop.f32.mrf.mxu1 }
  0xff   : > { %v2081_v53 = vpop.f32.mrf.mxu0 }
 0x100   : > { %v474_v58 = vpop.f32.mrf.mxu1 }
 0x101   : > { %v579_v56 = vpop.f32.mrf.mxu0  ;;  %v475_v59 = vadd.f32 %v474_v58, %v385_v7 }
 0x102   : > { %v606_v57 = vadd.f32 %v579_v56, %v467_v48  ;;  %v2066_v60 = vpop.f32.mrf.mxu1 }
 0x103   : > { %v2084_v43 = vpop.f32.mrf.mxu0 }
 0x104   : > { %v477_v63 = vpop.f32.mrf.mxu1 }
 0x105   : > { %v582_v61 = vpop.f32.mrf.mxu0  ;;  %v478_v2 = vadd.f32 %v477_v63, %v388_v12 }
 0x106   : > { %v607_v62 = vadd.f32 %v582_v61, %v470_v54  ;;  %v2067_v3 = vpop.f32.mrf.mxu1 }
 0x107   : > { %v2085_v0 = vpop.f32.mrf.mxu0 }
 0x108   : > { %v482_v6 = vpop.f32.mrf.mxu1 }
 0x109   : > { %v587_v4 = vpop.f32.mrf.mxu0  ;;  %v483_v9 = vadd.f32 %v482_v6, %v393_v36 }
 0x10a   : > { %v608_v5 = vadd.f32 %v587_v4, %v475_v59  ;;  %v2070_v11 = vpop.f32.mrf.mxu1 }
 0x10b   : > { %v2088_v8 = vpop.f32.mrf.mxu0 }
 0x10c   : > { %v485_v14 = vpop.f32.mrf.mxu1 }
 0x10d   : > { %v590_v13 = vpop.f32.mrf.mxu0  ;;  %v486_v16 = vadd.f32 %v485_v14, %v396_v17 }
 0x10e   : > { %v609_v10 = vadd.f32 %v590_v13, %v478_v2  ;;  %v2071_v1 = vpop.f32.mrf.mxu1 }
 0x10f   : > { %v2089_v15 = vpop.f32.mrf.mxu0 }
 0x110   : > { %v720_v19 = vpop.f32.mrf.mxu1 }
 0x111   : > { %v595_v7 = vpop.f32.mrf.mxu0  ;;  %v759_v21 = vadd.f32 %v720_v19, %v602_v31 }
 0x112   : > { %v610_v18 = vadd.f32 %v595_v7, %v483_v9  ;;  %v2098_v22 = vpop.f32.mrf.mxu1 }
 0x113   : > { %v2092_v20 = vpop.f32.mrf.mxu0 }
 0x114   : > { %v723_v24 = vpop.f32.mrf.mxu1 }
 0x115   : > { %v598_v12 = vpop.f32.mrf.mxu0  ;;  %v760_v26 = vadd.f32 %v723_v24, %v603_v38  ;;  %v1513_v24 = vlaneseq }
 0x116   : > { %v611_v23 = vadd.f32 %v598_v12, %v486_v16  ;;  %v2099_v27 = vpop.f32.mrf.mxu1 }
 0x117   : > { %v2093_v25 = vpop.f32.mrf.mxu0 }
 0x118   : > { %v728_v29 = vpop.f32.mrf.mxu1 }
 0x119   : > { %v885_v36 = vpop.f32.mrf.mxu0  ;;  %v761_v32 = vadd.f32 %v728_v29, %v604_v46 }
 0x11a   : > { %v2677_v28 = vadd.f32 %v885_v36, %v759_v21  ;;  %v2102_v17 = vpop.f32.mrf.mxu1  ;;  %v2707_v36 = vshrl.u32 %v1513_v24, 7 }
 0x11b   : > { %v2120_v30 = vpop.f32.mrf.mxu0 }
 0x11c   : > { %v731_v35 = vpop.f32.mrf.mxu1 }
 0x11d   : > { %v888_v33 = vpop.f32.mrf.mxu0  ;;  %v762_v31 = vadd.f32 %v731_v35, %v605_v51  ;;  %v1516_v35 = vadd.s32 16, %v2707_v36 }
 0x11e   : > { %v2679_v34 = vadd.f32 %v888_v33, %v760_v26  ;;  %v2103_v39 = vpop.f32.mrf.mxu1 }
 0x11f   : > { %v2121_v37 = vpop.f32.mrf.mxu0 }
 0x120   : > { %v736_v44 = vpop.f32.mrf.mxu1 }
 0x121   : > { %v893_v40 = vpop.f32.mrf.mxu0  ;;  %v763_v45 = vadd.f32 %v736_v44, %v606_v57  ;;  %v1517_v44 = vadd.s32 24, %v2707_v36 }
 0x122   : > { %v2681_v42 = vadd.f32 %v893_v40, %v761_v32  ;;  %v2106_v41 = vpop.f32.mrf.mxu1  ;;  %v1515_v32 = vadd.s32 8, %v2707_v36  ;;  %v2718_v39 = vmul.u32.u64.low 3435973837, %v2707_v36  ;;  %v2719_v40 = vmul.u32.u64.high 3435973837, %v2707_v36, %v2718_v39 }
 0x123   : > { %v2124_v38 = vpop.f32.mrf.mxu0  ;;  %v2771_v39 = vadd.s32 48, %v2707_v36 }
 0x124   : > { %v739_v49 = vpop.f32.mrf.mxu1 }
 0x125   : > { %v896_v47 = vpop.f32.mrf.mxu0  ;;  %v764_v50 = vadd.f32 %v739_v49, %v607_v62 }
 0x126   : > { %v2683_v48 = vadd.f32 %v896_v47, %v762_v31  ;;  %v2107_v52 = vpop.f32.mrf.mxu1 }
 0x127   : > { %v2125_v46 = vpop.f32.mrf.mxu0 }
 0x128   : > { %v744_v55 = vpop.f32.mrf.mxu1  ;;  %v2727_v49 = vmul.u32.u64.low 3435973837, %v1516_v35  ;;  %v2728_v46 = vmul.u32.u64.high 3435973837, %v1516_v35, %v2727_v49 }
 0x129   : > { %v901_v53 = vpop.f32.mrf.mxu0  ;;  %v765_v56 = vadd.f32 %v744_v55, %v608_v5 }
 0x12a   : > { %v2685_v54 = vadd.f32 %v901_v53, %v763_v45  ;;  %v2110_v58 = vpop.f32.mrf.mxu1  ;;  %v2722_v38 = vmul.u32.u64.low 3435973837, %v1515_v32  ;;  %v2723_v45 = vmul.u32.u64.high 3435973837, %v1515_v32, %v2722_v38 }
 0x12b   : > { %v2128_v51 = vpop.f32.mrf.mxu0  ;;  %v2732_v53 = vmul.u32.u64.low 3435973837, %v1517_v44  ;;  %v2733_v55 = vmul.u32.u64.high 3435973837, %v1517_v44, %v2732_v53  ;;  %v2738_v58 = vadd.s32 32, %v2707_v36 }
 0x12c   : > { %v747_v60 = vpop.f32.mrf.mxu1 }
 0x12d   : > { %v904_v43 = vpop.f32.mrf.mxu0  ;;  %v766_v61 = vadd.f32 %v747_v60, %v609_v10 }
 0x12e   : > { %v2687_v59 = vadd.f32 %v904_v43, %v764_v50  ;;  %v2111_v63 = vpop.f32.mrf.mxu1 }
 0x12f   : > { %v2129_v57 = vpop.f32.mrf.mxu0 }
 0x130   : > { %v752_v3 = vpop.f32.mrf.mxu1  ;;  %v1530_v57 = vshrl.u32 %v2719_v40, 3 }
 0x131   : > { %v909_v0 = vpop.f32.mrf.mxu0  ;;  %v767_v4 = vadd.f32 %v752_v3, %v610_v18  ;;  %v2747_v3 = vadd.s32 40, %v2707_v36 }
 0x132   : > { %v2689_v2 = vadd.f32 %v909_v0, %v765_v56  ;;  %v2114_v6 = vpop.f32.mrf.mxu1 }
 0x133   : > { %v2132_v62 = vpop.f32.mrf.mxu0 }
 0x134   : > { %v755_v11 = vpop.f32.mrf.mxu1  ;;  %v1552_v62 = vshrl.u32 %v2728_v46, 3 }
 0x135   : > { %v912_v8 = vpop.f32.mrf.mxu0  ;;  %v768_v13 = vadd.f32 %v755_v11, %v611_v23 }
 0x136   : > { %v2691_v9 = vadd.f32 %v912_v8, %v766_v61  ;;  %v2115_v14 = vpop.f32.mrf.mxu1  ;;  %v1541_v61 = vshrl.u32 %v2723_v45, 3 }
 0x137   : > { %v2133_v5 = vpop.f32.mrf.mxu0 }
 0x138   : > { %v2695_v1 = vpop.f32.mrf.mxu1  ;;  %v1531_v5 = vmul.u32 10, %v1530_v57  ;;  %v1542_v14 = vmul.u32 10, %v1541_v61 }
 0x139   : > { %v917_v15 = vpop.f32.mrf.mxu0 }
 0x13a   : > { %v2693_v16 = vadd.f32 %v917_v15, %v767_v4  ;;  %v2142_v7 = vpop.f32.mrf.mxu1  ;;  %v2751_v4 = vmul.u32.u64.low 3435973837, %v2738_v58  ;;  %v2752_v6 = vmul.u32.u64.high 3435973837, %v2738_v58, %v2751_v4 }
 0x13b   : > { %v2136_v10 = vpop.f32.mrf.mxu0 }
 0x13c   : > { %v2699_v21 = vpop.f32.mrf.mxu1  ;;  %v1574_v38 = vshrl.u32 %v2752_v6, 3 }
 0x13d   : > { %v920_v19 = vpop.f32.mrf.mxu0 }
 0x13e   : > { %v2697_v20 = vadd.f32 %v920_v19, %v768_v13  ;;  %v2143_v22 = vpop.f32.mrf.mxu1  ;;  %v1563_v13 = vshrl.u32 %v2733_v55, 3  ;;  %v2760_v7 = vmul.u32.u64.low 3435973837, %v2747_v3  ;;  %v2761_v19 = vmul.u32.u64.high 3435973837, %v2747_v3, %v2760_v7 }
 0x13f   : > { %v2137_v18 = vpop.f32.mrf.mxu0  ;;  %v2786_v53 = vmul.u32.u64.low 3435973837, %v2771_v39  ;;  %v2787_v55 = vmul.u32.u64.high 3435973837, %v2771_v39, %v2786_v53 }
 0x140   : > { %v2703_v25 = vpop.f32.mrf.mxu1  ;;  %v1553_v18 = vmul.u32 10, %v1552_v62 }
 0x141   : > { %v2701_v12 = vpop.f32.mrf.mxu0 }
 0x142   : > { %v2146_v26 = vpop.f32.mrf.mxu1  ;;  %v2773_v40 = vsub.s32 %v1516_v35, %v1553_v18  ;;  %v1585_v35 = vshrl.u32 %v2761_v19, 3 }
 0x143   : > { %v2164_v23 = vpop.f32.mrf.mxu0  ;;  %v1564_v26 = vmul.u32 10, %v1563_v13 }
 0x144   : > { %v2709_v29 = vpop.f32.mrf.mxu1  ;;  %v1532_v23 = vsub.s32 %v2707_v36, %v1531_v5  ;;  %vm1636_vm13 = vcmp.ne.s32.totalorder %v2773_v40, 0  ;;  %vm1646_vm14 = vcmp.lt.s32.totalorder %v2773_v40, 0 }
 0x145   : > { %v2705_v27 = vpop.f32.mrf.mxu0  ;;  %v2778_v49 = vsub.s32 %v1517_v44, %v1564_v26  ;;  %v1575_v44 = vmul.u32 10, %v1574_v38  ;;  %vm2816_vm2 = vmand %vm1646_vm14, %vm1636_vm13 }
 0x146   : > { %v2147_v17 = vpop.f32.mrf.mxu1  ;;  %vm1634_vm8 = vcmp.ne.s32.totalorder %v1532_v23, 0  ;;  %vm1644_vm9 = vcmp.lt.s32.totalorder %v1532_v23, 0  ;;  %v1664_v46 = vadd.s32 10, %v1532_v23 }
 0x147   : > { %v2165_v30 = vpop.f32.mrf.mxu0  ;;  %vm2789_vm12 = vmand %vm1644_vm9, %vm1634_vm8  ;;  %vm1637_vm15 = vcmp.ne.s32.totalorder %v2778_v49, 0  ;;  %vm1647_vm0 = vcmp.lt.s32.totalorder %v2778_v49, 0  ;;  %v2830_v19 = vsub.s32 %v2738_v58, %v1575_v44 }
 0x148   : > { %v2715_v37 = vpop.f32.mrf.mxu1  ;;  %v2766_v30 = vsub.s32 %v1515_v32, %v1542_v14  ;;  %v1674_v5 = vsel %vm2789_vm12, %v1664_v46, %v1532_v23  ;;  %v1586_v14 = vmul.u32 10, %v1585_v35  ;;  %vm2825_vm3 = vmand %vm1647_vm0, %vm1637_vm15 }
 0x149   : > { %v2712_v33 = vpop.f32.mrf.mxu0  ;;  %vm2841_vm5 = vcmp.lt.s32.totalorder %v1674_v5, 8  ;;  %vm1638_vm6 = vcmp.ne.s32.totalorder %v2830_v19, 0  ;;  %vm1648_vm7 = vcmp.lt.s32.totalorder %v2830_v19, 0 }
 0x14a   : > { %v2150_v41 = vpop.f32.mrf.mxu1  ;;  %vm1635_vm10 = vcmp.ne.s32.totalorder %v2766_v30, 0  ;;  %vm1645_vm11 = vcmp.lt.s32.totalorder %v2766_v30, 0  ;;  %v1665_v4 = vadd.s32 10, %v2766_v30  ;;  %v2860_v35 = vsub.s32 %v2747_v3, %v1586_v14 }
 0x14b   : > { %v2168_v31 = vpop.f32.mrf.mxu0  ;;  %vm2804_vm1 = vmand %vm1645_vm11, %vm1635_vm10  ;;  %v1049_v3 = vadd.f32 %v2703_v25, %v2681_v42 }
 0x14c   : > { %v2730_v50 = vpop.f32.mrf.mxu1  ;;  %v1675_v58 = vsel %vm2804_vm1, %v1665_v4, %v2766_v30  ;;  %v1596_v30 = vshrl.u32 %v2787_v55, 3  ;;  %vm2896_vm11 = vmand %vm1648_vm7, %vm1638_vm6  ;;  %vm1639_vm12 = vcmp.ne.s32.totalorder %v2860_v35, 0  ;;  %vm1649_vm13 = vcmp.lt.s32.totalorder %v2860_v35, 0 }
 0x14d   : > { %v2725_v47 = vpop.f32.mrf.mxu0  ;;  %vm2880_vm8 = vcmp.lt.s32.totalorder %v1675_v58, 8  ;;  %v1206_v13 = vadd.f32 %v2712_v33, %v1049_v3  ;;  %v1051_v3 = vadd.f32 %v2715_v37, %v2685_v54  ;;  %vm2944_vm0 = vmand %vm1649_vm13, %vm1639_vm12 }
 0x14e   : > { %v2151_v51 = vpop.f32.mrf.mxu1  ;;  %v1597_v5 = vmul.u32 10, %v1596_v30 }
 0x14f   : > { %v2169_v52 = vpop.f32.mrf.mxu0 }
 0x150   : > { %v2740_v43 = vpop.f32.mrf.mxu1 }
 0x151   : > { %v2735_v56 = vpop.f32.mrf.mxu0 }
 0x152   : > { %v2154_v63 = vpop.f32.mrf.mxu1  ;;  %v1208_v54 = vadd.f32 %v2735_v56, %v1051_v3 }
 0x153   : > { %v2172_v60 = vpop.f32.mrf.mxu0  ;;  %v1047_v63 = vadd.f32 %v2695_v1, %v2677_v28  ;;  %v1666_v28 = vadd.s32 10, %v2773_v40  ;;  %v1667_v1 = vadd.s32 10, %v2778_v49 }
 0x154   : > { %v2754_v8 = vpop.f32.mrf.mxu1  ;;  %v2796_v60 = vadd.s32 56, %v2707_v36 }
 0x155   : > { %v2744_v0 = vpop.f32.mrf.mxu0 }
 0x156   : > { %v2155_v15 = vpop.f32.mrf.mxu1 }
 0x157   : > { %v2173_v11 = vpop.f32.mrf.mxu0  ;;  %v1204_v15 = vadd.f32 %v2701_v12, %v1047_v63  ;;  %v1048_v12 = vadd.f32 %v2699_v21, %v2679_v34  ;;  %v1676_v34 = vsel %vm2816_vm2, %v1666_v28, %v2773_v40  ;;  %v1677_v21 = vsel %vm2825_vm3, %v1667_v1, %v2778_v49 }
 0x158   : > { %v2763_v22 = vpop.f32.mrf.mxu1  ;;  %v2871_v49 = vadd.s32 72, %v2707_v36  ;;  %v1668_v63 = vadd.s32 10, %v2830_v19  ;;  %vm2884_vm9 = vcmp.lt.s32.totalorder %v1676_v34, 8  ;;  %vm2888_vm10 = vcmp.lt.s32.totalorder %v1677_v21, 8 }
 0x159   : > { %v2757_v10 = vpop.f32.mrf.mxu0  ;;  %v1205_v53 = vadd.f32 %v2705_v27, %v1048_v12 }
 0x15a   : > { %v2158_v17 = vpop.f32.mrf.mxu1 }
 0x15b   : > { %v2176_v24 = vpop.f32.mrf.mxu0  ;;  %v2837_v17 = vadd.s32 64, %v2707_v36 }
 0x15c   : > { %v2776_v45 = vpop.f32.mrf.mxu1  ;;  %v2833_v18 = vmul.u32.u64.low 3435973837, %v2796_v60  ;;  %v2834_v24 = vmul.u32.u64.high 3435973837, %v2796_v60, %v2833_v18 }
 0x15d   : > { %v2768_v31 = vpop.f32.mrf.mxu0  ;;  %v1056_v42 = vadd.f32 %v2776_v45, %v2697_v20 }
 0x15e   : > { %v2159_v32 = vpop.f32.mrf.mxu1  ;;  %v1607_v1 = vshrl.u32 %v2834_v24, 3  ;;  %v1678_v24 = vsel %vm2896_vm11, %v1668_v63, %v2830_v19 }
 0x15f   : > { %v2177_v41 = vpop.f32.mrf.mxu0  ;;  %vm2934_vm14 = vcmp.lt.s32.totalorder %v1678_v24, 8 }
 0x160   : > { %v1330_v57 = vpop.f32.mrf.mxu1  ;;  %v1608_v30 = vmul.u32 10, %v1607_v1 }
 0x161   : > { %v2781_v52 = vpop.f32.mrf.mxu0  ;;  %v1369_v38 = vadd.f32 %v1330_v57, %v1204_v15 }
 0x162   : > { %v2186_v6 = vpop.f32.mrf.mxu1  ;;  %v2949_v25 = vsub.s32 %v2796_v60, %v1608_v30 }
 0x163   : > { %v2180_v61 = vpop.f32.mrf.mxu0 }
 0x164   : > { %v1333_v23 = vpop.f32.mrf.mxu1  ;;  %v2867_v40 = vmul.u32.u64.low 3435973837, %v2837_v17  ;;  %v2868_v61 = vmul.u32.u64.high 3435973837, %v2837_v17, %v2867_v40  ;;  %vm1641_vm3 = vcmp.ne.s32.totalorder %v2949_v25, 0 }
 0x165   : > { %v2809_v11 = vpop.f32.mrf.mxu0  ;;  %v1370_v55 = vadd.f32 %v1333_v23, %v1205_v53  ;;  %v2905_v18 = vmul.u32.u64.low 3435973837, %v2871_v49  ;;  %v2906_v23 = vmul.u32.u64.high 3435973837, %v2871_v49, %v2905_v18 }
 0x166   : > { %v2187_v46 = vpop.f32.mrf.mxu1  ;;  %v1618_v40 = vshrl.u32 %v2868_v61, 3 }
 0x167   : > { %v2181_v26 = vpop.f32.mrf.mxu0  ;;  %v1629_v1 = vshrl.u32 %v2906_v23, 3 }
 0x168   : > { %v1338_v44 = vpop.f32.mrf.mxu1  ;;  %v1050_v26 = vadd.f32 %v2709_v29, %v2683_v48  ;;  %v2920_v48 = vsub.s32 %v2771_v39, %v1597_v5  ;;  %v1619_v56 = vmul.u32 10, %v1618_v40  ;;  %v1671_v40 = vadd.s32 10, %v2949_v25 }
 0x169   : > { %v1453_v32 = vpop.f32.mrf.mxu0  ;;  %v1371_v12 = vadd.f32 %v1338_v44, %v1206_v13 }
 0x16a   : > { %v1492_v51 = vadd.f32 %v1453_v32, %v1369_v38  ;;  %v2190_v62 = vpop.f32.mrf.mxu1  ;;  %v1207_v29 = vadd.f32 %v2725_v47, %v1050_v26  ;;  %vm1640_vm15 = vcmp.ne.s32.totalorder %v2920_v48, 0  ;;  %vm1650_vm1 = vcmp.lt.s32.totalorder %v2920_v48, 0 }
 0x16b   : > { %v2208_v57 = vpop.f32.mrf.mxu0  ;;  %v1670_v23 = vadd.s32 10, %v2920_v48  ;;  %vm2970_vm2 = vmand %vm1650_vm1, %vm1640_vm15 }
 0x16c   : > { %1503 = vst.msk [vmem:[%s2851_s18] sm:$0xff] %vm1502_vm4, %v1492_v51  ;;  %v1694_v27 = vsel %vm2841_vm5, %v1492_v51, 0.0  ;;  %v1341_v15 = vpop.f32.mrf.mxu1  ;;  %v1669_v57 = vadd.s32 10, %v2860_v35  ;;  %vm1651_vm5 = vcmp.lt.s32.totalorder %v2949_v25, 0 }
 0x16d   : > { %v1456_v4 = vpop.f32.mrf.mxu0  ;;  %v1731_v14 = vmul.f32 %v1694_v27, %v1694_v27  ;;  %v1704_v38 = vsel %vm1502_vm4, %v1694_v27, 0.0  ;;  %v1372_v39 = vadd.f32 %v1341_v15, %v1207_v29  ;;  %vm3001_vm7 = vmand %vm1651_vm5, %vm1641_vm3 }
 0x16e   : > { %v1493_v28 = vadd.f32 %v1456_v4, %v1370_v55  ;;  %v2191_v46 = vpop.f32.mrf.mxu1  ;;  %v1679_v24 = vsel %vm2944_vm0, %v1669_v57, %v2860_v35 }
 0x16f   : > { %v2209_v7 = vpop.f32.mrf.mxu0  ;;  %v1741_v53 = vsel %vm1502_vm4, %v1731_v14, 0.0  ;;  %v1052_v14 = vadd.f32 %v2730_v50, %v2687_v59  ;;  %v1630_v46 = vmul.u32 10, %v1629_v1  ;;  %vm2987_vm6 = vcmp.lt.s32.totalorder %v1679_v24, 8 }
 0x170   : > { %1504 = vst.msk [vmem:[%s2851_s18 + $0x8] sm:$0xff] %vm1502_vm4, %v1493_v28  ;;  %v1695_v33 = vsel %vm2880_vm8, %v1493_v28, 0.0  ;;  %v1346_v51 = vpop.f32.mrf.mxu1 }
 0x171   : > { %v1705_v41 = vsel %vm1502_vm4, %v1695_v33, 0.0  ;;  %v1732_v58 = vmul.f32 %v1695_v33, %v1695_v33  ;;  %v1461_v32 = vpop.f32.mrf.mxu0  ;;  %v1373_v15 = vadd.f32 %v1346_v51, %v1208_v54  ;;  %v1209_v59 = vadd.f32 %v2744_v0, %v1052_v14 }
 0x172   : > { %v1706_v34 = vadd.f32 %v1705_v41, %v1704_v38  ;;  %v1494_v21 = vadd.f32 %v1461_v32, %v1371_v12  ;;  %v2194_v62 = vpop.f32.mrf.mxu1  ;;  %v2978_v0 = vsub.s32 %v2837_v17, %v1619_v56  ;;  %v1053_v32 = vadd.f32 %v2740_v43, %v2689_v2 }
 0x173   : > { %v1742_v19 = vsel %vm1502_vm4, %v1732_v58, 0.0  ;;  %v2212_v44 = vpop.f32.mrf.mxu0  ;;  %v1680_v2 = vsel %vm2970_vm2, %v1670_v23, %v2920_v48  ;;  %v1054_v48 = vadd.f32 %v2754_v8, %v2691_v9  ;;  %vm1729_vm2 = vcmask 24576  }
 0x174   : > { %v1743_v55 = vadd.f32 %v1742_v19, %v1741_v53  ;;  %1505 = vst.msk [vmem:[%s2851_s18 + $0x10] sm:$0xff] %vm1502_vm4, %v1494_v21  ;;  %v1696_v47 = vsel %vm2884_vm9, %v1494_v21, 0.0  ;;  %v1349_v13 = vpop.f32.mrf.mxu1  ;;  %v1210_v43 = vadd.f32 %v2757_v10, %v1053_v32  ;;  %vm1642_vm8 = vcmp.ne.s32.totalorder %v2978_v0, 0 }
 0x175   : > { %v1707_v27 = vsel %vm1502_vm4, %v1696_v47, 0.0  ;;  %v1733_v63 = vmul.f32 %v1696_v47, %v1696_v47  ;;  %v1464_v4 = vpop.f32.mrf.mxu0  ;;  %v1374_v29 = vadd.f32 %v1349_v13, %v1209_v59  ;;  %vm1652_vm9 = vcmp.lt.s32.totalorder %v2978_v0, 0 }
 0x176   : > { %v1708_v37 = vadd.f32 %v1707_v27, %v1706_v34  ;;  %v1495_v61 = vadd.f32 %v1464_v4, %v1372_v39  ;;  %v2195_v12 = vpop.f32.mrf.mxu1  ;;  %v3008_v10 = vsub.s32 %v2871_v49, %v1630_v46  ;;  %v1672_v49 = vadd.s32 10, %v2978_v0  ;;  %vm3030_vm11 = vmand %vm1652_vm9, %vm1642_vm8 }
 0x177   : > { %v1744_v5 = vsel %vm1502_vm4, %v1733_v63, 0.0  ;;  %v2213_v28 = vpop.f32.mrf.mxu0  ;;  %v1211_v9 = vadd.f32 %v2768_v31, %v1054_v48  ;;  %v1055_v31 = vadd.f32 %v2763_v22, %v2693_v16 }
 0x178   : > { %v1745_v7 = vadd.f32 %v1744_v5, %v1743_v55  ;;  %1506 = vst.msk [vmem:[%s2851_s18 + $0x18] sm:$0xff] %vm1502_vm4, %v1495_v61  ;;  %v1697_v60 = vsel %vm2888_vm10, %v1495_v61, 0.0  ;;  %v1354_v35 = vpop.f32.mrf.mxu1  ;;  %vm3017_vm10 = vcmp.lt.s32.totalorder %v1680_v2, 8  ;;  %v1681_v5 = vsel %vm3001_vm7, %v1671_v40, %v2949_v25 }
 0x179   : > { %v1709_v18 = vsel %vm1502_vm4, %v1697_v60, 0.0  ;;  %v1734_v26 = vmul.f32 %v1697_v60, %v1697_v60  ;;  %v1469_v33 = vpop.f32.mrf.mxu0  ;;  %v1375_v27 = vadd.f32 %v1354_v35, %v1210_v43  ;;  %vm1643_vm12 = vcmp.ne.s32.totalorder %v3008_v10, 0 }
 0x17a   : > { %v1710_v50 = vadd.f32 %v1709_v18, %v1708_v37  ;;  %v1496_v38 = vadd.f32 %v1469_v33, %v1373_v15  ;;  %v2198_v19 = vpop.f32.mrf.mxu1  ;;  %vm1653_vm13 = vcmp.lt.s32.totalorder %v3008_v10, 0  ;;  %v1682_v12 = vsel %vm3030_vm11, %v1672_v49, %v2978_v0 }
 0x17b   : > { %v1746_v41 = vsel %vm1502_vm4, %v1734_v26, 0.0  ;;  %v2216_v58 = vpop.f32.mrf.mxu0  ;;  %v1212_v16 = vadd.f32 %v2781_v52, %v1055_v31  ;;  %v1673_v24 = vadd.s32 10, %v3008_v10  ;;  %vm3054_vm15 = vmand %vm1653_vm13, %vm1643_vm12  ;;  %vm1692_vm0 = vcmp.lt.s32.totalorder %v1682_v12, 8 }
 0x17c   : > { %v1747_v34 = vadd.f32 %v1746_v41, %v1745_v7  ;;  %1507 = vst.msk [vmem:[%s2851_s18 + $0x20] sm:$0xff] %vm1502_vm4, %v1496_v38  ;;  %v1698_v21 = vsel %vm2934_vm14, %v1496_v38, 0.0  ;;  %v1357_v39 = vpop.f32.mrf.mxu1  ;;  %vm1691_vm14 = vcmp.lt.s32.totalorder %v1681_v5, 8 }
 0x17d   : > { %v1711_v30 = vsel %vm1502_vm4, %v1698_v21, 0.0  ;;  %v1735_v53 = vmul.f32 %v1698_v21, %v1698_v21  ;;  %v1472_v51 = vpop.f32.mrf.mxu0  ;;  %v1376_v25 = vadd.f32 %v1357_v39, %v1211_v9  ;;  %v1683_v20 = vsel %vm3054_vm15, %v1673_v24, %v3008_v10 }
 0x17e   : > { %v1712_v17 = vadd.f32 %v1711_v30, %v1710_v50  ;;  %v1497_v57 = vadd.f32 %v1472_v51, %v1374_v29  ;;  %v2199_v54 = vpop.f32.mrf.mxu1  ;;  %v1213_v29 = vadd.f32 %v2809_v11, %v1056_v42  ;;  %vm1693_vm1 = vcmp.lt.s32.totalorder %v1683_v20, 8 }
 0x17f   : > { %v1748_v3 = vsel %vm1502_vm4, %v1735_v53, 0.0  ;;  %v2217_v55 = vpop.f32.mrf.mxu0 }
 0x180   : > { %v1749_v63 = vadd.f32 %v1748_v3, %v1747_v34  ;;  %1508 = vst.msk [vmem:[%s2851_s18 + $0x28] sm:$0xff] %vm1502_vm4, %v1497_v57  ;;  %v1699_v62 = vsel %vm2987_vm6, %v1497_v57, 0.0  ;;  %v1362_v56 = vpop.f32.mrf.mxu1 }
 0x181   : > { %v1713_v4 = vsel %vm1502_vm4, %v1699_v62, 0.0  ;;  %v1736_v6 = vmul.f32 %v1699_v62, %v1699_v62  ;;  %v1477_v37 = vpop.f32.mrf.mxu0  ;;  %v1377_v52 = vadd.f32 %v1362_v56, %v1212_v16 }
 0x182   : > { %v1714_v8 = vadd.f32 %v1713_v4, %v1712_v17  ;;  %v1498_v36 = vadd.f32 %v1477_v37, %v1375_v27  ;;  %v2202_v18 = vpop.f32.mrf.mxu1 }
 0x183   : > { %v1750_v28 = vsel %vm1502_vm4, %v1736_v6, 0.0  ;;  %v2220_v1 = vpop.f32.mrf.mxu0 }
 0x184   : > { %v1751_v14 = vadd.f32 %v1750_v28, %v1749_v63  ;;  %1509 = vst.msk [vmem:[%s2851_s18 + $0x30] sm:$0xff] %vm1502_vm4, %v1498_v36  ;;  %v1700_v15 = vsel %vm3017_vm10, %v1498_v36, 0.0  ;;  %v1365_v59 = vpop.f32.mrf.mxu1 }
 0x185   : > { %v1715_v7 = vsel %vm1502_vm4, %v1700_v15, 0.0  ;;  %v1737_v60 = vmul.f32 %v1700_v15, %v1700_v15  ;;  %v1480_v26 = vpop.f32.mrf.mxu0  ;;  %v1378_v53 = vadd.f32 %v1365_v59, %v1213_v29 }
 0x186   : > { %v1716_v22 = vadd.f32 %v1715_v7, %v1714_v8  ;;  %v1499_v33 = vadd.f32 %v1480_v26, %v1376_v25  ;;  %v2203_v46 = vpop.f32.mrf.mxu1 }
 0x187   : > { %v1752_v23 = vsel %vm1502_vm4, %v1737_v60, 0.0  ;;  %v2221_v50 = vpop.f32.mrf.mxu0 }
 0x188   : > { %v1753_v41 = vadd.f32 %v1752_v23, %v1751_v14  ;;  %1510 = vst.msk [vmem:[%s2851_s18 + $0x38] sm:$0xff] %vm1502_vm4, %v1499_v33  ;;  %v1701_v35 = vsel %vm1691_vm14, %v1499_v33, 0.0 }
 0x189   : > { %v1717_v58 = vsel %vm1502_vm4, %v1701_v35, 0.0  ;;  %v1738_v0 = vmul.f32 %v1701_v35, %v1701_v35  ;;  %v1485_v32 = vpop.f32.mrf.mxu0 }
 0x18a   : > { %v1718_v34 = vadd.f32 %v1717_v58, %v1716_v22  ;;  %v1500_v21 = vadd.f32 %v1485_v32, %v1377_v52 }
 0x18b   : > { %v1754_v45 = vsel %vm1502_vm4, %v1738_v0, 0.0  ;;  %v2224_v30 = vpop.f32.mrf.mxu0 }
 0x18c   : > { %v1755_v19 = vadd.f32 %v1754_v45, %v1753_v41  ;;  %1511 = vst.msk [vmem:[%s2851_s18 + $0x40] sm:$0xff] %vm1502_vm4, %v1500_v21  ;;  %v1702_v51 = vsel %vm1692_vm0, %v1500_v21, 0.0 }
 0x18d   : > { %v1719_v44 = vsel %vm1502_vm4, %v1702_v51, 0.0  ;;  %v1739_v2 = vmul.f32 %v1702_v51, %v1702_v51  ;;  %v1488_v43 = vpop.f32.mrf.mxu0 }
 0x18e   : > { %v1720_v11 = vadd.f32 %v1719_v44, %v1718_v34  ;;  %v1501_v17 = vadd.f32 %v1488_v43, %v1378_v53 }
 0x18f   : > { %v1756_v57 = vsel %vm1502_vm4, %v1739_v2, 0.0  ;;  %v2225_v40 = vpop.f32.mrf.mxu0 }
 0x190   : > { %v1757_v3 = vadd.f32 %v1756_v57, %v1755_v19  ;;  %1512 = vst.msk [vmem:[%s2851_s18 + $0x48] sm:$0xff] %vm1502_vm4, %v1501_v17  ;;  %v1703_v39 = vsel %vm1693_vm1, %v1501_v17, 0.0 }
 0x191   : > { %v1721_v55 = vsel %vm1502_vm4, %v1703_v39, 0.0  ;;  %v1740_v47 = vmul.f32 %v1703_v39, %v1703_v39 }
 0x192   : > { %v1722_v10 = vadd.f32 %v1721_v55, %v1720_v11 }
 0x193   : > { %v1758_v48 = vsel %vm1502_vm4, %v1740_v47, 0.0 }
 0x194   : > { %v1723_v27 = vrot.slane %v1722_v10, 4  ;;  %v1759_v63 = vadd.f32 %v1758_v48, %v1757_v3 }
 0x196   : > { %v1724_v62 = vadd.f32 %v1723_v27, %v1722_v10  ;;  %v1760_v4 = vrot.slane %v1759_v63, 4 }
 0x198   : > { %v1725_v6 = vrot.slane %v1724_v62, 2  ;;  %v1761_v54 = vadd.f32 %v1760_v4, %v1759_v63 }
 0x19a   : > { %v1726_v37 = vadd.f32 %v1725_v6, %v1724_v62  ;;  %v1762_v61 = vrot.slane %v1761_v54, 2 }
 0x19c   : > { %v1727_v49 = vrot.slane %v1726_v37, 1  ;;  %v1763_v9 = vadd.f32 %v1762_v61, %v1761_v54 }
 0x19e   : > { %v1728_v8 = vadd.f32 %v1727_v49, %v1726_v37  ;;  %v1764_v36 = vrot.slane %v1763_v9, 1 }
 0x1a0   : > { %1730 = vst.msk [vmem:[%s211_s21] sm:$0x1] %vm1729_vm2, %v1728_v8  ;;  %v1765_v5 = vadd.f32 %v1764_v36, %v1763_v9 }
 0x1a2   : > { %1766 = vst.msk [vmem:[%s214_s24] sm:$0x1] %vm1729_vm2, %v1765_v5 }
 0x1a3 PF: > { %s15_s15 = sadd.s32 1, %s2298_s15  }
 0x1a4   : > { %p12_p4 = scmp.ge.s32.totalorder %s15_s15, 4  }
 0x1a6   :  { %14 = sbr.rel (!%p12_p4) target bundleno = 1 (0x1), region = 90 }

// kernel: decoder_block_forward.13
= control target key start
LH: loop header
LB: loop body
LE: loop exit
PB: predicated region body
PF: predicated region fallthrough
CT: control target
= control target key end

     0   :  { %s813_s15 = smov 0   ;;  %s890_s0 = inlined_call_operand.vmem [shape: bf16[2,72,4], index: 0, kind: input, shape index: {}]   ;;  %s891_s1 = inlined_call_operand.vmem [shape: bf16[2,4,4], index: 1, kind: input, shape index: {}]   ;;  %s892_s2 = inlined_call_operand.vmem [shape: f32[2,64,4], index: 2, kind: output, shape index: {0}]   ;;  %s893_s3 = inlined_call_operand.vmem [shape: f32[2,1,4], index: 3, kind: output, shape index: {1}]   ;;  %s894_s4 = inlined_call_operand.vmem [shape: f32[2,1,4], index: 4, kind: output, shape index: {2}]  }
   0x1 LB: > { %s703_s16 = sadd.s32 4294967295, %s786_s15   ;;  %p707_p0 = scmp.ge.s32.totalorder %s786_s15, 1  ;;  %s786_s15 = sphi %s813_s15, %s15_s15  }
   0x2   : > { %p167_p1 = scmp.lt.s32.totalorder %s786_s15, 3 }
   0x4   : > { %p168_p2 = pnand %p707_p0, %p167_p1 }
   0x5   : > { %p199_p3 = scmp.lt.s32.totalorder (!%p168_p2), %s703_s16, 1 }
   0x6   : > { %171 = sbr.rel (%p168_p2) target bundleno = 251 (0xfb), region = 28 }
   0xb   : > { %v711_v0 = vld [vmem:[%s891_s1 + $0x2] sm:$0x3]  ;;  %vm261_vm0 = vcmask 1041408   ;;  %v224_v1 = vld [vmem:[%s891_s1] sm:$0x3]  ;;  %s896_s16 = smov (!%p199_p3, %s703_s16), 1 }
   0xc   : > { %761 = vmatprep.subr.msk.bf16.mxu0 %vm261_vm0, %v711_v0  ;;  %762 = vmatprep.subr.msk.bf16.mxu1 %vm261_vm0, %v224_v1  ;;  %v263_v2 = vsel %vm261_vm0, %v711_v0, 0  ;;  %v349_v3 = vsel %vm261_vm0, %v224_v1, 0  ;;  %s763_s21 = smul.u32 36, %s896_s16  ;;  %vm248_vm1 = vcmask 31744   ;;  %s730_s25 = sshll.u32 %s896_s16, 6  ;;  %vm566_vm2 = vcmask 24576  }
   0xd   : > { %742 = vmatpush3.bf16.msra.mxu0 %v263_v2  ;;  %752 = vmatpush3.bf16.msra.mxu1 %v349_v3  ;;  %s845_s28 = scalar_lea.vmem %s892_s2, %s730_s25  ;;  %s211_s5 = scalar_lea.vmem %s893_s3, %s896_s16 }
   0xe   : > { %s203_s24 = scalar_lea.vmem %s890_s0, %s763_s21  ;;  %s214_s8 = scalar_lea.vmem %s894_s4, %s896_s16 }
   0xf   : > { %v217_v4 = vld [vmem:[%s203_s24 + $0x4] sm:$0xf]  ;;  %v218_v5 = vld [vmem:[%s203_s24 + $0x8] sm:$0xf]  ;;  %v219_v6 = vld [vmem:[%s203_s24 + $0xc] sm:$0xf] }
  0x10   : > { %v220_v7 = vld [vmem:[%s203_s24 + $0x10] sm:$0xf]  ;;  %v712_v8 = vcombine.low %v217_v4, %v218_v5  ;;  %v721_v9 = vcombine.low %v218_v5, %v219_v6  ;;  %v216_v10 = vld [vmem:[%s203_s24] sm:$0xf]  ;;  %v221_v11 = vld [vmem:[%s203_s24 + $0x14] sm:$0xf] }
  0x11   : > { %v713_v12 = vcombine.low %v219_v6, %v220_v7  ;;  %v720_v13 = vcombine.low %v216_v10, %v217_v4  ;;  %v222_v14 = vld [vmem:[%s203_s24 + $0x18] sm:$0xf]  ;;  %v722_v15 = vcombine.low %v220_v7, %v221_v11  ;;  %v223_v17 = vld [vmem:[%s203_s24 + $0x1c] sm:$0xf]  ;;  %v225_v18 = vld [vmem:[%s203_s24 + $0x20] sm:$0xf] }
  0x12   : > { %743 = vmatprep.mubr.msk.bf16.mxu0 %vm248_vm1, %v712_v8  ;;  %v714_v16 = vcombine.low %v221_v11, %v222_v14  ;;  %v715_v19 = vcombine.low %v223_v17, %v225_v18  ;;  %v723_v20 = vcombine.low %v222_v14, %v223_v17 }
  0x13   : > { %753 = vmatprep.mubr.msk.bf16.mxu1 %vm248_vm1, %v720_v13  ;;  %744 = vmatmul.mubr.msk.bf16.vlgmr.msra.gmra.mxu0 %vm248_vm1, %v713_v12 }
  0x14   : > { %754 = vmatmul.mubr.msk.bf16.vlgmr.msra.gmra.mxu1 %vm248_vm1, %v721_v9  ;;  %747 = vmatprep.mubr.msk.bf16.mxu0 %vm248_vm1, %v714_v16 }
  0x15   : > { %757 = vmatprep.mubr.msk.bf16.mxu1 %vm248_vm1, %v722_v15 }
  0x1b   : > { %748 = vmatmul.mubr.msk.bf16.gmra.mxu0 %vm248_vm1, %v715_v19 }
  0x1c   : > { %758 = vmatmul.mubr.msk.bf16.gmra.mxu1 %vm248_vm1, %v723_v20 }
  0xd3   : > { %v745_v21 = vpop.f32.mrf.mxu0 }
  0xd4   : > { %v755_v22 = vpop.f32.mrf.mxu1 }
  0xd5   : > { %v394_v23 = vadd.f32 %v755_v22, %v745_v21  ;;  %v299_v24 = vpop.f32.mrf.mxu0 }
  0xd6   : > { %v385_v25 = vpop.f32.mrf.mxu1 }
  0xd7   : > { %418 = vst.msk [vmem:[%s845_s28 + $0x10] sm:$0xff] %vm248_vm1, %v394_v23  ;;  %v386_v26 = vadd.f32 %v385_v25, %v299_v24  ;;  %v746_v27 = vpop.f32.mrf.mxu0  ;;  %v570_v35 = vmul.f32 %v394_v23, %v394_v23  ;;  %v548_v42 = vsel %vm248_vm1, %v394_v23, 0.0 }
  0xd8   : > { %v756_v28 = vpop.f32.mrf.mxu1 }
  0xd9   : > { %416 = vst.msk [vmem:[%s845_s28] sm:$0xff] %vm248_vm1, %v386_v26  ;;  %v397_v29 = vadd.f32 %v756_v28, %v746_v27  ;;  %v302_v30 = vpop.f32.mrf.mxu0  ;;  %v568_v32 = vmul.f32 %v386_v26, %v386_v26  ;;  %v545_v37 = vsel %vm248_vm1, %v386_v26, 0.0  ;;  %v579_v53 = vsel %vm248_vm1, %v570_v35, 0.0 }
  0xda   : > { %v388_v31 = vpop.f32.mrf.mxu1 }
  0xdb   : > { %419 = vst.msk [vmem:[%s845_s28 + $0x18] sm:$0xff] %vm248_vm1, %v397_v29  ;;  %v389_v33 = vadd.f32 %v388_v31, %v302_v30  ;;  %v749_v34 = vpop.f32.mrf.mxu0  ;;  %v576_v45 = vsel %vm248_vm1, %v568_v32, 0.0  ;;  %v571_v46 = vmul.f32 %v397_v29, %v397_v29  ;;  %v550_v54 = vsel %vm248_vm1, %v397_v29, 0.0 }
  0xdc   : > { %v759_v36 = vpop.f32.mrf.mxu1 }
  0xdd   : > { %417 = vst.msk [vmem:[%s845_s28 + $0x8] sm:$0xff] %vm248_vm1, %v389_v33  ;;  %v546_v38 = vsel %vm248_vm1, %v389_v33, 0.0  ;;  %v569_v39 = vmul.f32 %v389_v33, %v389_v33  ;;  %v410_v40 = vadd.f32 %v759_v36, %v749_v34  ;;  %v315_v41 = vpop.f32.mrf.mxu0  ;;  %v581_v61 = vsel %vm248_vm1, %v571_v46, 0.0 }
  0xde   : > { %v547_v43 = vadd.f32 %v546_v38, %v545_v37  ;;  %v401_v44 = vpop.f32.mrf.mxu1 }
  0xdf   : > { %v577_v47 = vsel %vm248_vm1, %v569_v39, 0.0  ;;  %422 = vst.msk [vmem:[%s845_s28 + $0x30] sm:$0xff] %vm248_vm1, %v410_v40  ;;  %v402_v48 = vadd.f32 %v401_v44, %v315_v41  ;;  %v750_v49 = vpop.f32.mrf.mxu0  ;;  %v574_v2 = vmul.f32 %v410_v40, %v410_v40  ;;  %v556_v8 = vsel %vm248_vm1, %v410_v40, 0.0 }
  0xe0   : > { %v549_v50 = vadd.f32 %v548_v42, %v547_v43  ;;  %v578_v51 = vadd.f32 %v577_v47, %v576_v45  ;;  %v760_v52 = vpop.f32.mrf.mxu1 }
  0xe1   : > { %420 = vst.msk [vmem:[%s845_s28 + $0x20] sm:$0xff] %vm248_vm1, %v402_v48  ;;  %v572_v55 = vmul.f32 %v402_v48, %v402_v48  ;;  %v413_v56 = vadd.f32 %v760_v52, %v750_v49  ;;  %v318_v57 = vpop.f32.mrf.mxu0  ;;  %v552_v62 = vsel %vm248_vm1, %v402_v48, 0.0  ;;  %v587_v13 = vsel %vm248_vm1, %v574_v2, 0.0 }
  0xe2   : > { %v580_v58 = vadd.f32 %v579_v53, %v578_v51  ;;  %v551_v59 = vadd.f32 %v550_v54, %v549_v50  ;;  %v404_v60 = vpop.f32.mrf.mxu1 }
  0xe3   : > { %423 = vst.msk [vmem:[%s845_s28 + $0x38] sm:$0xff] %vm248_vm1, %v413_v56  ;;  %v405_v63 = vadd.f32 %v404_v60, %v318_v57  ;;  %v583_v3 = vsel %vm248_vm1, %v572_v55, 0.0  ;;  %v575_v9 = vmul.f32 %v413_v56, %v413_v56  ;;  %v558_v14 = vsel %vm248_vm1, %v413_v56, 0.0 }
  0xe4   : > { %v553_v0 = vadd.f32 %v552_v62, %v551_v59  ;;  %v582_v1 = vadd.f32 %v581_v61, %v580_v58 }
  0xe5   : > { %421 = vst.msk [vmem:[%s845_s28 + $0x28] sm:$0xff] %vm248_vm1, %v405_v63  ;;  %v554_v4 = vsel %vm248_vm1, %v405_v63, 0.0  ;;  %v573_v5 = vmul.f32 %v405_v63, %v405_v63  ;;  %v589_v17 = vsel %vm248_vm1, %v575_v9, 0.0 }
  0xe6   : > { %v584_v6 = vadd.f32 %v583_v3, %v582_v1  ;;  %v555_v7 = vadd.f32 %v554_v4, %v553_v0 }
  0xe7   : > { %v585_v10 = vsel %vm248_vm1, %v573_v5, 0.0 }
  0xe8   : > { %v557_v11 = vadd.f32 %v556_v8, %v555_v7  ;;  %v586_v12 = vadd.f32 %v585_v10, %v584_v6 }
  0xea   : > { %v559_v15 = vadd.f32 %v558_v14, %v557_v11  ;;  %v588_v16 = vadd.f32 %v587_v13, %v586_v12 }
  0xec   : > { %v560_v18 = vrot.slane %v559_v15, 4  ;;  %v590_v19 = vadd.f32 %v589_v17, %v588_v16 }
  0xee   : > { %v561_v20 = vadd.f32 %v560_v18, %v559_v15  ;;  %v591_v21 = vrot.slane %v590_v19, 4 }
  0xf0   : > { %v562_v22 = vrot.slane %v561_v20, 2  ;;  %v592_v23 = vadd.f32 %v591_v21, %v590_v19 }
  0xf2   : > { %v563_v24 = vadd.f32 %v562_v22, %v561_v20  ;;  %v593_v25 = vrot.slane %v592_v23, 2 }
  0xf4   : > { %v564_v26 = vrot.slane %v563_v24, 1  ;;  %v594_v27 = vadd.f32 %v593_v25, %v592_v23 }
  0xf6   : > { %v565_v28 = vadd.f32 %v564_v26, %v563_v24  ;;  %v595_v29 = vrot.slane %v594_v27, 1 }
  0xf8   : > { %567 = vst.msk [vmem:[%s211_s5] sm:$0x1] %vm566_vm2, %v565_v28  ;;  %v596_v30 = vadd.f32 %v595_v29, %v594_v27 }
  0xfa   : > { %597 = vst.msk [vmem:[%s214_s8] sm:$0x1] %vm566_vm2, %v596_v30 }
  0xfb PF: > { %s15_s15 = sadd.s32 1, %s786_s15  }
  0xfc   : > { %p12_p4 = scmp.ge.s32.totalorder %s15_s15, 4  }
  0xfe   :  { %14 = sbr.rel (!%p12_p4) target bundleno = 1 (0x1), region = 83 }

// kernel: decoder_block_forward.14
= control target key start
LH: loop header
LB: loop body
LE: loop exit
PB: predicated region body
PF: predicated region fallthrough
CT: control target
= control target key end

     0   :  { %s1340_s15 = smov 0   ;;  %s1820_s0 = inlined_call_operand.vmem [shape: bf16[2,82,4], index: 0, kind: input, shape index: {}]   ;;  %s1821_s1 = inlined_call_operand.vmem [shape: bf16[4,4,4], index: 1, kind: input, shape index: {}]   ;;  %s1822_s2 = inlined_call_operand.vmem [shape: f32[2,72,4], index: 2, kind: output, shape index: {0}]   ;;  %s1823_s3 = inlined_call_operand.vmem [shape: f32[2,1,4], index: 3, kind: output, shape index: {1}]   ;;  %s1824_s4 = inlined_call_operand.vmem [shape: f32[2,1,4], index: 4, kind: output, shape index: {2}]  }
   0x1 LB: > { %s1107_s16 = sadd.s32 4294967295, %s1311_s15   ;;  %p1111_p0 = scmp.ge.s32.totalorder %s1311_s15, 1  ;;  %s1311_s15 = sphi %s1340_s15, %s15_s15  }
   0x2   : > { %p167_p1 = scmp.lt.s32.totalorder %s1311_s15, 3 }
   0x4   : > { %p168_p2 = pnand %p1111_p0, %p167_p1 }
   0x5   : > { %p199_p3 = scmp.lt.s32.totalorder (!%p168_p2), %s1107_s16, 1 }
   0x6   : > { %171 = sbr.rel (%p168_p2) target bundleno = 312 (0x138), region = 28 }
   0xb   : > { %v225_v0 = vld [vmem:[%s1821_s1] sm:$0x3]  ;;  %vm310_vm0 = vcmask 1041408   ;;  %v1313_v1 = vmov 0.0   ;;  %v1114_v3 = vld [vmem:[%s1821_s1 + $0x2] sm:$0x3] }
   0xc   : > { %1197 = vmatprep.subr.bf16.mxu1 %v1313_v1  ;;  %v399_v2 = vsel %vm310_vm0, %v225_v0, 0  ;;  %1175 = vmatprep.subr.bf16.mxu0 %v1313_v1  ;;  %vm1314_vm1 = vmmov 0   ;;  %v312_v4 = vsel %vm310_vm0, %v1114_v3, 0  ;;  %s1856_s16 = smov (!%p199_p3, %s1107_s16), 1  ;;  %v1142_v5 = vld [vmem:[%s1821_s1 + $0x6] sm:$0x3] }
   0xd   : > { %1198 = vmatpush3.bf16.msra.mxu1 %v399_v2  ;;  %1199 = vmatprep.mubr.msk.bf16.mxu1 %vm1314_vm1, %v1313_v1  ;;  %s1263_s21 = smul.u32 44, %s1856_s16  ;;  %vm294_vm2 = vcmask 31744   ;;  %v680_v7 = vsel %vm310_vm0, %v1142_v5, 0  ;;  %v1131_v14 = vld [vmem:[%s1821_s1 + $0x4] sm:$0x3]  ;;  %vm654_vm4 = vcmask 1046528   ;;  %s211_s9 = scalar_lea.vmem %s1823_s3, %s1856_s16 }
   0xe   : > { %1176 = vmatpush3.bf16.msra.mxu0 %v312_v4  ;;  %1177 = vmatprep.mubr.msk.bf16.mxu0 %vm1314_vm1, %v1313_v1  ;;  %vm254_vm3 = vsmask.f32 7424  ;;  %v565_v19 = vsel %vm310_vm0, %v1131_v14, 0  ;;  %s1264_s29 = smul.u32 72, %s1856_s16  ;;  %s214_s12 = scalar_lea.vmem %s1824_s4, %s1856_s16 }
   0xf   : > { %1219 = vmatprep.subr.bf16.mxu0 %v1313_v1  ;;  %1241 = vmatprep.subr.bf16.mxu1 %v1313_v1  ;;  %s1373_s26 = scalar_lea.vmem %s1820_s0, %s1263_s21 }
  0x10   : > { %v1293_v6 = vld [vmem:[%s1373_s26] sm:$0xff]   ;;  %v1294_v8 = vld [vmem:[%s1373_s26 + $0x8] sm:$0xff]   ;;  %v1295_v12 = vld [vmem:[%s1373_s26 + $0x10] sm:$0xff]   ;;  %s1568_s6 = scalar_lea.vmem %s1822_s2, %s1264_s29 }
  0x11   : > { %1200 = vmatmul.mubr.msk.bf16.vlgmr.msra.gmra.mxu1 %vm294_vm2, %v1293_v6  ;;  %v256_v9 = vshrl.u32 %v1293_v6, 16  ;;  %v258_v10 = vshll.u32 %v1293_v6, 16  ;;  %v263_v11 = vshll.u32 %v1294_v8, 16  ;;  %v267_v17 = vshrl.u32 %v1294_v8, 16  ;;  %v1296_v23 = vld [vmem:[%s1373_s26 + $0x18] sm:$0xff]   ;;  %v1300_v43 = vld [vmem:[%s1373_s26 + $0xc] sm:$0xff]  }
  0x12   : > { %1242 = vmatpush3.bf16.msra.mxu1 %v680_v7  ;;  %1203 = vmatprep.mubr.msk.bf16.mxu1 %vm1314_vm1, %v1313_v1  ;;  %v271_v18 = vshll.u32 %v1295_v12, 16  ;;  %v275_v25 = vshrl.u32 %v1295_v12, 16  ;;  %v279_v26 = vshll.u32 %v1296_v23, 16  ;;  %v224_v27 = vld [vmem:[%s1373_s26 + $0x20] sm:$0xf]  ;;  %v283_v33 = vshrl.u32 %v1296_v23, 16 }
  0x13   : > { %v260_v13 = vrot.slane %v258_v10, 1  ;;  %v265_v15 = vrot.slane %v263_v11, 1  ;;  %v226_v28 = vld [vmem:[%s1373_s26 + $0x24] sm:$0x1]  ;;  %v474_v38 = vld [vmem:[%s1373_s26 + $0x8] sm:$0xf]  ;;  %v1125_v41 = vcombine.low %v224_v27, %v224_v27 }
  0x14   : > { %v273_v22 = vrot.slane %v271_v18, 1  ;;  %v281_v30 = vrot.slane %v279_v26, 1  ;;  %v1119_v31 = vcombine.low %v224_v27, %v226_v28  ;;  %v473_v37 = vld [vmem:[%s1373_s26 + $0x4] sm:$0xf]  ;;  %v656_v48 = vrot.slane %v1300_v43, 1  ;;  %v1302_v54 = vld [vmem:[%s1373_s26 + $0x14] sm:$0xff]  }
  0x15   : > { %v261_v16 = vor.u32 %v260_v13, %v256_v9  ;;  %v269_v21 = vor.u32 %v267_v17, %v265_v15  ;;  %v648_v39 = vld [vmem:[%s1373_s26 + $0x4] sm:$0xe]  ;;  %v1132_v42 = vcombine.low %v473_v37, %v474_v38  ;;  %v518_v52 = vshll.u32 %v1300_v43, 16  ;;  %v1303_v62 = vld [vmem:[%s1373_s26 + $0x1c] sm:$0xff]  }
  0x16   : > { %v277_v29 = vor.u32 %v275_v25, %v273_v22  ;;  %v287_v34 = vshll.u32 %v1119_v31, 16  ;;  %v285_v35 = vor.u32 %v283_v33, %v281_v30  ;;  %v1143_v44 = vcombine.low %v648_v39, %v474_v38  ;;  %v1304_v7 = vld [vmem:[%s1373_s26 + $0x24] sm:$0x1f]  }
  0x17   : > { %v266_v20 = vsel %vm254_vm3, %v261_v16, %v265_v15  ;;  %v274_v24 = vsel %vm254_vm3, %v269_v21, %v273_v22  ;;  %v291_v45 = vshrl.u32 %v1119_v31, 16  ;;  %v513_v46 = vshll.u32 %v1132_v42, 16 }
  0x18   : > { %1178 = vmatmul.mubr.msk.bf16.vlgmr.msra.gmra.mxu0 %vm294_vm2, %v266_v20  ;;  %v282_v32 = vsel %vm254_vm3, %v277_v29, %v281_v30  ;;  %v289_v36 = vrot.slane %v287_v34, 1  ;;  %v655_v47 = vrot.slane %v1143_v44, 1  ;;  %v511_v50 = vshrl.u32 %v1132_v42, 16 }
  0x19   : > { %1220 = vmatpush3.bf16.msra.mxu0 %v565_v19  ;;  %1204 = vmatmul.mubr.msk.bf16.gmra.mxu1 %vm294_vm2, %v1294_v8  ;;  %v515_v51 = vrot.slane %v513_v46, 1  ;;  %v520_v56 = vrot.slane %v518_v52, 1  ;;  %v658_v57 = vrot.slane %v1302_v54, 1  ;;  %v522_v59 = vshrl.u32 %v1300_v43, 16 }
  0x1a   : > { %1181 = vmatprep.mubr.msk.bf16.mxu0 %vm1314_vm1, %v1313_v1  ;;  %1207 = vmatprep.mubr.msk.bf16.mxu1 %vm1314_vm1, %v1313_v1  ;;  %v290_v40 = vsel %vm254_vm3, %v285_v35, %v289_v36  ;;  %v293_v49 = vor.u32 %v291_v45, %v289_v36  ;;  %v657_v53 = vsel %vm654_vm4, %v655_v47, %v656_v48  ;;  %v526_v60 = vshll.u32 %v1302_v54, 16 }
  0x1b   : > { %v516_v55 = vor.u32 %v515_v51, %v511_v50  ;;  %v659_v61 = vsel %vm654_vm4, %v656_v48, %v658_v57  ;;  %v524_v63 = vor.u32 %v522_v59, %v520_v56  ;;  %v660_v2 = vrot.slane %v1303_v62, 1 }
  0x1c   : > { %v528_v0 = vrot.slane %v526_v60, 1  ;;  %v530_v4 = vshrl.u32 %v1302_v54, 16  ;;  %v534_v5 = vshll.u32 %v1303_v62, 16  ;;  %v662_v10 = vrot.slane %v1304_v7, 1 }
  0x1d   : > { %v521_v58 = vsel %vm254_vm3, %v516_v55, %v520_v56  ;;  %v661_v6 = vsel %vm654_vm4, %v658_v57, %v660_v2  ;;  %v542_v13 = vshll.u32 %v1304_v7, 16  ;;  %v546_v18 = vshrl.u32 %v1304_v7, 16 }
  0x1e   : > { %v529_v3 = vsel %vm254_vm3, %v524_v63, %v528_v0  ;;  %v532_v8 = vor.u32 %v530_v4, %v528_v0  ;;  %v536_v9 = vrot.slane %v534_v5, 1  ;;  %v663_v14 = vsel %vm654_vm4, %v660_v2, %v662_v10 }
  0x1f   : > { %v544_v16 = vrot.slane %v542_v13, 1  ;;  %v772_v35 = vlaneseq }
  0x20   : > { %1182 = vmatmul.mubr.msk.bf16.gmra.mxu0 %vm294_vm2, %v274_v24  ;;  %v537_v11 = vsel %vm254_vm3, %v532_v8, %v536_v9 }
  0x21   : > { %1208 = vmatmul.mubr.msk.bf16.gmra.mxu1 %vm294_vm2, %v1295_v12  ;;  %1185 = vmatprep.mubr.msk.bf16.mxu0 %vm1314_vm1, %v1313_v1  ;;  %v538_v12 = vshrl.u32 %v1303_v62, 16  ;;  %v548_v19 = vor.u32 %v546_v18, %v544_v16 }
  0x22   : > { %1211 = vmatprep.mubr.msk.bf16.mxu1 %vm1314_vm1, %v1313_v1 }
  0x23   : > { %v540_v15 = vor.u32 %v538_v12, %v536_v9 }
  0x25   : > { %v545_v17 = vsel %vm254_vm3, %v540_v15, %v544_v16 }
  0x28   : > { %1186 = vmatmul.mubr.msk.bf16.gmra.mxu0 %vm294_vm2, %v282_v32 }
  0x29   : > { %1212 = vmatmul.mubr.msk.bf16.gmra.mxu1 %vm294_vm2, %v1296_v23  ;;  %1189 = vmatprep.mubr.msk.bf16.mxu0 %vm1314_vm1, %v1313_v1 }
  0x2a   : > { %1215 = vmatprep.mubr.msk.bf16.mxu1 %vm1314_vm1, %v1313_v1 }
  0x30   : > { %1190 = vmatmul.mubr.msk.bf16.gmra.mxu0 %vm294_vm2, %v290_v40  ;;  %v1481_v40 = vshrl.u32 %v772_v35, 7 }
  0x31   : > { %1216 = vmatmul.mubr.msk.bf16.gmra.mxu1 %vm294_vm2, %v1125_v41  ;;  %1193 = vmatprep.mubr.msk.bf16.mxu0 %vm1314_vm1, %v1313_v1 }
  0x32   : > { %1243 = vmatprep.mubr.msk.bf16.mxu1 %vm1314_vm1, %v1313_v1  ;;  %v774_v43 = vadd.s32 8, %v1481_v40  ;;  %v775_v51 = vadd.s32 16, %v1481_v40  ;;  %v1499_v54 = vadd.s32 24, %v1481_v40  ;;  %v1514_v62 = vadd.s32 40, %v1481_v40 }
  0x33   : > { %v1504_v56 = vmul.u32.u64.low 3817748708, %v1481_v40  ;;  %v1505_v57 = vmul.u32.u64.high 3817748708, %v1481_v40, %v1504_v56  ;;  %v1523_v4 = vadd.s32 48, %v1481_v40  ;;  %v1535_v13 = vadd.s32 56, %v1481_v40 }
  0x35   : > { %v1540_v15 = vmul.u32.u64.low 3817748708, %v1523_v4  ;;  %v1541_v16 = vmul.u32.u64.high 3817748708, %v1523_v4, %v1540_v15  ;;  %v788_v18 = vshrl.u32 %v1505_v57, 3 }
  0x38   : > { %1194 = vmatmul.mubr.msk.bf16.gmra.mxu0 %vm294_vm2, %v293_v49  ;;  %v1492_v48 = vmul.u32.u64.low 3817748708, %v774_v43  ;;  %v1493_v49 = vmul.u32.u64.high 3817748708, %v774_v43, %v1492_v48 }
  0x39   : > { %1244 = vmatmul.mubr.msk.bf16.vlgmr.msra.gmra.mxu1 %vm294_vm2, %v657_v53  ;;  %1221 = vmatprep.mubr.msk.bf16.mxu0 %vm1314_vm1, %v1313_v1 }
  0x3a   : > { %1247 = vmatprep.mubr.msk.bf16.mxu1 %vm1314_vm1, %v1313_v1 }
  0x40   : > { %1222 = vmatmul.mubr.msk.bf16.vlgmr.msra.gmra.mxu0 %vm294_vm2, %v521_v58  ;;  %v1508_v58 = vadd.s32 32, %v1481_v40 }
  0x41   : > { %1248 = vmatmul.mubr.msk.bf16.gmra.mxu1 %vm294_vm2, %v659_v61  ;;  %1225 = vmatprep.mubr.msk.bf16.mxu0 %vm1314_vm1, %v1313_v1  ;;  %v1510_v60 = vmul.u32.u64.low 3817748708, %v775_v51  ;;  %v1511_v61 = vmul.u32.u64.high 3817748708, %v775_v51, %v1510_v60 }
  0x42   : > { %1251 = vmatprep.mubr.msk.bf16.mxu1 %vm1314_vm1, %v1313_v1  ;;  %v1527_v7 = vmul.u32.u64.low 3817748708, %v1508_v58  ;;  %v1528_v8 = vmul.u32.u64.high 3817748708, %v1508_v58, %v1527_v7 }
  0x48   : > { %1226 = vmatmul.mubr.msk.bf16.gmra.mxu0 %vm294_vm2, %v529_v3  ;;  %v1519_v2 = vmul.u32.u64.low 3817748708, %v1499_v54  ;;  %v1520_v3 = vmul.u32.u64.high 3817748708, %v1499_v54, %v1519_v2 }
  0x49   : > { %1252 = vmatmul.mubr.msk.bf16.gmra.mxu1 %vm294_vm2, %v661_v6  ;;  %1229 = vmatprep.mubr.msk.bf16.mxu0 %vm1314_vm1, %v1313_v1  ;;  %v799_v6 = vshrl.u32 %v1493_v49, 3  ;;  %v1556_v49 = vadd.s32 64, %v1481_v40 }
  0x4a   : > { %1255 = vmatprep.mubr.msk.bf16.mxu1 %vm1314_vm1, %v1313_v1 }
  0x50   : > { %1230 = vmatmul.mubr.msk.bf16.gmra.mxu0 %vm294_vm2, %v537_v11 }
  0x51   : > { %1256 = vmatmul.mubr.msk.bf16.gmra.mxu1 %vm294_vm2, %v663_v14  ;;  %1233 = vmatprep.mubr.msk.bf16.mxu0 %vm1314_vm1, %v1313_v1 }
  0x52   : > { %1259 = vmatprep.mubr.msk.bf16.mxu1 %vm1314_vm1, %v1313_v1 }
  0x58   : > { %1234 = vmatmul.mubr.msk.bf16.gmra.mxu0 %vm294_vm2, %v545_v17 }
  0x59   : > { %1260 = vmatmul.mubr.msk.bf16.gmra.mxu1 %vm294_vm2, %v662_v10  ;;  %1237 = vmatprep.mubr.msk.bf16.mxu0 %vm1314_vm1, %v1313_v1  ;;  %v1531_v10 = vmul.u32.u64.low 3817748708, %v1514_v62  ;;  %v1532_v11 = vmul.u32.u64.high 3817748708, %v1514_v62, %v1531_v10 }
  0x5b   : > { %v843_v48 = vshrl.u32 %v1532_v11, 3 }
  0x5d   : > { %v844_v2 = vmul.u32 9, %v843_v48 }
  0x60   : > { %1238 = vmatmul.mubr.msk.bf16.gmra.mxu0 %vm294_vm2, %v548_v19  ;;  %v800_v19 = vmul.u32 9, %v799_v6 }
  0xd1   : > { %v1461_v20 = vpop.f32.mrf.mxu1 }
  0xd3   : > { %v1201_v21 = vpop.f32.mrf.mxu1 }
  0xd5   : > { %v1463_v22 = vpop.f32.mrf.mxu1 }
  0xd7   : > { %v1202_v23 = vpop.f32.mrf.mxu1 }
  0xd8   : > { %v1465_v24 = vpop.f32.mrf.mxu0  ;;  %v810_v23 = vshrl.u32 %v1511_v61, 3 }
  0xd9   : > { %v1467_v25 = vpop.f32.mrf.mxu1 }
  0xda   : > { %v1179_v26 = vpop.f32.mrf.mxu0 }
  0xdb   : > { %v1205_v27 = vpop.f32.mrf.mxu1 }
  0xdc   : > { %v1469_v28 = vpop.f32.mrf.mxu0 }
  0xdd   : > { %v1471_v29 = vpop.f32.mrf.mxu1 }
  0xde   : > { %v1180_v1 = vpop.f32.mrf.mxu0 }
  0xdf   : > { %v1206_v30 = vpop.f32.mrf.mxu1  ;;  %v1546_v27 = vmul.u32.u64.low 3817748708, %v1535_v13  ;;  %v1547_v1 = vmul.u32.u64.high 3817748708, %v1535_v13, %v1546_v27 }
  0xe0   : > { %v1473_v31 = vpop.f32.mrf.mxu0 }
  0xe1   : > { %v1475_v32 = vpop.f32.mrf.mxu1 }
  0xe2   : > { %v1183_v33 = vpop.f32.mrf.mxu0 }
  0xe3   : > { %v1209_v34 = vpop.f32.mrf.mxu1  ;;  %v821_v33 = vshrl.u32 %v1520_v3, 3 }
  0xe4   : > { %v1477_v36 = vpop.f32.mrf.mxu0  ;;  %v789_v34 = vmul.u32 9, %v788_v18 }
  0xe5   : > { %v1479_v37 = vpop.f32.mrf.mxu1  ;;  %v822_v57 = vmul.u32 9, %v821_v33 }
  0xe6   : > { %v1184_v38 = vpop.f32.mrf.mxu0  ;;  %v1562_v60 = vsub.s32 %v1481_v40, %v789_v34  ;;  %v439_v40 = vadd.f32 %v1463_v22, %v1469_v28 }
  0xe7   : > { %v1210_v39 = vpop.f32.mrf.mxu1  ;;  %v1550_v38 = vsub.s32 %v774_v43, %v800_v19  ;;  %v1583_v10 = vsub.s32 %v1499_v54, %v822_v57 }
  0xe8   : > { %v1483_v41 = vpop.f32.mrf.mxu0  ;;  %v832_v39 = vshrl.u32 %v1528_v8, 3  ;;  %v865_v8 = vshrl.u32 %v1547_v1, 3  ;;  %vm881_vm7 = vcmp.ne.s32.totalorder %v1562_v60, 0  ;;  %vm890_vm8 = vcmp.lt.s32.totalorder %v1562_v60, 0 }
  0xe9   : > { %v1485_v42 = vpop.f32.mrf.mxu1  ;;  %vm882_vm5 = vcmp.ne.s32.totalorder %v1550_v38, 0  ;;  %vm891_vm6 = vcmp.lt.s32.totalorder %v1550_v38, 0  ;;  %v909_v22 = vadd.s32 9, %v1550_v38  ;;  %vm884_vm12 = vcmp.ne.s32.totalorder %v1583_v10, 0  ;;  %vm1617_vm14 = vmand %vm890_vm8, %vm881_vm7 }
  0xea   : > { %v1187_v44 = vpop.f32.mrf.mxu0  ;;  %vm1593_vm9 = vmand %vm891_vm6, %vm882_vm5  ;;  %vm893_vm13 = vcmp.lt.s32.totalorder %v1583_v10, 0 }
  0xeb   : > { %v1213_v45 = vpop.f32.mrf.mxu1  ;;  %vm1646_vm4 = vmand %vm893_vm13, %vm884_vm12 }
  0xec   : > { %v1488_v46 = vpop.f32.mrf.mxu0  ;;  %v811_v45 = vmul.u32 9, %v810_v23  ;;  %v908_v23 = vadd.s32 9, %v1562_v60 }
  0xed   : > { %v1490_v47 = vpop.f32.mrf.mxu1 }
  0xee   : > { %v1188_v50 = vpop.f32.mrf.mxu0 }
  0xef   : > { %v1214_v52 = vpop.f32.mrf.mxu1  ;;  %v436_v50 = vadd.f32 %v1461_v20, %v1465_v24  ;;  %v1570_v24 = vsub.s32 %v775_v51, %v811_v45 }
  0xf0   : > { %v1496_v53 = vpop.f32.mrf.mxu0 }
  0xf1   : > { %v1501_v55 = vpop.f32.mrf.mxu1  ;;  %vm883_vm10 = vcmp.ne.s32.totalorder %v1570_v24, 0  ;;  %vm892_vm11 = vcmp.lt.s32.totalorder %v1570_v24, 0  ;;  %v910_v27 = vadd.s32 9, %v1570_v24 }
  0xf2   : > { %v1191_v59 = vpop.f32.mrf.mxu0  ;;  %vm1632_vm15 = vmand %vm892_vm11, %vm883_vm10 }
  0xf3   : > { %v1217_v63 = vpop.f32.mrf.mxu1  ;;  %v854_v59 = vshrl.u32 %v1541_v16, 3  ;;  %v1602_v16 = vsub.s32 %v1514_v62, %v844_v2 }
  0xf4   : > { %v1516_v0 = vpop.f32.mrf.mxu0  ;;  %v833_v63 = vmul.u32 9, %v832_v39 }
  0xf5   : > { %v470_v5 = vpop.f32.mrf.mxu1  ;;  %v855_v51 = vmul.u32 9, %v854_v59  ;;  %vm886_vm3 = vcmp.ne.s32.totalorder %v1602_v16, 0  ;;  %vm895_vm5 = vcmp.lt.s32.totalorder %v1602_v16, 0  ;;  %v913_v57 = vadd.s32 9, %v1602_v16 }
  0xf6   : > { %v1192_v9 = vpop.f32.mrf.mxu0  ;;  %v1573_v3 = vmul.u32.u64.low 3817748708, %v1556_v49  ;;  %v1574_v5 = vmul.u32.u64.high 3817748708, %v1556_v49, %v1573_v3  ;;  %v1599_v15 = vsub.s32 %v1508_v58, %v833_v63  ;;  %vm1685_vm10 = vmand %vm895_vm5, %vm886_vm3 }
  0xf7   : > { %v1218_v12 = vpop.f32.mrf.mxu1  ;;  %v1611_v58 = vsub.s32 %v1523_v4, %v855_v51  ;;  %v911_v4 = vadd.s32 9, %v1583_v10 }
  0xf8   : > { %v1537_v14 = vpop.f32.mrf.mxu0  ;;  %vm885_vm0 = vcmp.ne.s32.totalorder %v1599_v15, 0  ;;  %vm894_vm1 = vcmp.lt.s32.totalorder %v1599_v15, 0  ;;  %v876_v34 = vshrl.u32 %v1574_v5, 3 }
  0xf9   : > { %v716_v17 = vpop.f32.mrf.mxu1  ;;  %vm887_vm6 = vcmp.ne.s32.totalorder %v1611_v58, 0  ;;  %vm896_vm7 = vcmp.lt.s32.totalorder %v1611_v58, 0  ;;  %vm1669_vm8 = vmand %vm894_vm1, %vm885_vm0  ;;  %v914_v63 = vadd.s32 9, %v1611_v58 }
  0xfa   : > { %v1195_v21 = vpop.f32.mrf.mxu0  ;;  %vm1696_vm11 = vmand %vm896_vm7, %vm887_vm6 }
  0xfb   : > { %v1245_v26 = vpop.f32.mrf.mxu1  ;;  %v866_v21 = vmul.u32 9, %v865_v8 }
  0xfc   : > { %v383_v30 = vpop.f32.mrf.mxu0 }
  0xfd   : > { %v719_v35 = vpop.f32.mrf.mxu1  ;;  %v1652_v45 = vsub.s32 %v1535_v13, %v866_v21 }
  0xfe   : > { %v1196_v44 = vpop.f32.mrf.mxu0 }
  0xff   : > { %v1246_v52 = vpop.f32.mrf.mxu1  ;;  %vm888_vm12 = vcmp.ne.s32.totalorder %v1652_v45, 0  ;;  %vm897_vm13 = vcmp.lt.s32.totalorder %v1652_v45, 0 }
 0x100   : > { %v601_v56 = vpop.f32.mrf.mxu0  ;;  %vm1726_vm1 = vmand %vm897_vm13, %vm888_vm12 }
 0x101   : > { %v639_v43 = vadd.f32 %v601_v56, %v436_v50  ;;  %v724_v61 = vpop.f32.mrf.mxu1  ;;  %v912_v50 = vadd.s32 9, %v1599_v15 }
 0x102   : > { %v1223_v20 = vpop.f32.mrf.mxu0 }
 0x103   : > { %v1578_v6 = vadd.f32 %v716_v17, %v639_v43  ;;  %v1249_v7 = vpop.f32.mrf.mxu1  ;;  %v444_v17 = vadd.f32 %v1467_v25, %v1473_v31  ;;  %v918_v31 = vsel %vm1593_vm9, %v909_v22, %v1550_v38  ;;  %v920_v43 = vsel %vm1646_vm4, %v911_v4, %v1583_v10 }
 0x104   : > { %v604_v9 = vpop.f32.mrf.mxu0  ;;  %vm1674_vm9 = vcmp.lt.s32.totalorder %v918_v31, 8  ;;  %v877_v20 = vmul.u32 9, %v876_v34  ;;  %v921_v7 = vsel %vm1669_vm8, %v912_v50, %v1599_v15  ;;  %v922_v10 = vsel %vm1685_vm10, %v913_v57, %v1602_v16 }
 0x105   : > { %763 = vst.msk [vmem:[%s1568_s6] sm:$0xff] %vm294_vm2, %v1578_v6  ;;  %v640_v11 = vadd.f32 %v604_v9, %v439_v40  ;;  %v727_v28 = vpop.f32.mrf.mxu1  ;;  %vm929_vm0 = vcmp.lt.s32.totalorder %v920_v43, 8  ;;  %v455_v15 = vadd.f32 %v1479_v37, %v1488_v46  ;;  %vm930_vm3 = vcmp.lt.s32.totalorder %v921_v7, 8 }
 0x106   : > { %v1224_v54 = vpop.f32.mrf.mxu0  ;;  %vm1740_vm4 = vcmp.lt.s32.totalorder %v922_v10, 8  ;;  %v460_v4 = vadd.f32 %v1485_v42, %v1496_v53  ;;  %v463_v57 = vadd.f32 %v1490_v47, %v1516_v0 }
 0x107   : > { %v755_v18 = vadd.f32 %v719_v35, %v640_v11  ;;  %v1250_v19 = vpop.f32.mrf.mxu1  ;;  %v447_v35 = vadd.f32 %v1471_v29, %v1477_v36  ;;  %v917_v29 = vsel %vm1617_vm14, %v908_v23, %v1562_v60  ;;  %v919_v36 = vsel %vm1632_vm15, %v910_v27, %v1570_v24 }
 0x108   : > { %v609_v26 = vpop.f32.mrf.mxu0  ;;  %v452_v24 = vadd.f32 %v1475_v32, %v1483_v41  ;;  %vm1702_vm14 = vcmp.lt.s32.totalorder %v917_v29, 8  ;;  %vm1706_vm15 = vcmp.lt.s32.totalorder %v919_v36, 8  ;;  %v915_v11 = vadd.s32 9, %v1652_v45 }
 0x109   : > { %764 = vst.msk [vmem:[%s1568_s6 + $0x8] sm:$0xff] %vm294_vm2, %v755_v18  ;;  %v641_v62 = vadd.f32 %v609_v26, %v444_v17  ;;  %v732_v1 = vpop.f32.mrf.mxu1  ;;  %v936_v8 = vsel %vm1674_vm9, %v755_v18, 0.0  ;;  %v1731_v54 = vsub.s32 %v1556_v49, %v877_v20  ;;  %v935_v16 = vsel %vm1702_vm14, %v1578_v6, 0.0 }
 0x10a   : > { %v1227_v33 = vpop.f32.mrf.mxu0  ;;  %v970_v21 = vmul.f32 %v936_v8, %v936_v8  ;;  %v969_v25 = vmul.f32 %v935_v16, %v935_v16  ;;  %v945_v31 = vsel %vm294_vm2, %v936_v8, 0.0  ;;  %v944_v34 = vsel %vm294_vm2, %v935_v16, 0.0 }
 0x10b   : > { %v756_v38 = vadd.f32 %v724_v61, %v641_v62  ;;  %v1253_v44 = vpop.f32.mrf.mxu1  ;;  %vm889_vm6 = vcmp.ne.s32.totalorder %v1731_v54, 0  ;;  %vm898_vm7 = vcmp.lt.s32.totalorder %v1731_v54, 0  ;;  %v916_v50 = vadd.s32 9, %v1731_v54 }
 0x10c   : > { %v612_v48 = vpop.f32.mrf.mxu0  ;;  %v978_v29 = vsel %vm294_vm2, %v969_v25, 0.0  ;;  %vm1775_vm8 = vmand %vm898_vm7, %vm889_vm6 }
 0x10d   : > { %765 = vst.msk [vmem:[%s1568_s6 + $0x10] sm:$0xff] %vm294_vm2, %v756_v38  ;;  %v642_v52 = vadd.f32 %v612_v48, %v447_v35  ;;  %v735_v56 = vpop.f32.mrf.mxu1  ;;  %v937_v17 = vsel %vm1706_vm15, %v756_v38, 0.0  ;;  %v979_v35 = vsel %vm294_vm2, %v970_v21, 0.0 }
 0x10e   : > { %v1228_v60 = vpop.f32.mrf.mxu0  ;;  %v971_v62 = vmul.f32 %v937_v17, %v937_v17  ;;  %v947_v38 = vsel %vm294_vm2, %v937_v17, 0.0  ;;  %v980_v59 = vadd.f32 %v979_v35, %v978_v29 }
 0x10f   : > { %v757_v2 = vadd.f32 %v727_v28, %v642_v52  ;;  %v1254_v3 = vpop.f32.mrf.mxu1  ;;  %v923_v28 = vsel %vm1696_vm11, %v914_v63, %v1611_v58  ;;  %v924_v58 = vsel %vm1726_vm1, %v915_v11, %v1652_v45  ;;  %v946_v45 = vadd.f32 %v945_v31, %v944_v34 }
 0x110   : > { %v617_v41 = vpop.f32.mrf.mxu0  ;;  %vm1746_vm5 = vcmp.lt.s32.totalorder %v923_v28, 8  ;;  %v981_v36 = vsel %vm294_vm2, %v971_v62, 0.0  ;;  %vm1781_vm9 = vcmp.lt.s32.totalorder %v924_v58, 8  ;;  %v468_v11 = vadd.f32 %v1501_v55, %v1537_v14 }
 0x111   : > { %766 = vst.msk [vmem:[%s1568_s6 + $0x18] sm:$0xff] %vm294_vm2, %v757_v2  ;;  %v643_v9 = vadd.f32 %v617_v41, %v452_v24  ;;  %v740_v51 = vpop.f32.mrf.mxu1  ;;  %v938_v49 = vsel %vm929_vm0, %v757_v2, 0.0  ;;  %v948_v43 = vadd.f32 %v947_v38, %v946_v45  ;;  %v982_v0 = vadd.f32 %v981_v36, %v980_v59 }
 0x112   : > { %v1231_v22 = vpop.f32.mrf.mxu0  ;;  %v972_v39 = vmul.f32 %v938_v49, %v938_v49  ;;  %v949_v52 = vsel %vm294_vm2, %v938_v49, 0.0  ;;  %vm967_vm11 = vcmask 24576  }
 0x113   : > { %v758_v18 = vadd.f32 %v732_v1, %v643_v9  ;;  %v1257_v19 = vpop.f32.mrf.mxu1  ;;  %v950_v5 = vadd.f32 %v949_v52, %v948_v43 }
 0x114   : > { %v620_v23 = vpop.f32.mrf.mxu0  ;;  %v983_v20 = vsel %vm294_vm2, %v972_v39, 0.0 }
 0x115   : > { %767 = vst.msk [vmem:[%s1568_s6 + $0x20] sm:$0xff] %vm294_vm2, %v758_v18  ;;  %v644_v37 = vadd.f32 %v620_v23, %v455_v15  ;;  %v743_v6 = vpop.f32.mrf.mxu1  ;;  %v939_v1 = vsel %vm930_vm3, %v758_v18, 0.0  ;;  %v984_v22 = vadd.f32 %v983_v20, %v982_v0 }
 0x116   : > { %v1232_v27 = vpop.f32.mrf.mxu0  ;;  %v973_v13 = vmul.f32 %v939_v1, %v939_v1  ;;  %v951_v24 = vsel %vm294_vm2, %v939_v1, 0.0 }
 0x117   : > { %v759_v30 = vadd.f32 %v735_v56, %v644_v37  ;;  %v1258_v33 = vpop.f32.mrf.mxu1  ;;  %v952_v28 = vadd.f32 %v951_v24, %v950_v5 }
 0x118   : > { %v625_v44 = vpop.f32.mrf.mxu0  ;;  %v985_v7 = vsel %vm294_vm2, %v973_v13, 0.0 }
 0x119   : > { %768 = vst.msk [vmem:[%s1568_s6 + $0x28] sm:$0xff] %vm294_vm2, %v759_v30  ;;  %v940_v48 = vsel %vm1740_vm4, %v759_v30, 0.0  ;;  %v645_v42 = vadd.f32 %v625_v44, %v460_v4  ;;  %v748_v53 = vpop.f32.mrf.mxu1  ;;  %v986_v19 = vadd.f32 %v985_v7, %v984_v22 }
 0x11a   : > { %v1235_v56 = vpop.f32.mrf.mxu0  ;;  %v974_v2 = vmul.f32 %v940_v48, %v940_v48  ;;  %v953_v8 = vsel %vm294_vm2, %v940_v48, 0.0 }
 0x11b   : > { %v760_v60 = vadd.f32 %v740_v51, %v645_v42  ;;  %v1261_v61 = vpop.f32.mrf.mxu1  ;;  %v925_v51 = vsel %vm1775_vm8, %v916_v50, %v1731_v54  ;;  %v954_v21 = vadd.f32 %v953_v8, %v952_v28 }
 0x11c   : > { %v628_v3 = vpop.f32.mrf.mxu0  ;;  %v987_v16 = vsel %vm294_vm2, %v974_v2, 0.0  ;;  %vm934_vm10 = vcmp.lt.s32.totalorder %v925_v51, 8 }
 0x11d   : > { %769 = vst.msk [vmem:[%s1568_s6 + $0x30] sm:$0xff] %vm294_vm2, %v760_v60  ;;  %v941_v40 = vsel %vm1746_vm5, %v760_v60, 0.0  ;;  %v646_v32 = vadd.f32 %v628_v3, %v463_v57  ;;  %v751_v41 = vpop.f32.mrf.mxu1  ;;  %v988_v37 = vadd.f32 %v987_v16, %v986_v19 }
 0x11e   : > { %v975_v9 = vmul.f32 %v941_v40, %v941_v40  ;;  %v1236_v10 = vpop.f32.mrf.mxu0  ;;  %v955_v17 = vsel %vm294_vm2, %v941_v40, 0.0 }
 0x11f   : > { %v761_v12 = vadd.f32 %v743_v6, %v646_v32  ;;  %v1262_v15 = vpop.f32.mrf.mxu1  ;;  %v956_v46 = vadd.f32 %v955_v17, %v954_v21 }
 0x120   : > { %v633_v18 = vpop.f32.mrf.mxu0  ;;  %v989_v55 = vsel %vm294_vm2, %v975_v9, 0.0 }
 0x121   : > { %770 = vst.msk [vmem:[%s1568_s6 + $0x38] sm:$0xff] %vm294_vm2, %v761_v12  ;;  %v942_v54 = vsel %vm1781_vm9, %v761_v12, 0.0  ;;  %v647_v23 = vadd.f32 %v633_v18, %v468_v11  ;;  %v990_v31 = vadd.f32 %v989_v55, %v988_v37 }
 0x122   : > { %v957_v14 = vsel %vm294_vm2, %v942_v54, 0.0  ;;  %v976_v26 = vmul.f32 %v942_v54, %v942_v54  ;;  %v1239_v49 = vpop.f32.mrf.mxu0 }
 0x123   : > { %v762_v6 = vadd.f32 %v748_v53, %v647_v23  ;;  %v958_v62 = vadd.f32 %v957_v14, %v956_v46 }
 0x124   : > { %v991_v58 = vsel %vm294_vm2, %v976_v26, 0.0  ;;  %v636_v25 = vpop.f32.mrf.mxu0 }
 0x125   : > { %771 = vst.msk [vmem:[%s1568_s6 + $0x40] sm:$0xff] %vm294_vm2, %v762_v6  ;;  %v943_v27 = vsel %vm934_vm10, %v762_v6, 0.0  ;;  %v992_v33 = vadd.f32 %v991_v58, %v990_v31 }
 0x126   : > { %v959_v4 = vsel %vm294_vm2, %v943_v27, 0.0  ;;  %v977_v1 = vmul.f32 %v943_v27, %v943_v27  ;;  %v1240_v30 = vpop.f32.mrf.mxu0 }
 0x127   : > { %v960_v34 = vadd.f32 %v959_v4, %v958_v62 }
 0x128   : > { %v993_v35 = vsel %vm294_vm2, %v977_v1, 0.0 }
 0x129   : > { %v961_v38 = vrot.slane %v960_v34, 4  ;;  %v994_v39 = vadd.f32 %v993_v35, %v992_v33 }
 0x12b   : > { %v962_v44 = vadd.f32 %v961_v38, %v960_v34  ;;  %v995_v45 = vrot.slane %v994_v39, 4 }
 0x12d   : > { %v963_v48 = vrot.slane %v962_v44, 2  ;;  %v996_v42 = vadd.f32 %v995_v45, %v994_v39 }
 0x12f   : > { %v964_v53 = vadd.f32 %v963_v48, %v962_v44  ;;  %v997_v50 = vrot.slane %v996_v42, 2 }
 0x131   : > { %v965_v29 = vrot.slane %v964_v53, 1  ;;  %v998_v36 = vadd.f32 %v997_v50, %v996_v42 }
 0x133   : > { %v966_v52 = vadd.f32 %v965_v29, %v964_v53  ;;  %v999_v13 = vrot.slane %v998_v36, 1 }
 0x135   : > { %968 = vst.msk [vmem:[%s211_s9] sm:$0x1] %vm967_vm11, %v966_v52  ;;  %v1000_v56 = vadd.f32 %v999_v13, %v998_v36 }
 0x137   : > { %1001 = vst.msk [vmem:[%s214_s12] sm:$0x1] %vm967_vm11, %v1000_v56 }
 0x138 PF: > { %s15_s15 = sadd.s32 1, %s1311_s15  }
 0x139   : > { %p12_p4 = scmp.ge.s32.totalorder %s15_s15, 4  }
 0x13b   :  { %14 = sbr.rel (!%p12_p4) target bundleno = 1 (0x1), region = 85 }

// kernel: decoder_block_forward.11
= control target key start
LH: loop header
LB: loop body
LE: loop exit
PB: predicated region body
PF: predicated region fallthrough
CT: control target
= control target key end

     0   :  { %s699_s15 = smov 0   ;;  %s759_s0 = inlined_call_operand.vmem [shape: bf16[2,64,4], index: 0, kind: input, shape index: {}]   ;;  %s760_s1 = inlined_call_operand.vmem [shape: bf16[1,4,4], index: 1, kind: input, shape index: {}]   ;;  %s761_s2 = inlined_call_operand.vmem [shape: f32[2,64,4], index: 2, kind: output, shape index: {0}]   ;;  %s762_s3 = inlined_call_operand.vmem [shape: f32[2,1,4], index: 3, kind: output, shape index: {1}]   ;;  %s763_s4 = inlined_call_operand.vmem [shape: f32[2,1,4], index: 4, kind: output, shape index: {2}]  }
   0x1 LB: > { %s614_s16 = sadd.s32 4294967295, %s672_s15   ;;  %p618_p0 = scmp.ge.s32.totalorder %s672_s15, 1  ;;  %s672_s15 = sphi %s699_s15, %s15_s15  }
   0x2   : > { %p167_p1 = scmp.lt.s32.totalorder %s672_s15, 3 }
   0x4   : > { %p168_p2 = pnand %p618_p0, %p167_p1 }
   0x5   : > { %p199_p3 = scmp.lt.s32.totalorder (!%p168_p2), %s614_s16, 1 }
   0x6   : > { %171 = sbr.rel (%p168_p2) target bundleno = 245 (0xf5), region = 28 }
   0xb   : > { %v224_v0 = vld [vmem:[%s760_s1] sm:$0x3]  ;;  %vm258_vm0 = vcmask 1041408   ;;  %s765_s16 = smov (!%p199_p3, %s614_s16), 1  ;;  %vm245_vm1 = vcmask 31744   ;;  %vm477_vm2 = vcmask 24576  }
   0xc   : > { %652 = vmatprep.subr.msk.bf16.mxu0 %vm258_vm0, %v224_v0  ;;  %v260_v1 = vsel %vm258_vm0, %v224_v0, 0  ;;  %653 = vmatprep.subr.msk.bf16.mxu1 %vm258_vm0, %v224_v0  ;;  %s633_s19 = sshll.u32 %s765_s16, 5  ;;  %s634_s23 = sshll.u32 %s765_s16, 6 }
   0xd   : > { %641 = vmatpush3.bf16.msra.mxu0 %v260_v1  ;;  %651 = vmatpush3.bf16.msra.mxu1 %v260_v1  ;;  %s203_s22 = scalar_lea.vmem %s759_s0, %s633_s19  ;;  %s208_s26 = scalar_lea.vmem %s761_s2, %s634_s23 }
   0xe   : > { %v662_v2 = vld [vmem:[%s203_s22] sm:$0xff]   ;;  %v663_v3 = vld [vmem:[%s203_s22 + $0x8] sm:$0xff]   ;;  %v664_v4 = vld [vmem:[%s203_s22 + $0x10] sm:$0xff]   ;;  %s211_s29 = scalar_lea.vmem %s762_s3, %s765_s16  ;;  %s214_s6 = scalar_lea.vmem %s763_s4, %s765_s16 }
   0xf   : > { %642 = vmatprep.mubr.msk.bf16.mxu0 %vm245_vm1, %v662_v2  ;;  %v665_v5 = vld [vmem:[%s203_s22 + $0x18] sm:$0xff]   ;;  %646 = vmatprep.mubr.msk.bf16.mxu1 %vm245_vm1, %v664_v4 }
  0x10   : > { %643 = vmatmul.mubr.msk.bf16.vlgmr.msra.gmra.mxu0 %vm245_vm1, %v663_v3  ;;  %647 = vmatmul.mubr.msk.bf16.vlgmr.msra.gmra.mxu1 %vm245_vm1, %v665_v5 }
  0xd0   : > { %v644_v6 = vpop.f32.mrf.mxu0  ;;  %v648_v8 = vpop.f32.mrf.mxu1 }
  0xd1   : > { %329 = vst.msk [vmem:[%s208_s26 + $0x10] sm:$0xff] %vm245_vm1, %v644_v6  ;;  %333 = vst.msk [vmem:[%s208_s26 + $0x30] sm:$0xff] %vm245_vm1, %v648_v8  ;;  %v481_v14 = vmul.f32 %v644_v6, %v644_v6  ;;  %v459_v20 = vsel %vm245_vm1, %v644_v6, 0.0  ;;  %v485_v36 = vmul.f32 %v648_v8, %v648_v8  ;;  %v467_v41 = vsel %vm245_vm1, %v648_v8, 0.0 }
  0xd2   : > { %v296_v7 = vpop.f32.mrf.mxu0  ;;  %v312_v10 = vpop.f32.mrf.mxu1 }
  0xd3   : > { %327 = vst.msk [vmem:[%s208_s26] sm:$0xff] %vm245_vm1, %v296_v7  ;;  %v479_v11 = vmul.f32 %v296_v7, %v296_v7  ;;  %331 = vst.msk [vmem:[%s208_s26 + $0x20] sm:$0xff] %vm245_vm1, %v312_v10  ;;  %v456_v15 = vsel %vm245_vm1, %v296_v7, 0.0  ;;  %v490_v26 = vsel %vm245_vm1, %v481_v14, 0.0  ;;  %v483_v28 = vmul.f32 %v312_v10, %v312_v10 }
  0xd4   : > { %v645_v9 = vpop.f32.mrf.mxu0  ;;  %v649_v13 = vpop.f32.mrf.mxu1  ;;  %v463_v32 = vsel %vm245_vm1, %v312_v10, 0.0  ;;  %v498_v46 = vsel %vm245_vm1, %v485_v36, 0.0 }
  0xd5   : > { %330 = vst.msk [vmem:[%s208_s26 + $0x18] sm:$0xff] %vm245_vm1, %v645_v9  ;;  %334 = vst.msk [vmem:[%s208_s26 + $0x38] sm:$0xff] %vm245_vm1, %v649_v13  ;;  %v487_v21 = vsel %vm245_vm1, %v479_v11, 0.0  ;;  %v482_v22 = vmul.f32 %v645_v9, %v645_v9  ;;  %v461_v27 = vsel %vm245_vm1, %v645_v9, 0.0  ;;  %v494_v37 = vsel %vm245_vm1, %v483_v28, 0.0 }
  0xd6   : > { %v299_v12 = vpop.f32.mrf.mxu0  ;;  %v315_v19 = vpop.f32.mrf.mxu1  ;;  %v486_v42 = vmul.f32 %v649_v13, %v649_v13  ;;  %v469_v47 = vsel %vm245_vm1, %v649_v13, 0.0 }
  0xd7   : > { %328 = vst.msk [vmem:[%s208_s26 + $0x8] sm:$0xff] %vm245_vm1, %v299_v12  ;;  %v457_v16 = vsel %vm245_vm1, %v299_v12, 0.0  ;;  %v480_v17 = vmul.f32 %v299_v12, %v299_v12  ;;  %332 = vst.msk [vmem:[%s208_s26 + $0x28] sm:$0xff] %vm245_vm1, %v315_v19  ;;  %v492_v31 = vsel %vm245_vm1, %v482_v22, 0.0  ;;  %v484_v33 = vmul.f32 %v315_v19, %v315_v19 }
  0xd8   : > { %v458_v18 = vadd.f32 %v457_v16, %v456_v15  ;;  %v465_v38 = vsel %vm245_vm1, %v315_v19, 0.0  ;;  %v500_v50 = vsel %vm245_vm1, %v486_v42, 0.0 }
  0xd9   : > { %v488_v23 = vsel %vm245_vm1, %v480_v17, 0.0  ;;  %v496_v43 = vsel %vm245_vm1, %v484_v33, 0.0 }
  0xda   : > { %v460_v24 = vadd.f32 %v459_v20, %v458_v18  ;;  %v489_v25 = vadd.f32 %v488_v23, %v487_v21 }
  0xdc   : > { %v491_v29 = vadd.f32 %v490_v26, %v489_v25  ;;  %v462_v30 = vadd.f32 %v461_v27, %v460_v24 }
  0xde   : > { %v464_v34 = vadd.f32 %v463_v32, %v462_v30  ;;  %v493_v35 = vadd.f32 %v492_v31, %v491_v29 }
  0xe0   : > { %v466_v39 = vadd.f32 %v465_v38, %v464_v34  ;;  %v495_v40 = vadd.f32 %v494_v37, %v493_v35 }
  0xe2   : > { %v468_v44 = vadd.f32 %v467_v41, %v466_v39  ;;  %v497_v45 = vadd.f32 %v496_v43, %v495_v40 }
  0xe4   : > { %v470_v48 = vadd.f32 %v469_v47, %v468_v44  ;;  %v499_v49 = vadd.f32 %v498_v46, %v497_v45 }
  0xe6   : > { %v471_v51 = vrot.slane %v470_v48, 4  ;;  %v501_v52 = vadd.f32 %v500_v50, %v499_v49 }
  0xe8   : > { %v472_v53 = vadd.f32 %v471_v51, %v470_v48  ;;  %v502_v54 = vrot.slane %v501_v52, 4 }
  0xea   : > { %v473_v55 = vrot.slane %v472_v53, 2  ;;  %v503_v56 = vadd.f32 %v502_v54, %v501_v52 }
  0xec   : > { %v474_v57 = vadd.f32 %v473_v55, %v472_v53  ;;  %v504_v58 = vrot.slane %v503_v56, 2 }
  0xee   : > { %v475_v59 = vrot.slane %v474_v57, 1  ;;  %v505_v60 = vadd.f32 %v504_v58, %v503_v56 }
  0xf0   : > { %v476_v61 = vadd.f32 %v475_v59, %v474_v57  ;;  %v506_v62 = vrot.slane %v505_v60, 1 }
  0xf2   : > { %478 = vst.msk [vmem:[%s211_s29] sm:$0x1] %vm477_vm2, %v476_v61  ;;  %v507_v63 = vadd.f32 %v506_v62, %v505_v60 }
  0xf4   : > { %508 = vst.msk [vmem:[%s214_s6] sm:$0x1] %vm477_vm2, %v507_v63 }
  0xf5 PF: > { %s15_s15 = sadd.s32 1, %s672_s15  }
  0xf6   : > { %p12_p4 = scmp.ge.s32.totalorder %s15_s15, 4  }
  0xf8   :  { %14 = sbr.rel (!%p12_p4) target bundleno = 1 (0x1), region = 82 }

// kernel: decoder_block_forward.15
= control target key start
LH: loop header
LB: loop body
LE: loop exit
PB: predicated region body
PF: predicated region fallthrough
CT: control target
= control target key end

     0   :  { %vm533_vm0 = vcmask 27648   ;;  %s1333_s0 = inlined_call_operand.vmem [shape: f32[512,4], index: 0, kind: input, shape index: {}]   ;;  %s1334_s1 = inlined_call_operand.vmem [shape: f32[2,4], index: 1, kind: input, shape index: {}]   ;;  %s1335_s2 = inlined_call_operand.vmem [shape: bf16[512,4], index: 2, kind: output, shape index: {}]  }
   0x1   :  { %v750_v0 = vld [vmem:[%s1334_s1] ss:$0 sm:$0xff]  ;;  %v755_v1 = vld [vmem:[%s1334_s1 + $0x1] ss:$0 sm:$0xff]  ;;  %v14_v4 = vld [vmem:[%s1333_s0 + $0x8] sm:$0xff] }
   0x2   :  { %v13_v2 = vld [vmem:[%s1333_s0] sm:$0xff]  ;;  %v15_v5 = vld [vmem:[%s1333_s0 + $0x10] sm:$0xff]  ;;  %v16_v6 = vld [vmem:[%s1333_s0 + $0x18] sm:$0xff]  ;;  %v82_v7 = vmul.f32 %v750_v0, %v14_v4 }
   0x3   :  { %v81_v3 = vmul.f32 %v750_v0, %v13_v2  ;;  %v83_v8 = vmul.f32 %v750_v0, %v15_v5  ;;  %v84_v9 = vmul.f32 %v750_v0, %v16_v6  ;;  %v17_v10 = vld [vmem:[%s1333_s0 + $0x20] sm:$0xff]  ;;  %v18_v11 = vld [vmem:[%s1333_s0 + $0x28] sm:$0xff]  ;;  %v19_v12 = vld [vmem:[%s1333_s0 + $0x30] sm:$0xff] }
   0x4   :  { %v85_v14 = vmul.f32 %v750_v0, %v17_v10  ;;  %v86_v15 = vmul.f32 %v750_v0, %v18_v11  ;;  %v87_v16 = vmul.f32 %v750_v0, %v19_v12  ;;  %v20_v17 = vld [vmem:[%s1333_s0 + $0x38] sm:$0xff]  ;;  %v150_v18 = vadd.f32 %v755_v1, %v82_v7  ;;  %v21_v30 = vld [vmem:[%s1333_s0 + $0x40] sm:$0xff]  ;;  %v22_v35 = vld [vmem:[%s1333_s0 + $0x48] sm:$0xff] }
   0x5   :  { %v149_v13 = vadd.f32 %v755_v1, %v81_v3  ;;  %v151_v19 = vadd.f32 %v755_v1, %v83_v8  ;;  %v152_v20 = vadd.f32 %v755_v1, %v84_v9  ;;  %v88_v21 = vmul.f32 %v750_v0, %v20_v17  ;;  %v23_v36 = vld [vmem:[%s1333_s0 + $0x50] sm:$0xff]  ;;  %v24_v37 = vld [vmem:[%s1333_s0 + $0x58] sm:$0xff]  ;;  %v25_v42 = vld [vmem:[%s1333_s0 + $0x60] sm:$0xff] }
   0x6   :  { %v153_v23 = vadd.f32 %v755_v1, %v85_v14  ;;  %v154_v24 = vadd.f32 %v755_v1, %v86_v15  ;;  %v155_v25 = vadd.f32 %v755_v1, %v87_v16  ;;  %v214_v26 = vmax.f32 %v150_v18, 0.0  ;;  %v26_v43 = vld [vmem:[%s1333_s0 + $0x68] sm:$0xff]  ;;  %v27_v44 = vld [vmem:[%s1333_s0 + $0x70] sm:$0xff]  ;;  %v28_v49 = vld [vmem:[%s1333_s0 + $0x78] sm:$0xff] }
   0x7   :  { %v213_v22 = vmax.f32 %v149_v13, 0.0  ;;  %v215_v27 = vmax.f32 %v151_v19, 0.0  ;;  %v216_v28 = vmax.f32 %v152_v20, 0.0  ;;  %v156_v29 = vadd.f32 %v755_v1, %v88_v21  ;;  %v29_v8 = vld [vmem:[%s1333_s0 + $0x80] sm:$0xff]  ;;  %v30_v13 = vld [vmem:[%s1333_s0 + $0x88] sm:$0xff]  ;;  %v31_v14 = vld [vmem:[%s1333_s0 + $0x90] sm:$0xff] }
   0x8   :  { %v217_v32 = vmax.f32 %v153_v23, 0.0  ;;  %v218_v33 = vmax.f32 %v154_v24, 0.0  ;;  %v219_v34 = vmax.f32 %v155_v25, 0.0  ;;  %v669_v38 = vpack.c.bf16 %v214_v26, %v214_v26  ;;  %v32_v15 = vld [vmem:[%s1333_s0 + $0x98] sm:$0xff]  ;;  %v33_v20 = vld [vmem:[%s1333_s0 + $0xa0] sm:$0xff]  ;;  %v34_v21 = vld [vmem:[%s1333_s0 + $0xa8] sm:$0xff] }
   0x9   :  { %v668_v31 = vpack.c.bf16 %v213_v22, %v213_v22  ;;  %v670_v39 = vpack.c.bf16 %v215_v27, %v215_v27  ;;  %v671_v40 = vpack.c.bf16 %v216_v28, %v216_v28  ;;  %v220_v41 = vmax.f32 %v156_v29, 0.0  ;;  %v35_v22 = vld [vmem:[%s1333_s0 + $0xb0] sm:$0xff]  ;;  %v36_v27 = vld [vmem:[%s1333_s0 + $0xb8] sm:$0xff] }
   0xa   :  { %v672_v45 = vpack.c.bf16 %v217_v32, %v217_v32  ;;  %v673_v46 = vpack.c.bf16 %v218_v33, %v218_v33  ;;  %v674_v47 = vpack.c.bf16 %v219_v34, %v219_v34  ;;  %v89_v48 = vmul.f32 %v750_v0, %v21_v30  ;;  %535 = vst.msk [vmem:[%s1335_s2 + $0x4] sm:$0xf] %vm533_vm0, %v669_v38 }
   0xb   :  { %534 = vst.msk [vmem:[%s1335_s2] sm:$0xf] %vm533_vm0, %v668_v31  ;;  %536 = vst.msk [vmem:[%s1335_s2 + $0x8] sm:$0xf] %vm533_vm0, %v670_v39  ;;  %v675_v50 = vpack.c.bf16 %v220_v41, %v220_v41  ;;  %v90_v51 = vmul.f32 %v750_v0, %v22_v35  ;;  %v91_v52 = vmul.f32 %v750_v0, %v23_v36 }
   0xc   :  { %537 = vst.msk [vmem:[%s1335_s2 + $0xc] sm:$0xf] %vm533_vm0, %v671_v40  ;;  %v92_v53 = vmul.f32 %v750_v0, %v24_v37  ;;  %538 = vst.msk [vmem:[%s1335_s2 + $0x10] sm:$0xf] %vm533_vm0, %v672_v45  ;;  %v157_v54 = vadd.f32 %v755_v1, %v89_v48  ;;  %v93_v55 = vmul.f32 %v750_v0, %v25_v42  ;;  %v37_v48 = vld [vmem:[%s1333_s0 + $0xc0] sm:$0xff] }
   0xd   :  { %539 = vst.msk [vmem:[%s1335_s2 + $0x14] sm:$0xf] %vm533_vm0, %v673_v46  ;;  %540 = vst.msk [vmem:[%s1335_s2 + $0x18] sm:$0xf] %vm533_vm0, %v674_v47  ;;  %v94_v56 = vmul.f32 %v750_v0, %v26_v43  ;;  %v95_v57 = vmul.f32 %v750_v0, %v27_v44  ;;  %v158_v58 = vadd.f32 %v755_v1, %v90_v51 }
   0xe   :  { %541 = vst.msk [vmem:[%s1335_s2 + $0x1c] sm:$0xf] %vm533_vm0, %v675_v50  ;;  %v159_v59 = vadd.f32 %v755_v1, %v91_v52  ;;  %v160_v60 = vadd.f32 %v755_v1, %v92_v53  ;;  %v96_v61 = vmul.f32 %v750_v0, %v28_v49  ;;  %v221_v62 = vmax.f32 %v157_v54, 0.0  ;;  %v38_v53 = vld [vmem:[%s1333_s0 + $0xc8] sm:$0xff]  ;;  %v39_v54 = vld [vmem:[%s1333_s0 + $0xd0] sm:$0xff] }
   0xf   :  { %v161_v63 = vadd.f32 %v755_v1, %v93_v55  ;;  %v162_v2 = vadd.f32 %v755_v1, %v94_v56  ;;  %v163_v3 = vadd.f32 %v755_v1, %v95_v57  ;;  %v222_v4 = vmax.f32 %v158_v58, 0.0  ;;  %v40_v55 = vld [vmem:[%s1333_s0 + $0xd8] sm:$0xff] }
  0x10   :  { %v223_v5 = vmax.f32 %v159_v59, 0.0  ;;  %v224_v6 = vmax.f32 %v160_v60, 0.0  ;;  %v164_v7 = vadd.f32 %v755_v1, %v96_v61  ;;  %v676_v9 = vpack.c.bf16 %v221_v62, %v221_v62  ;;  %v41_v60 = vld [vmem:[%s1333_s0 + $0xe0] sm:$0xff]  ;;  %v42_v61 = vld [vmem:[%s1333_s0 + $0xe8] sm:$0xff]  ;;  %v43_v62 = vld [vmem:[%s1333_s0 + $0xf0] sm:$0xff] }
  0x11   :  { %v225_v10 = vmax.f32 %v161_v63, 0.0  ;;  %v226_v11 = vmax.f32 %v162_v2, 0.0  ;;  %v227_v12 = vmax.f32 %v163_v3, 0.0  ;;  %v677_v16 = vpack.c.bf16 %v222_v4, %v222_v4 }
  0x12   :  { %v678_v17 = vpack.c.bf16 %v223_v5, %v223_v5  ;;  %v679_v18 = vpack.c.bf16 %v224_v6, %v224_v6  ;;  %v228_v19 = vmax.f32 %v164_v7, 0.0  ;;  %542 = vst.msk [vmem:[%s1335_s2 + $0x20] sm:$0xf] %vm533_vm0, %v676_v9  ;;  %v97_v26 = vmul.f32 %v750_v0, %v29_v8  ;;  %v44_v5 = vld [vmem:[%s1333_s0 + $0xf8] sm:$0xff] }
  0x13   :  { %v680_v23 = vpack.c.bf16 %v225_v10, %v225_v10  ;;  %v681_v24 = vpack.c.bf16 %v226_v11, %v226_v11  ;;  %v682_v25 = vpack.c.bf16 %v227_v12, %v227_v12  ;;  %543 = vst.msk [vmem:[%s1335_s2 + $0x24] sm:$0xf] %vm533_vm0, %v677_v16  ;;  %v98_v29 = vmul.f32 %v750_v0, %v30_v13 }
  0x14   :  { %544 = vst.msk [vmem:[%s1335_s2 + $0x28] sm:$0xf] %vm533_vm0, %v678_v17  ;;  %545 = vst.msk [vmem:[%s1335_s2 + $0x2c] sm:$0xf] %vm533_vm0, %v679_v18  ;;  %v683_v28 = vpack.c.bf16 %v228_v19, %v228_v19  ;;  %v99_v30 = vmul.f32 %v750_v0, %v31_v14  ;;  %v100_v31 = vmul.f32 %v750_v0, %v32_v15 }
  0x15   :  { %546 = vst.msk [vmem:[%s1335_s2 + $0x30] sm:$0xf] %vm533_vm0, %v680_v23  ;;  %547 = vst.msk [vmem:[%s1335_s2 + $0x34] sm:$0xf] %vm533_vm0, %v681_v24  ;;  %v165_v32 = vadd.f32 %v755_v1, %v97_v26  ;;  %v101_v33 = vmul.f32 %v750_v0, %v33_v20  ;;  %v102_v34 = vmul.f32 %v750_v0, %v34_v21  ;;  %v45_v26 = vld [vmem:[%s1333_s0 + $0x100] sm:$0xff] }
  0x16   :  { %548 = vst.msk [vmem:[%s1335_s2 + $0x38] sm:$0xf] %vm533_vm0, %v682_v25  ;;  %v103_v35 = vmul.f32 %v750_v0, %v35_v22  ;;  %549 = vst.msk [vmem:[%s1335_s2 + $0x3c] sm:$0xf] %vm533_vm0, %v683_v28  ;;  %v166_v36 = vadd.f32 %v755_v1, %v98_v29  ;;  %v167_v37 = vadd.f32 %v755_v1, %v99_v30 }
  0x17   :  { %v168_v38 = vadd.f32 %v755_v1, %v100_v31  ;;  %v104_v39 = vmul.f32 %v750_v0, %v36_v27  ;;  %v229_v40 = vmax.f32 %v165_v32, 0.0  ;;  %v169_v41 = vadd.f32 %v755_v1, %v101_v33  ;;  %v46_v31 = vld [vmem:[%s1333_s0 + $0x108] sm:$0xff]  ;;  %v47_v32 = vld [vmem:[%s1333_s0 + $0x110] sm:$0xff]  ;;  %v48_v33 = vld [vmem:[%s1333_s0 + $0x118] sm:$0xff] }
  0x18   :  { %v170_v42 = vadd.f32 %v755_v1, %v102_v34  ;;  %v171_v43 = vadd.f32 %v755_v1, %v103_v35  ;;  %v230_v44 = vmax.f32 %v166_v36, 0.0  ;;  %v231_v45 = vmax.f32 %v167_v37, 0.0 }
  0x19   :  { %v232_v46 = vmax.f32 %v168_v38, 0.0  ;;  %v172_v47 = vadd.f32 %v755_v1, %v104_v39  ;;  %v684_v49 = vpack.c.bf16 %v229_v40, %v229_v40  ;;  %v233_v50 = vmax.f32 %v169_v41, 0.0  ;;  %v49_v38 = vld [vmem:[%s1333_s0 + $0x120] sm:$0xff]  ;;  %v50_v39 = vld [vmem:[%s1333_s0 + $0x128] sm:$0xff]  ;;  %v51_v40 = vld [vmem:[%s1333_s0 + $0x130] sm:$0xff] }
  0x1a   :  { %v234_v51 = vmax.f32 %v170_v42, 0.0  ;;  %v235_v52 = vmax.f32 %v171_v43, 0.0  ;;  %v685_v56 = vpack.c.bf16 %v230_v44, %v230_v44  ;;  %v686_v57 = vpack.c.bf16 %v231_v45, %v231_v45  ;;  %v52_v45 = vld [vmem:[%s1333_s0 + $0x138] sm:$0xff] }
  0x1b   :  { %v687_v58 = vpack.c.bf16 %v232_v46, %v232_v46  ;;  %v236_v59 = vmax.f32 %v172_v47, 0.0  ;;  %550 = vst.msk [vmem:[%s1335_s2 + $0x40] sm:$0xf] %vm533_vm0, %v684_v49  ;;  %v688_v63 = vpack.c.bf16 %v233_v50, %v233_v50  ;;  %v105_v4 = vmul.f32 %v750_v0, %v37_v48 }
  0x1c   :  { %v689_v2 = vpack.c.bf16 %v234_v51, %v234_v51  ;;  %v690_v3 = vpack.c.bf16 %v235_v52, %v235_v52  ;;  %551 = vst.msk [vmem:[%s1335_s2 + $0x44] sm:$0xf] %vm533_vm0, %v685_v56  ;;  %552 = vst.msk [vmem:[%s1335_s2 + $0x48] sm:$0xf] %vm533_vm0, %v686_v57  ;;  %v106_v7 = vmul.f32 %v750_v0, %v38_v53 }
  0x1d   :  { %553 = vst.msk [vmem:[%s1335_s2 + $0x4c] sm:$0xf] %vm533_vm0, %v687_v58  ;;  %v691_v6 = vpack.c.bf16 %v236_v59, %v236_v59  ;;  %v107_v8 = vmul.f32 %v750_v0, %v39_v54  ;;  %v108_v9 = vmul.f32 %v750_v0, %v40_v55  ;;  %554 = vst.msk [vmem:[%s1335_s2 + $0x50] sm:$0xf] %vm533_vm0, %v688_v63 }
  0x1e   :  { %555 = vst.msk [vmem:[%s1335_s2 + $0x54] sm:$0xf] %vm533_vm0, %v689_v2  ;;  %556 = vst.msk [vmem:[%s1335_s2 + $0x58] sm:$0xf] %vm533_vm0, %v690_v3  ;;  %v173_v10 = vadd.f32 %v755_v1, %v105_v4  ;;  %v109_v11 = vmul.f32 %v750_v0, %v41_v60  ;;  %v110_v12 = vmul.f32 %v750_v0, %v42_v61  ;;  %v53_v4 = vld [vmem:[%s1333_s0 + $0x140] sm:$0xff] }
  0x1f   :  { %v111_v13 = vmul.f32 %v750_v0, %v43_v62  ;;  %557 = vst.msk [vmem:[%s1335_s2 + $0x5c] sm:$0xf] %vm533_vm0, %v691_v6  ;;  %v174_v14 = vadd.f32 %v755_v1, %v106_v7  ;;  %v175_v15 = vadd.f32 %v755_v1, %v107_v8  ;;  %v176_v16 = vadd.f32 %v755_v1, %v108_v9  ;;  %v54_v9 = vld [vmem:[%s1333_s0 + $0x148] sm:$0xff] }
  0x20   :  { %v112_v17 = vmul.f32 %v750_v0, %v44_v5  ;;  %v237_v18 = vmax.f32 %v173_v10, 0.0  ;;  %v177_v19 = vadd.f32 %v755_v1, %v109_v11  ;;  %v178_v20 = vadd.f32 %v755_v1, %v110_v12  ;;  %v55_v10 = vld [vmem:[%s1333_s0 + $0x150] sm:$0xff]  ;;  %v56_v11 = vld [vmem:[%s1333_s0 + $0x158] sm:$0xff] }
  0x21   :  { %v179_v21 = vadd.f32 %v755_v1, %v111_v13  ;;  %v238_v22 = vmax.f32 %v174_v14, 0.0  ;;  %v239_v23 = vmax.f32 %v175_v15, 0.0  ;;  %v240_v24 = vmax.f32 %v176_v16, 0.0  ;;  %v57_v16 = vld [vmem:[%s1333_s0 + $0x160] sm:$0xff] }
  0x22   :  { %v180_v25 = vadd.f32 %v755_v1, %v112_v17  ;;  %v692_v27 = vpack.c.bf16 %v237_v18, %v237_v18  ;;  %v241_v28 = vmax.f32 %v177_v19, 0.0  ;;  %v242_v29 = vmax.f32 %v178_v20, 0.0  ;;  %v58_v17 = vld [vmem:[%s1333_s0 + $0x168] sm:$0xff]  ;;  %v59_v18 = vld [vmem:[%s1333_s0 + $0x170] sm:$0xff] }
  0x23   :  { %v243_v30 = vmax.f32 %v179_v21, 0.0  ;;  %v693_v34 = vpack.c.bf16 %v238_v22, %v238_v22  ;;  %v694_v35 = vpack.c.bf16 %v239_v23, %v239_v23  ;;  %v695_v36 = vpack.c.bf16 %v240_v24, %v240_v24  ;;  %v60_v23 = vld [vmem:[%s1333_s0 + $0x178] sm:$0xff] }
  0x24   :  { %v244_v37 = vmax.f32 %v180_v25, 0.0  ;;  %558 = vst.msk [vmem:[%s1335_s2 + $0x60] sm:$0xf] %vm533_vm0, %v692_v27  ;;  %v696_v41 = vpack.c.bf16 %v241_v28, %v241_v28  ;;  %v697_v42 = vpack.c.bf16 %v242_v29, %v242_v29  ;;  %v113_v44 = vmul.f32 %v750_v0, %v45_v26 }
  0x25   :  { %v698_v43 = vpack.c.bf16 %v243_v30, %v243_v30  ;;  %559 = vst.msk [vmem:[%s1335_s2 + $0x64] sm:$0xf] %vm533_vm0, %v693_v34  ;;  %560 = vst.msk [vmem:[%s1335_s2 + $0x68] sm:$0xf] %vm533_vm0, %v694_v35  ;;  %v114_v47 = vmul.f32 %v750_v0, %v46_v31  ;;  %v115_v48 = vmul.f32 %v750_v0, %v47_v32 }
  0x26   :  { %561 = vst.msk [vmem:[%s1335_s2 + $0x6c] sm:$0xf] %vm533_vm0, %v695_v36  ;;  %v699_v46 = vpack.c.bf16 %v244_v37, %v244_v37  ;;  %v116_v49 = vmul.f32 %v750_v0, %v48_v33  ;;  %562 = vst.msk [vmem:[%s1335_s2 + $0x70] sm:$0xf] %vm533_vm0, %v696_v41  ;;  %v181_v50 = vadd.f32 %v755_v1, %v113_v44  ;;  %v61_v44 = vld [vmem:[%s1333_s0 + $0x180] sm:$0xff] }
  0x27   :  { %563 = vst.msk [vmem:[%s1335_s2 + $0x74] sm:$0xf] %vm533_vm0, %v697_v42  ;;  %564 = vst.msk [vmem:[%s1335_s2 + $0x78] sm:$0xf] %vm533_vm0, %v698_v43  ;;  %v117_v51 = vmul.f32 %v750_v0, %v49_v38  ;;  %v118_v52 = vmul.f32 %v750_v0, %v50_v39  ;;  %v119_v53 = vmul.f32 %v750_v0, %v51_v40 }
  0x28   :  { %565 = vst.msk [vmem:[%s1335_s2 + $0x7c] sm:$0xf] %vm533_vm0, %v699_v46  ;;  %v182_v54 = vadd.f32 %v755_v1, %v114_v47  ;;  %v183_v55 = vadd.f32 %v755_v1, %v115_v48  ;;  %v184_v56 = vadd.f32 %v755_v1, %v116_v49  ;;  %v120_v57 = vmul.f32 %v750_v0, %v52_v45  ;;  %v62_v49 = vld [vmem:[%s1333_s0 + $0x188] sm:$0xff] }
  0x29   :  { %v245_v58 = vmax.f32 %v181_v50, 0.0  ;;  %v185_v59 = vadd.f32 %v755_v1, %v117_v51  ;;  %v186_v60 = vadd.f32 %v755_v1, %v118_v52  ;;  %v187_v61 = vadd.f32 %v755_v1, %v119_v53  ;;  %v63_v50 = vld [vmem:[%s1333_s0 + $0x190] sm:$0xff]  ;;  %v64_v51 = vld [vmem:[%s1333_s0 + $0x198] sm:$0xff] }
  0x2a   :  { %v246_v62 = vmax.f32 %v182_v54, 0.0  ;;  %v247_v63 = vmax.f32 %v183_v55, 0.0  ;;  %v248_v2 = vmax.f32 %v184_v56, 0.0  ;;  %v188_v3 = vadd.f32 %v755_v1, %v120_v57  ;;  %v65_v56 = vld [vmem:[%s1333_s0 + $0x1a0] sm:$0xff]  ;;  %v66_v57 = vld [vmem:[%s1333_s0 + $0x1a8] sm:$0xff] }
  0x2b   :  { %v700_v5 = vpack.c.bf16 %v245_v58, %v245_v58  ;;  %v249_v6 = vmax.f32 %v185_v59, 0.0  ;;  %v250_v7 = vmax.f32 %v186_v60, 0.0  ;;  %v251_v8 = vmax.f32 %v187_v61, 0.0  ;;  %v67_v58 = vld [vmem:[%s1333_s0 + $0x1b0] sm:$0xff] }
  0x2c   :  { %v701_v12 = vpack.c.bf16 %v246_v62, %v246_v62  ;;  %v702_v13 = vpack.c.bf16 %v247_v63, %v247_v63  ;;  %v703_v14 = vpack.c.bf16 %v248_v2, %v248_v2  ;;  %v252_v15 = vmax.f32 %v188_v3, 0.0  ;;  %v68_v63 = vld [vmem:[%s1333_s0 + $0x1b8] sm:$0xff] }
  0x2d   :  { %566 = vst.msk [vmem:[%s1335_s2 + $0x80] sm:$0xf] %vm533_vm0, %v700_v5  ;;  %v704_v19 = vpack.c.bf16 %v249_v6, %v249_v6  ;;  %v705_v20 = vpack.c.bf16 %v250_v7, %v250_v7  ;;  %v706_v21 = vpack.c.bf16 %v251_v8, %v251_v8  ;;  %v121_v22 = vmul.f32 %v750_v0, %v53_v4 }
  0x2e   :  { %567 = vst.msk [vmem:[%s1335_s2 + $0x84] sm:$0xf] %vm533_vm0, %v701_v12  ;;  %568 = vst.msk [vmem:[%s1335_s2 + $0x88] sm:$0xf] %vm533_vm0, %v702_v13  ;;  %v707_v24 = vpack.c.bf16 %v252_v15, %v252_v15  ;;  %v122_v25 = vmul.f32 %v750_v0, %v54_v9  ;;  %v123_v26 = vmul.f32 %v750_v0, %v55_v10 }
  0x2f   :  { %569 = vst.msk [vmem:[%s1335_s2 + $0x8c] sm:$0xf] %vm533_vm0, %v703_v14  ;;  %v124_v27 = vmul.f32 %v750_v0, %v56_v11  ;;  %570 = vst.msk [vmem:[%s1335_s2 + $0x90] sm:$0xf] %vm533_vm0, %v704_v19  ;;  %v189_v28 = vadd.f32 %v755_v1, %v121_v22  ;;  %v125_v29 = vmul.f32 %v750_v0, %v57_v16  ;;  %v69_v22 = vld [vmem:[%s1333_s0 + $0x1c0] sm:$0xff] }
  0x30   :  { %571 = vst.msk [vmem:[%s1335_s2 + $0x94] sm:$0xf] %vm533_vm0, %v705_v20  ;;  %572 = vst.msk [vmem:[%s1335_s2 + $0x98] sm:$0xf] %vm533_vm0, %v706_v21  ;;  %v126_v30 = vmul.f32 %v750_v0, %v58_v17  ;;  %v127_v31 = vmul.f32 %v750_v0, %v59_v18  ;;  %v190_v32 = vadd.f32 %v755_v1, %v122_v25 }
  0x31   :  { %573 = vst.msk [vmem:[%s1335_s2 + $0x9c] sm:$0xf] %vm533_vm0, %v707_v24  ;;  %v191_v33 = vadd.f32 %v755_v1, %v123_v26  ;;  %v192_v34 = vadd.f32 %v755_v1, %v124_v27  ;;  %v128_v35 = vmul.f32 %v750_v0, %v60_v23  ;;  %v253_v36 = vmax.f32 %v189_v28, 0.0  ;;  %v70_v27 = vld [vmem:[%s1333_s0 + $0x1c8] sm:$0xff]  ;;  %v71_v28 = vld [vmem:[%s1333_s0 + $0x1d0] sm:$0xff] }
  0x32   :  { %v193_v37 = vadd.f32 %v755_v1, %v125_v29  ;;  %v194_v38 = vadd.f32 %v755_v1, %v126_v30  ;;  %v195_v39 = vadd.f32 %v755_v1, %v127_v31  ;;  %v254_v40 = vmax.f32 %v190_v32, 0.0  ;;  %v72_v29 = vld [vmem:[%s1333_s0 + $0x1d8] sm:$0xff] }
  0x33   :  { %v255_v41 = vmax.f32 %v191_v33, 0.0  ;;  %v256_v42 = vmax.f32 %v192_v34, 0.0  ;;  %v196_v43 = vadd.f32 %v755_v1, %v128_v35  ;;  %v708_v45 = vpack.c.bf16 %v253_v36, %v253_v36  ;;  %v73_v34 = vld [vmem:[%s1333_s0 + $0x1e0] sm:$0xff]  ;;  %v74_v35 = vld [vmem:[%s1333_s0 + $0x1e8] sm:$0xff]  ;;  %v75_v36 = vld [vmem:[%s1333_s0 + $0x1f0] sm:$0xff] }
  0x34   :  { %v257_v46 = vmax.f32 %v193_v37, 0.0  ;;  %v258_v47 = vmax.f32 %v194_v38, 0.0  ;;  %v259_v48 = vmax.f32 %v195_v39, 0.0  ;;  %v709_v52 = vpack.c.bf16 %v254_v40, %v254_v40 }
  0x35   :  { %v710_v53 = vpack.c.bf16 %v255_v41, %v255_v41  ;;  %v711_v54 = vpack.c.bf16 %v256_v42, %v256_v42  ;;  %v260_v55 = vmax.f32 %v196_v43, 0.0  ;;  %574 = vst.msk [vmem:[%s1335_s2 + $0xa0] sm:$0xf] %vm533_vm0, %v708_v45  ;;  %v129_v62 = vmul.f32 %v750_v0, %v61_v44  ;;  %v76_v41 = vld [vmem:[%s1333_s0 + $0x1f8] sm:$0xff] }
  0x36   :  { %v712_v59 = vpack.c.bf16 %v257_v46, %v257_v46  ;;  %v713_v60 = vpack.c.bf16 %v258_v47, %v258_v47  ;;  %v714_v61 = vpack.c.bf16 %v259_v48, %v259_v48  ;;  %575 = vst.msk [vmem:[%s1335_s2 + $0xa4] sm:$0xf] %vm533_vm0, %v709_v52  ;;  %v130_v3 = vmul.f32 %v750_v0, %v62_v49 }
  0x37   :  { %576 = vst.msk [vmem:[%s1335_s2 + $0xa8] sm:$0xf] %vm533_vm0, %v710_v53  ;;  %577 = vst.msk [vmem:[%s1335_s2 + $0xac] sm:$0xf] %vm533_vm0, %v711_v54  ;;  %v715_v2 = vpack.c.bf16 %v260_v55, %v260_v55  ;;  %v131_v4 = vmul.f32 %v750_v0, %v63_v50  ;;  %v132_v5 = vmul.f32 %v750_v0, %v64_v51 }
  0x38   :  { %578 = vst.msk [vmem:[%s1335_s2 + $0xb0] sm:$0xf] %vm533_vm0, %v712_v59  ;;  %579 = vst.msk [vmem:[%s1335_s2 + $0xb4] sm:$0xf] %vm533_vm0, %v713_v60  ;;  %v197_v6 = vadd.f32 %v755_v1, %v129_v62  ;;  %v133_v7 = vmul.f32 %v750_v0, %v65_v56  ;;  %v134_v8 = vmul.f32 %v750_v0, %v66_v57 }
  0x39   :  { %580 = vst.msk [vmem:[%s1335_s2 + $0xb8] sm:$0xf] %vm533_vm0, %v714_v61  ;;  %v135_v9 = vmul.f32 %v750_v0, %v67_v58  ;;  %581 = vst.msk [vmem:[%s1335_s2 + $0xbc] sm:$0xf] %vm533_vm0, %v715_v2  ;;  %v198_v10 = vadd.f32 %v755_v1, %v130_v3  ;;  %v199_v11 = vadd.f32 %v755_v1, %v131_v4 }
  0x3a   :  { %v200_v12 = vadd.f32 %v755_v1, %v132_v5  ;;  %v136_v13 = vmul.f32 %v750_v0, %v68_v63  ;;  %v261_v14 = vmax.f32 %v197_v6, 0.0  ;;  %v201_v15 = vadd.f32 %v755_v1, %v133_v7 }
  0x3b   :  { %v202_v16 = vadd.f32 %v755_v1, %v134_v8  ;;  %v203_v17 = vadd.f32 %v755_v1, %v135_v9  ;;  %v262_v18 = vmax.f32 %v198_v10, 0.0  ;;  %v263_v19 = vmax.f32 %v199_v11, 0.0 }
  0x3c   :  { %v264_v20 = vmax.f32 %v200_v12, 0.0  ;;  %v204_v21 = vadd.f32 %v755_v1, %v136_v13  ;;  %v716_v23 = vpack.c.bf16 %v261_v14, %v261_v14  ;;  %v265_v24 = vmax.f32 %v201_v15, 0.0 }
  0x3d   :  { %v266_v25 = vmax.f32 %v202_v16, 0.0  ;;  %v267_v26 = vmax.f32 %v203_v17, 0.0  ;;  %v717_v30 = vpack.c.bf16 %v262_v18, %v262_v18  ;;  %v718_v31 = vpack.c.bf16 %v263_v19, %v263_v19 }
  0x3e   :  { %v719_v32 = vpack.c.bf16 %v264_v20, %v264_v20  ;;  %v268_v33 = vmax.f32 %v204_v21, 0.0  ;;  %582 = vst.msk [vmem:[%s1335_s2 + $0xc0] sm:$0xf] %vm533_vm0, %v716_v23  ;;  %v720_v37 = vpack.c.bf16 %v265_v24, %v265_v24  ;;  %v137_v40 = vmul.f32 %v750_v0, %v69_v22 }
  0x3f   :  { %v721_v38 = vpack.c.bf16 %v266_v25, %v266_v25  ;;  %v722_v39 = vpack.c.bf16 %v267_v26, %v267_v26  ;;  %583 = vst.msk [vmem:[%s1335_s2 + $0xc4] sm:$0xf] %vm533_vm0, %v717_v30  ;;  %584 = vst.msk [vmem:[%s1335_s2 + $0xc8] sm:$0xf] %vm533_vm0, %v718_v31  ;;  %v138_v43 = vmul.f32 %v750_v0, %v70_v27 }
  0x40   :  { %585 = vst.msk [vmem:[%s1335_s2 + $0xcc] sm:$0xf] %vm533_vm0, %v719_v32  ;;  %v723_v42 = vpack.c.bf16 %v268_v33, %v268_v33  ;;  %v139_v44 = vmul.f32 %v750_v0, %v71_v28  ;;  %v140_v45 = vmul.f32 %v750_v0, %v72_v29  ;;  %586 = vst.msk [vmem:[%s1335_s2 + $0xd0] sm:$0xf] %vm533_vm0, %v720_v37 }
  0x41   :  { %587 = vst.msk [vmem:[%s1335_s2 + $0xd4] sm:$0xf] %vm533_vm0, %v721_v38  ;;  %588 = vst.msk [vmem:[%s1335_s2 + $0xd8] sm:$0xf] %vm533_vm0, %v722_v39  ;;  %v205_v46 = vadd.f32 %v755_v1, %v137_v40  ;;  %v141_v47 = vmul.f32 %v750_v0, %v73_v34  ;;  %v142_v48 = vmul.f32 %v750_v0, %v74_v35 }
  0x42   :  { %v143_v49 = vmul.f32 %v750_v0, %v75_v36  ;;  %589 = vst.msk [vmem:[%s1335_s2 + $0xdc] sm:$0xf] %vm533_vm0, %v723_v42  ;;  %v206_v50 = vadd.f32 %v755_v1, %v138_v43  ;;  %v207_v51 = vadd.f32 %v755_v1, %v139_v44  ;;  %v208_v52 = vadd.f32 %v755_v1, %v140_v45 }
  0x43   :  { %v144_v53 = vmul.f32 %v750_v0, %v76_v41  ;;  %v269_v54 = vmax.f32 %v205_v46, 0.0  ;;  %v209_v55 = vadd.f32 %v755_v1, %v141_v47  ;;  %v210_v56 = vadd.f32 %v755_v1, %v142_v48 }
  0x44   :  { %v211_v57 = vadd.f32 %v755_v1, %v143_v49  ;;  %v270_v58 = vmax.f32 %v206_v50, 0.0  ;;  %v271_v59 = vmax.f32 %v207_v51, 0.0  ;;  %v272_v60 = vmax.f32 %v208_v52, 0.0 }
  0x45   :  { %v212_v61 = vadd.f32 %v755_v1, %v144_v53  ;;  %v724_v62 = vpack.c.bf16 %v269_v54, %v269_v54  ;;  %v273_v63 = vmax.f32 %v209_v55, 0.0  ;;  %v274_v2 = vmax.f32 %v210_v56, 0.0 }
  0x46   :  { %v275_v3 = vmax.f32 %v211_v57, 0.0  ;;  %v725_v4 = vpack.c.bf16 %v270_v58, %v270_v58  ;;  %v726_v5 = vpack.c.bf16 %v271_v59, %v271_v59  ;;  %v727_v6 = vpack.c.bf16 %v272_v60, %v272_v60 }
  0x47   :  { %v276_v0 = vmax.f32 %v212_v61, 0.0  ;;  %590 = vst.msk [vmem:[%s1335_s2 + $0xe0] sm:$0xf] %vm533_vm0, %v724_v62  ;;  %v728_v7 = vpack.c.bf16 %v273_v63, %v273_v63  ;;  %v729_v8 = vpack.c.bf16 %v274_v2, %v274_v2 }
  0x48   :  { %v730_v9 = vpack.c.bf16 %v275_v3, %v275_v3  ;;  %591 = vst.msk [vmem:[%s1335_s2 + $0xe4] sm:$0xf] %vm533_vm0, %v725_v4  ;;  %592 = vst.msk [vmem:[%s1335_s2 + $0xe8] sm:$0xf] %vm533_vm0, %v726_v5 }
  0x49   :  { %593 = vst.msk [vmem:[%s1335_s2 + $0xec] sm:$0xf] %vm533_vm0, %v727_v6  ;;  %v731_v1 = vpack.c.bf16 %v276_v0, %v276_v0  ;;  %594 = vst.msk [vmem:[%s1335_s2 + $0xf0] sm:$0xf] %vm533_vm0, %v728_v7 }
  0x4a   :  { %595 = vst.msk [vmem:[%s1335_s2 + $0xf4] sm:$0xf] %vm533_vm0, %v729_v8  ;;  %596 = vst.msk [vmem:[%s1335_s2 + $0xf8] sm:$0xf] %vm533_vm0, %v730_v9 }
  0x4b   :  { %597 = vst.msk [vmem:[%s1335_s2 + $0xfc] sm:$0xf] %vm533_vm0, %v731_v1 }

// kernel: decoder_block_forward.17
= control target key start
LH: loop header
LB: loop body
LE: loop exit
PB: predicated region body
PF: predicated region fallthrough
CT: control target
= control target key end

     0   :  { %vm309_vm0 = vcmask 64512   ;;  %s1061_s0 = inlined_call_operand.vmem [shape: f32[576,8], index: 0, kind: input, shape index: {}]   ;;  %s1062_s1 = inlined_call_operand.vmem [shape: f32[2,8], index: 1, kind: input, shape index: {}]   ;;  %s1063_s2 = inlined_call_operand.vmem [shape: f32[576,8], index: 2, kind: output, shape index: {}]  }
   0x1   :  { %v406_v0 = vld [vmem:[%s1062_s1] ss:$0 sm:$0xff]  ;;  %v411_v1 = vld [vmem:[%s1062_s1 + $0x1] ss:$0 sm:$0xff]  ;;  %v14_v4 = vld [vmem:[%s1061_s0 + $0x8] sm:$0xff] }
   0x2   :  { %v13_v2 = vld [vmem:[%s1061_s0] sm:$0xff]  ;;  %v15_v5 = vld [vmem:[%s1061_s0 + $0x10] sm:$0xff]  ;;  %v16_v6 = vld [vmem:[%s1061_s0 + $0x18] sm:$0xff]  ;;  %v90_v7 = vmul.f32 %v406_v0, %v14_v4 }
   0x3   :  { %v89_v3 = vmul.f32 %v406_v0, %v13_v2  ;;  %v91_v8 = vmul.f32 %v406_v0, %v15_v5  ;;  %v92_v9 = vmul.f32 %v406_v0, %v16_v6  ;;  %v17_v10 = vld [vmem:[%s1061_s0 + $0x20] sm:$0xff]  ;;  %v18_v11 = vld [vmem:[%s1061_s0 + $0x28] sm:$0xff]  ;;  %v19_v12 = vld [vmem:[%s1061_s0 + $0x30] sm:$0xff] }
   0x4   :  { %v93_v14 = vmul.f32 %v406_v0, %v17_v10  ;;  %v94_v15 = vmul.f32 %v406_v0, %v18_v11  ;;  %v95_v16 = vmul.f32 %v406_v0, %v19_v12  ;;  %v20_v17 = vld [vmem:[%s1061_s0 + $0x38] sm:$0xff]  ;;  %v166_v18 = vadd.f32 %v411_v1, %v90_v7  ;;  %v21_v22 = vld [vmem:[%s1061_s0 + $0x40] sm:$0xff]  ;;  %v22_v27 = vld [vmem:[%s1061_s0 + $0x48] sm:$0xff] }
   0x5   :  { %v165_v13 = vadd.f32 %v411_v1, %v89_v3  ;;  %v167_v19 = vadd.f32 %v411_v1, %v91_v8  ;;  %v168_v20 = vadd.f32 %v411_v1, %v92_v9  ;;  %v96_v21 = vmul.f32 %v406_v0, %v20_v17  ;;  %v23_v28 = vld [vmem:[%s1061_s0 + $0x50] sm:$0xff]  ;;  %v24_v29 = vld [vmem:[%s1061_s0 + $0x58] sm:$0xff]  ;;  %v25_v34 = vld [vmem:[%s1061_s0 + $0x60] sm:$0xff] }
   0x6   :  { %v169_v24 = vadd.f32 %v411_v1, %v93_v14  ;;  %v170_v25 = vadd.f32 %v411_v1, %v94_v15  ;;  %v171_v26 = vadd.f32 %v411_v1, %v95_v16  ;;  %v238_v30 = vmax.f32 %v166_v18, 0.0  ;;  %v26_v35 = vld [vmem:[%s1061_s0 + $0x68] sm:$0xff]  ;;  %v27_v36 = vld [vmem:[%s1061_s0 + $0x70] sm:$0xff]  ;;  %v28_v41 = vld [vmem:[%s1061_s0 + $0x78] sm:$0xff] }
   0x7   :  { %v237_v23 = vmax.f32 %v165_v13, 0.0  ;;  %v239_v31 = vmax.f32 %v167_v19, 0.0  ;;  %v240_v32 = vmax.f32 %v168_v20, 0.0  ;;  %v172_v33 = vadd.f32 %v411_v1, %v96_v21  ;;  %v29_v54 = vld [vmem:[%s1061_s0 + $0x80] sm:$0xff]  ;;  %v30_v59 = vld [vmem:[%s1061_s0 + $0x88] sm:$0xff]  ;;  %v31_v60 = vld [vmem:[%s1061_s0 + $0x90] sm:$0xff] }
   0x8   :  { %v241_v37 = vmax.f32 %v169_v24, 0.0  ;;  %v242_v38 = vmax.f32 %v170_v25, 0.0  ;;  %v243_v39 = vmax.f32 %v171_v26, 0.0  ;;  %v97_v40 = vmul.f32 %v406_v0, %v21_v22  ;;  %311 = vst.msk [vmem:[%s1063_s2 + $0x8] sm:$0xff] %vm309_vm0, %v238_v30  ;;  %v32_v61 = vld [vmem:[%s1061_s0 + $0x98] sm:$0xff]  ;;  %v33_v4 = vld [vmem:[%s1061_s0 + $0xa0] sm:$0xff] }
   0x9   :  { %310 = vst.msk [vmem:[%s1063_s2] sm:$0xff] %vm309_vm0, %v237_v23  ;;  %312 = vst.msk [vmem:[%s1063_s2 + $0x10] sm:$0xff] %vm309_vm0, %v239_v31  ;;  %v244_v42 = vmax.f32 %v172_v33, 0.0  ;;  %v98_v43 = vmul.f32 %v406_v0, %v22_v27  ;;  %v99_v44 = vmul.f32 %v406_v0, %v23_v28  ;;  %v100_v45 = vmul.f32 %v406_v0, %v24_v29  ;;  %v34_v5 = vld [vmem:[%s1061_s0 + $0xa8] sm:$0xff]  ;;  %v35_v6 = vld [vmem:[%s1061_s0 + $0xb0] sm:$0xff] }
   0xa   :  { %313 = vst.msk [vmem:[%s1063_s2 + $0x18] sm:$0xff] %vm309_vm0, %v240_v32  ;;  %314 = vst.msk [vmem:[%s1063_s2 + $0x20] sm:$0xff] %vm309_vm0, %v241_v37  ;;  %v173_v46 = vadd.f32 %v411_v1, %v97_v40  ;;  %v101_v47 = vmul.f32 %v406_v0, %v25_v34  ;;  %v102_v48 = vmul.f32 %v406_v0, %v26_v35  ;;  %v36_v11 = vld [vmem:[%s1061_s0 + $0xb8] sm:$0xff]  ;;  %v37_v24 = vld [vmem:[%s1061_s0 + $0xc0] sm:$0xff] }
   0xb   :  { %315 = vst.msk [vmem:[%s1063_s2 + $0x28] sm:$0xff] %vm309_vm0, %v242_v38  ;;  %316 = vst.msk [vmem:[%s1063_s2 + $0x30] sm:$0xff] %vm309_vm0, %v243_v39  ;;  %v103_v49 = vmul.f32 %v406_v0, %v27_v36  ;;  %v174_v50 = vadd.f32 %v411_v1, %v98_v43  ;;  %v175_v51 = vadd.f32 %v411_v1, %v99_v44  ;;  %v38_v29 = vld [vmem:[%s1061_s0 + $0xc8] sm:$0xff]  ;;  %v39_v30 = vld [vmem:[%s1061_s0 + $0xd0] sm:$0xff] }
   0xc   :  { %317 = vst.msk [vmem:[%s1063_s2 + $0x38] sm:$0xff] %vm309_vm0, %v244_v42  ;;  %v176_v52 = vadd.f32 %v411_v1, %v100_v45  ;;  %v104_v53 = vmul.f32 %v406_v0, %v28_v41  ;;  %v245_v55 = vmax.f32 %v173_v46, 0.0  ;;  %v177_v56 = vadd.f32 %v411_v1, %v101_v47  ;;  %v40_v31 = vld [vmem:[%s1061_s0 + $0xd8] sm:$0xff]  ;;  %v41_v36 = vld [vmem:[%s1061_s0 + $0xe0] sm:$0xff]  ;;  %v42_v37 = vld [vmem:[%s1061_s0 + $0xe8] sm:$0xff] }
   0xd   :  { %v178_v57 = vadd.f32 %v411_v1, %v102_v48  ;;  %v179_v58 = vadd.f32 %v411_v1, %v103_v49  ;;  %v246_v62 = vmax.f32 %v174_v50, 0.0  ;;  %v247_v63 = vmax.f32 %v175_v51, 0.0  ;;  %v43_v38 = vld [vmem:[%s1061_s0 + $0xf0] sm:$0xff]  ;;  %v44_v43 = vld [vmem:[%s1061_s0 + $0xf8] sm:$0xff] }
   0xe   :  { %v248_v2 = vmax.f32 %v176_v52, 0.0  ;;  %v180_v3 = vadd.f32 %v411_v1, %v104_v53  ;;  %318 = vst.msk [vmem:[%s1063_s2 + $0x40] sm:$0xff] %vm309_vm0, %v245_v55  ;;  %v249_v7 = vmax.f32 %v177_v56, 0.0  ;;  %v105_v10 = vmul.f32 %v406_v0, %v29_v54  ;;  %v45_v56 = vld [vmem:[%s1061_s0 + $0x100] sm:$0xff] }
   0xf   :  { %v250_v8 = vmax.f32 %v178_v57, 0.0  ;;  %v251_v9 = vmax.f32 %v179_v58, 0.0  ;;  %319 = vst.msk [vmem:[%s1063_s2 + $0x48] sm:$0xff] %vm309_vm0, %v246_v62  ;;  %320 = vst.msk [vmem:[%s1063_s2 + $0x50] sm:$0xff] %vm309_vm0, %v247_v63  ;;  %v106_v13 = vmul.f32 %v406_v0, %v30_v59  ;;  %v107_v14 = vmul.f32 %v406_v0, %v31_v60  ;;  %v47_v62 = vld [vmem:[%s1061_s0 + $0x110] sm:$0xff]  ;;  %v48_v63 = vld [vmem:[%s1061_s0 + $0x118] sm:$0xff] }
  0x10   :  { %321 = vst.msk [vmem:[%s1063_s2 + $0x58] sm:$0xff] %vm309_vm0, %v248_v2  ;;  %v252_v12 = vmax.f32 %v180_v3, 0.0  ;;  %v108_v15 = vmul.f32 %v406_v0, %v32_v61  ;;  %322 = vst.msk [vmem:[%s1063_s2 + $0x60] sm:$0xff] %vm309_vm0, %v249_v7  ;;  %v181_v16 = vadd.f32 %v411_v1, %v105_v10  ;;  %v109_v17 = vmul.f32 %v406_v0, %v33_v4  ;;  %v46_v61 = vld [vmem:[%s1061_s0 + $0x108] sm:$0xff] }
  0x11   :  { %323 = vst.msk [vmem:[%s1063_s2 + $0x68] sm:$0xff] %vm309_vm0, %v250_v8  ;;  %324 = vst.msk [vmem:[%s1063_s2 + $0x70] sm:$0xff] %vm309_vm0, %v251_v9  ;;  %v110_v18 = vmul.f32 %v406_v0, %v34_v5  ;;  %v111_v19 = vmul.f32 %v406_v0, %v35_v6  ;;  %v182_v20 = vadd.f32 %v411_v1, %v106_v13  ;;  %v49_v6 = vld [vmem:[%s1061_s0 + $0x120] sm:$0xff]  ;;  %v50_v7 = vld [vmem:[%s1061_s0 + $0x128] sm:$0xff] }
  0x12   :  { %325 = vst.msk [vmem:[%s1063_s2 + $0x78] sm:$0xff] %vm309_vm0, %v252_v12  ;;  %v183_v21 = vadd.f32 %v411_v1, %v107_v14  ;;  %v184_v22 = vadd.f32 %v411_v1, %v108_v15  ;;  %v112_v23 = vmul.f32 %v406_v0, %v36_v11  ;;  %v253_v25 = vmax.f32 %v181_v16, 0.0  ;;  %v51_v8 = vld [vmem:[%s1061_s0 + $0x130] sm:$0xff]  ;;  %v52_v13 = vld [vmem:[%s1061_s0 + $0x138] sm:$0xff] }
  0x13   :  { %v185_v26 = vadd.f32 %v411_v1, %v109_v17  ;;  %v186_v27 = vadd.f32 %v411_v1, %v110_v18  ;;  %v187_v28 = vadd.f32 %v411_v1, %v111_v19  ;;  %v254_v32 = vmax.f32 %v182_v20, 0.0 }
  0x14   :  { %v255_v33 = vmax.f32 %v183_v21, 0.0  ;;  %v256_v34 = vmax.f32 %v184_v22, 0.0  ;;  %v188_v35 = vadd.f32 %v411_v1, %v112_v23  ;;  %326 = vst.msk [vmem:[%s1063_s2 + $0x80] sm:$0xff] %vm309_vm0, %v253_v25  ;;  %v113_v42 = vmul.f32 %v406_v0, %v37_v24 }
  0x15   :  { %v257_v39 = vmax.f32 %v185_v26, 0.0  ;;  %v258_v40 = vmax.f32 %v186_v27, 0.0  ;;  %v259_v41 = vmax.f32 %v187_v28, 0.0  ;;  %327 = vst.msk [vmem:[%s1063_s2 + $0x88] sm:$0xff] %vm309_vm0, %v254_v32  ;;  %v114_v45 = vmul.f32 %v406_v0, %v38_v29  ;;  %v53_v26 = vld [vmem:[%s1061_s0 + $0x140] sm:$0xff]  ;;  %v55_v32 = vld [vmem:[%s1061_s0 + $0x150] sm:$0xff] }
  0x16   :  { %328 = vst.msk [vmem:[%s1063_s2 + $0x90] sm:$0xff] %vm309_vm0, %v255_v33  ;;  %329 = vst.msk [vmem:[%s1063_s2 + $0x98] sm:$0xff] %vm309_vm0, %v256_v34  ;;  %v260_v44 = vmax.f32 %v188_v35, 0.0  ;;  %v115_v46 = vmul.f32 %v406_v0, %v39_v30  ;;  %v116_v47 = vmul.f32 %v406_v0, %v40_v31  ;;  %v189_v48 = vadd.f32 %v411_v1, %v113_v42  ;;  %v54_v31 = vld [vmem:[%s1061_s0 + $0x148] sm:$0xff]  ;;  %v56_v33 = vld [vmem:[%s1061_s0 + $0x158] sm:$0xff] }
  0x17   :  { %330 = vst.msk [vmem:[%s1063_s2 + $0xa0] sm:$0xff] %vm309_vm0, %v257_v39  ;;  %331 = vst.msk [vmem:[%s1063_s2 + $0xa8] sm:$0xff] %vm309_vm0, %v258_v40  ;;  %v117_v49 = vmul.f32 %v406_v0, %v41_v36  ;;  %v118_v50 = vmul.f32 %v406_v0, %v42_v37  ;;  %v119_v51 = vmul.f32 %v406_v0, %v43_v38  ;;  %v57_v38 = vld [vmem:[%s1061_s0 + $0x160] sm:$0xff]  ;;  %v58_v39 = vld [vmem:[%s1061_s0 + $0x168] sm:$0xff] }
  0x18   :  { %332 = vst.msk [vmem:[%s1063_s2 + $0xb0] sm:$0xff] %vm309_vm0, %v259_v41  ;;  %333 = vst.msk [vmem:[%s1063_s2 + $0xb8] sm:$0xff] %vm309_vm0, %v260_v44  ;;  %v190_v52 = vadd.f32 %v411_v1, %v114_v45  ;;  %v191_v53 = vadd.f32 %v411_v1, %v115_v46  ;;  %v192_v54 = vadd.f32 %v411_v1, %v116_v47  ;;  %v261_v57 = vmax.f32 %v189_v48, 0.0  ;;  %v59_v40 = vld [vmem:[%s1061_s0 + $0x170] sm:$0xff]  ;;  %v60_v45 = vld [vmem:[%s1061_s0 + $0x178] sm:$0xff] }
  0x19   :  { %v120_v55 = vmul.f32 %v406_v0, %v44_v43  ;;  %v193_v58 = vadd.f32 %v411_v1, %v117_v49  ;;  %v194_v59 = vadd.f32 %v411_v1, %v118_v50  ;;  %v195_v60 = vadd.f32 %v411_v1, %v119_v51 }
  0x1a   :  { %v262_v2 = vmax.f32 %v190_v52, 0.0  ;;  %v263_v3 = vmax.f32 %v191_v53, 0.0  ;;  %v264_v4 = vmax.f32 %v192_v54, 0.0  ;;  %334 = vst.msk [vmem:[%s1063_s2 + $0xc0] sm:$0xff] %vm309_vm0, %v261_v57  ;;  %v121_v12 = vmul.f32 %v406_v0, %v45_v56 }
  0x1b   :  { %v196_v5 = vadd.f32 %v411_v1, %v120_v55  ;;  %v265_v9 = vmax.f32 %v193_v58, 0.0  ;;  %v266_v10 = vmax.f32 %v194_v59, 0.0  ;;  %v267_v11 = vmax.f32 %v195_v60, 0.0  ;;  %v61_v58 = vld [vmem:[%s1061_s0 + $0x180] sm:$0xff] }
  0x1c   :  { %335 = vst.msk [vmem:[%s1063_s2 + $0xc8] sm:$0xff] %vm309_vm0, %v262_v2  ;;  %336 = vst.msk [vmem:[%s1063_s2 + $0xd0] sm:$0xff] %vm309_vm0, %v263_v3  ;;  %v122_v15 = vmul.f32 %v406_v0, %v46_v61  ;;  %v123_v16 = vmul.f32 %v406_v0, %v47_v62  ;;  %v124_v17 = vmul.f32 %v406_v0, %v48_v63  ;;  %v62_v63 = vld [vmem:[%s1061_s0 + $0x188] sm:$0xff]  ;;  %v63_v2 = vld [vmem:[%s1061_s0 + $0x190] sm:$0xff] }
  0x1d   :  { %337 = vst.msk [vmem:[%s1063_s2 + $0xd8] sm:$0xff] %vm309_vm0, %v264_v4  ;;  %v268_v14 = vmax.f32 %v196_v5, 0.0  ;;  %338 = vst.msk [vmem:[%s1063_s2 + $0xe0] sm:$0xff] %vm309_vm0, %v265_v9  ;;  %v197_v18 = vadd.f32 %v411_v1, %v121_v12  ;;  %v125_v19 = vmul.f32 %v406_v0, %v49_v6  ;;  %v126_v20 = vmul.f32 %v406_v0, %v50_v7  ;;  %v64_v3 = vld [vmem:[%s1061_s0 + $0x198] sm:$0xff]  ;;  %v66_v9 = vld [vmem:[%s1061_s0 + $0x1a8] sm:$0xff] }
  0x1e   :  { %339 = vst.msk [vmem:[%s1063_s2 + $0xe8] sm:$0xff] %vm309_vm0, %v266_v10  ;;  %340 = vst.msk [vmem:[%s1063_s2 + $0xf0] sm:$0xff] %vm309_vm0, %v267_v11  ;;  %v127_v21 = vmul.f32 %v406_v0, %v51_v8  ;;  %v198_v22 = vadd.f32 %v411_v1, %v122_v15  ;;  %v199_v23 = vadd.f32 %v411_v1, %v123_v16  ;;  %v65_v8 = vld [vmem:[%s1061_s0 + $0x1a0] sm:$0xff]  ;;  %v67_v10 = vld [vmem:[%s1061_s0 + $0x1b0] sm:$0xff] }
  0x1f   :  { %341 = vst.msk [vmem:[%s1063_s2 + $0xf8] sm:$0xff] %vm309_vm0, %v268_v14  ;;  %v200_v24 = vadd.f32 %v411_v1, %v124_v17  ;;  %v128_v25 = vmul.f32 %v406_v0, %v52_v13  ;;  %v269_v27 = vmax.f32 %v197_v18, 0.0  ;;  %v201_v28 = vadd.f32 %v411_v1, %v125_v19  ;;  %v68_v15 = vld [vmem:[%s1061_s0 + $0x1b8] sm:$0xff] }
  0x20   :  { %v202_v29 = vadd.f32 %v411_v1, %v126_v20  ;;  %v203_v30 = vadd.f32 %v411_v1, %v127_v21  ;;  %v270_v34 = vmax.f32 %v198_v22, 0.0  ;;  %v271_v35 = vmax.f32 %v199_v23, 0.0 }
  0x21   :  { %v272_v36 = vmax.f32 %v200_v24, 0.0  ;;  %v204_v37 = vadd.f32 %v411_v1, %v128_v25  ;;  %342 = vst.msk [vmem:[%s1063_s2 + $0x100] sm:$0xff] %vm309_vm0, %v269_v27  ;;  %v273_v41 = vmax.f32 %v201_v28, 0.0  ;;  %v129_v44 = vmul.f32 %v406_v0, %v53_v26  ;;  %v69_v28 = vld [vmem:[%s1061_s0 + $0x1c0] sm:$0xff] }
  0x22   :  { %v274_v42 = vmax.f32 %v202_v29, 0.0  ;;  %v275_v43 = vmax.f32 %v203_v30, 0.0  ;;  %343 = vst.msk [vmem:[%s1063_s2 + $0x108] sm:$0xff] %vm309_vm0, %v270_v34  ;;  %344 = vst.msk [vmem:[%s1063_s2 + $0x110] sm:$0xff] %vm309_vm0, %v271_v35  ;;  %v130_v47 = vmul.f32 %v406_v0, %v54_v31  ;;  %v131_v48 = vmul.f32 %v406_v0, %v55_v32  ;;  %v71_v34 = vld [vmem:[%s1061_s0 + $0x1d0] sm:$0xff]  ;;  %v72_v35 = vld [vmem:[%s1061_s0 + $0x1d8] sm:$0xff] }
  0x23   :  { %345 = vst.msk [vmem:[%s1063_s2 + $0x118] sm:$0xff] %vm309_vm0, %v272_v36  ;;  %v276_v46 = vmax.f32 %v204_v37, 0.0  ;;  %v132_v49 = vmul.f32 %v406_v0, %v56_v33  ;;  %346 = vst.msk [vmem:[%s1063_s2 + $0x120] sm:$0xff] %vm309_vm0, %v273_v41  ;;  %v205_v50 = vadd.f32 %v411_v1, %v129_v44  ;;  %v133_v51 = vmul.f32 %v406_v0, %v57_v38  ;;  %v70_v33 = vld [vmem:[%s1061_s0 + $0x1c8] sm:$0xff] }
  0x24   :  { %347 = vst.msk [vmem:[%s1063_s2 + $0x128] sm:$0xff] %vm309_vm0, %v274_v42  ;;  %348 = vst.msk [vmem:[%s1063_s2 + $0x130] sm:$0xff] %vm309_vm0, %v275_v43  ;;  %v134_v52 = vmul.f32 %v406_v0, %v58_v39  ;;  %v135_v53 = vmul.f32 %v406_v0, %v59_v40  ;;  %v206_v54 = vadd.f32 %v411_v1, %v130_v47  ;;  %v73_v40 = vld [vmem:[%s1061_s0 + $0x1e0] sm:$0xff]  ;;  %v74_v41 = vld [vmem:[%s1061_s0 + $0x1e8] sm:$0xff] }
  0x25   :  { %349 = vst.msk [vmem:[%s1063_s2 + $0x138] sm:$0xff] %vm309_vm0, %v276_v46  ;;  %v207_v55 = vadd.f32 %v411_v1, %v131_v48  ;;  %v208_v56 = vadd.f32 %v411_v1, %v132_v49  ;;  %v136_v57 = vmul.f32 %v406_v0, %v60_v45  ;;  %v277_v59 = vmax.f32 %v205_v50, 0.0  ;;  %v75_v42 = vld [vmem:[%s1061_s0 + $0x1f0] sm:$0xff]  ;;  %v76_v47 = vld [vmem:[%s1061_s0 + $0x1f8] sm:$0xff] }
  0x26   :  { %v209_v60 = vadd.f32 %v411_v1, %v133_v51  ;;  %v210_v61 = vadd.f32 %v411_v1, %v134_v52  ;;  %v211_v62 = vadd.f32 %v411_v1, %v135_v53  ;;  %v278_v4 = vmax.f32 %v206_v54, 0.0 }
  0x27   :  { %v279_v5 = vmax.f32 %v207_v55, 0.0  ;;  %v280_v6 = vmax.f32 %v208_v56, 0.0  ;;  %v212_v7 = vadd.f32 %v411_v1, %v136_v57  ;;  %350 = vst.msk [vmem:[%s1063_s2 + $0x140] sm:$0xff] %vm309_vm0, %v277_v59  ;;  %v137_v14 = vmul.f32 %v406_v0, %v61_v58 }
  0x28   :  { %v281_v11 = vmax.f32 %v209_v60, 0.0  ;;  %v282_v12 = vmax.f32 %v210_v61, 0.0  ;;  %v283_v13 = vmax.f32 %v211_v62, 0.0  ;;  %351 = vst.msk [vmem:[%s1063_s2 + $0x148] sm:$0xff] %vm309_vm0, %v278_v4  ;;  %v138_v17 = vmul.f32 %v406_v0, %v62_v63  ;;  %v77_v60 = vld [vmem:[%s1061_s0 + $0x200] sm:$0xff]  ;;  %v79_v4 = vld [vmem:[%s1061_s0 + $0x210] sm:$0xff] }
  0x29   :  { %352 = vst.msk [vmem:[%s1063_s2 + $0x150] sm:$0xff] %vm309_vm0, %v279_v5  ;;  %353 = vst.msk [vmem:[%s1063_s2 + $0x158] sm:$0xff] %vm309_vm0, %v280_v6  ;;  %v284_v16 = vmax.f32 %v212_v7, 0.0  ;;  %v139_v18 = vmul.f32 %v406_v0, %v63_v2  ;;  %v140_v19 = vmul.f32 %v406_v0, %v64_v3  ;;  %v213_v20 = vadd.f32 %v411_v1, %v137_v14  ;;  %v78_v3 = vld [vmem:[%s1061_s0 + $0x208] sm:$0xff]  ;;  %v80_v5 = vld [vmem:[%s1061_s0 + $0x218] sm:$0xff] }
  0x2a   :  { %354 = vst.msk [vmem:[%s1063_s2 + $0x160] sm:$0xff] %vm309_vm0, %v281_v11  ;;  %355 = vst.msk [vmem:[%s1063_s2 + $0x168] sm:$0xff] %vm309_vm0, %v282_v12  ;;  %v141_v21 = vmul.f32 %v406_v0, %v65_v8  ;;  %v142_v22 = vmul.f32 %v406_v0, %v66_v9  ;;  %v143_v23 = vmul.f32 %v406_v0, %v67_v10  ;;  %v81_v10 = vld [vmem:[%s1061_s0 + $0x220] sm:$0xff]  ;;  %v82_v11 = vld [vmem:[%s1061_s0 + $0x228] sm:$0xff] }
  0x2b   :  { %356 = vst.msk [vmem:[%s1063_s2 + $0x170] sm:$0xff] %vm309_vm0, %v283_v13  ;;  %357 = vst.msk [vmem:[%s1063_s2 + $0x178] sm:$0xff] %vm309_vm0, %v284_v16  ;;  %v214_v24 = vadd.f32 %v411_v1, %v138_v17  ;;  %v215_v25 = vadd.f32 %v411_v1, %v139_v18  ;;  %v216_v26 = vadd.f32 %v411_v1, %v140_v19  ;;  %v285_v29 = vmax.f32 %v213_v20, 0.0  ;;  %v83_v12 = vld [vmem:[%s1061_s0 + $0x230] sm:$0xff]  ;;  %v84_v17 = vld [vmem:[%s1061_s0 + $0x238] sm:$0xff] }
  0x2c   :  { %v144_v27 = vmul.f32 %v406_v0, %v68_v15  ;;  %v217_v30 = vadd.f32 %v411_v1, %v141_v21  ;;  %v218_v31 = vadd.f32 %v411_v1, %v142_v22  ;;  %v219_v32 = vadd.f32 %v411_v1, %v143_v23 }
  0x2d   :  { %v286_v36 = vmax.f32 %v214_v24, 0.0  ;;  %v287_v37 = vmax.f32 %v215_v25, 0.0  ;;  %v288_v38 = vmax.f32 %v216_v26, 0.0  ;;  %358 = vst.msk [vmem:[%s1063_s2 + $0x180] sm:$0xff] %vm309_vm0, %v285_v29  ;;  %v145_v46 = vmul.f32 %v406_v0, %v69_v28 }
  0x2e   :  { %v220_v39 = vadd.f32 %v411_v1, %v144_v27  ;;  %v289_v43 = vmax.f32 %v217_v30, 0.0  ;;  %v290_v44 = vmax.f32 %v218_v31, 0.0  ;;  %v291_v45 = vmax.f32 %v219_v32, 0.0 }
  0x2f   :  { %359 = vst.msk [vmem:[%s1063_s2 + $0x188] sm:$0xff] %vm309_vm0, %v286_v36  ;;  %360 = vst.msk [vmem:[%s1063_s2 + $0x190] sm:$0xff] %vm309_vm0, %v287_v37  ;;  %v146_v49 = vmul.f32 %v406_v0, %v70_v33  ;;  %v147_v50 = vmul.f32 %v406_v0, %v71_v34  ;;  %v148_v51 = vmul.f32 %v406_v0, %v72_v35 }
  0x30   :  { %361 = vst.msk [vmem:[%s1063_s2 + $0x198] sm:$0xff] %vm309_vm0, %v288_v38  ;;  %v292_v48 = vmax.f32 %v220_v39, 0.0  ;;  %362 = vst.msk [vmem:[%s1063_s2 + $0x1a0] sm:$0xff] %vm309_vm0, %v289_v43  ;;  %v221_v52 = vadd.f32 %v411_v1, %v145_v46  ;;  %v149_v53 = vmul.f32 %v406_v0, %v73_v40  ;;  %v150_v54 = vmul.f32 %v406_v0, %v74_v41 }
  0x31   :  { %363 = vst.msk [vmem:[%s1063_s2 + $0x1a8] sm:$0xff] %vm309_vm0, %v290_v44  ;;  %364 = vst.msk [vmem:[%s1063_s2 + $0x1b0] sm:$0xff] %vm309_vm0, %v291_v45  ;;  %v151_v55 = vmul.f32 %v406_v0, %v75_v42  ;;  %v222_v56 = vadd.f32 %v411_v1, %v146_v49  ;;  %v223_v57 = vadd.f32 %v411_v1, %v147_v50 }
  0x32   :  { %365 = vst.msk [vmem:[%s1063_s2 + $0x1b8] sm:$0xff] %vm309_vm0, %v292_v48  ;;  %v224_v58 = vadd.f32 %v411_v1, %v148_v51  ;;  %v152_v59 = vmul.f32 %v406_v0, %v76_v47  ;;  %v293_v61 = vmax.f32 %v221_v52, 0.0  ;;  %v225_v62 = vadd.f32 %v411_v1, %v149_v53 }
  0x33   :  { %v226_v63 = vadd.f32 %v411_v1, %v150_v54  ;;  %v227_v2 = vadd.f32 %v411_v1, %v151_v55  ;;  %v294_v6 = vmax.f32 %v222_v56, 0.0  ;;  %v295_v7 = vmax.f32 %v223_v57, 0.0 }
  0x34   :  { %v296_v8 = vmax.f32 %v224_v58, 0.0  ;;  %v228_v9 = vadd.f32 %v411_v1, %v152_v59  ;;  %366 = vst.msk [vmem:[%s1063_s2 + $0x1c0] sm:$0xff] %vm309_vm0, %v293_v61  ;;  %v297_v13 = vmax.f32 %v225_v62, 0.0  ;;  %v153_v16 = vmul.f32 %v406_v0, %v77_v60 }
  0x35   :  { %v298_v14 = vmax.f32 %v226_v63, 0.0  ;;  %v299_v15 = vmax.f32 %v227_v2, 0.0  ;;  %367 = vst.msk [vmem:[%s1063_s2 + $0x1c8] sm:$0xff] %vm309_vm0, %v294_v6  ;;  %368 = vst.msk [vmem:[%s1063_s2 + $0x1d0] sm:$0xff] %vm309_vm0, %v295_v7  ;;  %v154_v19 = vmul.f32 %v406_v0, %v78_v3  ;;  %v155_v20 = vmul.f32 %v406_v0, %v79_v4 }
  0x36   :  { %369 = vst.msk [vmem:[%s1063_s2 + $0x1d8] sm:$0xff] %vm309_vm0, %v296_v8  ;;  %v300_v18 = vmax.f32 %v228_v9, 0.0  ;;  %v156_v21 = vmul.f32 %v406_v0, %v80_v5  ;;  %370 = vst.msk [vmem:[%s1063_s2 + $0x1e0] sm:$0xff] %vm309_vm0, %v297_v13  ;;  %v229_v22 = vadd.f32 %v411_v1, %v153_v16  ;;  %v157_v23 = vmul.f32 %v406_v0, %v81_v10 }
  0x37   :  { %371 = vst.msk [vmem:[%s1063_s2 + $0x1e8] sm:$0xff] %vm309_vm0, %v298_v14  ;;  %372 = vst.msk [vmem:[%s1063_s2 + $0x1f0] sm:$0xff] %vm309_vm0, %v299_v15  ;;  %v158_v24 = vmul.f32 %v406_v0, %v82_v11  ;;  %v159_v25 = vmul.f32 %v406_v0, %v83_v12  ;;  %v230_v26 = vadd.f32 %v411_v1, %v154_v19 }
  0x38   :  { %373 = vst.msk [vmem:[%s1063_s2 + $0x1f8] sm:$0xff] %vm309_vm0, %v300_v18  ;;  %v231_v27 = vadd.f32 %v411_v1, %v155_v20  ;;  %v232_v28 = vadd.f32 %v411_v1, %v156_v21  ;;  %v160_v29 = vmul.f32 %v406_v0, %v84_v17  ;;  %v301_v30 = vmax.f32 %v229_v22, 0.0 }
  0x39   :  { %v233_v31 = vadd.f32 %v411_v1, %v157_v23  ;;  %v234_v32 = vadd.f32 %v411_v1, %v158_v24  ;;  %v235_v33 = vadd.f32 %v411_v1, %v159_v25  ;;  %v302_v34 = vmax.f32 %v230_v26, 0.0 }
  0x3a   :  { %v303_v35 = vmax.f32 %v231_v27, 0.0  ;;  %v304_v36 = vmax.f32 %v232_v28, 0.0  ;;  %v236_v37 = vadd.f32 %v411_v1, %v160_v29  ;;  %374 = vst.msk [vmem:[%s1063_s2 + $0x200] sm:$0xff] %vm309_vm0, %v301_v30 }
  0x3b   :  { %v305_v38 = vmax.f32 %v233_v31, 0.0  ;;  %v306_v39 = vmax.f32 %v234_v32, 0.0  ;;  %v307_v0 = vmax.f32 %v235_v33, 0.0  ;;  %375 = vst.msk [vmem:[%s1063_s2 + $0x208] sm:$0xff] %vm309_vm0, %v302_v34 }
  0x3c   :  { %376 = vst.msk [vmem:[%s1063_s2 + $0x210] sm:$0xff] %vm309_vm0, %v303_v35  ;;  %377 = vst.msk [vmem:[%s1063_s2 + $0x218] sm:$0xff] %vm309_vm0, %v304_v36  ;;  %v308_v1 = vmax.f32 %v236_v37, 0.0 }
  0x3d   :  { %378 = vst.msk [vmem:[%s1063_s2 + $0x220] sm:$0xff] %vm309_vm0, %v305_v38  ;;  %379 = vst.msk [vmem:[%s1063_s2 + $0x228] sm:$0xff] %vm309_vm0, %v306_v39 }
  0x3e   :  { %380 = vst.msk [vmem:[%s1063_s2 + $0x230] sm:$0xff] %vm309_vm0, %v307_v0  ;;  %381 = vst.msk [vmem:[%s1063_s2 + $0x238] sm:$0xff] %vm309_vm0, %v308_v1 }

// kernel: decoder_block_forward.16
= control target key start
LH: loop header
LB: loop body
LE: loop exit
PB: predicated region body
PF: predicated region fallthrough
CT: control target
= control target key end

     0   :  { %s5627_s15 = smov 0   ;;  %s8483_s0 = inlined_call_operand.vmem [shape: bf16[2,326,4], index: 0, kind: input, shape index: {}]   ;;  %s8484_s1 = inlined_call_operand.vmem [shape: bf16[9,4,8], index: 1, kind: input, shape index: {}]   ;;  %s8485_s2 = inlined_call_operand.vmem [shape: f32[2,288,8], index: 2, kind: output, shape index: {0}]   ;;  %s8486_s3 = inlined_call_operand.vmem [shape: f32[2,1,8], index: 3, kind: output, shape index: {1}]   ;;  %s8487_s4 = inlined_call_operand.vmem [shape: f32[2,1,8], index: 4, kind: output, shape index: {2}]  }
   0x1 LB: > { %s4684_s16 = sadd.s32 4294967295, %s5600_s15   ;;  %p4688_p0 = scmp.ge.s32.totalorder %s5600_s15, 1  ;;  %s5600_s15 = sphi %s5627_s15, %s15_s15  }
   0x2   : > { %p167_p1 = scmp.lt.s32.totalorder %s5600_s15, 3 }
   0x4   : > { %p168_p2 = pnand %p4688_p0, %p167_p1 }
   0x6   : > { %171 = sbr.rel (%p168_p2) target bundleno = 609 (0x261), region = 28 }
   0xb   : > { %v4691_v0 = vld [vmem:[%s8484_s1 + $0x2] sm:$0x3]  ;;  %vm553_vm0 = vcmask 1041408   ;;  %p199_p3 = scmp.lt.s32.totalorder %s4684_s16, 1  ;;  %v4747_v2 = vld [vmem:[%s8484_s1 + $0x4] sm:$0x3] }
   0xc   : > { %5440 = vmatprep.subr.msk.bf16.mxu0 %vm553_vm0, %v4691_v0  ;;  %5441 = vmatprep.subr.msk.bf16.mxu1 %vm553_vm0, %v4691_v0  ;;  %v555_v1 = vsel %vm553_vm0, %v4691_v0, 0  ;;  %v252_v3 = vld [vmem:[%s8484_s1] sm:$0x3]  ;;  %vm349_vm1 = vsmask.f32 7424  ;;  %vm498_vm2 = vcmask 31744  }
   0xd   : > { %5097 = vmatpush3.bf16.msra.mxu0 %v555_v1  ;;  %5439 = vmatpush3.bf16.msra.mxu1 %v555_v1  ;;  %s9202_s16 = smov (!%p199_p3, %s4684_s16), 1  ;;  %v1049_v8 = vsel %vm553_vm0, %v4747_v2, 0  ;;  %v771_v16 = vsel %vm553_vm0, %v252_v3, 0  ;;  %v5700_v33 = vld [vmem:[%s8484_s1 + $0x8] sm:$0x3]  ;;  %vm956_vm3 = vcmask 1046528  }
   0xe   : > { %5443 = vmatprep.subr.msk.bf16.mxu0 %vm553_vm0, %v4747_v2  ;;  %5442 = vmatprep.subr.msk.bf16.mxu1 %vm553_vm0, %v252_v3  ;;  %s5450_s23 = smul.u32 164, %s9202_s16  ;;  %v5720_v45 = vld [vmem:[%s8484_s1 + $0x6] sm:$0x3]  ;;  %vm2156_vm4 = vcmask 1045504   ;;  %vm1709_vm5 = vsmask.f32 6400  ;;  %s211_s21 = scalar_lea.vmem %s8486_s3, %s9202_s16 }
   0xf   : > { %vm3356_vm6 = vcmask 1044480   ;;  %vm2909_vm7 = vsmask.f32 5376  ;;  %s5451_s13 = smul.u32 288, %s9202_s16  ;;  %s214_s24 = scalar_lea.vmem %s8487_s4, %s9202_s16 }
  0x10   : > { %s5655_s26 = scalar_lea.vmem %s8483_s0, %s5450_s23 }
  0x11   : > { %v216_v4 = vld [vmem:[%s5655_s26] sm:$0xf]  ;;  %v5659_v5 = vld [vmem:[%s5655_s26 + $0x4] sm:$0xf]  ;;  %v5665_v7 = vld [vmem:[%s5655_s26 + $0x8] sm:$0xff]   ;;  %s7808_s18 = scalar_lea.vmem %s8485_s2, %s5451_s13 }
  0x12   : > { %v5662_v6 = vcombine.low %v216_v4, %v5659_v5  ;;  %v358_v11 = vshll.u32 %v5665_v7, 16  ;;  %v362_v12 = vshrl.u32 %v5665_v7, 16  ;;  %v5673_v13 = vld [vmem:[%s5655_s26 + $0x50] sm:$0xff]   ;;  %v5676_v14 = vld [vmem:[%s5655_s26 + $0x58] sm:$0xff]   ;;  %v5688_v24 = vld [vmem:[%s5655_s26 + $0x60] sm:$0xff]  }
  0x13   : > { %v5679_v15 = vld [vmem:[%s5655_s26 + $0x10] sm:$0xff]   ;;  %v430_v19 = vshll.u32 %v5673_v13, 16  ;;  %v434_v20 = vshrl.u32 %v5673_v13, 16  ;;  %v438_v21 = vshll.u32 %v5676_v14, 16  ;;  %v442_v22 = vshrl.u32 %v5676_v14, 16  ;;  %v5693_v28 = vld [vmem:[%s5655_s26 + $0x18] sm:$0xff]  }
  0x14   : > { %v351_v9 = vshrl.u32 %v5662_v6, 16  ;;  %v353_v10 = vshll.u32 %v5662_v6, 16  ;;  %v360_v18 = vrot.slane %v358_v11, 1  ;;  %v366_v23 = vshll.u32 %v5679_v15, 16  ;;  %v5706_v37 = vld [vmem:[%s5655_s26 + $0x68] sm:$0xff]   ;;  %v5710_v39 = vld [vmem:[%s5655_s26 + $0x20] sm:$0xff]  }
  0x15   : > { %v5690_v27 = vrot.slane %v430_v19, 1  ;;  %v440_v29 = vrot.slane %v438_v21, 1  ;;  %v446_v31 = vshll.u32 %v5688_v24, 16  ;;  %v370_v32 = vshrl.u32 %v5679_v15, 16  ;;  %v5715_v44 = vld [vmem:[%s5655_s26 + $0x70] sm:$0xff]   ;;  %v5727_v50 = vld [vmem:[%s5655_s26 + $0x28] sm:$0xff]  }
  0x16   : > { %v355_v17 = vrot.slane %v353_v10, 1  ;;  %v364_v26 = vor.u32 %v362_v12, %v360_v18  ;;  %v368_v30 = vrot.slane %v366_v23, 1  ;;  %v374_v36 = vshll.u32 %v5693_v28, 16  ;;  %v5742_v62 = vld [vmem:[%s5655_s26 + $0x78] sm:$0xff]   ;;  %v5752_v10 = vld [vmem:[%s5655_s26 + $0x30] sm:$0xff]   ;;  %v5755_v11 = vld [vmem:[%s5655_s26 + $0x80] sm:$0xff]  }
  0x17   : > { %v436_v35 = vor.u32 %v434_v20, %v5690_v27  ;;  %v450_v38 = vshrl.u32 %v5688_v24, 16  ;;  %v444_v40 = vor.u32 %v442_v22, %v440_v29  ;;  %v448_v42 = vrot.slane %v446_v31, 1  ;;  %v5764_v23 = vld [vmem:[%s5655_s26 + $0x38] sm:$0xff]  }
  0x18   : > { %v356_v25 = vor.u32 %v355_v17, %v351_v9  ;;  %v369_v41 = vsel %vm349_vm1, %v364_v26, %v368_v30  ;;  %v372_v43 = vor.u32 %v370_v32, %v368_v30  ;;  %v376_v47 = vrot.slane %v374_v36, 1  ;;  %v5769_v26 = vld [vmem:[%s5655_s26 + $0x88] sm:$0xff]  }
  0x19   : > { %v441_v46 = vsel %vm349_vm1, %v436_v35, %v440_v29  ;;  %v454_v48 = vshll.u32 %v5706_v37, 16  ;;  %v378_v49 = vshrl.u32 %v5693_v28, 16  ;;  %v449_v51 = vsel %vm349_vm1, %v444_v40, %v448_v42  ;;  %v5781_v40 = vld [vmem:[%s5655_s26 + $0x48] sm:$0xff]  }
  0x1a   : > { %v361_v34 = vsel %vm349_vm1, %v356_v25, %v360_v18  ;;  %5118 = vmatprep.mubr.msk.bf16.mxu1 %vm498_vm2, %v441_v46  ;;  %v452_v52 = vor.u32 %v450_v38, %v448_v42  ;;  %v382_v53 = vshll.u32 %v5710_v39, 16  ;;  %v458_v54 = vshrl.u32 %v5706_v37, 16  ;;  %v5778_v38 = vld [vmem:[%s5655_s26 + $0x40] sm:$0xff]  }
  0x1b   : > { %5098 = vmatprep.mubr.msk.bf16.mxu0 %vm498_vm2, %v361_v34  ;;  %5119 = vmatmul.mubr.msk.bf16.vlgmr.msra.gmra.mxu1 %vm498_vm2, %v449_v51  ;;  %v377_v55 = vsel %vm349_vm1, %v372_v43, %v376_v47  ;;  %v456_v56 = vrot.slane %v454_v48, 1  ;;  %v380_v57 = vor.u32 %v378_v49, %v376_v47  ;;  %v462_v58 = vshll.u32 %v5715_v44, 16  ;;  %v5549_v43 = vld [vmem:[%s5655_s26 + $0x90] ss:$0 sps:$4 sm:$0x11]  }
  0x1c   : > { %5099 = vmatmul.mubr.msk.bf16.vlgmr.msra.gmra.mxu0 %vm498_vm2, %v369_v41  ;;  %5135 = vmatpush3.bf16.msra.mxu1 %v771_v16  ;;  %v384_v59 = vrot.slane %v382_v53, 1  ;;  %v386_v60 = vshrl.u32 %v5710_v39, 16  ;;  %v390_v61 = vshll.u32 %v5727_v50, 16  ;;  %v466_v2 = vshrl.u32 %v5715_v44, 16 }
  0x1d   : > { %5173 = vmatpush3.bf16.msra.mxu0 %v1049_v8  ;;  %5102 = vmatprep.mubr.msk.bf16.mxu0 %vm498_vm2, %v377_v55  ;;  %v457_v63 = vsel %vm349_vm1, %v452_v52, %v456_v56  ;;  %v460_v0 = vor.u32 %v458_v54, %v456_v56  ;;  %v464_v1 = vrot.slane %v462_v58, 1  ;;  %v470_v9 = vshll.u32 %v5742_v62, 16 }
  0x1e   : > { %5445 = vmatprep.subr.msk.bf16.mxu0 %vm553_vm0, %v5700_v33  ;;  %5444 = vmatprep.subr.msk.bf16.mxu1 %vm553_vm0, %v5720_v45  ;;  %v385_v3 = vsel %vm349_vm1, %v380_v57, %v384_v59  ;;  %v388_v4 = vor.u32 %v386_v60, %v384_v59  ;;  %v392_v8 = vrot.slane %v390_v61, 1  ;;  %v394_v17 = vshrl.u32 %v5727_v50, 16 }
  0x1f   : > { %5122 = vmatprep.mubr.msk.bf16.mxu1 %vm498_vm2, %v457_v63  ;;  %v465_v12 = vsel %vm349_vm1, %v460_v0, %v464_v1  ;;  %v468_v16 = vor.u32 %v466_v2, %v464_v1  ;;  %v474_v18 = vshrl.u32 %v5742_v62, 16  ;;  %v472_v20 = vrot.slane %v470_v9, 1  ;;  %v950_v63 = vld [vmem:[%s5655_s26] sm:$0xe] }
  0x20   : > { %v393_v19 = vsel %vm349_vm1, %v388_v4, %v392_v8  ;;  %v398_v21 = vshll.u32 %v5752_v10, 16  ;;  %v478_v22 = vshll.u32 %v5755_v11, 16  ;;  %v402_v25 = vshrl.u32 %v5752_v10, 16 }
  0x21   : > { %v473_v29 = vsel %vm349_vm1, %v468_v16, %v472_v20  ;;  %v396_v30 = vor.u32 %v394_v17, %v392_v8  ;;  %v406_v34 = vshll.u32 %v5764_v23, 16  ;;  %v482_v35 = vshrl.u32 %v5755_v11, 16 }
  0x22   : > { %v400_v31 = vrot.slane %v398_v21, 1  ;;  %v480_v32 = vrot.slane %v478_v22, 1  ;;  %v486_v36 = vshll.u32 %v5769_v26, 16  ;;  %v476_v41 = vor.u32 %v474_v18, %v472_v20 }
  0x23   : > { %5123 = vmatmul.mubr.msk.bf16.gmra.mxu1 %vm498_vm2, %v465_v12  ;;  %v408_v46 = vrot.slane %v406_v34, 1  ;;  %v414_v49 = vshll.u32 %v5778_v38, 16  ;;  %v410_v52 = vshrl.u32 %v5764_v23, 16  ;;  %v418_v54 = vshrl.u32 %v5778_v38, 16 }
  0x24   : > { %5103 = vmatmul.mubr.msk.bf16.gmra.mxu0 %vm498_vm2, %v385_v3  ;;  %5126 = vmatprep.mubr.msk.bf16.mxu1 %vm498_vm2, %v473_v29  ;;  %v404_v42 = vor.u32 %v402_v25, %v400_v31  ;;  %v484_v47 = vor.u32 %v482_v35, %v480_v32  ;;  %v488_v48 = vrot.slane %v486_v36, 1  ;;  %v401_v51 = vsel %vm349_vm1, %v396_v30, %v400_v31 }
  0x25   : > { %5106 = vmatprep.mubr.msk.bf16.mxu0 %vm498_vm2, %v393_v19  ;;  %v422_v55 = vshll.u32 %v5781_v40, 16  ;;  %v481_v56 = vsel %vm349_vm1, %v476_v41, %v480_v32  ;;  %v490_v57 = vshrl.u32 %v5769_v26, 16  ;;  %v494_v58 = vshll.u32 %v5549_v43, 16 }
  0x26   : > { %v409_v53 = vsel %vm349_vm1, %v404_v42, %v408_v46  ;;  %v489_v59 = vsel %vm349_vm1, %v484_v47, %v488_v48  ;;  %v416_v60 = vrot.slane %v414_v49, 1  ;;  %v412_v61 = vor.u32 %v410_v52, %v408_v46  ;;  %v5880_v46 = vld [vmem:[%s5655_s26 + $0x10] sm:$0xff]   ;;  %v5885_v49 = vld [vmem:[%s5655_s26 + $0x18] sm:$0xff]  }
  0x27   : > { %v424_v1 = vrot.slane %v422_v55, 1  ;;  %v492_v2 = vor.u32 %v490_v57, %v488_v48  ;;  %v496_v3 = vrot.slane %v494_v58, 1  ;;  %v426_v8 = vshrl.u32 %v5781_v40, 16  ;;  %v5898_v55 = vld [vmem:[%s5655_s26 + $0x30] sm:$0xff]  }
  0x28   : > { %v420_v0 = vor.u32 %v418_v54, %v416_v60  ;;  %v417_v4 = vsel %vm349_vm1, %v412_v61, %v416_v60  ;;  %v4748_v12 = vcombine.low %v950_v63, %v5659_v5  ;;  %v990_v17 = vrot.slane %v5769_v26, 1  ;;  %v5913_v61 = vld [vmem:[%s5655_s26 + $0x38] sm:$0xff]  }
  0x29   : > { %v497_v16 = vsel %vm349_vm1, %v492_v2, %v496_v3  ;;  %v428_v18 = vor.u32 %v426_v8, %v424_v1  ;;  %v992_v19 = vrot.slane %v5549_v43, 1  ;;  %v958_v21 = vrot.slane %v5665_v7, 1  ;;  %v2150_v43 = vld [vmem:[%s5655_s26 + $0x8] sm:$0xc]  ;;  %v5923_v2 = vld [vmem:[%s5655_s26 + $0x40] sm:$0xff]  }
  0x2a   : > { %v425_v9 = vsel %vm349_vm1, %v420_v0, %v424_v1  ;;  %v957_v20 = vrot.slane %v4748_v12, 1  ;;  %v1488_v29 = vsel %vm553_vm0, %v5720_v45, 0  ;;  %v960_v30 = vrot.slane %v5679_v15, 1  ;;  %v5931_v8 = vld [vmem:[%s5655_s26 + $0x48] sm:$0xff]  }
  0x2b   : > { %5127 = vmatmul.mubr.msk.bf16.gmra.mxu1 %vm498_vm2, %v481_v56  ;;  %v5814_v5 = vsel %vm956_vm3, %v990_v17, %v992_v19  ;;  %v433_v22 = vsel %vm349_vm1, %v428_v18, %v5690_v27  ;;  %v962_v27 = vrot.slane %v5693_v28, 1  ;;  %v1935_v31 = vsel %vm553_vm0, %v5700_v33, 0 }
  0x2c   : > { %5107 = vmatmul.mubr.msk.bf16.gmra.mxu0 %vm498_vm2, %v401_v51  ;;  %5130 = vmatprep.mubr.msk.bf16.mxu1 %vm498_vm2, %v489_v59  ;;  %v959_v25 = vsel %vm956_vm3, %v957_v20, %v958_v21  ;;  %v961_v45 = vsel %vm956_vm3, %v958_v21, %v960_v30  ;;  %v966_v34 = vrot.slane %v5727_v50, 1  ;;  %v970_v36 = vrot.slane %v5764_v23, 1  ;;  %v5889_v51 = vld [vmem:[%s5655_s26 + $0x20] sm:$0xff]  }
  0x2d   : > { %5110 = vmatprep.mubr.msk.bf16.mxu0 %vm498_vm2, %v409_v53  ;;  %v963_v32 = vsel %vm956_vm3, %v960_v30, %v962_v27  ;;  %v972_v42 = vrot.slane %v5778_v38, 1  ;;  %v2158_v53 = vrot.slane %v5880_v46, 2  ;;  %v2160_v54 = vrot.slane %v5885_v49, 2  ;;  %v5961_v30 = vld [vmem:[%s5655_s26 + $0x58] sm:$0xff]  }
  0x2e   : > { %v2162_v57 = vrot.slane %v5889_v51, 2  ;;  %v976_v58 = vrot.slane %v5673_v13, 1  ;;  %v978_v59 = vrot.slane %v5676_v14, 1  ;;  %v2166_v1 = vrot.slane %v5898_v55, 2 }
  0x2f   : > { %v973_v48 = vsel %vm956_vm3, %v970_v36, %v972_v42  ;;  %v5908_v60 = vsel %vm2156_vm4, %v2158_v53, %v2160_v54  ;;  %v2172_v18 = vrot.slane %v5931_v8, 2  ;;  %v980_v20 = vrot.slane %v5688_v24, 1 }
  0x30   : > { %v5916_v63 = vsel %vm2156_vm4, %v2160_v54, %v2162_v57 }
  0x33   : > { %5131 = vmatmul.mubr.msk.bf16.gmra.mxu1 %vm498_vm2, %v497_v16  ;;  %v2170_v16 = vrot.slane %v5923_v2, 2 }
  0x34   : > { %5111 = vmatmul.mubr.msk.bf16.gmra.mxu0 %vm498_vm2, %v417_v4  ;;  %5136 = vmatprep.mubr.msk.bf16.mxu1 %vm498_vm2, %v5662_v6  ;;  %v5827_v6 = vld [vmem:[%s8484_s1 + $0xa] sm:$0x3]  ;;  %v2168_v4 = vrot.slane %v5913_v61, 2 }
  0x35   : > { %5114 = vmatprep.mubr.msk.bf16.mxu0 %vm498_vm2, %v425_v9  ;;  %v5949_v21 = vsel %vm2156_vm4, %v2170_v16, %v2172_v18 }
  0x36   : > { %v5938_v12 = vsel %vm2156_vm4, %v2166_v1, %v2168_v4  ;;  %v5944_v19 = vsel %vm2156_vm4, %v2168_v4, %v2170_v16 }
  0x3b   : > { %5137 = vmatmul.mubr.msk.bf16.vlgmr.msra.gmra.mxu1 %vm498_vm2, %v5665_v7  ;;  %v5843_v7 = vld [vmem:[%s8484_s1 + $0xc] sm:$0x3] }
  0x3c   : > { %5115 = vmatmul.mubr.msk.bf16.gmra.mxu0 %vm498_vm2, %v433_v22  ;;  %5211 = vmatpush3.bf16.msra.mxu1 %v1488_v29  ;;  %v982_v22 = vrot.slane %v5706_v37, 1  ;;  %v981_v29 = vsel %vm956_vm3, %v978_v59, %v980_v20 }
  0x3d   : > { %5174 = vmatprep.mubr.msk.bf16.mxu0 %vm498_vm2, %v959_v25  ;;  %5140 = vmatprep.mubr.msk.bf16.mxu1 %vm498_vm2, %v5679_v15  ;;  %v964_v15 = vrot.slane %v5710_v39, 1  ;;  %v5957_v25 = vld [vmem:[%s5655_s26 + $0x50] sm:$0xff]  }
  0x3e   : > { %5446 = vmatprep.subr.msk.bf16.mxu1 %vm553_vm0, %v5827_v6 }
  0x3f   : > { %v965_v33 = vsel %vm956_vm3, %v962_v27, %v964_v15  ;;  %v967_v35 = vsel %vm956_vm3, %v964_v15, %v966_v34  ;;  %v983_v27 = vsel %vm956_vm3, %v980_v20, %v982_v22  ;;  %v986_v15 = vrot.slane %v5742_v62, 1 }
  0x43   : > { %5141 = vmatmul.mubr.msk.bf16.gmra.mxu1 %vm498_vm2, %v5693_v28  ;;  %v968_v28 = vrot.slane %v5752_v10, 1 }
  0x44   : > { %5175 = vmatmul.mubr.msk.bf16.vlgmr.msra.gmra.mxu0 %vm498_vm2, %v961_v45  ;;  %5144 = vmatprep.mubr.msk.bf16.mxu1 %vm498_vm2, %v5710_v39  ;;  %v2174_v45 = vrot.slane %v5957_v25, 2 }
  0x45   : > { %5249 = vmatpush3.bf16.msra.mxu0 %v1935_v31  ;;  %5178 = vmatprep.mubr.msk.bf16.mxu0 %vm498_vm2, %v963_v32  ;;  %v969_v39 = vsel %vm956_vm3, %v966_v34, %v968_v28  ;;  %v971_v41 = vsel %vm956_vm3, %v968_v28, %v970_v36  ;;  %v1264_v34 = vld [vmem:[%s5655_s26 + $0x8] sm:$0xe] }
  0x46   : > { %5447 = vmatprep.subr.msk.bf16.mxu0 %vm553_vm0, %v5843_v7  ;;  %v5968_v31 = vsel %vm2156_vm4, %v2172_v18, %v2174_v45  ;;  %v5986_v28 = vld [vmem:[%s5655_s26 + $0x68] sm:$0xff]  }
  0x4b   : > { %5145 = vmatmul.mubr.msk.bf16.gmra.mxu1 %vm498_vm2, %v5727_v50  ;;  %v974_v50 = vrot.slane %v5781_v40, 1 }
  0x4c   : > { %5179 = vmatmul.mubr.msk.bf16.gmra.mxu0 %vm498_vm2, %v965_v33  ;;  %5148 = vmatprep.mubr.msk.bf16.mxu1 %vm498_vm2, %v5752_v10  ;;  %v5877_v10 = vld [vmem:[%s5655_s26 + $0xc] sm:$0xf]  ;;  %v5982_v33 = vld [vmem:[%s5655_s26 + $0x60] sm:$0xff]  }
  0x4d   : > { %5182 = vmatprep.mubr.msk.bf16.mxu0 %vm498_vm2, %v967_v35  ;;  %v4826_v47 = vcombine.low %v2150_v43, %v5877_v10 }
  0x4f   : > { %v2157_v52 = vrot.slane %v4826_v47, 2  ;;  %v1719_v47 = vshrl.u32 %v5880_v46, 16 }
  0x51   : > { %v5901_v56 = vsel %vm2156_vm4, %v2157_v52, %v2158_v53  ;;  %v1397_v52 = vrot.slane %v5880_v46, 1  ;;  %v6009_v53 = vld [vmem:[%s5655_s26 + $0x70] sm:$0xff]  }
  0x52   : > { %v2182_v4 = vrot.slane %v6009_v53, 2 }
  0x53   : > { %5149 = vmatmul.mubr.msk.bf16.gmra.mxu1 %vm498_vm2, %v5764_v23  ;;  %v975_v23 = vsel %vm956_vm3, %v972_v42, %v974_v50  ;;  %v988_v42 = vrot.slane %v5755_v11, 1 }
  0x54   : > { %5183 = vmatmul.mubr.msk.bf16.gmra.mxu0 %vm498_vm2, %v969_v39  ;;  %5152 = vmatprep.mubr.msk.bf16.mxu1 %vm498_vm2, %v5778_v38  ;;  %v5893_v38 = vld [vmem:[%s5655_s26 + $0x28] sm:$0xff]   ;;  %v2178_v39 = vrot.slane %v5982_v33, 2 }
  0x55   : > { %5186 = vmatprep.mubr.msk.bf16.mxu0 %vm498_vm2, %v971_v41  ;;  %v2164_v0 = vrot.slane %v5893_v38, 2  ;;  %v4768_v41 = vcombine.low %v1264_v34, %v5877_v10  ;;  %v989_v54 = vsel %vm956_vm3, %v986_v15, %v988_v42  ;;  %v6042_v34 = vld [vmem:[%s5655_s26 + $0x88] sm:$0xff]  }
  0x57   : > { %v5926_v3 = vsel %vm2156_vm4, %v2162_v57, %v2164_v0  ;;  %v5934_v9 = vsel %vm2156_vm4, %v2164_v0, %v2166_v1  ;;  %v1711_v43 = vshrl.u32 %v4768_v41, 16  ;;  %v1714_v10 = vshll.u32 %v4768_v41, 16 }
  0x58   : > { %v991_v57 = vsel %vm956_vm3, %v988_v42, %v990_v17  ;;  %v1721_v0 = vrot.slane %v1719_v47, 1  ;;  %v1728_v17 = vshrl.u32 %v5885_v49, 16  ;;  %v1749_v47 = vshll.u32 %v5893_v38, 16 }
  0x5b   : > { %5153 = vmatmul.mubr.msk.bf16.gmra.mxu1 %vm498_vm2, %v5781_v40  ;;  %v977_v40 = vsel %vm956_vm3, %v974_v50, %v976_v58 }
  0x5c   : > { %5187 = vmatmul.mubr.msk.bf16.gmra.mxu0 %vm498_vm2, %v973_v48  ;;  %5156 = vmatprep.mubr.msk.bf16.mxu1 %vm498_vm2, %v5673_v13  ;;  %v979_v13 = vsel %vm956_vm3, %v976_v58, %v978_v59  ;;  %v1722_v48 = vshll.u32 %v5880_v46, 16  ;;  %v6016_v58 = vld [vmem:[%s5655_s26 + $0x78] sm:$0xff]   ;;  %v1716_v59 = vrot.slane %v1714_v10, 2  ;;  %v1746_v10 = vshrl.u32 %v5893_v38, 16 }
  0x5d   : > { %5190 = vmatprep.mubr.msk.bf16.mxu0 %vm498_vm2, %v975_v23  ;;  %v1396_v23 = vrot.slane %v4768_v41, 1 }
  0x5e   : > { %v1724_v1 = vrot.slane %v1722_v48, 2 }
  0x5f   : > { %v1398_v46 = vsel %vm956_vm3, %v1396_v23, %v1397_v52  ;;  %v1755_v23 = vshrl.u32 %v5898_v55, 16 }
  0x60   : > { %v1725_v20 = vor.u32 %v1724_v1, %v1721_v0  ;;  %v2688_v0 = vsel %vm553_vm0, %v5843_v7, 0  ;;  %v1748_v1 = vrot.slane %v1746_v10, 1 }
  0x63   : > { %5157 = vmatmul.mubr.msk.bf16.gmra.mxu1 %vm498_vm2, %v5676_v14  ;;  %v2176_v14 = vrot.slane %v5961_v30, 2 }
  0x64   : > { %5191 = vmatmul.mubr.msk.bf16.gmra.mxu0 %vm498_vm2, %v977_v40  ;;  %5160 = vmatprep.mubr.msk.bf16.mxu1 %vm498_vm2, %v5688_v24  ;;  %v984_v24 = vrot.slane %v5715_v44, 1 }
  0x65   : > { %5194 = vmatprep.mubr.msk.bf16.mxu0 %vm498_vm2, %v979_v13  ;;  %v5973_v32 = vsel %vm2156_vm4, %v2174_v45, %v2176_v14  ;;  %v1731_v13 = vshll.u32 %v5885_v49, 16  ;;  %v1401_v45 = vrot.slane %v5889_v51, 1 }
  0x66   : > { %v985_v35 = vsel %vm956_vm3, %v982_v22, %v984_v24  ;;  %v987_v36 = vsel %vm956_vm3, %v984_v24, %v986_v15  ;;  %v1737_v22 = vshrl.u32 %v5889_v51, 16  ;;  %v1730_v24 = vrot.slane %v1728_v17, 1 }
  0x67   : > { %v1733_v15 = vrot.slane %v1731_v13, 2  ;;  %v1757_v17 = vrot.slane %v1755_v23, 1 }
  0x6b   : > { %5161 = vmatmul.mubr.msk.bf16.gmra.mxu1 %vm498_vm2, %v5706_v37  ;;  %v2180_v37 = vrot.slane %v5986_v28, 2 }
  0x6c   : > { %5195 = vmatmul.mubr.msk.bf16.gmra.mxu0 %vm498_vm2, %v981_v29  ;;  %5164 = vmatprep.mubr.msk.bf16.mxu1 %vm498_vm2, %v5715_v44  ;;  %v5994_v44 = vsel %vm2156_vm4, %v2176_v14, %v2178_v39  ;;  %v1740_v29 = vshll.u32 %v5889_v51, 16  ;;  %v6039_v14 = vld [vmem:[%s5655_s26 + $0x80] sm:$0xff]  }
  0x6d   : > { %5198 = vmatprep.mubr.msk.bf16.mxu0 %vm498_vm2, %v983_v27  ;;  %v5999_v50 = vsel %vm2156_vm4, %v2178_v39, %v2180_v37  ;;  %v6023_v40 = vsel %vm2156_vm4, %v2180_v37, %v2182_v4  ;;  %v1399_v27 = vrot.slane %v5885_v49, 1  ;;  %v2186_v39 = vrot.slane %v6039_v14, 2 }
  0x6e   : > { %v2188_v37 = vrot.slane %v6042_v34, 2  ;;  %v2249_v49 = vsel %vm553_vm0, %v5827_v6, 0 }
  0x6f   : > { %v1400_v41 = vsel %vm956_vm3, %v1397_v52, %v1399_v27  ;;  %v1402_v51 = vsel %vm956_vm3, %v1399_v27, %v1401_v45  ;;  %v1758_v52 = vshll.u32 %v5898_v55, 16  ;;  %v1764_v27 = vshrl.u32 %v5913_v61, 16 }
  0x70   : > { %v6065_v6 = vsel %vm2156_vm4, %v2186_v39, %v2188_v37 }
  0x73   : > { %5165 = vmatmul.mubr.msk.bf16.gmra.mxu1 %vm498_vm2, %v5742_v62  ;;  %v1713_v62 = vrot.slane %v1711_v43, 1  ;;  %v1734_v43 = vor.u32 %v1733_v15, %v1730_v24 }
  0x74   : > { %5199 = vmatmul.mubr.msk.bf16.gmra.mxu0 %vm498_vm2, %v985_v35  ;;  %5168 = vmatprep.mubr.msk.bf16.mxu1 %vm498_vm2, %v5755_v11  ;;  %v2184_v11 = vrot.slane %v6016_v58, 2  ;;  %v1739_v35 = vrot.slane %v1737_v22, 1 }
  0x75   : > { %5202 = vmatprep.mubr.msk.bf16.mxu0 %vm498_vm2, %v987_v36  ;;  %v1717_v18 = vor.u32 %v1716_v59, %v1713_v62  ;;  %v1742_v36 = vrot.slane %v1740_v29, 2  ;;  %v6074_v62 = vld [vmem:[%s5655_s26 + $0x90] sm:$0xff]   ;;  %v1735_v59 = vsel %vm1709_vm5, %v1725_v20, %v1734_v43 }
  0x76   : > { %v6029_v16 = vsel %vm2156_vm4, %v2182_v4, %v2184_v11  ;;  %v6054_v42 = vsel %vm2156_vm4, %v2184_v11, %v2186_v39  ;;  %v1751_v4 = vrot.slane %v1749_v47, 2  ;;  %v6082_v11 = vld [vmem:[%s5655_s26 + $0x98] ss:$0 sps:$4 sm:$0x33]   ;;  %v1409_v39 = vrot.slane %v5923_v2, 1 }
  0x77   : > { %v1743_v48 = vor.u32 %v1742_v36, %v1739_v35  ;;  %v1776_v35 = vshll.u32 %v5923_v2, 16  ;;  %v1407_v36 = vrot.slane %v5913_v61, 1 }
  0x78   : > { %v1752_v29 = vor.u32 %v1751_v4, %v1748_v1  ;;  %v6127_v1 = vld [vmem:[%s5655_s26 + $0x14] sm:$0xf]  ;;  %v3350_v4 = vld [vmem:[%s5655_s26 + $0x10] sm:$0x8] }
  0x79   : > { %v1778_v10 = vrot.slane %v1776_v35, 2  ;;  %v1410_v23 = vsel %vm956_vm3, %v1407_v36, %v1409_v39 }
  0x7b   : > { %5169 = vmatmul.mubr.msk.bf16.gmra.mxu1 %vm498_vm2, %v5769_v26  ;;  %v1726_v26 = vsel %vm1709_vm5, %v1717_v18, %v1725_v20  ;;  %v6090_v18 = vld [vmem:[%s8484_s1 + $0x10] sm:$0x3]  ;;  %v2192_v20 = vrot.slane %v6082_v11, 2 }
  0x7c   : > { %5203 = vmatmul.mubr.msk.bf16.gmra.mxu0 %vm498_vm2, %v989_v54  ;;  %5212 = vmatprep.mubr.msk.bf16.mxu1 %vm498_vm2, %v1398_v46  ;;  %v1403_v54 = vrot.slane %v5893_v38, 1  ;;  %v1744_v46 = vsel %vm1709_vm5, %v1734_v43, %v1743_v48  ;;  %v1760_v38 = vrot.slane %v1758_v52, 2 }
  0x7d   : > { %5206 = vmatprep.mubr.msk.bf16.mxu0 %vm498_vm2, %v991_v57  ;;  %v1405_v57 = vrot.slane %v5898_v55, 1  ;;  %v2190_v55 = vrot.slane %v6074_v62, 2 }
  0x7e   : > { %v1404_v13 = vsel %vm956_vm3, %v1401_v45, %v1403_v54  ;;  %v1767_v45 = vshll.u32 %v5913_v61, 16  ;;  %v1761_v15 = vor.u32 %v1760_v38, %v1757_v17 }
  0x7f   : > { %v1406_v7 = vsel %vm956_vm3, %v1403_v54, %v1405_v57  ;;  %v6096_v22 = vsel %vm2156_vm4, %v2188_v37, %v2190_v55  ;;  %v6102_v24 = vsel %vm2156_vm4, %v2190_v55, %v2192_v20  ;;  %v1766_v37 = vrot.slane %v1764_v27, 1  ;;  %v6132_v55 = vld [vmem:[%s5655_s26 + $0x18] sm:$0xff]   ;;  %v6137_v27 = vld [vmem:[%s5655_s26 + $0x20] sm:$0xff]  }
  0x80   : > { %v1408_v47 = vsel %vm956_vm3, %v1405_v57, %v1407_v36  ;;  %v1791_v54 = vshrl.u32 %v5957_v25, 16  ;;  %v1794_v57 = vshll.u32 %v5957_v25, 16  ;;  %v1800_v36 = vshrl.u32 %v5961_v30, 16 }
  0x83   : > { %5213 = vmatmul.mubr.msk.bf16.vlgmr.msra.gmra.mxu1 %vm498_vm2, %v1400_v41  ;;  %v1753_v41 = vsel %vm1709_vm5, %v1743_v48, %v1752_v29  ;;  %v1785_v48 = vshll.u32 %v5931_v8, 16 }
  0x84   : > { %5207 = vmatmul.mubr.msk.bf16.gmra.mxu0 %vm498_vm2, %v5814_v5  ;;  %v6062_v5 = vld [vmem:[%s8484_s1 + $0xe] sm:$0x3]  ;;  %5287 = vmatpush3.bf16.msra.mxu1 %v2249_v49  ;;  %v1769_v49 = vrot.slane %v1767_v45, 2  ;;  %v3358_v45 = vrot.slane %v6132_v55, 3 }
  0x85   : > { %5250 = vmatprep.mubr.msk.bf16.mxu0 %vm498_vm2, %v1726_v26  ;;  %5216 = vmatprep.mubr.msk.bf16.mxu1 %vm498_vm2, %v1402_v51  ;;  %v1773_v26 = vshrl.u32 %v5923_v2, 16  ;;  %v1762_v51 = vsel %vm1709_vm5, %v1752_v29, %v1761_v15  ;;  %v1782_v2 = vshrl.u32 %v5931_v8, 16  ;;  %v1787_v38 = vrot.slane %v1785_v48, 2 }
  0x86   : > { %5448 = vmatprep.subr.msk.bf16.mxu1 %vm553_vm0, %v6062_v5  ;;  %v1770_v61 = vor.u32 %v1769_v49, %v1766_v37  ;;  %v1796_v29 = vrot.slane %v1794_v57, 2  ;;  %v1809_v49 = vshrl.u32 %v5982_v33, 16 }
  0x87   : > { %v1775_v43 = vrot.slane %v1773_v26, 1  ;;  %v1784_v17 = vrot.slane %v1782_v2, 1  ;;  %v8488_v26 = vrot.slane %v6137_v27, 3 }
  0x89   : > { %v1779_v52 = vor.u32 %v1778_v10, %v1775_v43  ;;  %v1788_v35 = vor.u32 %v1787_v38, %v1784_v17  ;;  %v6156_v43 = vsel %vm3356_vm6, %v3358_v45, %v8488_v26  ;;  %v1415_v10 = vrot.slane %v5961_v30, 1 }
  0x8a   : > { %v1827_v17 = vshrl.u32 %v6009_v53, 16  ;;  %v1830_v38 = vshll.u32 %v6009_v53, 16 }
  0x8b   : > { %5217 = vmatmul.mubr.msk.bf16.gmra.mxu1 %vm498_vm2, %v1404_v13  ;;  %v4904_v13 = vcombine.low %v3350_v4, %v6127_v1  ;;  %v1780_v20 = vsel %vm1709_vm5, %v1770_v61, %v1779_v52 }
  0x8c   : > { %5251 = vmatmul.mubr.msk.bf16.vlgmr.msra.gmra.mxu0 %vm498_vm2, %v1735_v59  ;;  %5220 = vmatprep.mubr.msk.bf16.mxu1 %vm498_vm2, %v1406_v7  ;;  %v1411_v59 = vrot.slane %v5931_v8, 1  ;;  %v1793_v7 = vrot.slane %v1791_v54, 1  ;;  %v1811_v54 = vrot.slane %v1809_v49, 1  ;;  %v1848_v49 = vshll.u32 %v6039_v14, 16 }
  0x8d   : > { %5325 = vmatpush3.bf16.msra.mxu0 %v2688_v0  ;;  %5254 = vmatprep.mubr.msk.bf16.mxu0 %vm498_vm2, %v1744_v46  ;;  %v1413_v0 = vrot.slane %v5957_v25, 1  ;;  %v1771_v46 = vsel %vm1709_vm5, %v1761_v15, %v1770_v61  ;;  %v3357_v25 = vrot.slane %v4904_v13, 3  ;;  %v1802_v61 = vrot.slane %v1800_v36, 1 }
  0x8e   : > { %5449 = vmatprep.subr.msk.bf16.mxu0 %vm553_vm0, %v6090_v18  ;;  %v1412_v8 = vsel %vm956_vm3, %v1409_v39, %v1411_v59  ;;  %v1797_v39 = vor.u32 %v1796_v29, %v1793_v7  ;;  %v1421_v13 = vrot.slane %v6009_v53, 1  ;;  %v1839_v53 = vshll.u32 %v6016_v58, 16 }
  0x8f   : > { %v1414_v15 = vsel %vm956_vm3, %v1411_v59, %v1413_v0  ;;  %v6148_v37 = vsel %vm3356_vm6, %v3357_v25, %v3358_v45  ;;  %v1416_v59 = vsel %vm956_vm3, %v1413_v0, %v1415_v10  ;;  %v1419_v0 = vrot.slane %v5986_v28, 1 }
  0x90   : > { %v1798_v48 = vsel %vm1709_vm5, %v1788_v35, %v1797_v39  ;;  %v1829_v25 = vrot.slane %v1827_v17, 1  ;;  %v1832_v45 = vrot.slane %v1830_v38, 2  ;;  %v1429_v17 = vrot.slane %v6074_v62, 1 }
  0x93   : > { %5221 = vmatmul.mubr.msk.bf16.gmra.mxu1 %vm498_vm2, %v1408_v47  ;;  %v1417_v47 = vrot.slane %v5982_v33, 1 }
  0x94   : > { %5255 = vmatmul.mubr.msk.bf16.gmra.mxu0 %vm498_vm2, %v1753_v41  ;;  %5224 = vmatprep.mubr.msk.bf16.mxu1 %vm498_vm2, %v1410_v23  ;;  %v1803_v41 = vshll.u32 %v5961_v30, 16  ;;  %v1789_v23 = vsel %vm1709_vm5, %v1779_v52, %v1788_v35  ;;  %v1818_v30 = vshrl.u32 %v5986_v28, 16  ;;  %v1422_v35 = vsel %vm956_vm3, %v1419_v0, %v1421_v13 }
  0x95   : > { %5258 = vmatprep.mubr.msk.bf16.mxu0 %vm498_vm2, %v1762_v51  ;;  %v1812_v51 = vshll.u32 %v5982_v33, 16  ;;  %v1418_v4 = vsel %vm956_vm3, %v1415_v10, %v1417_v47  ;;  %v1821_v33 = vshll.u32 %v5986_v28, 16  ;;  %v1836_v28 = vshrl.u32 %v6016_v58, 16 }
  0x96   : > { %v1805_v2 = vrot.slane %v1803_v41, 2  ;;  %v1820_v7 = vrot.slane %v1818_v30, 1  ;;  %v1833_v41 = vor.u32 %v1832_v45, %v1829_v25  ;;  %v1425_v10 = vrot.slane %v6039_v14, 1  ;;  %v5570_v25 = vld [vmem:[%s5655_s26 + $0x98] ss:$0 sps:$4 sm:$0x11]  }
  0x97   : > { %v1814_v57 = vrot.slane %v1812_v51, 2  ;;  %v1823_v29 = vrot.slane %v1821_v33, 2  ;;  %v1423_v51 = vrot.slane %v6016_v58, 1  ;;  %v1854_v58 = vshrl.u32 %v6042_v34, 16 }
  0x98   : > { %v1863_v30 = vshrl.u32 %v6074_v62, 16  ;;  %v1866_v33 = vshll.u32 %v6074_v62, 16  ;;  %v1872_v62 = vshrl.u32 %v6082_v11, 16 }
  0x99   : > { %v1815_v52 = vor.u32 %v1814_v57, %v1811_v54  ;;  %v1824_v36 = vor.u32 %v1823_v29, %v1820_v7  ;;  %v1850_v54 = vrot.slane %v1848_v49, 2  ;;  %v1424_v57 = vsel %vm956_vm3, %v1421_v13, %v1423_v51 }
  0x9a   : > { %v1865_v7 = vrot.slane %v1863_v30, 1  ;;  %v1868_v29 = vrot.slane %v1866_v33, 2  ;;  %v6267_v30 = vld [vmem:[%s5655_s26 + $0x48] sm:$0xff]  }
  0x9b   : > { %5225 = vmatmul.mubr.msk.bf16.gmra.mxu1 %vm498_vm2, %v1412_v8 }
  0x9c   : > { %5259 = vmatmul.mubr.msk.bf16.gmra.mxu0 %vm498_vm2, %v1771_v46  ;;  %5228 = vmatprep.mubr.msk.bf16.mxu1 %vm498_vm2, %v1414_v15  ;;  %v1806_v46 = vor.u32 %v1805_v2, %v1802_v61  ;;  %v1420_v15 = vsel %vm956_vm3, %v1417_v47, %v1419_v0  ;;  %v1825_v47 = vsel %vm1709_vm5, %v1815_v52, %v1824_v36  ;;  %v1841_v61 = vrot.slane %v1839_v53, 2 }
  0x9d   : > { %5262 = vmatprep.mubr.msk.bf16.mxu0 %vm498_vm2, %v1780_v20  ;;  %v1834_v2 = vsel %vm1709_vm5, %v1824_v36, %v1833_v41  ;;  %v1856_v0 = vrot.slane %v1854_v58, 1  ;;  %v1431_v36 = vrot.slane %v5570_v25, 1  ;;  %v6251_v58 = vld [vmem:[%s5655_s26 + $0x38] sm:$0xff]  }
  0x9e   : > { %v1807_v20 = vsel %vm1709_vm5, %v1797_v39, %v1806_v46  ;;  %v1816_v8 = vsel %vm1709_vm5, %v1806_v46, %v1815_v52  ;;  %v1845_v39 = vshrl.u32 %v6039_v14, 16  ;;  %v1857_v14 = vshll.u32 %v6042_v34, 16 }
  0x9f   : > { %v1427_v52 = vrot.slane %v6042_v34, 1 }
  0xa0   : > { %v1859_v13 = vrot.slane %v1857_v14, 2  ;;  %v6263_v14 = vld [vmem:[%s5655_s26 + $0x40] sm:$0xff]  }
  0xa1   : > { %v1430_v45 = vsel %vm956_vm3, %v1427_v52, %v1429_v17 }
  0xa2   : > { %v1860_v34 = vor.u32 %v1859_v13, %v1856_v0 }
  0xa3   : > { %5229 = vmatmul.mubr.msk.bf16.gmra.mxu1 %vm498_vm2, %v1416_v59  ;;  %v1426_v59 = vsel %vm956_vm3, %v1423_v51, %v1425_v10 }
  0xa4   : > { %5263 = vmatmul.mubr.msk.bf16.gmra.mxu0 %vm498_vm2, %v1789_v23  ;;  %5232 = vmatprep.mubr.msk.bf16.mxu1 %vm498_vm2, %v1418_v4  ;;  %v1838_v23 = vrot.slane %v1836_v28, 1  ;;  %v2464_v28 = vld [vmem:[%s5655_s26 + $0x10] sm:$0xc] }
  0xa5   : > { %5266 = vmatprep.mubr.msk.bf16.mxu0 %vm498_vm2, %v1798_v48  ;;  %v1847_v48 = vrot.slane %v1845_v39, 1  ;;  %v6218_v51 = vcombine.low %v2464_v28, %v6127_v1 }
  0xa6   : > { %v1842_v4 = vor.u32 %v1841_v61, %v1838_v23  ;;  %v2597_v23 = vrot.slane %v6132_v55, 2 }
  0xa7   : > { %v1851_v46 = vor.u32 %v1850_v54, %v1847_v48  ;;  %v3135_v48 = vsel %vm553_vm0, %v6062_v5, 0  ;;  %v2599_v54 = vrot.slane %v6137_v27, 2  ;;  %v3449_v5 = vsel %vm553_vm0, %v6090_v18, 0 }
  0xa8   : > { %v1843_v38 = vsel %vm1709_vm5, %v1833_v41, %v1842_v4  ;;  %v1874_v41 = vrot.slane %v1872_v62, 1 }
  0xa9   : > { %v1861_v53 = vsel %vm1709_vm5, %v1851_v46, %v1860_v34 }
  0xab   : > { %5233 = vmatmul.mubr.msk.bf16.gmra.mxu1 %vm498_vm2, %v1420_v15  ;;  %v1875_v15 = vshll.u32 %v6082_v11, 16 }
  0xac   : > { %5267 = vmatmul.mubr.msk.bf16.gmra.mxu0 %vm498_vm2, %v1807_v20  ;;  %5236 = vmatprep.mubr.msk.bf16.mxu1 %vm498_vm2, %v1422_v35  ;;  %v1852_v20 = vsel %vm1709_vm5, %v1842_v4, %v1851_v46  ;;  %v1869_v35 = vor.u32 %v1868_v29, %v1865_v7 }
  0xad   : > { %5270 = vmatprep.mubr.msk.bf16.mxu0 %vm498_vm2, %v1816_v8  ;;  %v1428_v8 = vsel %vm956_vm3, %v1425_v10, %v1427_v52  ;;  %v1877_v39 = vrot.slane %v1875_v15, 2  ;;  %v1432_v10 = vsel %vm956_vm3, %v1429_v17, %v1431_v36  ;;  %v2609_v17 = vrot.slane %v6267_v30, 2 }
  0xae   : > { %v1870_v49 = vsel %vm1709_vm5, %v1860_v34, %v1869_v35 }
  0xaf   : > { %v1878_v11 = vor.u32 %v1877_v39, %v1874_v41 }
  0xb1   : > { %v1879_v1 = vsel %vm1709_vm5, %v1869_v35, %v1878_v11 }
  0xb3   : > { %5237 = vmatmul.mubr.msk.bf16.gmra.mxu1 %vm498_vm2, %v1424_v57  ;;  %v2600_v57 = vsel %vm2156_vm4, %v2597_v23, %v2599_v54 }
  0xb4   : > { %5271 = vmatmul.mubr.msk.bf16.gmra.mxu0 %vm498_vm2, %v1825_v47  ;;  %5240 = vmatprep.mubr.msk.bf16.mxu1 %vm498_vm2, %v1426_v59  ;;  %v2596_v47 = vrot.slane %v6218_v51, 2  ;;  %v6245_v59 = vld [vmem:[%s5655_s26 + $0x30] sm:$0xff]  }
  0xb5   : > { %5274 = vmatprep.mubr.msk.bf16.mxu0 %vm498_vm2, %v1834_v2  ;;  %v6231_v2 = vld [vmem:[%s5655_s26 + $0x28] sm:$0xff]  }
  0xb6   : > { %v2598_v61 = vsel %vm2156_vm4, %v2596_v47, %v2597_v23 }
  0xbb   : > { %5241 = vmatmul.mubr.msk.bf16.gmra.mxu1 %vm498_vm2, %v1428_v8  ;;  %v6297_v8 = vld [vmem:[%s5655_s26 + $0x58] sm:$0xff]  }
  0xbc   : > { %5275 = vmatmul.mubr.msk.bf16.gmra.mxu0 %vm498_vm2, %v1843_v38  ;;  %5244 = vmatprep.mubr.msk.bf16.mxu1 %vm498_vm2, %v1430_v45  ;;  %v2613_v15 = vrot.slane %v6297_v8, 2 }
  0xbd   : > { %5278 = vmatprep.mubr.msk.bf16.mxu0 %vm498_vm2, %v1852_v20  ;;  %v6289_v20 = vld [vmem:[%s5655_s26 + $0x50] sm:$0xff]  }
  0xbe   : > { %v2611_v45 = vrot.slane %v6289_v20, 2 }
  0xc0   : > { %v2612_v28 = vsel %vm2156_vm4, %v2609_v17, %v2611_v45 }
  0xc3   : > { %5245 = vmatmul.mubr.msk.bf16.gmra.mxu1 %vm498_vm2, %v1432_v10 }
  0xc4   : > { %5279 = vmatmul.mubr.msk.bf16.gmra.mxu0 %vm498_vm2, %v1861_v53  ;;  %5288 = vmatprep.mubr.msk.bf16.mxu1 %vm498_vm2, %v5901_v56  ;;  %v2601_v56 = vrot.slane %v6231_v2, 2  ;;  %v6321_v53 = vld [vmem:[%s5655_s26 + $0x60] sm:$0xff]  }
  0xc5   : > { %5282 = vmatprep.mubr.msk.bf16.mxu0 %vm498_vm2, %v1870_v49  ;;  %v6329_v49 = vld [vmem:[%s5655_s26 + $0x68] sm:$0xff]   ;;  %v2615_v11 = vrot.slane %v6321_v53, 2 }
  0xc6   : > { %v2602_v4 = vsel %vm2156_vm4, %v2599_v54, %v2601_v56 }
  0xc7   : > { %v2616_v54 = vsel %vm2156_vm4, %v2613_v15, %v2615_v11 }
  0xcb   : > { %5289 = vmatmul.mubr.msk.bf16.vlgmr.msra.gmra.mxu1 %vm498_vm2, %v5908_v60  ;;  %v2603_v60 = vrot.slane %v6245_v59, 2 }
  0xcc   : > { %5283 = vmatmul.mubr.msk.bf16.gmra.mxu0 %vm498_vm2, %v1879_v1  ;;  %5363 = vmatpush3.bf16.msra.mxu1 %v3135_v48  ;;  %v2617_v1 = vrot.slane %v6329_v49, 2 }
  0xcd   : > { %5326 = vmatprep.mubr.msk.bf16.mxu0 %vm498_vm2, %v2598_v61  ;;  %5292 = vmatprep.mubr.msk.bf16.mxu1 %vm498_vm2, %v5916_v63  ;;  %v2605_v63 = vrot.slane %v6251_v58, 2  ;;  %v2604_v18 = vsel %vm2156_vm4, %v2601_v56, %v2603_v60  ;;  %v6353_v56 = vld [vmem:[%s5655_s26 + $0x70] sm:$0xff]  }
  0xcf   : > { %v2606_v46 = vsel %vm2156_vm4, %v2603_v60, %v2605_v63 }
  0xd3   : > { %5293 = vmatmul.mubr.msk.bf16.gmra.mxu1 %vm498_vm2, %v5926_v3  ;;  %v2607_v3 = vrot.slane %v6263_v14, 2 }
  0xd4   : > { %5327 = vmatmul.mubr.msk.bf16.vlgmr.msra.gmra.mxu0 %vm498_vm2, %v2600_v57  ;;  %5296 = vmatprep.mubr.msk.bf16.mxu1 %vm498_vm2, %v5934_v9 }
  0xd5   : > { %5401 = vmatpush3.bf16.msra.mxu0 %v3449_v5  ;;  %5330 = vmatprep.mubr.msk.bf16.mxu0 %vm498_vm2, %v2602_v4  ;;  %v2608_v13 = vsel %vm2156_vm4, %v2605_v63, %v2607_v3  ;;  %v6361_v4 = vld [vmem:[%s5655_s26 + $0x78] sm:$0xff]   ;;  %v2619_v63 = vrot.slane %v6353_v56, 2 }
  0xdb   : > { %v6274_v52 = vpop.f32.mrf.mxu1  ;;  %5297 = vmatmul.mubr.msk.bf16.gmra.mxu1 %vm498_vm2, %v5938_v12  ;;  %v2610_v12 = vsel %vm2156_vm4, %v2607_v3, %v2609_v17  ;;  %v2621_v3 = vrot.slane %v6361_v4, 2 }
  0xdc   : > { %v6269_v33 = vpop.f32.mrf.mxu0  ;;  %5331 = vmatmul.mubr.msk.bf16.gmra.mxu0 %vm498_vm2, %v2604_v18  ;;  %5300 = vmatprep.mubr.msk.bf16.mxu1 %vm498_vm2, %v5944_v19 }
  0xdd   : > { %5334 = vmatprep.mubr.msk.bf16.mxu0 %vm498_vm2, %v2606_v46  ;;  %v6283_v38 = vpop.f32.mrf.mxu1 }
  0xde   : > { %v6278_v9 = vpop.f32.mrf.mxu0 }
  0xdf   : > { %v6291_v7 = vpop.f32.mrf.mxu1 }
  0xe0   : > { %v6285_v0 = vpop.f32.mrf.mxu0 }
  0xe1   : > { %v6299_v25 = vpop.f32.mrf.mxu1 }
  0xe2   : > { %v6293_v29 = vpop.f32.mrf.mxu0 }
  0xe3   : > { %v6306_v34 = vpop.f32.mrf.mxu1  ;;  %5301 = vmatmul.mubr.msk.bf16.gmra.mxu1 %vm498_vm2, %v5949_v21  ;;  %v2614_v21 = vsel %vm2156_vm4, %v2611_v45, %v2613_v15  ;;  %v6385_v45 = vld [vmem:[%s5655_s26 + $0x80] sm:$0xff]  }
  0xe4   : > { %v6301_v19 = vpop.f32.mrf.mxu0  ;;  %5335 = vmatmul.mubr.msk.bf16.gmra.mxu0 %vm498_vm2, %v2608_v13  ;;  %5304 = vmatprep.mubr.msk.bf16.mxu1 %vm498_vm2, %v5968_v31  ;;  %8599 = vst [vmem:[#allocation10_spill] sm:$0xff] %v6385_v45 }
  0xe5   : > { %5338 = vmatprep.mubr.msk.bf16.mxu0 %vm498_vm2, %v2610_v12  ;;  %v6315_v35 = vpop.f32.mrf.mxu1  ;;  %v2620_v12 = vsel %vm2156_vm4, %v2617_v1, %v2619_v63 }
  0xe6   : > { %v6310_v62 = vpop.f32.mrf.mxu0 }
  0xe7   : > { %v6323_v41 = vpop.f32.mrf.mxu1 }
  0xe8   : > { %v6317_v36 = vpop.f32.mrf.mxu0  ;;  %8591 = vst [vmem:[#allocation2_spill] sm:$0xff] %v6323_v41 }
  0xe9   : > { %v6331_v10 = vpop.f32.mrf.mxu1 }
  0xea   : > { %v6325_v39 = vpop.f32.mrf.mxu0  ;;  %8592 = vst [vmem:[#allocation3_spill] sm:$0xff] %v6331_v10 }
  0xeb   : > { %v6338_v47 = vpop.f32.mrf.mxu1  ;;  %5305 = vmatmul.mubr.msk.bf16.gmra.mxu1 %vm498_vm2, %v5973_v32  ;;  %v2618_v32 = vsel %vm2156_vm4, %v2615_v11, %v2617_v1 }
  0xec   : > { %v6333_v31 = vpop.f32.mrf.mxu0  ;;  %5339 = vmatmul.mubr.msk.bf16.gmra.mxu0 %vm498_vm2, %v2612_v28  ;;  %8593 = vst [vmem:[#allocation4_spill] sm:$0xff] %v6338_v47  ;;  %5308 = vmatprep.mubr.msk.bf16.mxu1 %vm498_vm2, %v5994_v44 }
  0xed   : > { %5342 = vmatprep.mubr.msk.bf16.mxu0 %vm498_vm2, %v2614_v21  ;;  %v6347_v61 = vpop.f32.mrf.mxu1  ;;  %v6393_v21 = vld [vmem:[%s5655_s26 + $0x88] sm:$0xff]  }
  0xee   : > { %v6342_v23 = vpop.f32.mrf.mxu0  ;;  %8594 = vst [vmem:[#allocation5_spill] sm:$0xff] %v6347_v61  ;;  %8601 = vst [vmem:[#allocation12_spill] sm:$0xff] %v6393_v21  ;;  %v6425_v61 = vld [vmem:[%s5655_s26 + $0x98] sm:$0xff]  }
  0xef   : > { %v6355_v57 = vpop.f32.mrf.mxu1  ;;  %8603 = vst [vmem:[#allocation14_spill] sm:$0xff] %v6425_v61 }
  0xf0   : > { %v6349_v48 = vpop.f32.mrf.mxu0  ;;  %8595 = vst [vmem:[#allocation6_spill] sm:$0xff] %v6355_v57  ;;  %v6419_v57 = vld [vmem:[%s5655_s26 + $0x90] sm:$0xff]  }
  0xf1   : > { %v6363_v60 = vpop.f32.mrf.mxu1 }
  0xf2   : > { %v6357_v5 = vpop.f32.mrf.mxu0  ;;  %8596 = vst [vmem:[#allocation7_spill] sm:$0xff] %v6363_v60 }
  0xf3   : > { %v6370_v18 = vpop.f32.mrf.mxu1  ;;  %5309 = vmatmul.mubr.msk.bf16.gmra.mxu1 %vm498_vm2, %v5999_v50  ;;  %v2622_v50 = vsel %vm2156_vm4, %v2619_v63, %v2621_v3  ;;  %v2625_v63 = vrot.slane %v6393_v21, 2 }
  0xf4   : > { %v6365_v44 = vpop.f32.mrf.mxu0  ;;  %5343 = vmatmul.mubr.msk.bf16.gmra.mxu0 %vm498_vm2, %v2616_v54  ;;  %8597 = vst [vmem:[#allocation8_spill] sm:$0xff] %v6370_v18  ;;  %5312 = vmatprep.mubr.msk.bf16.mxu1 %vm498_vm2, %v6023_v40  ;;  %v2623_v40 = vrot.slane %v6385_v45, 2 }
  0xf5   : > { %5346 = vmatprep.mubr.msk.bf16.mxu0 %vm498_vm2, %v2618_v32  ;;  %v6379_v17 = vpop.f32.mrf.mxu1 }
  0xf6   : > { %v6374_v46 = vpop.f32.mrf.mxu0  ;;  %8598 = vst [vmem:[#allocation9_spill] sm:$0xff] %v6379_v17  ;;  %v2919_v17 = vshrl.u32 %v6132_v55, 16  ;;  %v2624_v60 = vsel %vm2156_vm4, %v2621_v3, %v2623_v40 }
  0xf7   : > { %v6387_v15 = vpop.f32.mrf.mxu1 }
  0xf8   : > { %v6381_v13 = vpop.f32.mrf.mxu0  ;;  %8600 = vst [vmem:[#allocation11_spill] sm:$0xff] %v6387_v15  ;;  %v2914_v15 = vshll.u32 %v6218_v51, 16 }
  0xf9   : > { %v6395_v11 = vpop.f32.mrf.mxu1 }
  0xfa   : > { %v6389_v28 = vpop.f32.mrf.mxu0  ;;  %8602 = vst [vmem:[#allocation13_spill] sm:$0xff] %v6395_v11  ;;  %v2916_v21 = vrot.slane %v2914_v15, 3 }
  0xfb   : > { %v5138_v1 = vpop.f32.mrf.mxu1  ;;  %5313 = vmatmul.mubr.msk.bf16.gmra.mxu1 %vm498_vm2, %v6029_v16  ;;  %v2922_v16 = vshll.u32 %v6132_v55, 16 }
  0xfc   : > { %v6397_v54 = vpop.f32.mrf.mxu0  ;;  %5347 = vmatmul.mubr.msk.bf16.gmra.mxu0 %vm498_vm2, %v2620_v12  ;;  %v816_v26 = vadd.f32 %v5138_v1, %v6269_v33  ;;  %5316 = vmatprep.mubr.msk.bf16.mxu1 %vm498_vm2, %v6054_v42  ;;  %v2626_v42 = vsel %vm2156_vm4, %v2623_v40, %v2625_v63  ;;  %v2627_v40 = vrot.slane %v6419_v57, 2 }
  0xfd   : > { %5350 = vmatprep.mubr.msk.bf16.mxu0 %vm498_vm2, %v2622_v50  ;;  %v807_v12 = vpop.f32.mrf.mxu1  ;;  %v2911_v50 = vshrl.u32 %v6218_v51, 16 }
  0xfe   : > { %v6404_v32 = vpop.f32.mrf.mxu0  ;;  %v808_v18 = vadd.f32 %v807_v12, %v6278_v9  ;;  %v2921_v9 = vrot.slane %v2919_v17, 2  ;;  %v2924_v12 = vrot.slane %v2922_v16, 3 }
  0xff   : > { %v5139_v33 = vpop.f32.mrf.mxu1  ;;  %v2913_v55 = vrot.slane %v2911_v50, 2 }
 0x100   : > { %v6410_v11 = vpop.f32.mrf.mxu0  ;;  %v819_v47 = vadd.f32 %v5139_v33, %v6285_v0  ;;  %v2629_v33 = vrot.slane %v6425_v61, 2  ;;  %v2925_v16 = vor.u32 %v2924_v12, %v2921_v9 }
 0x101   : > { %v810_v51 = vpop.f32.mrf.mxu1  ;;  %v2917_v50 = vor.u32 %v2916_v21, %v2913_v55 }
 0x102   : > { %v6421_v1 = vpop.f32.mrf.mxu0  ;;  %v811_v3 = vadd.f32 %v810_v51, %v6293_v29  ;;  %v2931_v29 = vshll.u32 %v6137_v27, 16 }
 0x103   : > { %v5142_v41 = vpop.f32.mrf.mxu1  ;;  %5317 = vmatmul.mubr.msk.bf16.gmra.mxu1 %vm498_vm2, %v6065_v6  ;;  %v2937_v6 = vshrl.u32 %v6231_v2, 16 }
 0x104   : > { %v5176_v10 = vpop.f32.mrf.mxu0  ;;  %5351 = vmatmul.mubr.msk.bf16.gmra.mxu0 %vm498_vm2, %v2624_v60  ;;  %v832_v60 = vadd.f32 %v5142_v41, %v6301_v19  ;;  %5320 = vmatprep.mubr.msk.bf16.mxu1 %vm498_vm2, %v6096_v22  ;;  %v2628_v41 = vsel %vm2156_vm4, %v2625_v63, %v2627_v40  ;;  %v5591_v22 = vld [vmem:[%s5655_s26 + $0xa0] ss:$0 sps:$4 sm:$0x33]   ;;  %v2933_v9 = vrot.slane %v2931_v29, 3  ;;  %v2949_v29 = vshll.u32 %v6245_v59, 16 }
 0x105   : > { %v6430_v45 = vadd.f32 %v5176_v10, %v816_v26  ;;  %5354 = vmatprep.mubr.msk.bf16.mxu0 %vm498_vm2, %v2626_v42  ;;  %v2928_v26 = vshrl.u32 %v6137_v27, 16  ;;  %v823_v10 = vpop.f32.mrf.mxu1  ;;  %v2940_v42 = vshll.u32 %v6231_v2, 16 }
 0x106   : > { %v1085_v0 = vpop.f32.mrf.mxu0  ;;  %v824_v51 = vadd.f32 %v823_v10, %v6310_v62  ;;  %v2926_v62 = vsel %vm2909_vm7, %v2917_v50, %v2925_v16 }
 0x107   : > { %8604 = vst [vmem:[#allocation15_spill] sm:$0xff] %v6430_v45  ;;  %v6438_v17 = vadd.f32 %v1085_v0, %v808_v18  ;;  %v5143_v18 = vpop.f32.mrf.mxu1  ;;  %v2930_v55 = vrot.slane %v2928_v26, 2  ;;  %v2942_v63 = vrot.slane %v2940_v42, 3  ;;  %v2946_v26 = vshrl.u32 %v6245_v59, 16 }
 0x108   : > { %v5177_v15 = vpop.f32.mrf.mxu0  ;;  %v835_v45 = vadd.f32 %v5143_v18, %v6317_v36  ;;  %v2955_v42 = vshrl.u32 %v6251_v58, 16 }
 0x109   : > { %8605 = vst [vmem:[#allocation16_spill] sm:$0xff] %v6438_v17  ;;  %v6447_v19 = vadd.f32 %v5177_v15, %v819_v47  ;;  %v2630_v17 = vsel %vm2156_vm4, %v2627_v40, %v2629_v33  ;;  %v826_v12 = vpop.f32.mrf.mxu1  ;;  %v2939_v47 = vrot.slane %v2937_v6, 2  ;;  %v2631_v40 = vrot.slane %v5591_v22, 2 }
 0x10a   : > { %v1088_v0 = vpop.f32.mrf.mxu0  ;;  %v827_v10 = vadd.f32 %v826_v12, %v6325_v39  ;;  %v2934_v39 = vor.u32 %v2933_v9, %v2930_v55  ;;  %v2951_v12 = vrot.slane %v2949_v29, 3 }
 0x10b   : > { %v6453_v21 = vadd.f32 %v1088_v0, %v811_v3  ;;  %v5146_v36 = vpop.f32.mrf.mxu1  ;;  %5321 = vmatmul.mubr.msk.bf16.gmra.mxu1 %vm498_vm2, %v6102_v24  ;;  %v2632_v18 = vsel %vm2156_vm4, %v2629_v33, %v2631_v40 }
 0x10c   : > { %v5180_v61 = vpop.f32.mrf.mxu0  ;;  %5355 = vmatmul.mubr.msk.bf16.gmra.mxu0 %vm498_vm2, %v2628_v41  ;;  %v848_v50 = vadd.f32 %v5146_v36, %v6333_v31  ;;  %5364 = vmatprep.mubr.msk.bf16.mxu1 %vm498_vm2, %v2926_v62  ;;  %v2958_v41 = vshll.u32 %v6251_v58, 16  ;;  %v2935_v9 = vsel %vm2909_vm7, %v2925_v16, %v2934_v39 }
 0x10d   : > { %v6458_v15 = vadd.f32 %v5180_v61, %v832_v60  ;;  %5358 = vmatprep.mubr.msk.bf16.mxu0 %vm498_vm2, %v2630_v17  ;;  %v839_v61 = vpop.f32.mrf.mxu1  ;;  %v2943_v17 = vor.u32 %v2942_v63, %v2939_v47 }
 0x10e   : > { %v1101_v3 = vpop.f32.mrf.mxu0  ;;  %v840_v24 = vadd.f32 %v839_v61, %v6342_v23  ;;  %v2960_v36 = vrot.slane %v2958_v41, 3 }
 0x10f   : > { %v6466_v6 = vadd.f32 %v1101_v3, %v824_v51  ;;  %v5147_v0 = vpop.f32.mrf.mxu1  ;;  %v2948_v51 = vrot.slane %v2946_v26, 2  ;;  %v2944_v23 = vsel %vm2909_vm7, %v2934_v39, %v2943_v17  ;;  %v3362_v3 = vrot.slane %v6231_v2, 3 }
 0x110   : > { %v5181_v60 = vpop.f32.mrf.mxu0  ;;  %v851_v62 = vadd.f32 %v5147_v0, %v6349_v48  ;;  %v8606_v0 = vrot.slane %v6137_v27, 3 }
 0x111   : > { %v6472_v22 = vadd.f32 %v5181_v60, %v835_v45  ;;  %v842_v47 = vpop.f32.mrf.mxu1  ;;  %v2957_v45 = vrot.slane %v2955_v42, 2  ;;  %v2952_v16 = vor.u32 %v2951_v12, %v2948_v51  ;;  %v2973_v60 = vshrl.u32 %v6267_v30, 16 }
 0x112   : > { %v1104_v31 = vpop.f32.mrf.mxu0  ;;  %v843_v33 = vadd.f32 %v842_v47, %v6357_v5  ;;  %v2964_v5 = vshrl.u32 %v6263_v14, 16  ;;  %v2976_v42 = vshll.u32 %v6267_v30, 16 }
 0x113   : > { %v6476_v55 = vadd.f32 %v1104_v31, %v827_v10  ;;  %v5150_v48 = vpop.f32.mrf.mxu1  ;;  %5365 = vmatmul.mubr.msk.bf16.vlgmr.msra.gmra.mxu1 %vm498_vm2, %v2935_v9  ;;  %v3363_v31 = vsel %vm3356_vm6, %v8606_v0, %v3362_v3 }
 0x114   : > { %v5184_v63 = vpop.f32.mrf.mxu0  ;;  %5359 = vmatmul.mubr.msk.bf16.gmra.mxu0 %vm498_vm2, %v2632_v18  ;;  %v864_v26 = vadd.f32 %v5150_v48, %v6365_v44  ;;  %5368 = vmatprep.mubr.msk.bf16.mxu1 %vm498_vm2, %v2944_v23  ;;  %v2953_v18 = vsel %vm2909_vm7, %v2943_v17, %v2952_v16  ;;  %v2966_v9 = vrot.slane %v2964_v5, 2  ;;  %v3366_v48 = vrot.slane %v6251_v58, 3 }
 0x115   : > { %v6482_v40 = vadd.f32 %v5184_v63, %v848_v50  ;;  %5402 = vmatprep.mubr.msk.bf16.mxu0 %vm498_vm2, %v6148_v37  ;;  %v2967_v50 = vshll.u32 %v6263_v14, 16  ;;  %v855_v39 = vpop.f32.mrf.mxu1  ;;  %v2961_v37 = vor.u32 %v2960_v36, %v2957_v45  ;;  %v2978_v45 = vrot.slane %v2976_v42, 3 }
 0x116   : > { %v1117_v10 = vpop.f32.mrf.mxu0  ;;  %v856_v41 = vadd.f32 %v855_v39, %v6374_v46  ;;  %v2991_v39 = vshrl.u32 %v6297_v8, 16 }
 0x117   : > { %v6489_v29 = vadd.f32 %v1117_v10, %v840_v24  ;;  %v5151_v44 = vpop.f32.mrf.mxu1  ;;  %v2969_v47 = vrot.slane %v2967_v50, 3  ;;  %v2962_v46 = vsel %vm2909_vm7, %v2952_v16, %v2961_v37  ;;  %v2985_v10 = vshll.u32 %v6289_v20, 16 }
 0x118   : > { %v5185_v61 = vpop.f32.mrf.mxu0  ;;  %v867_v51 = vadd.f32 %v5151_v44, %v6381_v13  ;;  %v3364_v13 = vrot.slane %v6245_v59, 3 }
 0x119   : > { %v6497_v2 = vadd.f32 %v5185_v61, %v851_v62  ;;  %v858_v63 = vpop.f32.mrf.mxu1  ;;  %v2975_v62 = vrot.slane %v2973_v60, 2  ;;  %v2994_v61 = vshll.u32 %v6297_v8, 16 }
 0x11a   : > { %v1120_v24 = vpop.f32.mrf.mxu0  ;;  %v859_v17 = vadd.f32 %v858_v63, %v6389_v28  ;;  %v2970_v28 = vor.u32 %v2969_v47, %v2966_v9  ;;  %v3365_v42 = vsel %vm3356_vm6, %v3362_v3, %v3364_v13 }
 0x11b   : > { %v6504_v12 = vadd.f32 %v1120_v24, %v843_v33  ;;  %v5154_v36 = vpop.f32.mrf.mxu1  ;;  %5369 = vmatmul.mubr.msk.bf16.gmra.mxu1 %vm498_vm2, %v2953_v18  ;;  %v2979_v59 = vor.u32 %v2978_v45, %v2975_v62  ;;  %v2987_v18 = vrot.slane %v2985_v10, 3  ;;  %v2996_v3 = vrot.slane %v2994_v61, 3 }
 0x11c   : > { %v5188_v23 = vpop.f32.mrf.mxu0  ;;  %5403 = vmatmul.mubr.msk.bf16.vlgmr.msra.gmra.mxu0 %vm498_vm2, %v6156_v43  ;;  %v2982_v43 = vshrl.u32 %v6289_v20, 16  ;;  %v880_v16 = vadd.f32 %v5154_v36, %v6397_v54  ;;  %5372 = vmatprep.mubr.msk.bf16.mxu1 %vm498_vm2, %v2962_v46  ;;  %v2971_v9 = vsel %vm2909_vm7, %v2961_v37, %v2970_v28  ;;  %v3000_v36 = vshrl.u32 %v6321_v53, 16 }
 0x11d   : > { %v6510_v27 = vadd.f32 %v5188_v23, %v864_v26  ;;  %5406 = vmatprep.mubr.msk.bf16.mxu0 %vm498_vm2, %v3363_v31  ;;  %v871_v26 = vpop.f32.mrf.mxu1 }
 0x11e   : > { %v1133_v33 = vpop.f32.mrf.mxu0  ;;  %v872_v58 = vadd.f32 %v871_v26, %v6404_v32  ;;  %v2984_v24 = vrot.slane %v2982_v43, 2  ;;  %v2980_v32 = vsel %vm2909_vm7, %v2970_v28, %v2979_v59 }
 0x11f   : > { %v6519_v5 = vadd.f32 %v1133_v33, %v856_v41  ;;  %v5155_v44 = vpop.f32.mrf.mxu1  ;;  %v3367_v41 = vsel %vm3356_vm6, %v3364_v13, %v3366_v48 }
 0x120   : > { %v5189_v50 = vpop.f32.mrf.mxu0  ;;  %v883_v0 = vadd.f32 %v5155_v44, %v6410_v11  ;;  %v3368_v11 = vrot.slane %v6263_v14, 3  ;;  %v2988_v45 = vor.u32 %v2987_v18, %v2984_v24  ;;  %v3009_v14 = vshrl.u32 %v6329_v49, 16 }
 0x121   : > { %v6525_v60 = vadd.f32 %v5189_v50, %v867_v51  ;;  %v874_v47 = vpop.f32.mrf.mxu1  ;;  %v2993_v51 = vrot.slane %v2991_v39, 2  ;;  %v3002_v44 = vrot.slane %v3000_v36, 2  ;;  %v3030_v36 = vshll.u32 %v6361_v4, 16 }
 0x122   : > { %v1136_v54 = vpop.f32.mrf.mxu0  ;;  %v875_v23 = vadd.f32 %v874_v47, %v6421_v1  ;;  %v3003_v1 = vshll.u32 %v6321_v53, 16  ;;  %v3369_v26 = vsel %vm3356_vm6, %v3366_v48, %v3368_v11  ;;  %v2989_v39 = vsel %vm2909_vm7, %v2979_v59, %v2988_v45 }
 0x123   : > { %v6530_v31 = vadd.f32 %v1136_v54, %v859_v17  ;;  %v5158_v62 = vpop.f32.mrf.mxu1  ;;  %5373 = vmatmul.mubr.msk.bf16.gmra.mxu1 %vm498_vm2, %v2971_v9  ;;  %v3370_v17 = vrot.slane %v6267_v30, 3  ;;  %v2997_v10 = vor.u32 %v2996_v3, %v2993_v51  ;;  %v3018_v51 = vshrl.u32 %v6353_v56, 16 }
 0x124   : > { %v5192_v63 = vpop.f32.mrf.mxu0  ;;  %5407 = vmatmul.mubr.msk.bf16.gmra.mxu0 %vm498_vm2, %v3365_v42  ;;  %5376 = vmatprep.mubr.msk.bf16.mxu1 %vm498_vm2, %v2980_v32  ;;  %v3005_v54 = vrot.slane %v3003_v1, 3  ;;  %v3374_v32 = vrot.slane %v6297_v8, 3  ;;  %v3021_v3 = vshll.u32 %v6353_v56, 16 }
 0x125   : > { %v6536_v46 = vadd.f32 %v5192_v63, %v880_v16  ;;  %5410 = vmatprep.mubr.msk.bf16.mxu0 %vm498_vm2, %v3367_v41  ;;  %v887_v33 = vpop.f32.mrf.mxu1  ;;  %v3012_v16 = vshll.u32 %v6329_v49, 16  ;;  %v3371_v61 = vsel %vm3356_vm6, %v3368_v11, %v3370_v17  ;;  %v2998_v18 = vsel %vm2909_vm7, %v2988_v45, %v2997_v10 }
 0x126   : > { %v1149_v37 = vpop.f32.mrf.mxu0  ;;  %v888_v9 = vadd.f32 %v887_v33, %v6283_v38  ;;  %v3006_v38 = vor.u32 %v3005_v54, %v3002_v44  ;;  %v3027_v45 = vshrl.u32 %v6361_v4, 16 }
 0x127   : > { %v6542_v13 = vadd.f32 %v1149_v37, %v872_v58  ;;  %v5159_v30 = vpop.f32.mrf.mxu1  ;;  %v896_v58 = vadd.f32 %v5158_v62, %v6274_v52  ;;  %v3014_v48 = vrot.slane %v3012_v16, 3  ;;  %v3372_v52 = vrot.slane %v6289_v20, 3 }
 0x128   : > { %v5193_v43 = vpop.f32.mrf.mxu0  ;;  %v3020_v16 = vrot.slane %v3018_v51, 2  ;;  %v3029_v44 = vrot.slane %v3027_v45, 2 }
 0x129   : > { %v6549_v28 = vadd.f32 %v5193_v43, %v883_v0  ;;  %v890_v41 = vpop.f32.mrf.mxu1  ;;  %v3011_v0 = vrot.slane %v3009_v14, 2  ;;  %v3373_v33 = vsel %vm3356_vm6, %v3370_v17, %v3372_v52  ;;  %v3375_v14 = vsel %vm3356_vm6, %v3372_v52, %v3374_v32 }
 0x12a   : > { %v1152_v50 = vpop.f32.mrf.mxu0  ;;  %v891_v8 = vadd.f32 %v890_v41, %v6299_v25  ;;  %v3032_v17 = vrot.slane %v3030_v36, 3 }
 0x12b   : > { %v6555_v42 = vadd.f32 %v1152_v50, %v875_v23  ;;  %v5162_v59 = vpop.f32.mrf.mxu1  ;;  %5377 = vmatmul.mubr.msk.bf16.gmra.mxu1 %vm498_vm2, %v2989_v39  ;;  %v899_v23 = vadd.f32 %v5159_v30, %v6291_v7  ;;  %v3015_v20 = vor.u32 %v3014_v48, %v3011_v0  ;;  %v3007_v39 = vsel %vm2909_vm7, %v2997_v10, %v3006_v38  ;;  %v8607_v48 = vld [vmem:[#allocation2_spill] sm:$0xff] }
 0x12c   : > { %v5196_v24 = vpop.f32.mrf.mxu0  ;;  %5411 = vmatmul.mubr.msk.bf16.gmra.mxu0 %vm498_vm2, %v3369_v26  ;;  %5380 = vmatprep.mubr.msk.bf16.mxu1 %vm498_vm2, %v2998_v18  ;;  %v3023_v26 = vrot.slane %v3021_v3, 3  ;;  %v912_v30 = vadd.f32 %v5162_v59, %v6306_v34  ;;  %v3376_v34 = vrot.slane %v6321_v53, 3  ;;  %v3378_v0 = vrot.slane %v6329_v49, 3 }
 0x12d   : > { %v6560_v47 = vadd.f32 %v5196_v24, %v896_v58  ;;  %5414 = vmatprep.mubr.msk.bf16.mxu0 %vm498_vm2, %v3371_v61  ;;  %v903_v62 = vpop.f32.mrf.mxu1  ;;  %v3016_v25 = vsel %vm2909_vm7, %v3006_v38, %v3015_v20  ;;  %v3033_v53 = vor.u32 %v3032_v17, %v3029_v44  ;;  %v8612_v17 = vld [vmem:[#allocation5_spill] sm:$0xff] }
 0x12e   : > { %v1165_v63 = vpop.f32.mrf.mxu0  ;;  %v904_v54 = vadd.f32 %v903_v62, %v6315_v35  ;;  %v3024_v18 = vor.u32 %v3023_v26, %v3020_v16  ;;  %v8608_v35 = vld [vmem:[#allocation10_spill] sm:$0xff]  ;;  %v3377_v36 = vsel %vm3356_vm6, %v3374_v32, %v3376_v34 }
 0x12f   : > { %v6569_v11 = vadd.f32 %v1165_v63, %v888_v9  ;;  %v5163_v43 = vpop.f32.mrf.mxu1  ;;  %v3036_v59 = vshrl.u32 %v8608_v35, 16  ;;  %v3039_v63 = vshll.u32 %v8608_v35, 16 }
 0x130   : > { %v5197_v37 = vpop.f32.mrf.mxu0  ;;  %v915_v9 = vadd.f32 %v5163_v43, %v8607_v48  ;;  %v3025_v43 = vsel %vm2909_vm7, %v3015_v20, %v3024_v18  ;;  %v3380_v20 = vrot.slane %v6353_v56, 3  ;;  %v3382_v48 = vrot.slane %v6361_v4, 3  ;;  %v8615_v4 = vld [vmem:[#allocation7_spill] sm:$0xff] }
 0x131   : > { %v6575_v1 = vadd.f32 %v5197_v37, %v899_v23  ;;  %v906_v61 = vpop.f32.mrf.mxu1  ;;  %v8609_v23 = vld [vmem:[#allocation12_spill] sm:$0xff]  ;;  %v8610_v37 = vld [vmem:[#allocation3_spill] sm:$0xff] }
 0x132   : > { %v1168_v7 = vpop.f32.mrf.mxu0  ;;  %v3045_v38 = vshrl.u32 %v8609_v23, 16  ;;  %v3048_v62 = vshll.u32 %v8609_v23, 16  ;;  %v907_v45 = vadd.f32 %v906_v61, %v8610_v37  ;;  %v3034_v61 = vsel %vm2909_vm7, %v3024_v18, %v3033_v53  ;;  %v8614_v37 = vld [vmem:[#allocation14_spill] sm:$0xff] }
 0x133   : > { %v6580_v50 = vadd.f32 %v1168_v7, %v891_v8  ;;  %v5166_v24 = vpop.f32.mrf.mxu1  ;;  %5381 = vmatmul.mubr.msk.bf16.gmra.mxu1 %vm498_vm2, %v3007_v39  ;;  %v3379_v7 = vsel %vm3356_vm6, %v3376_v34, %v3378_v0  ;;  %v3041_v39 = vrot.slane %v3039_v63, 3  ;;  %v3057_v18 = vshll.u32 %v6419_v57, 16 }
 0x134   : > { %v5200_v58 = vpop.f32.mrf.mxu0  ;;  %5415 = vmatmul.mubr.msk.bf16.gmra.mxu0 %vm498_vm2, %v3373_v33  ;;  %5384 = vmatprep.mubr.msk.bf16.mxu1 %vm498_vm2, %v3016_v25  ;;  %v3047_v44 = vrot.slane %v3045_v38, 2  ;;  %v3050_v32 = vrot.slane %v3048_v62, 3 }
 0x135   : > { %v6586_v41 = vadd.f32 %v5200_v58, %v912_v30  ;;  %5418 = vmatprep.mubr.msk.bf16.mxu0 %vm498_vm2, %v3375_v14  ;;  %v919_v51 = vpop.f32.mrf.mxu1  ;;  %v8611_v14 = vld [vmem:[#allocation4_spill] sm:$0xff]  ;;  %v3038_v30 = vrot.slane %v3036_v59, 2  ;;  %v8613_v59 = vld [vmem:[#allocation6_spill] sm:$0xff] }
 0x136   : > { %v1181_v10 = vpop.f32.mrf.mxu0  ;;  %v928_v16 = vadd.f32 %v5166_v24, %v8611_v14  ;;  %v3051_v62 = vor.u32 %v3050_v32, %v3047_v44 }
 0x137   : > { %v6593_v52 = vadd.f32 %v1181_v10, %v904_v54  ;;  %v5167_v8 = vpop.f32.mrf.mxu1  ;;  %v920_v54 = vadd.f32 %v919_v51, %v8612_v17  ;;  %v3042_v51 = vor.u32 %v3041_v39, %v3038_v30  ;;  %v6632_v30 = vld [vmem:[%s5655_s26 + $0xa0] ss:$0 sps:$4 sm:$0x77]   ;;  %v8616_v39 = vld [vmem:[#allocation8_spill] sm:$0xff] }
 0x138   : > { %v5201_v3 = vpop.f32.mrf.mxu0  ;;  %v931_v63 = vadd.f32 %v5167_v8, %v8613_v59 }
 0x139   : > { %v6601_v49 = vadd.f32 %v5201_v3, %v915_v9  ;;  %v922_v58 = vpop.f32.mrf.mxu1  ;;  %v3054_v9 = vshrl.u32 %v6419_v57, 16  ;;  %v3043_v17 = vsel %vm2909_vm7, %v3033_v53, %v3042_v51 }
 0x13a   : > { %v1184_v33 = vpop.f32.mrf.mxu0 }
 0x13b   : > { %v6607_v26 = vadd.f32 %v1184_v33, %v907_v45  ;;  %v5170_v34 = vpop.f32.mrf.mxu1  ;;  %5385 = vmatmul.mubr.msk.bf16.gmra.mxu1 %vm498_vm2, %v3025_v43  ;;  %v3063_v45 = vshrl.u32 %v8614_v37, 16  ;;  %v923_v33 = vadd.f32 %v922_v58, %v8615_v4  ;;  %v3386_v4 = vrot.slane %v8609_v23, 3 }
 0x13c   : > { %v5204_v25 = vpop.f32.mrf.mxu0  ;;  %5419 = vmatmul.mubr.msk.bf16.gmra.mxu0 %vm498_vm2, %v3377_v36  ;;  %5388 = vmatprep.mubr.msk.bf16.mxu1 %vm498_vm2, %v3034_v61  ;;  %v3066_v36 = vshll.u32 %v8614_v37, 16  ;;  %v3059_v61 = vrot.slane %v3057_v18, 3  ;;  %v944_v44 = vadd.f32 %v5170_v34, %v8616_v39  ;;  %v3384_v34 = vrot.slane %v8608_v35, 3 }
 0x13d   : > { %v6612_v10 = vadd.f32 %v5204_v25, %v928_v16  ;;  %5422 = vmatprep.mubr.msk.bf16.mxu0 %vm498_vm2, %v3379_v7  ;;  %v935_v38 = vpop.f32.mrf.mxu1  ;;  %v3381_v7 = vsel %vm3356_vm6, %v3378_v0, %v3380_v20  ;;  %v3383_v16 = vsel %vm3356_vm6, %v3380_v20, %v3382_v48  ;;  %v3056_v25 = vrot.slane %v3054_v9, 2 }
 0x13e   : > { %v1197_v24 = vpop.f32.mrf.mxu0  ;;  %v3052_v0 = vsel %vm2909_vm7, %v3042_v51, %v3051_v62  ;;  %v3068_v59 = vrot.slane %v3066_v36, 3  ;;  %v8618_v51 = vld [vmem:[#allocation11_spill] sm:$0xff] }
 0x13f   : > { %v6621_v3 = vadd.f32 %v1197_v24, %v920_v54  ;;  %v5171_v8 = vpop.f32.mrf.mxu1  ;;  %v3065_v24 = vrot.slane %v3063_v45, 2  ;;  %v8619_v36 = vld [vmem:[#allocation15_spill] sm:$0xff] }
 0x140   : > { %v5205_v56 = vpop.f32.mrf.mxu0  ;;  %v947_v45 = vadd.f32 %v5171_v8, %v8618_v51 }
 0x141   : > { %v6627_v43 = vadd.f32 %v5205_v56, %v931_v63  ;;  %v938_v54 = vpop.f32.mrf.mxu1  ;;  %v8617_v63 = vld [vmem:[#allocation9_spill] sm:$0xff]  ;;  %v3060_v56 = vor.u32 %v3059_v61, %v3056_v25  ;;  %v3069_v39 = vor.u32 %v3068_v59, %v3065_v24  ;;  %v8621_v25 = vld [vmem:[#allocation16_spill] sm:$0xff] }
 0x142   : > { %v1200_v14 = vpop.f32.mrf.mxu0  ;;  %v936_v20 = vadd.f32 %v935_v38, %v8617_v63 }
 0x143   : > { %v6635_v32 = vadd.f32 %v1200_v14, %v923_v33  ;;  %v5214_v18 = vpop.f32.mrf.mxu1  ;;  %5389 = vmatmul.mubr.msk.bf16.gmra.mxu1 %vm498_vm2, %v3043_v17  ;;  %v3072_v33 = vshrl.u32 %v6632_v30, 16  ;;  %v3075_v14 = vshll.u32 %v6632_v30, 16 }
 0x144   : > { %v5208_v58 = vpop.f32.mrf.mxu0  ;;  %5423 = vmatmul.mubr.msk.bf16.gmra.mxu0 %vm498_vm2, %v3381_v7  ;;  %v1669_v7 = vadd.f32 %v5214_v18, %v8619_v36  ;;  %5392 = vmatprep.mubr.msk.bf16.mxu1 %vm498_vm2, %v3052_v0  ;;  %v3387_v18 = vsel %vm3356_vm6, %v3384_v34, %v3386_v4 }
 0x145   : > { %v6641_v9 = vadd.f32 %v5208_v58, %v944_v44  ;;  %5426 = vmatprep.mubr.msk.bf16.mxu0 %vm498_vm2, %v3383_v16  ;;  %v1524_v35 = vpop.f32.mrf.mxu1  ;;  %v8620_v44 = vld [vmem:[#allocation13_spill] sm:$0xff]  ;;  %v3385_v58 = vsel %vm3356_vm6, %v3382_v48, %v3384_v34  ;;  %v3074_v51 = vrot.slane %v3072_v33, 2  ;;  %v3077_v24 = vrot.slane %v3075_v14, 3 }
 0x146   : > { %v1213_v53 = vpop.f32.mrf.mxu0  ;;  %v939_v17 = vadd.f32 %v938_v54, %v8620_v44  ;;  %v1667_v61 = vadd.f32 %v1524_v35, %v8621_v25  ;;  %v3390_v33 = vrot.slane %v8614_v37, 3 }
 0x147   : > { %v6650_v38 = vadd.f32 %v1213_v53, %v936_v20  ;;  %v5215_v8 = vpop.f32.mrf.mxu1  ;;  %v3061_v20 = vsel %vm2909_vm7, %v3051_v62, %v3060_v56  ;;  %v3388_v62 = vrot.slane %v6419_v57, 3 }
 0x148   : > { %v5209_v16 = vpop.f32.mrf.mxu0  ;;  %v1670_v0 = vadd.f32 %v5215_v8, %v6447_v19 }
 0x149   : > { %v6656_v23 = vadd.f32 %v5209_v16, %v947_v45  ;;  %v1527_v59 = vpop.f32.mrf.mxu1  ;;  %v3070_v45 = vsel %vm2909_vm7, %v3060_v56, %v3069_v39  ;;  %v3078_v56 = vor.u32 %v3077_v24, %v3074_v51  ;;  %v3389_v57 = vsel %vm3356_vm6, %v3386_v4, %v3388_v62 }
 0x14a   : > { %v1216_v63 = vpop.f32.mrf.mxu0  ;;  %v1668_v48 = vadd.f32 %v1527_v59, %v6453_v21  ;;  %v3392_v4 = vrot.slane %v6632_v30, 3 }
 0x14b   : > { %v6662_v53 = vadd.f32 %v1216_v63, %v939_v17  ;;  %v5218_v34 = vpop.f32.mrf.mxu1  ;;  %5393 = vmatmul.mubr.msk.bf16.gmra.mxu1 %vm498_vm2, %v3061_v20 }
 0x14c   : > { %v5252_v54 = vpop.f32.mrf.mxu0  ;;  %5427 = vmatmul.mubr.msk.bf16.gmra.mxu0 %vm498_vm2, %v3385_v58  ;;  %v1673_v14 = vadd.f32 %v5218_v34, %v6458_v15  ;;  %5396 = vmatprep.mubr.msk.bf16.mxu1 %vm498_vm2, %v3070_v45  ;;  %v3391_v58 = vsel %vm3356_vm6, %v3388_v62, %v3390_v33  ;;  %v3701_v62 = vlaneseq }
 0x14d   : > { %v6667_v36 = vadd.f32 %v5252_v54, %v1669_v7  ;;  %5430 = vmatprep.mubr.msk.bf16.mxu0 %vm498_vm2, %v3387_v18  ;;  %v1540_v21 = vpop.f32.mrf.mxu1 }
 0x14e   : > { %v1971_v19 = vpop.f32.mrf.mxu0  ;;  %v1671_v16 = vadd.f32 %v1540_v21, %v6466_v6 }
 0x14f   : > { %v6674_v35 = vadd.f32 %v1971_v19, %v1667_v61  ;;  %v5219_v17 = vpop.f32.mrf.mxu1  ;;  %v3079_v61 = vsel %vm2909_vm7, %v3069_v39, %v3078_v56 }
 0x150   : > { %v5253_v7 = vpop.f32.mrf.mxu0  ;;  %v1674_v37 = vadd.f32 %v5219_v17, %v6472_v22 }
 0x151   : > { %v6678_v44 = vadd.f32 %v5253_v7, %v1670_v0  ;;  %v1543_v8 = vpop.f32.mrf.mxu1  ;;  %v6707_v7 = vshrl.u32 %v3701_v62, 7 }
 0x152   : > { %v1974_v25 = vpop.f32.mrf.mxu0  ;;  %v1672_v6 = vadd.f32 %v1543_v8, %v6476_v55  ;;  %v3393_v55 = vsel %vm3356_vm6, %v3390_v33, %v3392_v4 }
 0x153   : > { %v6683_v15 = vadd.f32 %v1974_v25, %v1668_v48  ;;  %v5222_v18 = vpop.f32.mrf.mxu1  ;;  %5397 = vmatmul.mubr.msk.bf16.gmra.mxu1 %vm498_vm2, %v3079_v61 }
 0x154   : > { %v5256_v63 = vpop.f32.mrf.mxu0  ;;  %5431 = vmatmul.mubr.msk.bf16.gmra.mxu0 %vm498_vm2, %v3389_v57  ;;  %v1677_v0 = vadd.f32 %v5222_v18, %v6482_v40 }
 0x155   : > { %v6688_v20 = vadd.f32 %v5256_v63, %v1673_v14  ;;  %5434 = vmatprep.mubr.msk.bf16.mxu0 %vm498_vm2, %v3391_v58  ;;  %v1556_v39 = vpop.f32.mrf.mxu1 }
 0x156   : > { %v1987_v22 = vpop.f32.mrf.mxu0  ;;  %v1675_v59 = vadd.f32 %v1556_v39, %v6489_v29 }
 0x157   : > { %v6694_v51 = vadd.f32 %v1987_v22, %v1671_v16  ;;  %v5223_v45 = vpop.f32.mrf.mxu1 }
 0x158   : > { %v5257_v24 = vpop.f32.mrf.mxu0  ;;  %v1678_v30 = vadd.f32 %v5223_v45, %v6497_v2 }
 0x159   : > { %v6697_v54 = vadd.f32 %v5257_v24, %v1674_v37  ;;  %v1559_v19 = vpop.f32.mrf.mxu1 }
 0x15a   : > { %v1990_v48 = vpop.f32.mrf.mxu0  ;;  %v1676_v40 = vadd.f32 %v1559_v19, %v6504_v12  ;;  %v3704_v12 = vadd.s32 16, %v6707_v7 }
 0x15b   : > { %v6701_v34 = vadd.f32 %v1990_v48, %v1672_v6  ;;  %v5226_v29 = vpop.f32.mrf.mxu1  ;;  %v6732_v45 = vmul.u32.u64.low 3817748708, %v6707_v7  ;;  %v6733_v48 = vmul.u32.u64.high 3817748708, %v6707_v7, %v6732_v45 }
 0x15c   : > { %v5260_v14 = vpop.f32.mrf.mxu0  ;;  %5435 = vmatmul.mubr.msk.bf16.gmra.mxu0 %vm498_vm2, %v3393_v55  ;;  %v1681_v33 = vadd.f32 %v5226_v29, %v6510_v27 }
 0x15d   : > { %v6705_v56 = vadd.f32 %v5260_v14, %v1677_v0  ;;  %v1572_v57 = vpop.f32.mrf.mxu1 }
 0x15e   : > { %v2003_v21 = vpop.f32.mrf.mxu0  ;;  %v1679_v17 = vadd.f32 %v1572_v57, %v6519_v5  ;;  %v6722_v0 = vmul.u32.u64.low 3817748708, %v3704_v12  ;;  %v6723_v5 = vmul.u32.u64.high 3817748708, %v3704_v12, %v6722_v0 }
 0x15f   : > { %v6710_v16 = vadd.f32 %v2003_v21, %v1675_v59  ;;  %v5227_v58 = vpop.f32.mrf.mxu1  ;;  %v6729_v59 = vadd.s32 24, %v6707_v7 }
 0x160   : > { %v5261_v2 = vpop.f32.mrf.mxu0  ;;  %v1682_v61 = vadd.f32 %v5227_v58, %v6525_v60  ;;  %v3766_v58 = vshrl.u32 %v6723_v5, 4 }
 0x161   : > { %v6713_v25 = vadd.f32 %v5261_v2, %v1678_v30  ;;  %v1575_v63 = vpop.f32.mrf.mxu1 }
 0x162   : > { %v2006_v37 = vpop.f32.mrf.mxu0  ;;  %v1680_v27 = vadd.f32 %v1575_v63, %v6530_v31 }
 0x163   : > { %v6717_v8 = vadd.f32 %v2006_v37, %v1676_v40  ;;  %v5230_v18 = vpop.f32.mrf.mxu1  ;;  %v6742_v40 = vmul.u32.u64.low 3817748708, %v6729_v59  ;;  %v6743_v29 = vmul.u32.u64.high 3817748708, %v6729_v59, %v6742_v40  ;;  %v6750_v37 = vadd.s32 8, %v6707_v7 }
 0x164   : > { %v5264_v6 = vpop.f32.mrf.mxu0  ;;  %v1685_v39 = vadd.f32 %v5230_v18, %v6536_v46  ;;  %v6757_v18 = vadd.s32 48, %v6707_v7 }
 0x165   : > { %v6720_v4 = vadd.f32 %v5264_v6, %v1681_v33  ;;  %v1588_v60 = vpop.f32.mrf.mxu1 }
 0x166   : > { %v2019_v22 = vpop.f32.mrf.mxu0  ;;  %v1683_v31 = vadd.f32 %v1588_v60, %v6542_v13 }
 0x167   : > { %v6726_v24 = vadd.f32 %v2019_v22, %v1679_v17  ;;  %v5231_v30 = vpop.f32.mrf.mxu1 }
 0x168   : > { %v5265_v55 = vpop.f32.mrf.mxu0  ;;  %v1686_v14 = vadd.f32 %v5231_v30, %v6549_v28 }
 0x169   : > { %v6736_v62 = vadd.f32 %v5265_v55, %v1682_v61  ;;  %v1591_v21 = vpop.f32.mrf.mxu1  ;;  %v6763_v60 = vmul.u32.u64.low 3817748708, %v6750_v37  ;;  %v6764_v55 = vmul.u32.u64.high 3817748708, %v6750_v37, %v6763_v60 }
 0x16a   : > { %v2022_v19 = vpop.f32.mrf.mxu0  ;;  %v1684_v57 = vadd.f32 %v1591_v21, %v6555_v42 }
 0x16b   : > { %v6739_v46 = vadd.f32 %v2022_v19, %v1680_v27  ;;  %v5234_v17 = vpop.f32.mrf.mxu1  ;;  %v3744_v27 = vshrl.u32 %v6733_v48, 4 }
 0x16c   : > { %v5268_v33 = vpop.f32.mrf.mxu0  ;;  %v1689_v28 = vadd.f32 %v5234_v17, %v6560_v47  ;;  %v6767_v47 = vadd.s32 32, %v6707_v7  ;;  %v6781_v17 = vadd.s32 56, %v6707_v7 }
 0x16d   : > { %v6746_v2 = vadd.f32 %v5268_v33, %v1685_v39  ;;  %v1604_v63 = vpop.f32.mrf.mxu1  ;;  %v3767_v39 = vmul.u32 18, %v3766_v58  ;;  %v3745_v19 = vmul.u32 18, %v3744_v27 }
 0x16e   : > { %v2035_v13 = vpop.f32.mrf.mxu0  ;;  %v1687_v42 = vadd.f32 %v1604_v63, %v6569_v11 }
 0x16f   : > { %v6753_v61 = vadd.f32 %v2035_v13, %v1683_v31  ;;  %v5235_v0 = vpop.f32.mrf.mxu1  ;;  %v3777_v31 = vshrl.u32 %v6743_v29, 4  ;;  %v6786_v29 = vmul.u32.u64.low 3817748708, %v6767_v47  ;;  %v6787_v58 = vmul.u32.u64.high 3817748708, %v6767_v47, %v6786_v29 }
 0x170   : > { %v5269_v6 = vpop.f32.mrf.mxu0  ;;  %v1690_v45 = vadd.f32 %v5235_v0, %v6575_v1 }
 0x171   : > { %v6760_v22 = vadd.f32 %v5269_v6, %v1686_v14  ;;  %v1607_v30 = vpop.f32.mrf.mxu1  ;;  %v6774_v14 = vmul.u32.u64.low 3817748708, %v6757_v18  ;;  %v6775_v40 = vmul.u32.u64.high 3817748708, %v6757_v18, %v6774_v14  ;;  %v3778_v27 = vmul.u32 18, %v3777_v31 }
 0x172   : > { %v2038_v5 = vpop.f32.mrf.mxu0  ;;  %v1688_v21 = vadd.f32 %v1607_v30, %v6580_v50  ;;  %v6802_v60 = vmul.u32.u64.low 3817748708, %v6781_v17  ;;  %v6803_v30 = vmul.u32.u64.high 3817748708, %v6781_v17, %v6802_v60  ;;  %v6807_v31 = vadd.s32 80, %v6707_v7 }
 0x173   : > { %v6770_v48 = vadd.f32 %v2038_v5, %v1684_v57  ;;  %v5238_v13 = vpop.f32.mrf.mxu1  ;;  %v6783_v57 = vsub.s32 %v3704_v12, %v3767_v39  ;;  %v6796_v5 = vadd.s32 40, %v6707_v7 }
 0x174   : > { %v5272_v11 = vpop.f32.mrf.mxu0  ;;  %v1693_v63 = vadd.f32 %v5238_v13, %v6586_v41  ;;  %v3755_v13 = vshrl.u32 %v6764_v55, 4  ;;  %v3788_v55 = vshrl.u32 %v6787_v58, 4 }
 0x175   : > { %8622 = vst [vmem:[#allocation2_spill] sm:$0xff] %v6770_v48  ;;  %v6778_v33 = vadd.f32 %v5272_v11, %v1689_v28  ;;  %8624 = vst [vmem:[#allocation12_spill] sm:$0xff] %v6783_v57  ;;  %v1620_v0 = vpop.f32.mrf.mxu1  ;;  %v6793_v28 = vsub.s32 %v6707_v7, %v3745_v19  ;;  %vm4136_vm8 = vcmp.ne.s32.totalorder %v6783_v57, 0  ;;  %vm4172_vm9 = vcmp.lt.s32.totalorder %v6783_v57, 0 }
 0x176   : > { %v2051_v1 = vpop.f32.mrf.mxu0  ;;  %v1691_v12 = vadd.f32 %v1620_v0, %v6593_v52  ;;  %v6814_v52 = vsub.s32 %v6729_v59, %v3778_v27  ;;  %v6822_v0 = vadd.s32 64, %v6707_v7  ;;  %v3810_v59 = vshrl.u32 %v6775_v40, 4  ;;  %vm6855_vm14 = vmand %vm4172_vm9, %vm4136_vm8 }
 0x177   : > { %8623 = vst [vmem:[#allocation10_spill] sm:$0xff] %v6778_v33  ;;  %v6790_v6 = vadd.f32 %v2051_v1, %v1687_v42  ;;  %8626 = vst [vmem:[#allocation4_spill] sm:$0xff] %v6793_v28  ;;  %v5239_v41 = vpop.f32.mrf.mxu1  ;;  %v6818_v1 = vmul.u32.u64.low 3817748708, %v6796_v5  ;;  %v6819_v29 = vmul.u32.u64.high 3817748708, %v6796_v5, %v6818_v1  ;;  %vm4134_vm10 = vcmp.ne.s32.totalorder %v6793_v28, 0 }
 0x178   : > { %v5273_v50 = vpop.f32.mrf.mxu0  ;;  %v1694_v11 = vadd.f32 %v5239_v41, %v6601_v49  ;;  %8629 = vst [vmem:[#allocation14_spill] sm:$0xff] %v6814_v52  ;;  %vm4170_vm11 = vcmp.lt.s32.totalorder %v6793_v28, 0  ;;  %v6832_v60 = vmul.u32.u64.low 3817748708, %v6807_v31  ;;  %v6833_v41 = vmul.u32.u64.high 3817748708, %v6807_v31, %v6832_v60 }
 0x179   : > { %8625 = vst [vmem:[#allocation3_spill] sm:$0xff] %v6790_v6  ;;  %v6799_v39 = vadd.f32 %v5273_v50, %v1690_v45  ;;  %v1623_v45 = vpop.f32.mrf.mxu1  ;;  %vm4137_vm12 = vcmp.ne.s32.totalorder %v6814_v52, 0  ;;  %vm4173_vm13 = vcmp.lt.s32.totalorder %v6814_v52, 0  ;;  %vm6875_vm15 = vmand %vm4170_vm11, %vm4134_vm10 }
 0x17a   : > { %v2054_v42 = vpop.f32.mrf.mxu0  ;;  %v1692_v49 = vadd.f32 %v1623_v45, %v6607_v26  ;;  %v6840_v26 = vadd.s32 88, %v6707_v7  ;;  %v3756_v45 = vmul.u32 18, %v3755_v13  ;;  %v6860_v13 = vadd.s32 18, %v6783_v57  ;;  %vm6887_vm0 = vmand %vm4173_vm13, %vm4137_vm12 }
 0x17b   : > { %8627 = vst [vmem:[#allocation5_spill] sm:$0xff] %v6799_v39  ;;  %v6810_v19 = vadd.f32 %v2054_v42, %v1688_v21  ;;  %v5242_v27 = vpop.f32.mrf.mxu1 }
 0x17c   : > { %v5276_v14 = vpop.f32.mrf.mxu0  ;;  %v1697_v42 = vadd.f32 %v5242_v27, %v6612_v10  ;;  %v3811_v10 = vmul.u32 18, %v3810_v59  ;;  %8636 = vst [vmem:[#allocation15_spill] sm:$0xff] %v6860_v13 }
 0x17d   : > { %8628 = vst [vmem:[#allocation6_spill] sm:$0xff] %v6810_v19  ;;  %v6825_v21 = vadd.f32 %v5276_v14, %v1693_v63  ;;  %v1636_v40 = vpop.f32.mrf.mxu1  ;;  %v6844_v58 = vmul.u32.u64.low 3817748708, %v6822_v0  ;;  %v6845_v14 = vmul.u32.u64.high 3817748708, %v6822_v0, %v6844_v58 }
 0x17e   : > { %v2067_v50 = vpop.f32.mrf.mxu0  ;;  %v1695_v60 = vadd.f32 %v1636_v40, %v6621_v3  ;;  %v6863_v3 = vadd.s32 18, %v6793_v28 }
 0x17f   : > { %8630 = vst [vmem:[#allocation7_spill] sm:$0xff] %v6825_v21  ;;  %v6836_v1 = vadd.f32 %v2067_v50, %v1691_v12  ;;  %v3821_v12 = vshrl.u32 %v6803_v30, 4  ;;  %v5243_v27 = vpop.f32.mrf.mxu1  ;;  %v3789_v30 = vmul.u32 18, %v3788_v55  ;;  %v3799_v55 = vshrl.u32 %v6819_v29, 4 }
 0x180   : > { %v5277_v63 = vpop.f32.mrf.mxu0  ;;  %8637 = vst [vmem:[#allocation13_spill] sm:$0xff] %v6863_v3  ;;  %v1698_v59 = vadd.f32 %v5243_v27, %v6627_v43  ;;  %v8643_v43 = vmov 0 }
 0x181   : > { %8631 = vst [vmem:[#allocation8_spill] sm:$0xff] %v6836_v1  ;;  %v6848_v21 = vadd.f32 %v5277_v63, %v1694_v11  ;;  %v8633_v1 = vmov 0  ;;  %v6866_v11 = vadd.s32 18, %v6814_v52  ;;  %v8640_v63 = vmov 0  ;;  %v1639_v19 = vpop.f32.mrf.mxu1 }
 0x182   : > { %v2070_v50 = vpop.f32.mrf.mxu0  ;;  %v8634_v1 = vsel %vm6855_vm14, 4294967295, %v8633_v1  ;;  %v8641_v63 = vsel %vm6875_vm15, 4294967295, %v8640_v63  ;;  %v8644_v43 = vsel %vm6887_vm0, 4294967295, %v8643_v43  ;;  %v1696_v27 = vadd.f32 %v1639_v19, %v6635_v32 }
 0x183   : > { %8632 = vst [vmem:[#allocation9_spill] sm:$0xff] %v6848_v21  ;;  %8635 = vst [vmem:[#allocation11_spill] sm:$0xff] %v8634_v1  ;;  %v6869_v40 = vadd.f32 %v2070_v50, %v1692_v49  ;;  %v6880_v58 = vmul.u32.u64.low 3817748708, %v6840_v26  ;;  %v6881_v21 = vmul.u32.u64.high 3817748708, %v6840_v26, %v6880_v58  ;;  %v6892_v49 = vsub.s32 %v6750_v37, %v3756_v45  ;;  %v5246_v6 = vpop.f32.mrf.mxu1 }
 0x184   : > { %8638 = vst [vmem:[#allocation16_spill] sm:$0xff] %v6866_v11  ;;  %8642 = vst [vmem:[#allocation18_spill] sm:$0xff] %v8641_v63  ;;  %v5280_v39 = vpop.f32.mrf.mxu0  ;;  %v6899_v58 = vsub.s32 %v6757_v18, %v3811_v10  ;;  %v3854_v32 = vshrl.u32 %v6833_v41, 4  ;;  %v1701_v18 = vadd.f32 %v5246_v6, %v6641_v9  ;;  %v3800_v9 = vmul.u32 18, %v3799_v55 }
 0x185   : > { %8639 = vst [vmem:[#allocation17_spill] sm:$0xff] %v6869_v40  ;;  %8645 = vst [vmem:[#allocation19_spill] sm:$0xff] %v8644_v43  ;;  %v6896_v50 = vadd.f32 %v5280_v39, %v1697_v42  ;;  %v3822_v40 = vmul.u32 18, %v3821_v12  ;;  %v6911_v39 = vadd.s32 72, %v6707_v7  ;;  %v6921_v42 = vsub.s32 %v6767_v47, %v3789_v30  ;;  %v1652_v45 = vpop.f32.mrf.mxu1 }
 0x186   : > { %8646 = vst [vmem:[#allocation20_spill] sm:$0xff] %v6899_v58  ;;  %v2083_v33 = vpop.f32.mrf.mxu0  ;;  %vm4135_vm1 = vcmp.ne.s32.totalorder %v6892_v49, 0  ;;  %vm4171_vm2 = vcmp.lt.s32.totalorder %v6892_v49, 0  ;;  %v6926_v41 = vadd.s32 18, %v6892_v49  ;;  %v6930_v6 = vadd.s32 112, %v6707_v7 }
 0x187   : > { %v6914_v19 = vadd.f32 %v2083_v33, %v1695_v60  ;;  %v3832_v33 = vshrl.u32 %v6845_v14, 4  ;;  %v1699_v60 = vadd.f32 %v1652_v45, %v6650_v38  ;;  %vm4140_vm3 = vcmp.ne.s32.totalorder %v6899_v58, 0  ;;  %v5247_v55 = vpop.f32.mrf.mxu1  ;;  %vm7011_vm13 = vmand %vm4171_vm2, %vm4135_vm1 }
 0x188   : > { %v5281_v10 = vpop.f32.mrf.mxu0  ;;  %vm4176_vm4 = vcmp.lt.s32.totalorder %v6899_v58, 0  ;;  %v6938_v47 = vadd.s32 18, %v6899_v58  ;;  %v6941_v30 = vsub.s32 %v6781_v17, %v3822_v40  ;;  %v3855_v14 = vmul.u32 18, %v3854_v32 }
 0x189   : > { %v6933_v12 = vadd.f32 %v5281_v10, %v1698_v59  ;;  %v6944_v37 = vmul.u32.u64.low 3817748708, %v6911_v39  ;;  %v6945_v48 = vmul.u32.u64.high 3817748708, %v6911_v39, %v6944_v37  ;;  %v6948_v38 = vadd.s32 96, %v6707_v7  ;;  %v1655_v17 = vpop.f32.mrf.mxu1  ;;  %vm7025_vm12 = vmand %vm4176_vm4, %vm4140_vm3 }
 0x18a   : > { %8647 = vst [vmem:[#allocation21_spill] sm:$0xff] %v6938_v47  ;;  %8648 = vst [vmem:[#allocation22_spill] sm:$0xff] %v6941_v30  ;;  %v2086_v29 = vpop.f32.mrf.mxu0  ;;  %v1702_v59 = vadd.f32 %v5247_v55, %v6656_v23  ;;  %vm4138_vm5 = vcmp.ne.s32.totalorder %v6921_v42, 0  ;;  %v3865_v10 = vshrl.u32 %v6881_v21, 4  ;;  %v6956_v52 = vsub.s32 %v6796_v5, %v3800_v9 }
 0x18b   : > { %v6951_v45 = vadd.f32 %v2086_v29, %v1696_v27  ;;  %v3833_v32 = vmul.u32 18, %v3832_v33  ;;  %v6959_v11 = vmul.u32.u64.low 3817748708, %v6930_v6  ;;  %v6960_v37 = vmul.u32.u64.high 3817748708, %v6930_v6, %v6959_v11  ;;  %v5290_v21 = vpop.f32.mrf.mxu1 }
 0x18c   : > { %v5284_v40 = vpop.f32.mrf.mxu0  ;;  %8649 = vst [vmem:[#allocation23_spill] sm:$0xff] %v6956_v52  ;;  %v1700_v43 = vadd.f32 %v1655_v17, %v6662_v53  ;;  %vm4174_vm6 = vcmp.lt.s32.totalorder %v6921_v42, 0  ;;  %v6967_v23 = vadd.s32 18, %v6921_v42  ;;  %vm4141_vm7 = vcmp.ne.s32.totalorder %v6941_v30, 0 }
 0x18d   : > { %v6963_v28 = vadd.f32 %v5284_v40, %v1701_v18  ;;  %v6971_v5 = vsub.s32 %v6807_v31, %v3855_v14  ;;  %v6974_v29 = vmul.u32.u64.low 3817748708, %v6948_v38  ;;  %v6975_v9 = vmul.u32.u64.high 3817748708, %v6948_v38, %v6974_v29  ;;  %v2285_v33 = vpop.f32.mrf.mxu1  ;;  %vm7042_vm3 = vmand %vm4174_vm6, %vm4138_vm5 }
 0x18e   : > { %v2099_v27 = vpop.f32.mrf.mxu0  ;;  %v2430_v53 = vadd.f32 %v5290_v21, %v6667_v36  ;;  %vm4177_vm8 = vcmp.lt.s32.totalorder %v6941_v30, 0  ;;  %v3866_v18 = vmul.u32 18, %v3865_v10  ;;  %v6982_v17 = vadd.s32 18, %v6941_v30 }
 0x18f   : > { %8650 = vst [vmem:[#allocation24_spill] sm:$0xff] %v6971_v5  ;;  %v6978_v11 = vadd.f32 %v2099_v27, %v1699_v60  ;;  %vm4139_vm9 = vcmp.ne.s32.totalorder %v6956_v52, 0  ;;  %v6986_v31 = vsub.s32 %v6822_v0, %v3833_v32  ;;  %v6989_v14 = vadd.s32 120, %v6707_v7  ;;  %v5291_v40 = vpop.f32.mrf.mxu1  ;;  %vm7054_vm4 = vmand %vm4177_vm8, %vm4141_vm7 }
 0x190   : > { %v5285_v55 = vpop.f32.mrf.mxu0  ;;  %8652 = vst [vmem:[#allocation26_spill] sm:$0xff] %v6982_v17  ;;  %v2428_v36 = vadd.f32 %v2285_v33, %v6674_v35  ;;  %vm4175_vm10 = vcmp.lt.s32.totalorder %v6956_v52, 0  ;;  %v6996_v10 = vadd.s32 18, %v6956_v52  ;;  %vm4144_vm11 = vcmp.ne.s32.totalorder %v6971_v5, 0 }
 0x191   : > { %8651 = vst [vmem:[#allocation25_spill] sm:$0xff] %v6978_v11  ;;  %8653 = vst [vmem:[#allocation27_spill] sm:$0xff] %v6986_v31  ;;  %v6992_v60 = vadd.f32 %v5285_v55, %v1702_v59  ;;  %v3843_v0 = vshrl.u32 %v6945_v48, 4  ;;  %v7002_v32 = vadd.s32 104, %v6707_v7  ;;  %v2431_v35 = vadd.f32 %v5291_v40, %v6678_v44  ;;  %v2288_v33 = vpop.f32.mrf.mxu1 }
 0x192   : > { %8655 = vst [vmem:[#allocation29_spill] sm:$0xff] %v6996_v10  ;;  %v2102_v21 = vpop.f32.mrf.mxu0  ;;  %v7016_v29 = vadd.s32 18, %v6971_v5  ;;  %v7019_v48 = vsub.s32 %v6840_v26, %v3866_v18  ;;  %v8661_v44 = vmov 0  ;;  %vm4142_vm1 = vcmp.ne.s32.totalorder %v6986_v31, 0  ;;  %vm7070_vm5 = vmand %vm4175_vm10, %vm4139_vm9 }
 0x193   : > { %8654 = vst [vmem:[#allocation28_spill] sm:$0xff] %v6992_v60  ;;  %v7005_v59 = vadd.f32 %v2102_v21, %v1700_v43  ;;  %v8662_v44 = vsel %vm7025_vm12, 4294967295, %v8661_v44  ;;  %v3898_v43 = vshrl.u32 %v6960_v37, 4  ;;  %v7033_v40 = vadd.s32 144, %v6707_v7  ;;  %v5294_v37 = vpop.f32.mrf.mxu1 }
 0x194   : > { %8659 = vst [vmem:[#allocation31_spill] sm:$0xff] %v7016_v29  ;;  %8660 = vst [vmem:[#allocation32_spill] sm:$0xff] %v7019_v48  ;;  %v5328_v55 = vpop.f32.mrf.mxu0  ;;  %v2429_v26 = vadd.f32 %v2288_v33, %v6683_v15  ;;  %v7047_v3 = vmul.u32.u64.low 3817748708, %v6989_v14  ;;  %v7048_v63 = vmul.u32.u64.high 3817748708, %v6989_v14, %v7047_v3  ;;  %v8667_v15 = vmov 0 }
 0x195   : > { %8656 = vst [vmem:[#allocation30_spill] sm:$0xff] %v7005_v59  ;;  %8663 = vst [vmem:[#allocation33_spill] sm:$0xff] %v8662_v44  ;;  %v7036_v18 = vadd.f32 %v5328_v55, %v2430_v53  ;;  %v8668_v15 = vsel %vm7054_vm4, 4294967295, %v8667_v15  ;;  %v3844_v53 = vmul.u32 18, %v3843_v0  ;;  %v3876_v33 = vshrl.u32 %v6975_v9, 4  ;;  %v2301_v9 = vpop.f32.mrf.mxu1 }
 0x196   : > { %v2724_v57 = vpop.f32.mrf.mxu0  ;;  %8669 = vst [vmem:[#allocation35_spill] sm:$0xff] %v8668_v15  ;;  %v2434_v13 = vadd.f32 %v5294_v37, %v6688_v20  ;;  %v8671_v1 = vmov 0  ;;  %vm4145_vm6 = vcmp.ne.s32.totalorder %v7019_v48, 0  ;;  %vm4181_vm7 = vcmp.lt.s32.totalorder %v7019_v48, 0 }
 0x197   : > { %8664 = vst [vmem:[#allocation34_spill] sm:$0xff] %v7036_v18  ;;  %v7060_v55 = vmul.u32.u64.low 3817748708, %v7002_v32  ;;  %v7061_v18 = vmul.u32.u64.high 3817748708, %v7002_v32, %v7060_v55  ;;  %v7064_v3 = vadd.f32 %v2724_v57, %v2428_v36  ;;  %v8672_v1 = vsel %vm7070_vm5, 4294967295, %v8671_v1 }
 0x198   : > { %8673 = vst [vmem:[#allocation37_spill] sm:$0xff] %v8672_v1  ;;  %v5329_v0 = vpop.f32.mrf.mxu0  ;;  %vm8674_vm8 = vcmp.lt.s32.totalorder %v6971_v5, 0  ;;  %v8675_v20 = vmov 0  ;;  %v7085_v57 = vadd.s32 18, %v6986_v31  ;;  %v3899_v36 = vmul.u32 18, %v3898_v43 }
 0x199   : > { %8670 = vst [vmem:[#allocation36_spill] sm:$0xff] %v7064_v3  ;;  %vm7080_vm2 = vmand %vm8674_vm8, %vm4144_vm11  ;;  %v7088_v37 = vmul.u32.u64.low 3817748708, %v7033_v40  ;;  %v7089_v55 = vmul.u32.u64.high 3817748708, %v7033_v40, %v7088_v37  ;;  %v2432_v3 = vadd.f32 %v2301_v9, %v6694_v51  ;;  %v7092_v59 = vadd.f32 %v5329_v0, %v2431_v35 }
 0x19a   : > { %v8676_v20 = vsel %vm7080_vm2, 4294967295, %v8675_v20  ;;  %8678 = vst [vmem:[#allocation39_spill] sm:$0xff] %v7085_v57  ;;  %vm8679_vm9 = vcmp.lt.s32.totalorder %v6986_v31, 0  ;;  %v8680_v11 = vmov 0  ;;  %v7107_v43 = vadd.s32 18, %v7019_v48  ;;  %v5295_v37 = vpop.f32.mrf.mxu1  ;;  %v2727_v51 = vpop.f32.mrf.mxu0  ;;  %vm7125_vm11 = vmand %vm4181_vm7, %vm4145_vm6 }
 0x19b   : > { %8677 = vst [vmem:[#allocation38_spill] sm:$0xff] %v8676_v20  ;;  %vm7102_vm10 = vmand %vm8679_vm9, %vm4142_vm1  ;;  %v8684_v60 = vmov 0  ;;  %v7130_v35 = vadd.s32 128, %v6707_v7  ;;  %v2435_v58 = vadd.f32 %v5295_v37, %v6697_v54  ;;  %v7133_v47 = vadd.f32 %v2727_v51, %v2429_v26 }
 0x19c   : > { %v8681_v11 = vsel %vm7102_vm10, 4294967295, %v8680_v11  ;;  %8683 = vst [vmem:[#allocation41_spill] sm:$0xff] %v7107_v43  ;;  %v8685_v60 = vsel %vm7125_vm11, 4294967295, %v8684_v60  ;;  %v7136_v9 = vsub.s32 %v6911_v39, %v3844_v53  ;;  %v3877_v15 = vmul.u32 18, %v3876_v33  ;;  %v2304_v0 = vpop.f32.mrf.mxu1  ;;  %v5332_v30 = vpop.f32.mrf.mxu0 }
 0x19d   : > { %8682 = vst [vmem:[#allocation40_spill] sm:$0xff] %v8681_v11  ;;  %8686 = vst [vmem:[#allocation42_spill] sm:$0xff] %v8685_v60  ;;  %v7151_v39 = vsub.s32 %v6930_v6, %v3899_v36  ;;  %v2433_v26 = vadd.f32 %v2304_v0, %v6701_v34  ;;  %v7154_v53 = vadd.f32 %v5332_v30, %v2434_v13  ;;  %v3909_v37 = vshrl.u32 %v7048_v63, 4 }
 0x19e   : > { %8687 = vst [vmem:[#allocation43_spill] sm:$0xff] %v7136_v9  ;;  %v5298_v51 = vpop.f32.mrf.mxu1  ;;  %v2740_v44 = vpop.f32.mrf.mxu0  ;;  %v3887_v17 = vshrl.u32 %v7061_v18, 4  ;;  %v7163_v54 = vmul.u32.u64.low 3817748708, %v7130_v35  ;;  %v7164_v31 = vmul.u32.u64.high 3817748708, %v7130_v35, %v7163_v54  ;;  %v7167_v6 = vadd.s32 152, %v6707_v7 }
 0x19f   : > { %8688 = vst [vmem:[#allocation44_spill] sm:$0xff] %v7151_v39  ;;  %v2438_v34 = vadd.f32 %v5298_v51, %v6705_v56  ;;  %v7170_v13 = vadd.f32 %v2740_v44, %v2432_v3  ;;  %vm4143_vm1 = vcmp.ne.s32.totalorder %v7136_v9, 0  ;;  %vm4179_vm6 = vcmp.lt.s32.totalorder %v7136_v9, 0 }
 0x1a0   : > { %v7175_v63 = vsub.s32 %v6948_v38, %v3877_v15  ;;  %v2317_v30 = vpop.f32.mrf.mxu1  ;;  %v5333_v18 = vpop.f32.mrf.mxu0  ;;  %v7178_v36 = vadd.s32 18, %v7136_v9  ;;  %v3942_v0 = vshrl.u32 %v7089_v55, 4  ;;  %v7183_v56 = vadd.s32 136, %v6707_v7  ;;  %vm7255_vm8 = vmand %vm4179_vm6, %vm4143_vm1 }
 0x1a1   : > { %8689 = vst [vmem:[#allocation45_spill] sm:$0xff] %v7170_v13  ;;  %v2436_v44 = vadd.f32 %v2317_v30, %v6710_v16  ;;  %v7186_v3 = vadd.f32 %v5333_v18, %v2435_v58  ;;  %v3910_v38 = vmul.u32 18, %v3909_v37  ;;  %v7190_v51 = vadd.s32 18, %v7151_v39 }
 0x1a2   : > { %8690 = vst [vmem:[#allocation46_spill] sm:$0xff] %v7175_v63  ;;  %8691 = vst [vmem:[#allocation47_spill] sm:$0xff] %v7178_v36  ;;  %v5299_v15 = vpop.f32.mrf.mxu1  ;;  %v2743_v54 = vpop.f32.mrf.mxu0  ;;  %v3888_v33 = vmul.u32 18, %v3887_v17  ;;  %v7193_v48 = vmul.u32.u64.low 3817748708, %v7167_v6  ;;  %v7194_v43 = vmul.u32.u64.high 3817748708, %v7167_v6, %v7193_v48  ;;  %v7201_v16 = vadd.s32 176, %v6707_v7 }
 0x1a3   : > { %8692 = vst [vmem:[#allocation48_spill] sm:$0xff] %v7186_v3  ;;  %8693 = vst [vmem:[#allocation49_spill] sm:$0xff] %v7190_v51  ;;  %v2439_v55 = vadd.f32 %v5299_v15, %v6713_v25  ;;  %v7197_v60 = vadd.f32 %v2743_v54, %v2433_v26  ;;  %v3943_v30 = vmul.u32 18, %v3942_v0  ;;  %v7208_v17 = vadd.s32 160, %v6707_v7  ;;  %v8774_v51 = vld [vmem:[#allocation17_spill] sm:$0xff] }
 0x1a4   : > { %v2320_v58 = vpop.f32.mrf.mxu1  ;;  %v5336_v37 = vpop.f32.mrf.mxu0  ;;  %v7204_v18 = vmul.u32.u64.low 3817748708, %v7183_v56  ;;  %v7205_v57 = vmul.u32.u64.high 3817748708, %v7183_v56, %v7204_v18  ;;  %v7215_v26 = vadd.s32 184, %v6707_v7  ;;  %v7218_v0 = vadd.s32 18, %v7175_v63 }
 0x1a5   : > { %8694 = vst [vmem:[#allocation50_spill] sm:$0xff] %v7197_v60  ;;  %v2437_v48 = vadd.f32 %v2320_v58, %v6717_v8  ;;  %v7211_v25 = vadd.f32 %v5336_v37, %v2438_v34  ;;  %v7221_v60 = vsub.s32 %v6989_v14, %v3910_v38  ;;  %v7224_v18 = vsub.s32 %v7002_v32, %v3888_v33 }
 0x1a6   : > { %v5302_v15 = vpop.f32.mrf.mxu1  ;;  %v2756_v54 = vpop.f32.mrf.mxu0  ;;  %8696 = vst [vmem:[#allocation52_spill] sm:$0xff] %v7218_v0  ;;  %v3920_v8 = vshrl.u32 %v7164_v31, 4  ;;  %v7235_v5 = vsub.s32 %v7033_v40, %v3943_v30  ;;  %v7238_v14 = vmul.u32.u64.low 3817748708, %v7208_v17  ;;  %v7239_v38 = vmul.u32.u64.high 3817748708, %v7208_v17, %v7238_v14 }
 0x1a7   : > { %8695 = vst [vmem:[#allocation51_spill] sm:$0xff] %v7211_v25  ;;  %8697 = vst [vmem:[#allocation53_spill] sm:$0xff] %v7221_v60  ;;  %v2442_v34 = vadd.f32 %v5302_v15, %v6720_v4  ;;  %v7228_v58 = vadd.f32 %v2756_v54, %v2436_v44  ;;  %v7231_v37 = vmul.u32.u64.low 3817748708, %v7201_v16  ;;  %v7232_v25 = vmul.u32.u64.high 3817748708, %v7201_v16, %v7231_v37 }
 0x1a8   : > { %8698 = vst [vmem:[#allocation54_spill] sm:$0xff] %v7224_v18  ;;  %v2333_v11 = vpop.f32.mrf.mxu1  ;;  %v5337_v3 = vpop.f32.mrf.mxu0  ;;  %8700 = vst [vmem:[#allocation56_spill] sm:$0xff] %v7235_v5  ;;  %v7242_v32 = vadd.s32 168, %v6707_v7  ;;  %v7248_v33 = vmul.u32.u64.low 3817748708, %v7215_v26  ;;  %v7249_v44 = vmul.u32.u64.high 3817748708, %v7215_v26, %v7248_v33  ;;  %v8702_v40 = vmov 0 }
 0x1a9   : > { %8699 = vst [vmem:[#allocation55_spill] sm:$0xff] %v7228_v58  ;;  %v2440_v4 = vadd.f32 %v2333_v11, %v6726_v24  ;;  %v7245_v31 = vadd.f32 %v5337_v3, %v2439_v55  ;;  %v8703_v40 = vsel %vm7255_vm8, 4294967295, %v8702_v40  ;;  %v3921_v24 = vmul.u32 18, %v3920_v8 }
 0x1aa   : > { %v5303_v15 = vpop.f32.mrf.mxu1  ;;  %v2759_v54 = vpop.f32.mrf.mxu0  ;;  %8704 = vst [vmem:[#allocation58_spill] sm:$0xff] %v8703_v40  ;;  %v3953_v11 = vshrl.u32 %v7194_v43, 4  ;;  %vm8706_vm11 = vcmp.ne.s32.totalorder %v7151_v39, 0  ;;  %vm8707_vm10 = vcmp.lt.s32.totalorder %v7151_v39, 0  ;;  %v8708_v30 = vmov 0 }
 0x1ab   : > { %8701 = vst [vmem:[#allocation57_spill] sm:$0xff] %v7245_v31  ;;  %v2443_v3 = vadd.f32 %v5303_v15, %v6736_v62  ;;  %v7263_v55 = vadd.f32 %v2759_v54, %v2437_v48  ;;  %vm7269_vm2 = vmand %vm8707_vm10, %vm8706_vm11  ;;  %vm4147_vm1 = vcmp.ne.s32.totalorder %v7224_v18, 0  ;;  %vm8711_vm7 = vcmp.ne.s32.totalorder %v7175_v63, 0 }
 0x1ac   : > { %v8709_v30 = vsel %vm7269_vm2, 4294967295, %v8708_v30  ;;  %v2336_v37 = vpop.f32.mrf.mxu1  ;;  %v5340_v8 = vpop.f32.mrf.mxu0  ;;  %vm8712_vm9 = vcmp.lt.s32.totalorder %v7175_v63, 0  ;;  %v8713_v62 = vmov 0  ;;  %v7284_v43 = vadd.s32 18, %v7221_v60 }
 0x1ad   : > { %8705 = vst [vmem:[#allocation59_spill] sm:$0xff] %v7263_v55  ;;  %8710 = vst [vmem:[#allocation60_spill] sm:$0xff] %v8709_v30  ;;  %v3931_v48 = vshrl.u32 %v7205_v57, 4  ;;  %v2441_v14 = vadd.f32 %v2336_v37, %v6739_v46  ;;  %v7290_v33 = vadd.f32 %v5340_v8, %v2442_v34  ;;  %vm8718_vm6 = vcmp.ne.s32.totalorder %v7221_v60, 0 }
 0x1ae   : > { %vm7279_vm5 = vmand %vm8712_vm9, %vm8711_vm7  ;;  %8716 = vst [vmem:[#allocation62_spill] sm:$0xff] %v7284_v43  ;;  %vm8719_vm7 = vcmp.lt.s32.totalorder %v7221_v60, 0  ;;  %v8720_v15 = vmov 0  ;;  %v7301_v54 = vmul.u32.u64.low 3817748708, %v7242_v32  ;;  %v7302_v55 = vmul.u32.u64.high 3817748708, %v7242_v32, %v7301_v54  ;;  %v5306_v31 = vpop.f32.mrf.mxu1  ;;  %v2772_v58 = vpop.f32.mrf.mxu0  ;;  %v8749_v60 = vld [vmem:[#allocation7_spill] sm:$0xff] }
 0x1af   : > { %v8714_v62 = vsel %vm7279_vm5, 4294967295, %v8713_v62  ;;  %8717 = vst [vmem:[#allocation63_spill] sm:$0xff] %v7290_v33  ;;  %vm7296_vm9 = vmand %vm8719_vm7, %vm8718_vm6  ;;  %vm8723_vm11 = vcmp.lt.s32.totalorder %v7224_v18, 0  ;;  %v8724_v57 = vmov 0  ;;  %v7317_v34 = vadd.s32 18, %v7224_v18 }
 0x1b0   : > { %8715 = vst [vmem:[#allocation61_spill] sm:$0xff] %v8714_v62  ;;  %v8721_v15 = vsel %vm7296_vm9, 4294967295, %v8720_v15  ;;  %vm7312_vm10 = vmand %vm8723_vm11, %vm4147_vm1  ;;  %v7320_v37 = vadd.s32 18, %v7235_v5  ;;  %v3954_v8 = vmul.u32 18, %v3953_v11  ;;  %v2446_v54 = vadd.f32 %v5306_v31, %v6746_v2  ;;  %v2349_v40 = vpop.f32.mrf.mxu1  ;;  %v5341_v29 = vpop.f32.mrf.mxu0 }
 0x1b1   : > { %8722 = vst [vmem:[#allocation64_spill] sm:$0xff] %v8721_v15  ;;  %v8725_v57 = vsel %vm7312_vm10, 4294967295, %v8724_v57  ;;  %8727 = vst [vmem:[#allocation66_spill] sm:$0xff] %v7317_v34  ;;  %v7323_v33 = vadd.f32 %v2772_v58, %v2440_v4  ;;  %vm8730_vm6 = vcmp.ne.s32.totalorder %v7235_v5, 0  ;;  %vm8731_vm7 = vcmp.lt.s32.totalorder %v7235_v5, 0  ;;  %v8737_v5 = vld [vmem:[#allocation2_spill] sm:$0xff] }
 0x1b2   : > { %8726 = vst [vmem:[#allocation65_spill] sm:$0xff] %v8725_v57  ;;  %8728 = vst [vmem:[#allocation67_spill] sm:$0xff] %v7320_v37  ;;  %v8732_v46 = vmov 0  ;;  %v7334_v9 = vsub.s32 %v7130_v35, %v3921_v24  ;;  %v3986_v36 = vshrl.u32 %v7232_v25, 4  ;;  %v3932_v4 = vmul.u32 18, %v3931_v48  ;;  %v5307_v2 = vpop.f32.mrf.mxu1 }
 0x1b3   : > { %8729 = vst [vmem:[#allocation68_spill] sm:$0xff] %v7323_v33  ;;  %vm7329_vm8 = vmand %vm8731_vm7, %vm8730_vm6  ;;  %v3964_v31 = vshrl.u32 %v7239_v38, 4  ;;  %v2444_v35 = vadd.f32 %v2349_v40, %v6753_v61  ;;  %v7347_v24 = vadd.f32 %v5341_v29, %v2443_v3  ;;  %v3997_v11 = vshrl.u32 %v7249_v44, 4  ;;  %v2775_v33 = vpop.f32.mrf.mxu0 }
 0x1b4   : > { %v8733_v46 = vsel %vm7329_vm8, 4294967295, %v8732_v46  ;;  %v7363_v29 = vsub.s32 %v7167_v6, %v3954_v8  ;;  %v7366_v38 = vadd.s32 208, %v6707_v7  ;;  %v2447_v44 = vadd.f32 %v5307_v2, %v6760_v22  ;;  %v2352_v48 = vpop.f32.mrf.mxu1 }
 0x1b5   : > { %8734 = vst [vmem:[#allocation69_spill] sm:$0xff] %v8733_v46  ;;  %8735 = vst [vmem:[#allocation70_spill] sm:$0xff] %v7347_v24  ;;  %v7369_v40 = vadd.f32 %v2775_v33, %v2441_v14  ;;  %v7372_v3 = vadd.s32 18, %v7334_v9  ;;  %v3987_v25 = vmul.u32 18, %v3986_v36  ;;  %v5344_v58 = vpop.f32.mrf.mxu0  ;;  %v7375_v24 = vsub.s32 %v7183_v56, %v3932_v4 }
 0x1b6   : > { %v3965_v61 = vmul.u32 18, %v3964_v31  ;;  %v7378_v6 = vadd.s32 192, %v6707_v7  ;;  %v7381_v8 = vadd.s32 216, %v6707_v7  ;;  %v2445_v22 = vadd.f32 %v2352_v48, %v8737_v5  ;;  %v5310_v36 = vpop.f32.mrf.mxu1 }
 0x1b7   : > { %8736 = vst [vmem:[#allocation71_spill] sm:$0xff] %v7369_v40  ;;  %v7384_v14 = vadd.f32 %v5344_v58, %v2446_v54  ;;  %v3998_v33 = vmul.u32 18, %v3997_v11  ;;  %v3975_v2 = vshrl.u32 %v7302_v55, 4  ;;  %v2788_v40 = vpop.f32.mrf.mxu0  ;;  %v7390_v56 = vadd.s32 18, %v7363_v29  ;;  %v8739_v54 = vld [vmem:[#allocation10_spill] sm:$0xff] }
 0x1b8   : > { %v7393_v4 = vmul.u32.u64.low 3817748708, %v7366_v38  ;;  %v7394_v31 = vmul.u32.u64.high 3817748708, %v7366_v38, %v7393_v4  ;;  %v7397_v5 = vadd.s32 200, %v6707_v7  ;;  %v2450_v58 = vadd.f32 %v5310_v36, %v8739_v54  ;;  %v8741_v36 = vld [vmem:[#allocation3_spill] sm:$0xff] }
 0x1b9   : > { %8738 = vst [vmem:[#allocation2_spill] sm:$0xff] %v7384_v14  ;;  %v7400_v11 = vadd.f32 %v2788_v40, %v2444_v35  ;;  %v7405_v55 = vsub.s32 %v7201_v16, %v3987_v25  ;;  %v7408_v48 = vadd.s32 240, %v6707_v7  ;;  %v2365_v14 = vpop.f32.mrf.mxu1  ;;  %v5345_v37 = vpop.f32.mrf.mxu0  ;;  %v7412_v4 = vsub.s32 %v7208_v17, %v3965_v61 }
 0x1ba   : > { %v7415_v35 = vmul.u32.u64.low 3817748708, %v7378_v6  ;;  %v7416_v40 = vmul.u32.u64.high 3817748708, %v7378_v6, %v7415_v35  ;;  %v2448_v54 = vadd.f32 %v2365_v14, %v8741_v36  ;;  %v7422_v16 = vsub.s32 %v7215_v26, %v3998_v33 }
 0x1bb   : > { %8740 = vst [vmem:[#allocation10_spill] sm:$0xff] %v7400_v11  ;;  %v7419_v11 = vadd.f32 %v5345_v37, %v2447_v44  ;;  %v3976_v25 = vmul.u32 18, %v3975_v2  ;;  %v5311_v46 = vpop.f32.mrf.mxu1  ;;  %v2791_v18 = vpop.f32.mrf.mxu0  ;;  %v7426_v34 = vadd.s32 18, %v7375_v24  ;;  %v8744_v35 = vld [vmem:[#allocation5_spill] sm:$0xff]  ;;  %v7438_v44 = vadd.s32 18, %v7405_v55  ;;  %v8746_v2 = vld [vmem:[#allocation6_spill] sm:$0xff] }
 0x1bc   : > { %8743 = vst [vmem:[#allocation72_spill] sm:$0xff] %v7422_v16  ;;  %v7429_v17 = vmul.u32.u64.low 3817748708, %v7381_v8  ;;  %v7430_v61 = vmul.u32.u64.high 3817748708, %v7381_v8, %v7429_v17  ;;  %v2451_v57 = vadd.f32 %v5311_v46, %v8744_v35  ;;  %v7433_v14 = vadd.f32 %v2791_v18, %v2445_v22 }
 0x1bd   : > { %8742 = vst [vmem:[#allocation3_spill] sm:$0xff] %v7419_v11  ;;  %v2368_v26 = vpop.f32.mrf.mxu1  ;;  %v5348_v37 = vpop.f32.mrf.mxu0  ;;  %v7443_v33 = vadd.s32 18, %v7412_v4  ;;  %v7450_v22 = vsub.s32 %v7242_v32, %v3976_v25  ;;  %v4030_v35 = vshrl.u32 %v7394_v31, 4  ;;  %v7465_v32 = vadd.s32 224, %v6707_v7 }
 0x1be   : > { %8745 = vst [vmem:[#allocation5_spill] sm:$0xff] %v7433_v14  ;;  %v2449_v46 = vadd.f32 %v2368_v26, %v8746_v2  ;;  %v7446_v18 = vadd.f32 %v5348_v37, %v2450_v58  ;;  %v7455_v14 = vmul.u32.u64.low 3817748708, %v7397_v5  ;;  %v7456_v11 = vmul.u32.u64.high 3817748708, %v7397_v5, %v7455_v14 }
 0x1bf   : > { %8748 = vst [vmem:[#allocation73_spill] sm:$0xff] %v7450_v22  ;;  %v5314_v36 = vpop.f32.mrf.mxu1  ;;  %v2804_v17 = vpop.f32.mrf.mxu0  ;;  %v7462_v58 = vadd.s32 18, %v7422_v16  ;;  %v4008_v2 = vshrl.u32 %v7416_v40, 4  ;;  %v7473_v14 = vadd.s32 248, %v6707_v7  ;;  %vm8754_vm6 = vcmp.ne.s32.totalorder %v7334_v9, 0 }
 0x1c0   : > { %8747 = vst [vmem:[#allocation6_spill] sm:$0xff] %v7446_v18  ;;  %v2454_v43 = vadd.f32 %v5314_v36, %v8749_v60  ;;  %v7459_v26 = vadd.f32 %v2804_v17, %v2448_v54  ;;  %v7469_v31 = vmul.u32.u64.low 3817748708, %v7408_v48  ;;  %v7470_v18 = vmul.u32.u64.high 3817748708, %v7408_v48, %v7469_v31  ;;  %v8752_v60 = vld [vmem:[#allocation8_spill] sm:$0xff] }
 0x1c1   : > { %8751 = vst [vmem:[#allocation74_spill] sm:$0xff] %v7462_v58  ;;  %v2381_v25 = vpop.f32.mrf.mxu1  ;;  %v5349_v37 = vpop.f32.mrf.mxu0  ;;  %vm8755_vm11 = vcmp.lt.s32.totalorder %v7334_v9, 0  ;;  %v8756_v17 = vmov 0  ;;  %v7488_v40 = vadd.s32 232, %v6707_v7  ;;  %vm8758_vm8 = vcmp.ne.s32.totalorder %v7363_v29, 0 }
 0x1c2   : > { %8750 = vst [vmem:[#allocation7_spill] sm:$0xff] %v7459_v26  ;;  %v2452_v54 = vadd.f32 %v2381_v25, %v8752_v60  ;;  %v7476_v36 = vadd.f32 %v5349_v37, %v2451_v57  ;;  %vm7482_vm1 = vmand %vm8755_vm11, %vm8754_vm6  ;;  %vm8759_vm10 = vcmp.lt.s32.totalorder %v7363_v29, 0  ;;  %v8760_v57 = vmov 0 }
 0x1c3   : > { %v8757_v17 = vsel %vm7482_vm1, 4294967295, %v8756_v17  ;;  %v5315_v31 = vpop.f32.mrf.mxu1  ;;  %v2807_v26 = vpop.f32.mrf.mxu0  ;;  %vm7494_vm9 = vmand %vm8759_vm10, %vm8758_vm8  ;;  %v4031_v25 = vmul.u32 18, %v4030_v35  ;;  %v4041_v37 = vshrl.u32 %v7430_v61, 4  ;;  %v7501_v60 = vadd.s32 272, %v6707_v7 }
 0x1c4   : > { %8753 = vst [vmem:[#allocation8_spill] sm:$0xff] %v7476_v36  ;;  %v8761_v57 = vsel %vm7494_vm9, 4294967295, %v8760_v57  ;;  %v8762_v36 = vld [vmem:[#allocation9_spill] sm:$0xff]  ;;  %v7504_v63 = vadd.f32 %v2807_v26, %v2449_v46  ;;  %vm8764_vm6 = vcmp.ne.s32.totalorder %v7375_v24, 0  ;;  %vm8765_vm7 = vcmp.lt.s32.totalorder %v7375_v24, 0 }
 0x1c5   : > { %v2455_v15 = vadd.f32 %v5315_v31, %v8762_v36  ;;  %vm7510_vm8 = vmand %vm8765_vm7, %vm8764_vm6  ;;  %v8766_v0 = vmov 0  ;;  %v7515_v62 = vmul.u32.u64.low 3817748708, %v7465_v32  ;;  %v7516_v35 = vmul.u32.u64.high 3817748708, %v7465_v32, %v7515_v62  ;;  %v2384_v61 = vpop.f32.mrf.mxu1  ;;  %v5352_v39 = vpop.f32.mrf.mxu0 }
 0x1c6   : > { %8763 = vst [vmem:[#allocation9_spill] sm:$0xff] %v7504_v63  ;;  %v8767_v0 = vsel %vm7510_vm8, 4294967295, %v8766_v0  ;;  %vm8768_vm10 = vcmp.ne.s32.totalorder %v7405_v55, 0  ;;  %vm8769_vm11 = vcmp.lt.s32.totalorder %v7405_v55, 0  ;;  %v8770_v46 = vmov 0 }
 0x1c7   : > { %vm7522_vm5 = vmand %vm8769_vm11, %vm8768_vm10  ;;  %v7527_v26 = vadd.s32 18, %v7450_v22  ;;  %v4009_v36 = vmul.u32 18, %v4008_v2  ;;  %v7530_v31 = vmul.u32.u64.low 3817748708, %v7473_v14  ;;  %v7531_v63 = vmul.u32.u64.high 3817748708, %v7473_v14, %v7530_v31  ;;  %v5318_v2 = vpop.f32.mrf.mxu1  ;;  %v2820_v10 = vpop.f32.mrf.mxu0 }
 0x1c8   : > { %v8771_v46 = vsel %vm7522_vm5, 4294967295, %v8770_v46  ;;  %v2453_v62 = vadd.f32 %v2384_v61, %v8774_v51  ;;  %v7534_v30 = vadd.f32 %v5352_v39, %v2454_v43  ;;  %vm8776_vm7 = vcmp.ne.s32.totalorder %v7412_v4, 0 }
 0x1c9   : > { %8772 = vst [vmem:[#allocation75_spill] sm:$0xff] %v8771_v46  ;;  %8773 = vst [vmem:[#allocation76_spill] sm:$0xff] %v7527_v26  ;;  %vm8777_vm6 = vcmp.lt.s32.totalorder %v7412_v4, 0  ;;  %v8778_v20 = vmov 0  ;;  %v7545_v13 = vmul.u32.u64.low 3817748708, %v7488_v40  ;;  %v7546_v52 = vmul.u32.u64.high 3817748708, %v7488_v40, %v7545_v13 }
 0x1ca   : > { %8775 = vst [vmem:[#allocation17_spill] sm:$0xff] %v7534_v30  ;;  %vm7540_vm11 = vmand %vm8777_vm6, %vm8776_vm7  ;;  %vm8780_vm10 = vcmp.ne.s32.totalorder %v7422_v16, 0  ;;  %vm8781_vm2 = vcmp.lt.s32.totalorder %v7422_v16, 0  ;;  %v8782_v39 = vmov 0  ;;  %v4042_v51 = vmul.u32 18, %v4041_v37  ;;  %v8798_v26 = vld [vmem:[#allocation28_spill] sm:$0xff] }
 0x1cb   : > { %v8779_v20 = vsel %vm7540_vm11, 4294967295, %v8778_v20  ;;  %vm7552_vm4 = vmand %vm8781_vm2, %vm8780_vm10  ;;  %v4019_v43 = vshrl.u32 %v7456_v11, 4  ;;  %v7558_v61 = vmul.u32.u64.low 3817748708, %v7501_v60  ;;  %v7559_v31 = vmul.u32.u64.high 3817748708, %v7501_v60, %v7558_v61 }
 0x1cc   : > { %v8783_v39 = vsel %vm7552_vm4, 4294967295, %v8782_v39  ;;  %v2458_v30 = vadd.f32 %v5318_v2, %v6896_v50  ;;  %v7562_v13 = vadd.f32 %v2820_v10, %v2452_v54  ;;  %vm8785_vm2 = vcmp.ne.s32.totalorder %v7450_v22, 0  ;;  %v2397_v61 = vpop.f32.mrf.mxu1  ;;  %v5353_v50 = vpop.f32.mrf.mxu0 }
 0x1cd   : > { %vm8786_vm7 = vcmp.lt.s32.totalorder %v7450_v22, 0  ;;  %v8787_v37 = vmov 0  ;;  %v7577_v11 = vsub.s32 %v7366_v38, %v4031_v25  ;;  %v7592_v38 = vsub.s32 %v7378_v6, %v4009_v36 }
 0x1ce   : > { %8784 = vst [vmem:[#allocation77_spill] sm:$0xff] %v7562_v13  ;;  %vm7572_vm6 = vmand %vm8786_vm7, %vm8785_vm2  ;;  %v2456_v25 = vadd.f32 %v2397_v61, %v6914_v19  ;;  %v7595_v1 = vadd.f32 %v5353_v50, %v2455_v15  ;;  %v5319_v13 = vpop.f32.mrf.mxu1  ;;  %v2823_v46 = vpop.f32.mrf.mxu0  ;;  %v7610_v19 = vsub.s32 %v7381_v8, %v4042_v51  ;;  %v4020_v15 = vmul.u32 18, %v4019_v43 }
 0x1cf   : > { %v8788_v37 = vsel %vm7572_vm6, 4294967295, %v8787_v37  ;;  %8790 = vst [vmem:[#allocation79_spill] sm:$0xff] %v7592_v38  ;;  %v4074_v36 = vshrl.u32 %v7470_v18, 4  ;;  %v2459_v61 = vadd.f32 %v5319_v13, %v6933_v12  ;;  %v7614_v50 = vadd.f32 %v2823_v46, %v2453_v62 }
 0x1d0   : > { %8789 = vst [vmem:[#allocation78_spill] sm:$0xff] %v8788_v37  ;;  %8791 = vst [vmem:[#allocation80_spill] sm:$0xff] %v7595_v1  ;;  %vm4160_vm10 = vcmp.ne.s32.totalorder %v7577_v11, 0  ;;  %v4052_v54 = vshrl.u32 %v7516_v35, 4  ;;  %v2400_v10 = vpop.f32.mrf.mxu1  ;;  %v5356_v2 = vpop.f32.mrf.mxu0  ;;  %v7620_v6 = vadd.s32 18, %v7577_v11  ;;  %v7625_v8 = vadd.s32 18, %v7592_v38 }
 0x1d1   : > { %8792 = vst [vmem:[#allocation81_spill] sm:$0xff] %v7614_v50  ;;  %v2457_v12 = vadd.f32 %v2400_v10, %v6951_v45  ;;  %v7628_v18 = vadd.f32 %v5356_v2, %v2458_v30  ;;  %v4085_v46 = vshrl.u32 %v7531_v63, 4  ;;  %v4063_v35 = vshrl.u32 %v7546_v52, 4 }
 0x1d2   : > { %8793 = vst [vmem:[#allocation82_spill] sm:$0xff] %v7625_v8  ;;  %v5322_v62 = vpop.f32.mrf.mxu1  ;;  %v2836_v51 = vpop.f32.mrf.mxu0  ;;  %v7634_v43 = vsub.s32 %v7397_v5, %v4020_v15  ;;  %v4118_v13 = vshrl.u32 %v7559_v31, 4  ;;  %v7638_v50 = vadd.s32 256, %v6707_v7  ;;  %v4075_v10 = vmul.u32 18, %v4074_v36  ;;  %v8796_v15 = vld [vmem:[#allocation25_spill] sm:$0xff]  ;;  %v8889_v8 = vld [vmem:[#allocation20_spill] sm:$0xff] }
 0x1d3   : > { %8794 = vst [vmem:[#allocation83_spill] sm:$0xff] %v7628_v18  ;;  %v2462_v45 = vadd.f32 %v5322_v62, %v6963_v28  ;;  %v7641_v30 = vadd.f32 %v2836_v51, %v2456_v25  ;;  %v4053_v63 = vmul.u32 18, %v4052_v54  ;;  %v7645_v18 = vadd.s32 18, %v7610_v19 }
 0x1d4   : > { %v2413_v2 = vpop.f32.mrf.mxu1  ;;  %v5357_v52 = vpop.f32.mrf.mxu0  ;;  %v7648_v5 = vadd.s32 280, %v6707_v7  ;;  %v7651_v31 = vadd.s32 264, %v6707_v7  ;;  %v4086_v25 = vmul.u32 18, %v4085_v46  ;;  %v4064_v36 = vmul.u32 18, %v4063_v35 }
 0x1d5   : > { %8795 = vst [vmem:[#allocation84_spill] sm:$0xff] %v7641_v30  ;;  %v2460_v1 = vadd.f32 %v2413_v2, %v8796_v15  ;;  %v7654_v28 = vadd.f32 %v5357_v52, %v2459_v61  ;;  %v4119_v51 = vmul.u32 18, %v4118_v13  ;;  %v7665_v7 = vsub.s32 %v7408_v48, %v4075_v10 }
 0x1d6   : > { %v5323_v54 = vpop.f32.mrf.mxu1  ;;  %v2839_v62 = vpop.f32.mrf.mxu0  ;;  %v7658_v30 = vmul.u32.u64.low 3817748708, %v7638_v50  ;;  %v7659_v22 = vmul.u32.u64.high 3817748708, %v7638_v50, %v7658_v30  ;;  %v7668_v61 = vsub.s32 %v7465_v32, %v4053_v63  ;;  %v7682_v48 = vsub.s32 %v7473_v14, %v4086_v25  ;;  %v8814_v14 = vld [vmem:[#allocation4_spill] sm:$0xff] }
 0x1d7   : > { %8797 = vst [vmem:[#allocation25_spill] sm:$0xff] %v7654_v28  ;;  %v2463_v37 = vadd.f32 %v5323_v54, %v8798_v26  ;;  %v7662_v16 = vadd.f32 %v2839_v62, %v2457_v12  ;;  %8800 = vst [vmem:[#allocation85_spill] sm:$0xff] %v7665_v7  ;;  %v7671_v2 = vmul.u32.u64.low 3817748708, %v7648_v5  ;;  %v7672_v13 = vmul.u32.u64.high 3817748708, %v7648_v5, %v7671_v2  ;;  %v8802_v26 = vld [vmem:[#allocation30_spill] sm:$0xff]  ;;  %v8807_v62 = vld [vmem:[#allocation15_spill] sm:$0xff] }
 0x1d8   : > { %8801 = vst [vmem:[#allocation86_spill] sm:$0xff] %v7668_v61  ;;  %v2416_v46 = vpop.f32.mrf.mxu1  ;;  %v5360_v35 = vpop.f32.mrf.mxu0  ;;  %v7675_v52 = vmul.u32.u64.low 3817748708, %v7651_v31  ;;  %v7676_v30 = vmul.u32.u64.high 3817748708, %v7651_v31, %v7675_v52  ;;  %8804 = vst [vmem:[#allocation87_spill] sm:$0xff] %v7682_v48  ;;  %v7685_v32 = vsub.s32 %v7488_v40, %v4064_v36  ;;  %v8808_v2 = vld [vmem:[#allocation12_spill] sm:$0xff]  ;;  %vm8818_vm7 = vcmp.lt.s32.totalorder %v7577_v11, 0 }
 0x1d9   : > { %8799 = vst [vmem:[#allocation28_spill] sm:$0xff] %v7662_v16  ;;  %v2461_v12 = vadd.f32 %v2416_v46, %v8802_v26  ;;  %v7679_v15 = vadd.f32 %v5360_v35, %v2462_v45  ;;  %v8809_v16 = vsel %vm6855_vm14, %v8807_v62, %v8808_v2  ;;  %v8813_v46 = vld [vmem:[#allocation13_spill] sm:$0xff]  ;;  %vm7709_vm4 = vmand %vm8818_vm7, %vm4160_vm10  ;;  %v8819_v36 = vmov 0 }
 0x1da   : > { %8805 = vst [vmem:[#allocation88_spill] sm:$0xff] %v7685_v32  ;;  %v5366_v10 = vpop.f32.mrf.mxu1  ;;  %v2852_v63 = vpop.f32.mrf.mxu0  ;;  %vm7692_vm6 = vcmp.lt.s32.totalorder %v8809_v16, 16  ;;  %v8815_v25 = vsel %vm6875_vm15, %v8813_v46, %v8814_v14  ;;  %v8820_v36 = vsel %vm7709_vm4, 4294967295, %v8819_v36  ;;  %v7715_v16 = vadd.s32 18, %v7634_v43 }
 0x1db   : > { %8803 = vst [vmem:[#allocation30_spill] sm:$0xff] %v7679_v15  ;;  %vm7701_vm2 = vcmp.lt.s32.totalorder %v8815_v25, 16  ;;  %v7718_v35 = vsub.s32 %v7501_v60, %v4119_v51  ;;  %v4096_v26 = vshrl.u32 %v7659_v22, 4  ;;  %v7721_v54 = vadd.f32 %v2852_v63, %v2460_v1 }
 0x1dc   : > { %vm8823_vm15 = vcmp.ne.s32.totalorder %v7592_v38, 0  ;;  %vm8824_vm11 = vcmp.lt.s32.totalorder %v7592_v38, 0  ;;  %v8825_v62 = vmov 0  ;;  %v7734_v2 = vadd.s32 18, %v7665_v7  ;;  %v3171_v60 = vpop.f32.mrf.mxu1  ;;  %v5361_v51 = vpop.f32.mrf.mxu0 }
 0x1dd   : > { %8821 = vst [vmem:[#allocation11_spill] sm:$0xff] %v7718_v35  ;;  %8822 = vst [vmem:[#allocation15_spill] sm:$0xff] %v7721_v54  ;;  %vm8829_vm5 = vcmp.ne.s32.totalorder %v7610_v19, 0  ;;  %vm8830_vm8 = vcmp.lt.s32.totalorder %v7610_v19, 0  ;;  %v4097_v22 = vmul.u32 18, %v4096_v26  ;;  %v4129_v63 = vshrl.u32 %v7672_v13, 4 }
 0x1de   : > { %vm7727_vm10 = vmand %vm8824_vm11, %vm8823_vm15  ;;  %8828 = vst [vmem:[#allocation18_spill] sm:$0xff] %v7734_v2  ;;  %v7748_v45 = vadd.f32 %v5361_v51, %v2463_v37  ;;  %vm8834_vm14 = vcmp.ne.s32.totalorder %v7634_v43, 0  ;;  %vm8835_vm7 = vcmp.lt.s32.totalorder %v7634_v43, 0  ;;  %v5367_v14 = vpop.f32.mrf.mxu1  ;;  %v2855_v25 = vpop.f32.mrf.mxu0  ;;  %v8839_v37 = vld [vmem:[#allocation16_spill] sm:$0xff]  ;;  %v8840_v13 = vld [vmem:[#allocation14_spill] sm:$0xff]  ;;  %v8844_v54 = vsel %vm7011_vm13, %v6926_v41, %v6892_v49 }
 0x1df   : > { %v8826_v62 = vsel %vm7727_vm10, 4294967295, %v8825_v62  ;;  %vm7741_vm9 = vmand %vm8830_vm8, %vm8829_vm5  ;;  %v8841_v51 = vsel %vm6887_vm0, %v8839_v37, %v8840_v13  ;;  %v8845_v15 = vmov 0  ;;  %vm8848_vm11 = vcmp.lt.s32.totalorder %v7665_v7, 0  ;;  %v8852_v41 = vld [vmem:[#allocation34_spill] sm:$0xff]  ;;  %v8895_v2 = vld [vmem:[#allocation35_spill] sm:$0xff] }
 0x1e0   : > { %8827 = vst [vmem:[#allocation12_spill] sm:$0xff] %v8826_v62  ;;  %8833 = vst [vmem:[#allocation13_spill] sm:$0xff] %v7748_v45  ;;  %vm7766_vm15 = vcmp.lt.s32.totalorder %v8841_v51, 16  ;;  %v7790_v27 = vsub.s32 %v7638_v50, %v4097_v22  ;;  %v4107_v49 = vshrl.u32 %v7676_v30, 4  ;;  %v7794_v37 = vadd.f32 %v2855_v25, %v2461_v12  ;;  %v3174_v28 = vpop.f32.mrf.mxu1  ;;  %v5404_v50 = vpop.f32.mrf.mxu0  ;;  %v8864_v22 = vld [vmem:[#allocation36_spill] sm:$0xff] }
 0x1e1   : > { %vm7754_vm1 = vmand %vm8835_vm7, %vm8834_vm14  ;;  %vm7775_vm14 = vcmp.lt.s32.totalorder %v8844_v54, 16  ;;  %vm8847_vm7 = vcmp.ne.s32.totalorder %v7665_v7, 0  ;;  %v3316_v54 = vadd.f32 %v5366_v10, %v8852_v41  ;;  %vm8854_vm13 = vcmp.ne.s32.totalorder %v7668_v61, 0 }
 0x1e2   : > { %v8846_v15 = vsel %vm7775_vm14, 4294967295, %v8845_v15  ;;  %vm7783_vm8 = vmand %vm8848_vm11, %vm8847_vm7  ;;  %8851 = vst [vmem:[#allocation4_spill] sm:$0xff] %v7790_v27  ;;  %vm8855_vm11 = vcmp.lt.s32.totalorder %v7668_v61, 0  ;;  %v8856_v13 = vmov 0  ;;  %v4130_v51 = vmul.u32 18, %v4129_v63 }
 0x1e3   : > { %8853 = vst [vmem:[#allocation19_spill] sm:$0xff] %v7794_v37  ;;  %vm7800_vm7 = vmand %vm8855_vm11, %vm8854_vm13  ;;  %v7811_v30 = vadd.s32 18, %v7668_v61  ;;  %vm8860_vm5 = vcmp.ne.s32.totalorder %v7682_v48, 0  ;;  %vm8861_vm13 = vcmp.lt.s32.totalorder %v7682_v48, 0  ;;  %v8862_v12 = vmov 0 }
 0x1e4   : > { %v8857_v13 = vsel %vm7800_vm7, 4294967295, %v8856_v13  ;;  %vm7817_vm11 = vmand %vm8861_vm13, %vm8860_vm5  ;;  %v7822_v10 = vadd.s32 18, %v7682_v48  ;;  %v3314_v63 = vadd.f32 %v3171_v60, %v8864_v22  ;;  %v3630_v25 = vadd.f32 %v5404_v50, %v3316_v54  ;;  %v5370_v60 = vpop.f32.mrf.mxu1  ;;  %v3485_v54 = vpop.f32.mrf.mxu0  ;;  %v8957_v48 = vld [vmem:[#allocation51_spill] sm:$0xff] }
 0x1e5   : > { %8858 = vst [vmem:[#allocation16_spill] sm:$0xff] %v8857_v13  ;;  %8859 = vst [vmem:[#allocation14_spill] sm:$0xff] %v7811_v30  ;;  %v8863_v12 = vsel %vm7817_vm11, 4294967295, %v8862_v12  ;;  %vm8865_vm5 = vcmp.ne.s32.totalorder %v7685_v32, 0  ;;  %vm8866_vm13 = vcmp.lt.s32.totalorder %v7685_v32, 0  ;;  %v8867_v58 = vmov 0 }
 0x1e6   : > { %vm7839_vm0 = vmand %vm8866_vm13, %vm8865_vm5  ;;  %v8870_v50 = vsel %vm7042_vm3, %v6967_v23, %v6921_v42  ;;  %v7853_v37 = vadd.s32 18, %v7685_v32  ;;  %vm8874_vm10 = vcmp.ne.s32.totalorder %v7718_v35, 0  ;;  %vm8875_vm5 = vcmp.lt.s32.totalorder %v7718_v35, 0  ;;  %v8888_v13 = vld [vmem:[#allocation21_spill] sm:$0xff] }
 0x1e7   : > { %v8868_v58 = vsel %vm7839_vm0, 4294967295, %v8867_v58  ;;  %vm7848_vm14 = vcmp.lt.s32.totalorder %v8870_v50, 16  ;;  %vm7859_vm13 = vmand %vm8875_vm5, %vm8874_vm10  ;;  %v8876_v41 = vmov 0  ;;  %v7864_v21 = vadd.s32 18, %v7718_v35 }
 0x1e8   : > { %8869 = vst [vmem:[#allocation34_spill] sm:$0xff] %v8868_v58  ;;  %8873 = vst [vmem:[#allocation36_spill] sm:$0xff] %v7853_v37  ;;  %v8877_v41 = vsel %vm7859_vm13, 4294967295, %v8876_v41  ;;  %v7867_v42 = vadd.s32 18, %v7790_v27  ;;  %v4108_v23 = vmul.u32 18, %v4107_v49  ;;  %v3317_v50 = vadd.f32 %v5367_v14, %v7092_v59  ;;  %v3187_v59 = vpop.f32.mrf.mxu1  ;;  %v5405_v14 = vpop.f32.mrf.mxu0 }
 0x1e9   : > { %8878 = vst [vmem:[#allocation89_spill] sm:$0xff] %v8877_v41  ;;  %8879 = vst [vmem:[#allocation90_spill] sm:$0xff] %v7864_v21  ;;  %vm8881_vm3 = vcmask 64512   ;;  %v3628_v38 = vadd.f32 %v3485_v54, %v3314_v63  ;;  %vm8882_vm10 = vcmp.ne.s32.totalorder %v7790_v27, 0  ;;  %vm8883_vm5 = vcmp.lt.s32.totalorder %v7790_v27, 0  ;;  %v8914_v27 = vld [vmem:[#allocation38_spill] sm:$0xff] }
 0x1ea   : > { %8880 = vst [vmem:[#allocation91_spill] sm:$0xff] %v7867_v42  ;;  %3667 = vst.msk [vmem:[%s7808_s18 + $0x10] sm:$0xff] %vm8881_vm3, %v3630_v25  ;;  %v8884_v62 = vmov 0  ;;  %v7885_v49 = vsub.s32 %v7648_v5, %v4130_v51  ;;  %v3315_v51 = vadd.f32 %v3174_v28, %v7133_v47  ;;  %v4352_v63 = vsel %vm7692_vm6, %v3630_v25, 0.0  ;;  %v5371_v5 = vpop.f32.mrf.mxu1  ;;  %v3488_v47 = vpop.f32.mrf.mxu0  ;;  %v8898_v25 = vld [vmem:[#allocation22_spill] sm:$0xff]  ;;  %v8916_v42 = vld [vmem:[#allocation31_spill] sm:$0xff] }
 0x1eb   : > { %vm7880_vm4 = vmand %vm8883_vm5, %vm8882_vm10  ;;  %3665 = vst.msk [vmem:[%s7808_s18] sm:$0xff] %vm8881_vm3, %v3628_v38  ;;  %v4350_v54 = vsel %vm7701_vm2, %v3628_v38, 0.0  ;;  %v3631_v7 = vadd.f32 %v5405_v14, %v3317_v50  ;;  %v8890_v61 = vsel %vm7025_vm12, %v8888_v13, %v8889_v8  ;;  %v3320_v52 = vadd.f32 %v5370_v60, %v7154_v53  ;;  %v8897_v13 = vld [vmem:[#allocation26_spill] sm:$0xff]  ;;  %v8902_v38 = vld [vmem:[#allocation37_spill] sm:$0xff] }
 0x1ec   : > { %v8885_v62 = vsel %vm7880_vm4, 4294967295, %v8884_v62  ;;  %vm7915_vm10 = vcmp.lt.s32.totalorder %v8890_v61, 16  ;;  %v7932_v61 = vsub.s32 %v7651_v31, %v4108_v23  ;;  %vm8894_vm12 = vmmov %vm8881_vm3  ;;  %v3629_v40 = vadd.f32 %v3488_v47, %v3315_v51  ;;  %v8904_v8 = vld [vmem:[#allocation29_spill] sm:$0xff]  ;;  %v8905_v31 = vld [vmem:[#allocation23_spill] sm:$0xff]  ;;  %v3190_v47 = vpop.f32.mrf.mxu1 }
 0x1ed   : > { %8886 = vst [vmem:[#allocation92_spill] sm:$0xff] %v8885_v62  ;;  %3668 = vst.msk [vmem:[%s7808_s18 + $0x18] sm:$0xff] %vm8894_vm12, %v3631_v7  ;;  %vm8896_vm6 = vnez %v8895_v2  ;;  %vm8903_vm5 = vnez %v8902_v38  ;;  %v4467_v60 = vmul.f32 %v4352_v63, %v4352_v63  ;;  %v4465_v51 = vmul.f32 %v4350_v54, %v4350_v54  ;;  %v5408_v2 = vpop.f32.mrf.mxu0  ;;  %v8941_v62 = vld [vmem:[#allocation32_spill] sm:$0xff]  ;;  %v8970_v28 = vld [vmem:[#allocation61_spill] sm:$0xff] }
 0x1ee   : > { %8893 = vst [vmem:[#allocation33_spill] sm:$0xff] %v7932_v61  ;;  %v8899_v50 = vsel %vm8896_vm6, %v8897_v13, %v8898_v25  ;;  %v8906_v23 = vsel %vm8903_vm5, %v8904_v8, %v8905_v31  ;;  %vm8909_vm4 = vmmov %vm8894_vm12  ;;  %v7959_v38 = vadd.s32 18, %v7885_v49  ;;  %v8910_v13 = vld [vmem:[#allocation45_spill] sm:$0xff]  ;;  %v4353_v25 = vsel %vm7766_vm15, %v3631_v7, 0.0  ;;  %v5374_v21 = vpop.f32.mrf.mxu1 }
 0x1ef   : > { %vm7942_vm2 = vcmp.lt.s32.totalorder %v8899_v50, 16  ;;  %vm7951_vm3 = vcmp.lt.s32.totalorder %v8906_v23, 16  ;;  %v4389_v53 = vsel %vm8909_vm4, %v4352_v63, 0.0  ;;  %v3318_v8 = vadd.f32 %v3187_v59, %v8910_v13  ;;  %vm8911_vm6 = vmmov %vm8909_vm4  ;;  %v3501_v41 = vpop.f32.mrf.mxu0  ;;  %v8917_v59 = vld [vmem:[#allocation24_spill] sm:$0xff] }
 0x1f0   : > { %3666 = vst.msk [vmem:[%s7808_s18 + $0x8] sm:$0xff] %vm8911_vm6, %v3629_v40  ;;  %vm8912_vm5 = vnez %v8846_v15  ;;  %v3634_v31 = vadd.f32 %v5408_v2, %v3320_v52  ;;  %v4386_v63 = vsel %vm8909_vm4, %v4350_v54, 0.0  ;;  %vm8913_vm13 = vmmov %vm8909_vm4  ;;  %vm8915_vm12 = vnez %v8914_v27  ;;  %v8921_v15 = vld [vmem:[#allocation48_spill] sm:$0xff]  ;;  %v8925_v2 = vld [vmem:[#allocation39_spill] sm:$0xff] }
 0x1f1   : > { %v4351_v50 = vsel %vm8912_vm5, %v3629_v40, 0.0  ;;  %v8918_v13 = vsel %vm8915_vm12, %v8916_v42, %v8917_v59  ;;  %v3321_v45 = vadd.f32 %v5371_v5, %v8921_v15  ;;  %vm8922_vm6 = vmmov %vm8909_vm4  ;;  %v3632_v52 = vadd.f32 %v3501_v41, %v3318_v8  ;;  %v8923_v40 = vld [vmem:[#allocation40_spill] sm:$0xff]  ;;  %v8926_v27 = vld [vmem:[#allocation27_spill] sm:$0xff] }
 0x1f2   : > { %v4387_v23 = vsel %vm8913_vm13, %v4351_v50, 0.0  ;;  %v4466_v35 = vmul.f32 %v4351_v50, %v4351_v50  ;;  %vm7975_vm0 = vcmp.lt.s32.totalorder %v8918_v13, 16  ;;  %3671 = vst.msk [vmem:[%s7808_s18 + $0x30] sm:$0xff] %vm8922_vm6, %v3634_v31  ;;  %vm8924_vm13 = vnez %v8923_v40  ;;  %vm8930_vm15 = vmmov %vm8909_vm4  ;;  %v8936_v15 = vld [vmem:[#allocation50_spill] sm:$0xff] }
 0x1f3   : > { %v4388_v54 = vadd.f32 %v4387_v23, %v4386_v63  ;;  %v8927_v50 = vsel %vm8924_vm13, %v8925_v2, %v8926_v27  ;;  %vm4203_vm12 = vcmp.lt.s32.totalorder %v7932_v61, 0  ;;  %v4501_v59 = vsel %vm8909_vm4, %v4465_v51, 0.0  ;;  %v3203_v63 = vpop.f32.mrf.mxu1  ;;  %v5409_v23 = vpop.f32.mrf.mxu0  ;;  %vm8937_vm13 = vmmov %vm8909_vm4  ;;  %v8938_v27 = vld [vmem:[#allocation42_spill] sm:$0xff] }
 0x1f4   : > { %vm7988_vm5 = vcmp.lt.s32.totalorder %v8927_v50, 16  ;;  %v4468_v13 = vmul.f32 %v4353_v25, %v4353_v25  ;;  %v4502_v5 = vsel %vm8930_vm15, %v4466_v35, 0.0  ;;  %vm8931_vm6 = vcmp.ne.s32.totalorder %v7885_v49, 0  ;;  %3669 = vst.msk [vmem:[%s7808_s18 + $0x20] sm:$0xff] %vm8937_vm13, %v3632_v52  ;;  %v8940_v50 = vld [vmem:[#allocation41_spill] sm:$0xff] }
 0x1f5   : > { %vm8932_vm11 = vcmp.lt.s32.totalorder %v7885_v49, 0  ;;  %v8004_v8 = vadd.s32 18, %v7932_v61  ;;  %v3319_v40 = vadd.f32 %v3190_v47, %v8936_v15  ;;  %v4390_v2 = vadd.f32 %v4389_v53, %v4388_v54  ;;  %v5375_v54 = vpop.f32.mrf.mxu1  ;;  %v8951_v15 = vld [vmem:[#allocation47_spill] sm:$0xff] }
 0x1f6   : > { %vm7999_vm7 = vmand %vm8932_vm11, %vm8931_vm6  ;;  %v4503_v51 = vadd.f32 %v4502_v5, %v4501_v59  ;;  %v4354_v35 = vsel %vm7848_vm14, %v3632_v52, 0.0  ;;  %vm8939_vm15 = vnez %v8938_v27  ;;  %v4504_v58 = vsel %vm8909_vm4, %v4467_v60, 0.0  ;;  %v3504_v5 = vpop.f32.mrf.mxu0  ;;  %v8949_v60 = vld [vmem:[#allocation58_spill] sm:$0xff] }
 0x1f7   : > { %8935 = vst [vmem:[#allocation21_spill] sm:$0xff] %v8004_v8  ;;  %v8942_v32 = vsel %vm8939_vm15, %v8940_v50, %v8941_v62  ;;  %vm8945_vm6 = vmmov %vm8909_vm4  ;;  %v4469_v47 = vmul.f32 %v4354_v35, %v4354_v35  ;;  %v3635_v59 = vadd.f32 %v5409_v23, %v3321_v45  ;;  %vm8946_vm14 = vcmp.ne.s32.totalorder %v7932_v61, 0  ;;  %v8979_v61 = vld [vmem:[#allocation59_spill] sm:$0xff] }
 0x1f8   : > { %vm8016_vm11 = vcmp.lt.s32.totalorder %v8942_v32, 16  ;;  %v4391_v53 = vsel %vm8945_vm6, %v4353_v25, 0.0  ;;  %vm8026_vm13 = vmand %vm4203_vm12, %vm8946_vm14  ;;  %v4505_v32 = vadd.f32 %v4504_v58, %v4503_v51  ;;  %v3633_v52 = vadd.f32 %v3504_v5, %v3319_v40  ;;  %v8952_v25 = vld [vmem:[#allocation43_spill] sm:$0xff]  ;;  %v3206_v51 = vpop.f32.mrf.mxu1 }
 0x1f9   : > { %v4392_v62 = vadd.f32 %v4391_v53, %v4390_v2  ;;  %vm8950_vm15 = vnez %v8949_v60  ;;  %vm8956_vm12 = vmmov %vm8945_vm6  ;;  %v3324_v58 = vadd.f32 %v5374_v21, %v8957_v48  ;;  %v4356_v40 = vsel %vm7915_vm10, %v3634_v31, 0.0  ;;  %v5412_v53 = vpop.f32.mrf.mxu0  ;;  %v8959_v5 = vld [vmem:[#allocation55_spill] sm:$0xff] }
 0x1fa   : > { %v8953_v27 = vsel %vm8950_vm15, %v8951_v15, %v8952_v25  ;;  %v4506_v50 = vsel %vm8956_vm12, %v4468_v13, 0.0  ;;  %v4393_v2 = vsel %vm8945_vm6, %v4354_v35, 0.0  ;;  %vm8958_vm14 = vmmov %vm8945_vm6  ;;  %v3322_v60 = vadd.f32 %v3203_v63, %v8959_v5  ;;  %v5378_v13 = vpop.f32.mrf.mxu1 }
 0x1fb   : > { %vm8035_vm4 = vcmp.lt.s32.totalorder %v8953_v27, 16  ;;  %3672 = vst.msk [vmem:[%s7808_s18 + $0x38] sm:$0xff] %vm8958_vm14, %v3635_v59  ;;  %v4394_v15 = vadd.f32 %v4393_v2, %v4392_v62  ;;  %v4507_v25 = vadd.f32 %v4506_v50, %v4505_v32  ;;  %vm8960_vm15 = vmmov %vm8945_vm6  ;;  %v4357_v21 = vsel %vm7942_vm2, %v3635_v59, 0.0  ;;  %v3517_v35 = vpop.f32.mrf.mxu0  ;;  %v8962_v32 = vld [vmem:[#allocation60_spill] sm:$0xff]  ;;  %v8964_v62 = vld [vmem:[#allocation49_spill] sm:$0xff] }
 0x1fc   : > { %3670 = vst.msk [vmem:[%s7808_s18 + $0x28] sm:$0xff] %vm8960_vm15, %v3633_v52  ;;  %vm8961_vm12 = vmmov %vm8945_vm6  ;;  %v4355_v31 = vsel %vm7951_vm3, %v3633_v52, 0.0  ;;  %v3638_v63 = vadd.f32 %v5412_v53, %v3324_v58  ;;  %vm8963_vm10 = vnez %v8962_v32  ;;  %v8965_v27 = vld [vmem:[#allocation44_spill] sm:$0xff]  ;;  %v4471_v5 = vmul.f32 %v4356_v40, %v4356_v40  ;;  %v8973_v58 = vld [vmem:[#allocation46_spill] sm:$0xff] }
 0x1fd   : > { %v4508_v30 = vsel %vm8961_vm12, %v4469_v47, 0.0  ;;  %v8966_v50 = vsel %vm8963_vm10, %v8964_v62, %v8965_v27  ;;  %vm8969_vm14 = vmmov %vm8961_vm12  ;;  %v4470_v59 = vmul.f32 %v4355_v31, %v4355_v31  ;;  %vm8971_vm2 = vnez %v8970_v28  ;;  %v8972_v52 = vld [vmem:[#allocation52_spill] sm:$0xff]  ;;  %v8978_v27 = vld [vmem:[#allocation57_spill] sm:$0xff]  ;;  %v5413_v23 = vpop.f32.mrf.mxu0 }
 0x1fe   : > { %vm8067_vm6 = vcmp.lt.s32.totalorder %v8966_v50, 16  ;;  %v4509_v47 = vadd.f32 %v4508_v30, %v4507_v25  ;;  %v4395_v14 = vsel %vm8969_vm14, %v4355_v31, 0.0  ;;  %v8974_v53 = vsel %vm8971_vm2, %v8972_v52, %v8973_v58  ;;  %vm8977_vm15 = vmmov %vm8961_vm12  ;;  %3675 = vst.msk [vmem:[%s7808_s18 + $0x50] sm:$0xff] %vm8961_vm12, %v3638_v63  ;;  %v3219_v25 = vpop.f32.mrf.mxu1 }
 0x1ff   : > { %vm8077_vm3 = vcmp.lt.s32.totalorder %v8974_v53, 16  ;;  %v4397_v62 = vsel %vm8977_vm15, %v4356_v40, 0.0  ;;  %v3325_v50 = vadd.f32 %v5375_v54, %v8978_v27  ;;  %v4396_v48 = vadd.f32 %v4395_v14, %v4394_v15  ;;  %vm8980_vm10 = vmmov %vm8961_vm12  ;;  %v8984_v14 = vld [vmem:[#allocation62_spill] sm:$0xff] }
 0x200   : > { %v3636_v30 = vadd.f32 %v3517_v35, %v3322_v60  ;;  %v4472_v31 = vmul.f32 %v4357_v21, %v4357_v21  ;;  %v3323_v28 = vadd.f32 %v3206_v51, %v8979_v61  ;;  %v4510_v8 = vsel %vm8980_vm10, %v4470_v59, 0.0  ;;  %vm8981_vm14 = vmmov %vm8980_vm10  ;;  %v5379_v40 = vpop.f32.mrf.mxu1  ;;  %v3520_v60 = vpop.f32.mrf.mxu0  ;;  %v8982_v35 = vld [vmem:[#allocation64_spill] sm:$0xff]  ;;  %v8985_v61 = vld [vmem:[#allocation53_spill] sm:$0xff] }
 0x201   : > { %v4360_v52 = vsel %vm7975_vm0, %v3638_v63, 0.0  ;;  %v4398_v58 = vadd.f32 %v4397_v62, %v4396_v48  ;;  %v4511_v53 = vadd.f32 %v4510_v8, %v4509_v47  ;;  %v3639_v15 = vadd.f32 %v5413_v23, %v3325_v50  ;;  %vm8989_vm0 = vmmov %vm8980_vm10  ;;  %v8991_v48 = vld [vmem:[#allocation63_spill] sm:$0xff]  ;;  %v8992_v47 = vld [vmem:[#allocation65_spill] sm:$0xff] }
 0x202   : > { %3673 = vst.msk [vmem:[%s7808_s18 + $0x40] sm:$0xff] %vm8981_vm14, %v3636_v30  ;;  %v4358_v54 = vsel %vm7988_vm5, %v3636_v30, 0.0  ;;  %vm8983_vm2 = vnez %v8982_v35  ;;  %v4512_v7 = vsel %vm8989_vm0, %v4471_v5, 0.0  ;;  %vm8990_vm12 = vmmov %vm8989_vm0  ;;  %v3328_v63 = vadd.f32 %v5378_v13, %v8991_v48  ;;  %v8994_v23 = vld [vmem:[#allocation66_spill] sm:$0xff]  ;;  %v3222_v5 = vpop.f32.mrf.mxu1  ;;  %v9001_v48 = vld [vmem:[#allocation68_spill] sm:$0xff] }
 0x203   : > { %v8986_v51 = vsel %vm8983_vm2, %v8984_v14, %v8985_v61  ;;  %v4399_v8 = vsel %vm8990_vm12, %v4357_v21, 0.0  ;;  %v4473_v42 = vmul.f32 %v4358_v54, %v4358_v54  ;;  %vm8993_vm5 = vnez %v8992_v47  ;;  %v8995_v62 = vld [vmem:[#allocation54_spill] sm:$0xff]  ;;  %vm8999_vm14 = vmmov %vm8989_vm0  ;;  %v5416_v14 = vpop.f32.mrf.mxu0 }
 0x204   : > { %vm8098_vm15 = vcmp.lt.s32.totalorder %v8986_v51, 16  ;;  %v8996_v27 = vsel %vm8993_vm5, %v8994_v23, %v8995_v62  ;;  %v4513_v30 = vadd.f32 %v4512_v7, %v4511_v53  ;;  %v4400_v35 = vadd.f32 %v4399_v8, %v4398_v58  ;;  %3676 = vst.msk [vmem:[%s7808_s18 + $0x58] sm:$0xff] %vm8999_vm14, %v3639_v15  ;;  %vm9000_vm2 = vmmov %vm8989_vm0  ;;  %v5382_v37 = vpop.f32.mrf.mxu1 }
 0x205   : > { %vm8110_vm10 = vcmp.lt.s32.totalorder %v8996_v27, 16  ;;  %v4361_v21 = vsel %vm8016_vm11, %v3639_v15, 0.0  ;;  %v3637_v13 = vadd.f32 %v3520_v60, %v3323_v28  ;;  %v4514_v61 = vsel %vm9000_vm2, %v4472_v31, 0.0  ;;  %vm9002_vm12 = vmmov %vm8989_vm0  ;;  %v3533_v15 = vpop.f32.mrf.mxu0  ;;  %v9003_v28 = vld [vmem:[#allocation69_spill] sm:$0xff]  ;;  %v9005_v60 = vld [vmem:[#allocation67_spill] sm:$0xff] }
 0x206   : > { %v4475_v51 = vmul.f32 %v4360_v52, %v4360_v52  ;;  %v3326_v47 = vadd.f32 %v3219_v25, %v9001_v48  ;;  %v4401_v23 = vsel %vm8989_vm0, %v4358_v54, 0.0  ;;  %v4515_v27 = vadd.f32 %v4514_v61, %v4513_v30  ;;  %v9006_v31 = vld [vmem:[#allocation56_spill] sm:$0xff]  ;;  %vm9010_vm14 = vmmov %vm8989_vm0 }
 0x207   : > { %v4402_v62 = vadd.f32 %v4401_v23, %v4400_v35  ;;  %3674 = vst.msk [vmem:[%s7808_s18 + $0x48] sm:$0xff] %vm9002_vm12, %v3637_v13  ;;  %v4359_v58 = vsel %vm8035_vm4, %v3637_v13, 0.0  ;;  %v3642_v53 = vadd.f32 %v5416_v14, %v3328_v63  ;;  %vm9004_vm11 = vnez %v9003_v28  ;;  %vm9011_vm2 = vmmov %vm8989_vm0  ;;  %v9016_v14 = vld [vmem:[#allocation70_spill] sm:$0xff]  ;;  %v5417_v28 = vpop.f32.mrf.mxu0 }
 0x208   : > { %v9007_v7 = vsel %vm9004_vm11, %v9005_v60, %v9006_v31  ;;  %v4516_v54 = vsel %vm9010_vm14, %v4473_v42, 0.0  ;;  %v4476_v8 = vmul.f32 %v4361_v21, %v4361_v21  ;;  %v4403_v30 = vsel %vm9011_vm2, %v4359_v58, 0.0  ;;  %vm9017_vm12 = vmmov %vm9011_vm2  ;;  %v3235_v42 = vpop.f32.mrf.mxu1 }
 0x209   : > { %vm8130_vm5 = vcmp.lt.s32.totalorder %v9007_v7, 16  ;;  %v4474_v35 = vmul.f32 %v4359_v58, %v4359_v58  ;;  %vm9012_vm4 = vnez %v8757_v17  ;;  %v4517_v13 = vadd.f32 %v4516_v54, %v4515_v27  ;;  %3679 = vst.msk [vmem:[%s7808_s18 + $0x70] sm:$0xff] %vm9017_vm12, %v3642_v53  ;;  %vm9018_vm11 = vmmov %vm9011_vm2  ;;  %v9019_v17 = vld [vmem:[#allocation71_spill] sm:$0xff]  ;;  %v9033_v54 = vld [vmem:[#allocation2_spill] sm:$0xff] }
 0x20a   : > { %v9013_v45 = vsel %vm9012_vm4, %v7372_v3, %v7334_v9  ;;  %v3329_v61 = vadd.f32 %v5379_v40, %v9016_v14  ;;  %v4404_v48 = vadd.f32 %v4403_v30, %v4402_v62  ;;  %v3640_v23 = vadd.f32 %v3533_v15, %v3326_v47  ;;  %vm9020_vm14 = vmmov %vm9011_vm2  ;;  %v9080_v7 = vld [vmem:[#allocation12_spill] sm:$0xff] }
 0x20b   : > { %vm8141_vm0 = vcmp.lt.s32.totalorder %v9013_v45, 16  ;;  %v4405_v58 = vsel %vm9018_vm11, %v4360_v52, 0.0  ;;  %v3327_v60 = vadd.f32 %v3222_v5, %v9019_v17  ;;  %v4518_v9 = vsel %vm9020_vm14, %v4474_v35, 0.0  ;;  %vm9025_vm12 = vmmov %vm9018_vm11  ;;  %v5383_v5 = vpop.f32.mrf.mxu1 }
 0x20c   : > { %v4364_v3 = vsel %vm8067_vm6, %v3642_v53, 0.0  ;;  %vm9021_vm2 = vnez %v8761_v57  ;;  %v4406_v47 = vadd.f32 %v4405_v58, %v4404_v48  ;;  %v4519_v27 = vadd.f32 %v4518_v9, %v4517_v13  ;;  %3677 = vst.msk [vmem:[%s7808_s18 + $0x60] sm:$0xff] %vm9025_vm12, %v3640_v23  ;;  %v3536_v53 = vpop.f32.mrf.mxu0  ;;  %vm9026_vm6 = vmmov %vm9018_vm11  ;;  %v9036_v13 = vld [vmem:[#allocation10_spill] sm:$0xff]  ;;  %v9039_v58 = vld [vmem:[#allocation75_spill] sm:$0xff] }
 0x20d   : > { %v9022_v40 = vsel %vm9021_vm2, %v7390_v56, %v7363_v29  ;;  %v4362_v52 = vsel %vm8077_vm3, %v3640_v23, 0.0  ;;  %v3643_v2 = vadd.f32 %v5417_v28, %v3329_v61  ;;  %v4520_v57 = vsel %vm9026_vm6, %v4475_v51, 0.0  ;;  %vm9027_vm11 = vmmov %vm9026_vm6 }
 0x20e   : > { %vm8158_vm4 = vcmp.lt.s32.totalorder %v9022_v40, 16  ;;  %v4407_v15 = vsel %vm9027_vm11, %v4361_v21, 0.0  ;;  %vm9028_vm14 = vmmov %vm9026_vm6  ;;  %v4477_v56 = vmul.f32 %v4362_v52, %v4362_v52  ;;  %vm9029_vm2 = vnez %v8767_v0  ;;  %v3238_v21 = vpop.f32.mrf.mxu1 }
 0x20f   : > { %v4522_v29 = vsel %vm9028_vm14, %v4476_v8, 0.0  ;;  %v9030_v31 = vsel %vm9029_vm2, %v7426_v34, %v7375_v24  ;;  %v4521_v32 = vadd.f32 %v4520_v57, %v4519_v27  ;;  %v3332_v30 = vadd.f32 %v5382_v37, %v9033_v54  ;;  %vm9034_vm3 = vmmov %vm9026_vm6  ;;  %v5420_v8 = vpop.f32.mrf.mxu0 }
 0x210   : > { %vm8174_vm12 = vcmp.lt.s32.totalorder %v9030_v31, 16  ;;  %v4408_v35 = vadd.f32 %v4407_v15, %v4406_v47  ;;  %3680 = vst.msk [vmem:[%s7808_s18 + $0x78] sm:$0xff] %vm9034_vm3, %v3643_v2  ;;  %v3641_v51 = vadd.f32 %v3536_v53, %v3327_v60  ;;  %vm9035_vm6 = vmmov %vm9034_vm3  ;;  %v3330_v0 = vadd.f32 %v3235_v42, %v9036_v13  ;;  %v5386_v48 = vpop.f32.mrf.mxu1  ;;  %v9051_v15 = vld [vmem:[#allocation5_spill] sm:$0xff] }
 0x211   : > { %v4413_v45 = vsel %vm9035_vm6, %v4364_v3, 0.0  ;;  %vm9037_vm11 = vmmov %vm9034_vm3  ;;  %v4365_v34 = vsel %vm8098_vm15, %v3643_v2, 0.0  ;;  %v4523_v61 = vadd.f32 %v4522_v29, %v4521_v32  ;;  %v3646_v23 = vadd.f32 %v5420_v8, %v3332_v30  ;;  %v3549_v28 = vpop.f32.mrf.mxu0  ;;  %v9055_v30 = vld [vmem:[#allocation74_spill] sm:$0xff] }
 0x212   : > { %v4409_v14 = vsel %vm9037_vm11, %v4362_v52, 0.0  ;;  %vm9038_vm14 = vmmov %vm9034_vm3  ;;  %v4363_v37 = vsel %vm8110_vm10, %v3641_v51, 0.0  ;;  %vm9040_vm2 = vnez %v9039_v58  ;;  %v4479_v59 = vmul.f32 %v4364_v3, %v4364_v3  ;;  %v3251_v3 = vpop.f32.mrf.mxu1 }
 0x213   : > { %v4410_v24 = vadd.f32 %v4409_v14, %v4408_v35  ;;  %3678 = vst.msk [vmem:[%s7808_s18 + $0x68] sm:$0xff] %vm9038_vm14, %v3641_v51  ;;  %v9041_v42 = vsel %vm9040_vm2, %v7438_v44, %v7405_v55  ;;  %vm9044_vm15 = vmmov %vm9035_vm6  ;;  %v4411_v9 = vsel %vm9035_vm6, %v4363_v37, 0.0  ;;  %v4478_v50 = vmul.f32 %v4363_v37, %v4363_v37  ;;  %v9049_v44 = vld [vmem:[#allocation3_spill] sm:$0xff]  ;;  %v5421_v53 = vpop.f32.mrf.mxu0  ;;  %v9056_v35 = vld [vmem:[#allocation72_spill] sm:$0xff] }
 0x214   : > { %vm8195_vm3 = vcmp.lt.s32.totalorder %v9041_v42, 16  ;;  %v4524_v60 = vsel %vm9044_vm15, %v4477_v56, 0.0  ;;  %vm9045_vm10 = vnez %v8779_v20  ;;  %v3333_v27 = vadd.f32 %v5383_v5, %v9049_v44  ;;  %vm9050_vm14 = vmmov %vm9035_vm6  ;;  %v5387_v31 = vpop.f32.mrf.mxu1  ;;  %v9065_v14 = vld [vmem:[#allocation76_spill] sm:$0xff] }
 0x215   : > { %v9046_v40 = vsel %vm9045_vm10, %v7443_v33, %v7412_v4  ;;  %v4525_v55 = vadd.f32 %v4524_v60, %v4523_v61  ;;  %v4412_v52 = vadd.f32 %v4411_v9, %v4410_v24  ;;  %3683 = vst.msk [vmem:[%s7808_s18 + $0x90] sm:$0xff] %vm9050_vm14, %v3646_v23  ;;  %v3644_v2 = vadd.f32 %v3549_v28, %v3330_v0  ;;  %vm9052_vm2 = vmmov %vm9035_vm6  ;;  %v3552_v54 = vpop.f32.mrf.mxu0  ;;  %v9063_v0 = vld [vmem:[#allocation78_spill] sm:$0xff]  ;;  %v9066_v24 = vld [vmem:[#allocation73_spill] sm:$0xff] }
 0x216   : > { %vm8206_vm11 = vcmp.lt.s32.totalorder %v9046_v40, 16  ;;  %v4480_v57 = vmul.f32 %v4365_v34, %v4365_v34  ;;  %v3331_v29 = vadd.f32 %v3238_v21, %v9051_v15  ;;  %v4526_v20 = vsel %vm9052_vm2, %v4478_v50, 0.0  ;;  %vm9053_vm15 = vmmov %vm9052_vm2  ;;  %v3254_v28 = vpop.f32.mrf.mxu1  ;;  %v9072_v60 = vld [vmem:[#allocation7_spill] sm:$0xff] }
 0x217   : > { %v4368_v4 = vsel %vm8130_vm5, %v3646_v23, 0.0  ;;  %v4414_v33 = vadd.f32 %v4413_v45, %v4412_v52  ;;  %v4527_v56 = vadd.f32 %v4526_v20, %v4525_v55  ;;  %3681 = vst.msk [vmem:[%s7808_s18 + $0x80] sm:$0xff] %vm9053_vm15, %v3644_v2  ;;  %v4366_v5 = vsel %vm8141_vm0, %v3644_v2, 0.0  ;;  %vm9060_vm5 = vmmov %vm9052_vm2  ;;  %v9062_v45 = vld [vmem:[#allocation6_spill] sm:$0xff]  ;;  %v5424_v58 = vpop.f32.mrf.mxu0 }
 0x218   : > { %v3647_v32 = vadd.f32 %v5421_v53, %v3333_v27  ;;  %vm9054_vm6 = vnez %v8783_v39  ;;  %v4528_v25 = vsel %vm9060_vm5, %v4479_v59, 0.0  ;;  %vm9061_vm14 = vmmov %vm9052_vm2  ;;  %v3336_v13 = vadd.f32 %v5386_v48, %v9062_v45  ;;  %v5390_v62 = vpop.f32.mrf.mxu1  ;;  %v9082_v20 = vld [vmem:[#allocation82_spill] sm:$0xff] }
 0x219   : > { %v9057_v21 = vsel %vm9054_vm6, %v9055_v30, %v9056_v35  ;;  %v4415_v8 = vsel %vm9061_vm14, %v4365_v34, 0.0  ;;  %v4481_v63 = vmul.f32 %v4366_v5, %v4366_v5  ;;  %vm9064_vm0 = vnez %v9063_v0  ;;  %vm9070_vm15 = vmmov %vm9060_vm5  ;;  %v3565_v52 = vpop.f32.mrf.mxu0 }
 0x21a   : > { %vm8226_vm10 = vcmp.lt.s32.totalorder %v9057_v21, 16  ;;  %v9067_v39 = vsel %vm9064_vm0, %v9065_v14, %v9066_v24  ;;  %v4529_v37 = vadd.f32 %v4528_v25, %v4527_v56  ;;  %v4416_v23 = vadd.f32 %v4415_v8, %v4414_v33  ;;  %3684 = vst.msk [vmem:[%s7808_s18 + $0x98] sm:$0xff] %vm9070_vm15, %v3647_v32  ;;  %vm9071_vm6 = vmmov %vm9060_vm5  ;;  %v9083_v33 = vld [vmem:[#allocation79_spill] sm:$0xff]  ;;  %v9090_v25 = vld [vmem:[#allocation9_spill] sm:$0xff] }
 0x21b   : > { %vm8238_vm2 = vcmp.lt.s32.totalorder %v9067_v39, 16  ;;  %v4369_v34 = vsel %vm8158_vm4, %v3647_v32, 0.0  ;;  %v3645_v48 = vadd.f32 %v3552_v54, %v3331_v29  ;;  %v4530_v42 = vsel %vm9071_vm6, %v4480_v57, 0.0  ;;  %vm9073_vm14 = vmmov %vm9060_vm5  ;;  %v3267_v54 = vpop.f32.mrf.mxu1  ;;  %v5425_v35 = vpop.f32.mrf.mxu0 }
 0x21c   : > { %v4483_v59 = vmul.f32 %v4368_v4, %v4368_v4  ;;  %v3334_v9 = vadd.f32 %v3251_v3, %v9072_v60  ;;  %v4417_v50 = vsel %vm9060_vm5, %v4366_v5, 0.0  ;;  %v4531_v55 = vadd.f32 %v4530_v42, %v4529_v37  ;;  %vm9078_vm15 = vmmov %vm9060_vm5 }
 0x21d   : > { %v4418_v40 = vadd.f32 %v4417_v50, %v4416_v23  ;;  %3682 = vst.msk [vmem:[%s7808_s18 + $0x88] sm:$0xff] %vm9073_vm14, %v3645_v48  ;;  %v4367_v44 = vsel %vm8174_vm12, %v3645_v48, 0.0  ;;  %v3650_v27 = vadd.f32 %v5424_v58, %v3336_v13  ;;  %vm9074_vm4 = vnez %v8820_v36  ;;  %vm9079_vm6 = vmmov %vm9060_vm5  ;;  %v5391_v24 = vpop.f32.mrf.mxu1  ;;  %v3568_v39 = vpop.f32.mrf.mxu0  ;;  %v9102_v48 = vld [vmem:[#allocation17_spill] sm:$0xff] }
 0x21e   : > { %v9075_v2 = vsel %vm9074_vm4, %v7620_v6, %v7577_v11  ;;  %v4532_v53 = vsel %vm9078_vm15, %v4481_v63, 0.0  ;;  %v4484_v57 = vmul.f32 %v4369_v34, %v4369_v34  ;;  %v4419_v15 = vsel %vm9079_vm6, %v4367_v44, 0.0  ;;  %v9087_v6 = vld [vmem:[#allocation8_spill] sm:$0xff]  ;;  %vm9088_vm14 = vmmov %vm9079_vm6  ;;  %v9105_v50 = vld [vmem:[#allocation77_spill] sm:$0xff] }
 0x21f   : > { %vm8258_vm0 = vcmp.lt.s32.totalorder %v9075_v2, 16  ;;  %v4482_v29 = vmul.f32 %v4367_v44, %v4367_v44  ;;  %vm9081_vm12 = vnez %v9080_v7  ;;  %v4533_v11 = vadd.f32 %v4532_v53, %v4531_v55  ;;  %3687 = vst.msk [vmem:[%s7808_s18 + $0xb0] sm:$0xff] %vm9088_vm14, %v3650_v27  ;;  %vm9089_vm4 = vmmov %vm9079_vm6  ;;  %v5428_v60 = vpop.f32.mrf.mxu0  ;;  %v9108_v2 = vld [vmem:[#allocation18_spill] sm:$0xff]  ;;  %v9109_v53 = vld [vmem:[#allocation85_spill] sm:$0xff] }
 0x220   : > { %v9084_v56 = vsel %vm9081_vm12, %v9082_v20, %v9083_v33  ;;  %v3337_v5 = vadd.f32 %v5387_v31, %v9087_v6  ;;  %v4420_v32 = vadd.f32 %v4419_v15, %v4418_v40  ;;  %v3648_v30 = vadd.f32 %v3565_v52, %v3334_v9  ;;  %vm9091_vm15 = vmmov %vm9089_vm4  ;;  %v9115_v20 = vld [vmem:[#allocation16_spill] sm:$0xff]  ;;  %v9117_v33 = vld [vmem:[#allocation14_spill] sm:$0xff] }
 0x221   : > { %vm8269_vm5 = vcmp.lt.s32.totalorder %v9084_v56, 16  ;;  %v4421_v21 = vsel %vm9089_vm4, %v4368_v4, 0.0  ;;  %v3335_v8 = vadd.f32 %v3254_v28, %v9090_v25  ;;  %v4534_v45 = vsel %vm9091_vm15, %v4482_v29, 0.0  ;;  %vm9095_vm12 = vmmov %vm9089_vm4  ;;  %v3581_v52 = vpop.f32.mrf.mxu0  ;;  %v9118_v56 = vld [vmem:[#allocation86_spill] sm:$0xff] }
 0x222   : > { %v4372_v13 = vsel %vm8195_vm3, %v3650_v27, 0.0  ;;  %v9092_v31 = vsel %vm7741_vm9, %v7645_v18, %v7610_v19  ;;  %v4422_v0 = vadd.f32 %v4421_v21, %v4420_v32  ;;  %v4535_v14 = vadd.f32 %v4534_v45, %v4533_v11  ;;  %3685 = vst.msk [vmem:[%s7808_s18 + $0xa0] sm:$0xff] %vm9095_vm12, %v3648_v30  ;;  %vm9096_vm3 = vmmov %vm9089_vm4 }
 0x223   : > { %vm8286_vm6 = vcmp.lt.s32.totalorder %v9092_v31, 16  ;;  %v4370_v4 = vsel %vm8206_vm11, %v3648_v30, 0.0  ;;  %v3651_v17 = vadd.f32 %v5425_v35, %v3337_v5  ;;  %v4536_v1 = vsel %vm9096_vm3, %v4483_v59, 0.0  ;;  %vm9097_vm14 = vmmov %vm9096_vm3  ;;  %v9122_v5 = vld [vmem:[#allocation80_spill] sm:$0xff]  ;;  %v5429_v21 = vpop.f32.mrf.mxu0 }
 0x224   : > { %v4423_v37 = vsel %vm9097_vm14, %v4369_v34, 0.0  ;;  %vm9098_vm9 = vmmov %vm9096_vm3  ;;  %v4485_v18 = vmul.f32 %v4370_v4, %v4370_v4  ;;  %v9099_v23 = vsel %vm7754_vm1, %v7715_v16, %v7634_v43  ;;  %v4537_v47 = vadd.f32 %v4536_v1, %v4535_v14  ;;  %v3270_v34 = vpop.f32.mrf.mxu1  ;;  %v9128_v1 = vld [vmem:[#allocation87_spill] sm:$0xff] }
 0x225   : > { %v4538_v19 = vsel %vm9098_vm9, %v4484_v57, 0.0  ;;  %vm8302_vm4 = vcmp.lt.s32.totalorder %v9099_v23, 16  ;;  %v3340_v58 = vadd.f32 %v5390_v62, %v9102_v48  ;;  %v4424_v42 = vadd.f32 %v4423_v37, %v4422_v0  ;;  %vm9103_vm11 = vmmov %vm9096_vm3  ;;  %v9134_v23 = vld [vmem:[#allocation83_spill] sm:$0xff]  ;;  %v9135_v48 = vld [vmem:[#allocation34_spill] sm:$0xff] }
 0x226   : > { %3688 = vst.msk [vmem:[%s7808_s18 + $0xb8] sm:$0xff] %vm9103_vm11, %v3651_v17  ;;  %v3649_v59 = vadd.f32 %v3568_v39, %v3335_v8  ;;  %vm9104_vm15 = vmmov %vm9096_vm3  ;;  %v3338_v46 = vadd.f32 %v3267_v54, %v9105_v50  ;;  %v4373_v43 = vsel %vm8226_vm10, %v3651_v17, 0.0  ;;  %v4539_v55 = vadd.f32 %v4538_v19, %v4537_v47  ;;  %v5394_v62 = vpop.f32.mrf.mxu1  ;;  %v9124_v8 = vld [vmem:[#allocation81_spill] sm:$0xff]  ;;  %v3584_v39 = vpop.f32.mrf.mxu0 }
 0x227   : > { %v4429_v9 = vsel %vm9104_vm15, %v4372_v13, 0.0  ;;  %vm9106_vm12 = vmmov %vm9096_vm3  ;;  %v3654_v27 = vadd.f32 %v5428_v60, %v3340_v58  ;;  %v9110_v57 = vsel %vm7783_vm8, %v9108_v2, %v9109_v53  ;;  %v4487_v51 = vmul.f32 %v4372_v13, %v4372_v13  ;;  %v9137_v58 = vld [vmem:[#allocation36_spill] sm:$0xff] }
 0x228   : > { %v4425_v40 = vsel %vm9106_vm12, %v4370_v4, 0.0  ;;  %vm9107_vm1 = vmmov %vm9096_vm3  ;;  %v4371_v44 = vsel %vm8238_vm2, %v3649_v59, 0.0  ;;  %vm8323_vm3 = vcmp.lt.s32.totalorder %v9110_v57, 16  ;;  %vm9116_vm2 = vnez %v9115_v20  ;;  %v3283_v30 = vpop.f32.mrf.mxu1  ;;  %v9147_v57 = vld [vmem:[#allocation92_spill] sm:$0xff] }
 0x229   : > { %v4426_v16 = vadd.f32 %v4425_v40, %v4424_v42  ;;  %3686 = vst.msk [vmem:[%s7808_s18 + $0xa8] sm:$0xff] %vm9107_vm1, %v3649_v59  ;;  %vm9113_vm10 = vmmov %vm9107_vm1  ;;  %v4486_v61 = vmul.f32 %v4371_v44, %v4371_v44  ;;  %v9119_v11 = vsel %vm9116_vm2, %v9117_v33, %v9118_v56  ;;  %v3341_v32 = vadd.f32 %v5391_v24, %v9122_v5  ;;  %v9138_v42 = vld [vmem:[#allocation88_spill] sm:$0xff] }
 0x22a   : > { %v4540_v29 = vsel %vm9113_vm10, %v4485_v18, 0.0  ;;  %vm9114_vm14 = vmmov %vm9107_vm1  ;;  %vm8334_vm9 = vcmp.lt.s32.totalorder %v9119_v11, 16  ;;  %v3652_v35 = vadd.f32 %v3581_v52, %v3338_v46  ;;  %v4488_v25 = vmul.f32 %v4373_v43, %v4373_v43  ;;  %v5395_v24 = vpop.f32.mrf.mxu1  ;;  %v5432_v46 = vpop.f32.mrf.mxu0 }
 0x22b   : > { %v4427_v7 = vsel %vm9114_vm14, %v4371_v44, 0.0  ;;  %v4541_v6 = vadd.f32 %v4540_v29, %v4539_v55  ;;  %vm9123_vm8 = vmmov %vm9107_vm1  ;;  %v3339_v45 = vadd.f32 %v3270_v34, %v9124_v8  ;;  %v4376_v31 = vsel %vm8258_vm0, %v3654_v27, 0.0  ;;  %v9150_v29 = vld [vmem:[#allocation4_spill] sm:$0xff] }
 0x22c   : > { %v4428_v54 = vadd.f32 %v4427_v7, %v4426_v16  ;;  %3691 = vst.msk [vmem:[%s7808_s18 + $0xd0] sm:$0xff] %vm9123_vm8, %v3654_v27  ;;  %vm9125_vm11 = vmmov %vm9107_vm1  ;;  %v4374_v4 = vsel %vm8269_vm5, %v3652_v35, 0.0  ;;  %v3655_v17 = vadd.f32 %v5429_v21, %v3341_v32  ;;  %vm9127_vm12 = vnez %v8863_v12  ;;  %v9144_v16 = vld [vmem:[#allocation84_spill] sm:$0xff]  ;;  %v3597_v53 = vpop.f32.mrf.mxu0 }
 0x22d   : > { %v4542_v13 = vsel %vm9125_vm11, %v4486_v61, 0.0  ;;  %vm9126_vm15 = vmmov %vm9107_vm1  ;;  %v9129_v37 = vsel %vm9127_vm12, %v7822_v10, %v9128_v1  ;;  %v3344_v47 = vadd.f32 %v5394_v62, %v9134_v23  ;;  %v4489_v36 = vmul.f32 %v4374_v4, %v4374_v4 }
 0x22e   : > { %v4430_v0 = vadd.f32 %v4429_v9, %v4428_v54  ;;  %v4543_v14 = vadd.f32 %v4542_v13, %v4541_v6  ;;  %3689 = vst.msk [vmem:[%s7808_s18 + $0xc0] sm:$0xff] %vm9126_vm15, %v3652_v35  ;;  %vm8354_vm1 = vcmp.lt.s32.totalorder %v9129_v37, 16  ;;  %vm9132_vm0 = vmmov %vm9123_vm8  ;;  %vm9136_vm5 = vnez %v9135_v48  ;;  %v3286_v9 = vpop.f32.mrf.mxu1  ;;  %v9155_v6 = vld [vmem:[#allocation25_spill] sm:$0xff]  ;;  %v5433_v35 = vpop.f32.mrf.mxu0 }
 0x22f   : > { %v4544_v3 = vsel %vm9132_vm0, %v4487_v51, 0.0  ;;  %vm9133_vm10 = vmmov %vm9132_vm0  ;;  %v9139_v12 = vsel %vm9136_vm5, %v9137_v58, %v9138_v42  ;;  %v4377_v60 = vsel %vm8286_vm6, %v3655_v17, 0.0  ;;  %v3653_v50 = vadd.f32 %v3584_v39, %v3339_v45  ;;  %v9149_v51 = vld [vmem:[#allocation91_spill] sm:$0xff]  ;;  %v9173_v42 = vld [vmem:[#allocation30_spill] sm:$0xff] }
 0x230   : > { %v4431_v18 = vsel %vm9133_vm10, %v4373_v43, 0.0  ;;  %vm8366_vm14 = vcmp.lt.s32.totalorder %v9139_v12, 16  ;;  %v4545_v10 = vadd.f32 %v4544_v3, %v4543_v14  ;;  %vm9142_vm2 = vmmov %vm9132_vm0  ;;  %v4491_v43 = vmul.f32 %v4376_v31, %v4376_v31  ;;  %v5398_v63 = vpop.f32.mrf.mxu1  ;;  %v9162_v14 = vld [vmem:[#allocation90_spill] sm:$0xff]  ;;  %v3600_v3 = vpop.f32.mrf.mxu0 }
 0x231   : > { %v4432_v59 = vadd.f32 %v4431_v18, %v4430_v0  ;;  %3692 = vst.msk [vmem:[%s7808_s18 + $0xd8] sm:$0xff] %vm9142_vm2, %v3655_v17  ;;  %vm9143_vm8 = vmmov %vm9132_vm0  ;;  %v3342_v55 = vadd.f32 %v3283_v30, %v9144_v16  ;;  %v4375_v52 = vsel %vm8302_vm4, %v3653_v50, 0.0  ;;  %v3658_v2 = vadd.f32 %v5432_v46, %v3344_v47  ;;  %v9160_v0 = vld [vmem:[#allocation89_spill] sm:$0xff] }
 0x232   : > { %v4546_v40 = vsel %vm9143_vm8, %v4488_v25, 0.0  ;;  %vm9145_vm11 = vmmov %vm9132_vm0  ;;  %vm9148_vm6 = vnez %v9147_v57  ;;  %v4548_v20 = vsel %vm9132_vm0, %v4489_v36, 0.0  ;;  %v4492_v33 = vmul.f32 %v4377_v60, %v4377_v60  ;;  %v3299_v54 = vpop.f32.mrf.mxu1  ;;  %v9158_v25 = vld [vmem:[#allocation28_spill] sm:$0xff] }
 0x233   : > { %v4433_v44 = vsel %vm9145_vm11, %v4374_v4, 0.0  ;;  %v4547_v27 = vadd.f32 %v4546_v40, %v4545_v10  ;;  %vm9146_vm15 = vmmov %vm9132_vm0  ;;  %v9151_v7 = vsel %vm9148_vm6, %v9149_v51, %v9150_v29  ;;  %v4490_v28 = vmul.f32 %v4375_v52, %v4375_v52  ;;  %v9163_v4 = vld [vmem:[#allocation11_spill] sm:$0xff] }
 0x234   : > { %v4434_v62 = vadd.f32 %v4433_v44, %v4432_v59  ;;  %3690 = vst.msk [vmem:[%s7808_s18 + $0xc8] sm:$0xff] %vm9146_vm15, %v3653_v50  ;;  %vm8386_vm12 = vcmp.lt.s32.totalorder %v9151_v7, 16  ;;  %vm9154_vm10 = vmmov %vm9132_vm0  ;;  %v3345_v5 = vadd.f32 %v5395_v24, %v9155_v6  ;;  %v3656_v30 = vadd.f32 %v3597_v53, %v3342_v55  ;;  %v5399_v37 = vpop.f32.mrf.mxu1  ;;  %v9175_v50 = vld [vmem:[#allocation15_spill] sm:$0xff]  ;;  %v9181_v53 = vld [vmem:[#allocation13_spill] sm:$0xff] }
 0x235   : > { %v4435_v56 = vsel %vm9154_vm10, %v4375_v52, 0.0  ;;  %v4549_v11 = vadd.f32 %v4548_v20, %v4547_v27  ;;  %vm9156_vm4 = vmmov %vm9132_vm0  ;;  %v3343_v8 = vadd.f32 %v3286_v9, %v9158_v25  ;;  %v4380_v13 = vsel %vm8323_vm3, %v3658_v2, 0.0  ;;  %v9183_v7 = vld [vmem:[#allocation19_spill] sm:$0xff] }
 0x236   : > { %v4436_v32 = vadd.f32 %v4435_v56, %v4434_v62  ;;  %3695 = vst.msk [vmem:[%s7808_s18 + $0xf0] sm:$0xff] %vm9156_vm4, %v3658_v2  ;;  %vm9157_vm5 = vmmov %vm9132_vm0  ;;  %vm9161_vm8 = vnez %v9160_v0  ;;  %v3659_v15 = vadd.f32 %v5433_v35, %v3345_v5  ;;  %v4554_v47 = vsel %vm9132_vm0, %v4492_v33, 0.0 }
 0x237   : > { %v4437_v21 = vsel %vm9157_vm5, %v4376_v31, 0.0  ;;  %vm9159_vm2 = vmmov %vm9132_vm0  ;;  %v9164_v24 = vsel %vm9161_vm8, %v9162_v14, %v9163_v4  ;;  %v4378_v31 = vsel %vm8334_vm9, %v3656_v30, 0.0  ;;  %v9170_v48 = vsel %vm7999_vm7, %v7959_v38, %v7885_v49 }
 0x238   : > { %v4550_v45 = vsel %vm9159_vm2, %v4490_v28, 0.0  ;;  %vm8405_vm11 = vcmp.lt.s32.totalorder %v9164_v24, 16  ;;  %v4438_v39 = vadd.f32 %v4437_v21, %v4436_v32  ;;  %vm9167_vm15 = vmmov %vm9132_vm0  ;;  %v4493_v36 = vmul.f32 %v4378_v31, %v4378_v31  ;;  %v9187_v32 = vld [vmem:[#allocation21_spill] sm:$0xff] }
 0x239   : > { %v4551_v1 = vadd.f32 %v4550_v45, %v4549_v11  ;;  %3693 = vst.msk [vmem:[%s7808_s18 + $0xe0] sm:$0xff] %vm9167_vm15, %v3656_v30  ;;  %vm9168_vm3 = vmmov %vm9132_vm0  ;;  %vm8421_vm10 = vcmp.lt.s32.totalorder %v9170_v48, 16  ;;  %v3348_v12 = vadd.f32 %v5398_v63, %v9173_v42  ;;  %v3657_v59 = vadd.f32 %v3600_v3, %v3343_v8 }
 0x23a   : > { %v4552_v18 = vsel %vm9168_vm3, %v4491_v43, 0.0  ;;  %vm9169_vm6 = vmmov %vm9132_vm0  ;;  %v4495_v9 = vmul.f32 %v4380_v13, %v4380_v13  ;;  %v3346_v46 = vadd.f32 %v3299_v54, %v9175_v50  ;;  %v4381_v49 = vsel %vm8354_vm1, %v3659_v15, 0.0  ;;  %v3302_v43 = vpop.f32.mrf.mxu1  ;;  %v9188_v54 = vld [vmem:[#allocation33_spill] sm:$0xff] }
 0x23b   : > { %v4439_v23 = vsel %vm9169_vm6, %v4377_v60, 0.0  ;;  %v4553_v26 = vadd.f32 %v4552_v18, %v4551_v1  ;;  %vm9174_vm9 = vmmov %vm9132_vm0  ;;  %v5436_v60 = vpop.f32.mrf.mxu0  ;;  %v4379_v16 = vsel %vm8366_vm14, %v3657_v59, 0.0  ;;  %v3349_v57 = vadd.f32 %v5399_v37, %v9181_v53 }
 0x23c   : > { %v4440_v10 = vadd.f32 %v4439_v23, %v4438_v39  ;;  %3696 = vst.msk [vmem:[%s7808_s18 + $0xf8] sm:$0xff] %vm9174_vm9, %v3659_v15  ;;  %vm9176_vm4 = vmmov %vm9132_vm0  ;;  %v3662_v55 = vadd.f32 %v5436_v60, %v3348_v12  ;;  %v4494_v52 = vmul.f32 %v4379_v16, %v4379_v16  ;;  %v4496_v34 = vmul.f32 %v4381_v49, %v4381_v49 }
 0x23d   : > { %v4441_v41 = vsel %vm9176_vm4, %v4378_v31, 0.0  ;;  %v4555_v40 = vadd.f32 %v4554_v47, %v4553_v26  ;;  %vm9177_vm7 = vmmov %vm9132_vm0  ;;  %v3613_v44 = vpop.f32.mrf.mxu0  ;;  %v3347_v20 = vadd.f32 %v3302_v43, %v9183_v7  ;;  %v9189_v30 = vsel %vm8026_vm13, %v9187_v32, %v9188_v54 }
 0x23e   : > { %v4442_v38 = vadd.f32 %v4441_v41, %v4440_v10  ;;  %3694 = vst.msk [vmem:[%s7808_s18 + $0xe8] sm:$0xff] %vm9177_vm7, %v3657_v59  ;;  %vm9178_vm5 = vmmov %vm9132_vm0  ;;  %v3660_v63 = vadd.f32 %v3613_v44, %v3346_v46  ;;  %vm4347_vm6 = vcmp.lt.s32.totalorder %v9189_v30, 16  ;;  %v4447_v35 = vsel %vm9132_vm0, %v4381_v49, 0.0 }
 0x23f   : > { %v4556_v62 = vsel %vm9178_vm5, %v4493_v36, 0.0  ;;  %vm9179_vm2 = vmmov %vm9132_vm0  ;;  %v5437_v29 = vpop.f32.mrf.mxu0  ;;  %v4384_v45 = vsel %vm8405_vm11, %v3662_v55, 0.0 }
 0x240   : > { %v4443_v27 = vsel %vm9179_vm2, %v4379_v16, 0.0  ;;  %vm9180_vm8 = vmmov %vm9132_vm0  ;;  %v4557_v2 = vadd.f32 %v4556_v62, %v4555_v40  ;;  %v4382_v56 = vsel %vm8386_vm12, %v3660_v63, 0.0  ;;  %v3663_v25 = vadd.f32 %v5437_v29, %v3349_v57 }
 0x241   : > { %v4445_v19 = vsel %vm9180_vm8, %v4380_v13, 0.0  ;;  %v4444_v51 = vadd.f32 %v4443_v27, %v4442_v38  ;;  %vm9182_vm1 = vmmov %vm9132_vm0  ;;  %v3616_v5 = vpop.f32.mrf.mxu0  ;;  %v4497_v21 = vmul.f32 %v4382_v56, %v4382_v56  ;;  %v4499_v1 = vmul.f32 %v4384_v45, %v4384_v45 }
 0x242   : > { %3699 = vst.msk [vmem:[%s7808_s18 + $0x110] sm:$0xff] %vm9182_vm1, %v3662_v55  ;;  %vm9184_vm14 = vmmov %vm9132_vm0  ;;  %v3661_v8 = vadd.f32 %v3616_v5, %v3347_v20  ;;  %v4385_v39 = vsel %vm8421_vm10, %v3663_v25, 0.0 }
 0x243   : > { %v4558_v33 = vsel %vm9184_vm14, %v4494_v52, 0.0  ;;  %vm9185_vm15 = vmmov %vm9132_vm0  ;;  %v4446_v11 = vadd.f32 %v4445_v19, %v4444_v51  ;;  %v4500_v23 = vmul.f32 %v4385_v39, %v4385_v39  ;;  %vm4463_vm14 = vcmask 57344  }
 0x244   : > { %3697 = vst.msk [vmem:[%s7808_s18 + $0x100] sm:$0xff] %vm9185_vm15, %v3660_v63  ;;  %vm9186_vm3 = vmmov %vm9132_vm0  ;;  %v4559_v6 = vadd.f32 %v4558_v33, %v4557_v2  ;;  %v4383_v22 = vsel %vm4347_vm6, %v3661_v8, 0.0 }
 0x245   : > { %v4560_v28 = vsel %vm9186_vm3, %v4495_v9, 0.0  ;;  %v4448_v13 = vadd.f32 %v4447_v35, %v4446_v11  ;;  %vm9190_vm12 = vmmov %vm9132_vm0  ;;  %v4498_v37 = vmul.f32 %v4383_v22, %v4383_v22 }
 0x246   : > { %v4561_v61 = vadd.f32 %v4560_v28, %v4559_v6  ;;  %v4562_v0 = vsel %vm9190_vm12, %v4496_v34, 0.0  ;;  %vm9191_vm9 = vmmov %vm9132_vm0 }
 0x247   : > { %v4449_v14 = vsel %vm9191_vm9, %v4382_v56, 0.0  ;;  %vm9192_vm4 = vmmov %vm9132_vm0 }
 0x248   : > { %3700 = vst.msk [vmem:[%s7808_s18 + $0x118] sm:$0xff] %vm9192_vm4, %v3663_v25  ;;  %vm9193_vm7 = vmmov %vm9132_vm0  ;;  %v4450_v4 = vadd.f32 %v4449_v14, %v4448_v13  ;;  %v4563_v24 = vadd.f32 %v4562_v0, %v4561_v61 }
 0x249   : > { %3698 = vst.msk [vmem:[%s7808_s18 + $0x108] sm:$0xff] %vm9193_vm7, %v3661_v8  ;;  %vm9194_vm13 = vmmov %vm9132_vm0 }
 0x24a   : > { %v4564_v31 = vsel %vm9194_vm13, %v4497_v21, 0.0  ;;  %vm9195_vm5 = vmmov %vm9132_vm0 }
 0x24b   : > { %v4451_v17 = vsel %vm9195_vm5, %v4383_v22, 0.0  ;;  %v4565_v15 = vadd.f32 %v4564_v31, %v4563_v24  ;;  %vm9196_vm11 = vmmov %vm9132_vm0 }
 0x24c   : > { %v4452_v3 = vadd.f32 %v4451_v17, %v4450_v4  ;;  %v4453_v18 = vsel %vm9196_vm11, %v4384_v45, 0.0  ;;  %vm9197_vm2 = vmmov %vm9132_vm0 }
 0x24d   : > { %v4566_v47 = vsel %vm9197_vm2, %v4498_v37, 0.0  ;;  %vm9198_vm8 = vmmov %vm9132_vm0 }
 0x24e   : > { %v4454_v36 = vadd.f32 %v4453_v18, %v4452_v3  ;;  %v4567_v48 = vadd.f32 %v4566_v47, %v4565_v15  ;;  %v4568_v26 = vsel %vm9198_vm8, %v4499_v1, 0.0  ;;  %vm9199_vm1 = vmmov %vm9132_vm0 }
 0x24f   : > { %v4455_v58 = vsel %vm9199_vm1, %v4385_v39, 0.0  ;;  %vm9200_vm10 = vmmov %vm9132_vm0 }
 0x250   : > { %v4456_v42 = vadd.f32 %v4455_v58, %v4454_v36  ;;  %v4569_v12 = vadd.f32 %v4568_v26, %v4567_v48  ;;  %v4570_v10 = vsel %vm9200_vm10, %v4500_v23, 0.0 }
 0x252   : > { %v4457_v59 = vrot.slane %v4456_v42, 4  ;;  %v4571_v60 = vadd.f32 %v4570_v10, %v4569_v12 }
 0x254   : > { %v4458_v9 = vadd.f32 %v4457_v59, %v4456_v42  ;;  %v4572_v50 = vrot.slane %v4571_v60, 4 }
 0x256   : > { %v4459_v46 = vrot.slane %v4458_v9, 2  ;;  %v4573_v41 = vadd.f32 %v4572_v50, %v4571_v60 }
 0x258   : > { %v4460_v49 = vadd.f32 %v4459_v46, %v4458_v9  ;;  %v4574_v38 = vrot.slane %v4573_v41, 2 }
 0x25a   : > { %v4461_v40 = vrot.slane %v4460_v49, 1  ;;  %v4575_v43 = vadd.f32 %v4574_v38, %v4573_v41 }
 0x25c   : > { %v4462_v16 = vadd.f32 %v4461_v40, %v4460_v49  ;;  %v4576_v55 = vrot.slane %v4575_v43, 1 }
 0x25e   : > { %4464 = vst.msk [vmem:[%s211_s21] sm:$0x1] %vm4463_vm14, %v4462_v16  ;;  %v4577_v44 = vadd.f32 %v4576_v55, %v4575_v43 }
 0x260   : > { %4578 = vst.msk [vmem:[%s214_s24] sm:$0x1] %vm4463_vm14, %v4577_v44 }
 0x261 PF: > { %s15_s15 = sadd.s32 1, %s5600_s15  }
 0x262   : > { %p12_p4 = scmp.ge.s32.totalorder %s15_s15, 4  }
 0x264   :  { %14 = sbr.rel (!%p12_p4) target bundleno = 1 (0x1), region = 90 }

</bundles_post_ra>
